<compile_context>
chip_gen: v7x
topology: tpu7x:2x2x1
jax: 0.10.0
libtpu: 0.0.40
codegen_flags: <defaults>
</compile_context>

<pallas_src>
import jax
import jax.numpy as jnp
from jax.experimental import pallas as pl
from jax.experimental.pallas import tpu as pltpu


def _sigmoid(z):
    # exp + approx reciprocal both issue on the EUP slot; VALU stays free.
    return pl.reciprocal(1.0 + jnp.exp(-z), approx=True)


def _softmax(z, axis):
    z = z - jnp.max(z, axis=axis, keepdims=True)
    e = jnp.exp(z)
    return e * pl.reciprocal(jnp.sum(e, axis=axis, keepdims=True), approx=True)


def wei_pooling_kernel(xt_ref, dwt_ref, w1t_ref, w2t_ref, wpool_ref, wpt_ref,
                       b_ref, out_ref, wei_ref):
    x_t = xt_ref[0]            # (WH, D)   bf16  == x^T
    dw_t = dwt_ref[0]          # (WH, WH)  bf16  == diffW^T

    # out_diff^T = diffW^T @ x^T  -> (WH, D); bf16 MXU, f32 accumulation, N = D.
    od_t = jnp.dot(dw_t, x_t, preferred_element_type=jnp.float32)

    # conv1 (1x1, no bias) + sigmoid: (WH, D) @ (D, DM) -> (WH, DM); N = DM.
    z1 = jnp.dot(od_t.astype(jnp.bfloat16), w1t_ref[...],
                 preferred_element_type=jnp.float32)
    h1_t = _sigmoid(z1)                                          # f32 elementwise

    # conv2 (1x1, no bias): (WH, DM) @ (DM, NCLS) -> (WH, NCLS)  (tiny; f32).
    logits_t = jnp.dot(h1_t, w2t_ref[...], preferred_element_type=jnp.float32)

    # Class softmax applied twice (module forward + weiPooling.softmax2).
    sm_t = _softmax(_softmax(logits_t, axis=1), axis=1)          # (WH, NCLS)
    wei_ref[0] = sm_t

    # weiPooling: spatial softmax of class maps scaled by exp(per-class temp).
    ew = jnp.exp(wpool_ref[...])                                 # (1, NCLS), hoisted
    att_t = _softmax(sm_t * ew, axis=0)                          # (WH, NCLS)

    # Fused pred head: scores_c = sum_p att[p,c] * (out_diff^T @ wp^T)[p,c].
    y_t = jnp.dot(od_t, wpt_ref[...], preferred_element_type=jnp.float32)  # (WH, NCLS)
    scores = jnp.sum(att_t * y_t, axis=0, keepdims=True) + b_ref[...]      # (1, NCLS)
    out_ref[0] = _sigmoid(scores)


def self_attention_forward(x, diffW, params):
    """x: (bs, d, w, h) NCHW, diffW: (bs, w*h, w*h). Returns (out, wei)."""
    bs, d, w, h = x.shape
    wh = w * h
    w1, w2, wpool, wp, bias = params
    dm = w1.shape[0]
    ncls = w2.shape[0]

    # Lane-dense transposed layouts; bf16 only for the MXU-heavy operands.
    x_t = jnp.transpose(x.reshape(bs, d, wh), (0, 2, 1)).astype(jnp.bfloat16)  # (bs,wh,d)
    dw_t = jnp.transpose(diffW, (0, 2, 1)).astype(jnp.bfloat16)                # (bs,wh,wh)
    w1_t = jnp.transpose(w1).astype(jnp.bfloat16)                              # (d, dm)
    w2_t = jnp.transpose(w2).astype(jnp.float32)                               # (dm, ncls)
    wp_t = jnp.transpose(wp).astype(jnp.float32)                               # (d, ncls)
    wpool_r = wpool.reshape(1, ncls).astype(jnp.float32)                       # (1, ncls)
    bias_r = bias.reshape(1, ncls).astype(jnp.float32)                         # (1, ncls)

    out, wei_t = pl.pallas_call(
        wei_pooling_kernel,
        out_shape=(jax.ShapeDtypeStruct((bs, 1, ncls), jnp.float32),
                   jax.ShapeDtypeStruct((bs, wh, ncls), jnp.float32)),
        grid_spec=pltpu.PrefetchScalarGridSpec(
            num_scalar_prefetch=0,
            grid=(bs,),
            in_specs=[
                pl.BlockSpec((1, wh, d), lambda b: (b, 0, 0)),    # x^T (bf16)
                pl.BlockSpec((1, wh, wh), lambda b: (b, 0, 0)),   # diffW^T (bf16)
                pl.BlockSpec((d, dm), lambda b: (0, 0)),          # conv1 weight^T (bf16)
                pl.BlockSpec((dm, ncls), lambda b: (0, 0)),       # conv2 weight^T (f32)
                pl.BlockSpec((1, ncls), lambda b: (0, 0)),        # weiPooling temps
                pl.BlockSpec((d, ncls), lambda b: (0, 0)),        # pred weights^T
                pl.BlockSpec((1, ncls), lambda b: (0, 0)),        # pred bias
            ],
            out_specs=[
                pl.BlockSpec((1, 1, ncls), lambda b: (b, 0, 0)),
                pl.BlockSpec((1, wh, ncls), lambda b: (b, 0, 0)),
            ],
        ),
        compiler_params=pltpu.CompilerParams(
            dimension_semantics=("parallel",),
            vmem_limit_bytes=32 * 1024 * 1024),
    )(x_t, dw_t, w1_t, w2_t, wpool_r, wp_t, bias_r)

    # wei back to the module's (bs, ncls, wh); out already (bs, 1, ncls).
    wei = jnp.transpose(wei_t, (0, 2, 1))
    return out, wei


def reference_forward(x, diffW, params):
    """Pure-JAX f32 reference of the PyTorch forward (sanity check)."""
    w1, w2, wpool, wp, bias = params
    bs, d, w, h = x.shape
    wh = w * h
    out_diff = jnp.einsum('bdp,bpq->bdq', x.reshape(bs, d, wh), diffW)
    h1 = jax.nn.sigmoid(jnp.einsum('md,bdp->bmp', w1, out_diff))
    logits = jnp.einsum('cm,bmp->bcp', w2, h1)
    sm = jax.nn.softmax(jax.nn.softmax(logits, axis=1), axis=1)
    att = jax.nn.softmax(sm * jnp.exp(wpool)[None], axis=2)
    pooled = jnp.einsum('bcp,bdp->bcd', att, out_diff)
    scores = jnp.sum(pooled * wp[None], axis=2) + bias[None, :, 0]
    out = jax.nn.sigmoid(scores).reshape(bs, 1, -1)
    return out, sm


if __name__ == "__main__":
    key = jax.random.PRNGKey(0)
    # Module hard-codes 2048 -> 1024 -> num_classes 1x1 convs; small spatial.
    bs, d, dm, w, h, ncls = 2, 2048, 1024, 8, 8, 8
    k1, k2, k3, k4, k5 = jax.random.split(key, 5)
    x = jax.random.normal(k1, (bs, d, w, h), jnp.float32)
    diffW = jax.random.normal(k2, (bs, w * h, w * h), jnp.float32)

    # Deterministic parameter init (shapes per the module's __init__).
    w1 = jax.random.normal(k3, (dm, d), jnp.float32) * 0.01    # conv1.weight (1x1)
    # Module inits conv2.weight to 0; use a small random init so the softmax /
    # pooling path is exercised non-trivially.
    w2 = jax.random.normal(k4, (ncls, dm), jnp.float32) * 0.01  # conv2.weight (1x1)
    wpool = jnp.full((ncls, 1), 5.0, jnp.float32)               # weiPooling.weights
    wp = jax.random.normal(k5, (ncls, d), jnp.float32) * 0.01   # pred.weights
    bias = jnp.zeros((ncls, 1), jnp.float32)                    # pred.bias
    params = (w1, w2, wpool, wp, bias)

    out, wei = self_attention_forward(x, diffW, params)
    jax.block_until_ready((out, wei))

    out_ref, wei_ref = reference_forward(x, diffW, params)
    assert out.shape == (bs, 1, ncls) and wei.shape == (bs, ncls, w * h)
    assert bool(jnp.allclose(out, out_ref, rtol=2e-2, atol=2e-2))
    assert bool(jnp.allclose(wei, wei_ref, rtol=2e-2, atol=2e-2))
    print("KERNEL_OK")
</pallas_src>

<mosaic_0001>
module attributes {stable_mosaic.version = 11 : i64} {
  func.func @wei_pooling_kernel(%arg0: i32, %arg1: memref<1x64x2048xbf16, #tpu.memory_space<vmem>>, %arg2: memref<1x64x64xbf16, #tpu.memory_space<vmem>>, %arg3: memref<2048x1024xbf16, #tpu.memory_space<vmem>>, %arg4: memref<1024x8xf32, #tpu.memory_space<vmem>>, %arg5: memref<1x8xf32, #tpu.memory_space<vmem>>, %arg6: memref<2048x8xf32, #tpu.memory_space<vmem>>, %arg7: memref<1x8xf32, #tpu.memory_space<vmem>>, %arg8: memref<1x1x8xf32, #tpu.memory_space<vmem>>, %arg9: memref<1x64x8xf32, #tpu.memory_space<vmem>>) attributes {dimension_semantics = [#tpu.dimension_semantics<parallel>], iteration_bounds = array<i64: 2>, scalar_prefetch = 0 : i64, scratch_operands = 0 : i64, tpu.core_type = #tpu.core_type<tc>, window_params = [{transform_indices = @transform_0, window_bounds = array<i64: 1, 64, 2048>}, {transform_indices = @transform_1, window_bounds = array<i64: 1, 64, 64>}, {pipeline_mode = #tpu.pipeline_mode<synchronous>, transform_indices = @transform_2, window_bounds = array<i64: 2048, 1024>}, {pipeline_mode = #tpu.pipeline_mode<synchronous>, transform_indices = @transform_3, window_bounds = array<i64: 1024, 8>}, {pipeline_mode = #tpu.pipeline_mode<synchronous>, transform_indices = @transform_4, window_bounds = array<i64: 1, 8>}, {pipeline_mode = #tpu.pipeline_mode<synchronous>, transform_indices = @transform_5, window_bounds = array<i64: 2048, 8>}, {pipeline_mode = #tpu.pipeline_mode<synchronous>, transform_indices = @transform_6, window_bounds = array<i64: 1, 8>}, {transform_indices = @transform_7, window_bounds = array<i64: 1, 1, 8>}, {transform_indices = @transform_8, window_bounds = array<i64: 1, 64, 8>}]} {
    %c0 = arith.constant 0 : index
    %c0_0 = arith.constant 0 : index
    %c0_1 = arith.constant 0 : index
    %0 = vector.load %arg1[%c0, %c0_0, %c0_1] : memref<1x64x2048xbf16, #tpu.memory_space<vmem>>, vector<1x64x2048xbf16>
    %1 = vector.shape_cast %0 : vector<1x64x2048xbf16> to vector<64x2048xbf16>
    %c0_2 = arith.constant 0 : index
    %c0_3 = arith.constant 0 : index
    %c0_4 = arith.constant 0 : index
    %2 = vector.load %arg2[%c0_2, %c0_3, %c0_4] : memref<1x64x64xbf16, #tpu.memory_space<vmem>>, vector<1x64x64xbf16>
    %3 = vector.shape_cast %2 : vector<1x64x64xbf16> to vector<64x64xbf16>
    %cst = arith.constant dense<0.000000e+00> : vector<64x2048xf32>
    %4 = tpu.matmul %3, %1, %cst {dimension_numbers = #tpu.dot_dimension_numbers<[1], [0], [0], [1], [0, 0, 1, 1], [], []>} : vector<64x64xbf16>, vector<64x2048xbf16>, vector<64x2048xf32> -> vector<64x2048xf32>
    %5 = arith.truncf %4 : vector<64x2048xf32> to vector<64x2048xbf16>
    %c0_5 = arith.constant 0 : index
    %c0_6 = arith.constant 0 : index
    %6 = vector.load %arg3[%c0_5, %c0_6] : memref<2048x1024xbf16, #tpu.memory_space<vmem>>, vector<2048x1024xbf16>
    %cst_7 = arith.constant dense<0.000000e+00> : vector<64x1024xf32>
    %7 = tpu.matmul %5, %6, %cst_7 {dimension_numbers = #tpu.dot_dimension_numbers<[1], [0], [0], [1], [0, 0, 1, 1], [], []>} : vector<64x2048xbf16>, vector<2048x1024xbf16>, vector<64x1024xf32> -> vector<64x1024xf32>
    %cst_8 = arith.constant 0.000000e+00 : f32
    %8 = vector.broadcast %cst_8 : f32 to vector<64x1024xf32>
    %9 = arith.subf %8, %7 : vector<64x1024xf32>
    %10 = math.exp %9 : vector<64x1024xf32>
    %cst_9 = arith.constant 1.000000e+00 : f32
    %11 = vector.broadcast %cst_9 : f32 to vector<64x1024xf32>
    %12 = arith.addf %11, %10 : vector<64x1024xf32>
    %13 = tpu.reciprocal %12 {approx = true} : vector<64x1024xf32> -> vector<64x1024xf32>
    %c0_10 = arith.constant 0 : index
    %c0_11 = arith.constant 0 : index
    %14 = vector.load %arg4[%c0_10, %c0_11] : memref<1024x8xf32, #tpu.memory_space<vmem>>, vector<1024x8xf32>
    %cst_12 = arith.constant dense<0.000000e+00> : vector<64x8xf32>
    %15 = tpu.matmul %13, %14, %cst_12 {dimension_numbers = #tpu.dot_dimension_numbers<[1], [0], [0], [1], [0, 0, 1, 1], [], []>} : vector<64x1024xf32>, vector<1024x8xf32>, vector<64x8xf32> -> vector<64x8xf32>
    %cst_13 = arith.constant dense<0xFF800000> : vector<64xf32>
    %16 = vector.multi_reduction <maximumf>, %15, %cst_13 [1] : vector<64x8xf32> to vector<64xf32>
    %17 = vector.shape_cast %16 : vector<64xf32> to vector<64x1xf32>
    %18 = vector.broadcast %17 : vector<64x1xf32> to vector<64x8xf32>
    %19 = arith.subf %15, %18 : vector<64x8xf32>
    %20 = math.exp %19 : vector<64x8xf32>
    %cst_14 = arith.constant dense<0.000000e+00> : vector<64xf32>
    %21 = vector.multi_reduction <add>, %20, %cst_14 [1] : vector<64x8xf32> to vector<64xf32>
    %22 = vector.shape_cast %21 : vector<64xf32> to vector<64x1xf32>
    %23 = tpu.reciprocal %22 {approx = true} : vector<64x1xf32> -> vector<64x1xf32>
    %24 = vector.broadcast %23 : vector<64x1xf32> to vector<64x8xf32>
    %25 = arith.mulf %20, %24 : vector<64x8xf32>
    %cst_15 = arith.constant dense<0xFF800000> : vector<64xf32>
    %26 = vector.multi_reduction <maximumf>, %25, %cst_15 [1] : vector<64x8xf32> to vector<64xf32>
    %27 = vector.shape_cast %26 : vector<64xf32> to vector<64x1xf32>
    %28 = vector.broadcast %27 : vector<64x1xf32> to vector<64x8xf32>
    %29 = arith.subf %25, %28 : vector<64x8xf32>
    %30 = math.exp %29 : vector<64x8xf32>
    %cst_16 = arith.constant dense<0.000000e+00> : vector<64xf32>
    %31 = vector.multi_reduction <add>, %30, %cst_16 [1] : vector<64x8xf32> to vector<64xf32>
    %32 = vector.shape_cast %31 : vector<64xf32> to vector<64x1xf32>
    %33 = tpu.reciprocal %32 {approx = true} : vector<64x1xf32> -> vector<64x1xf32>
    %34 = vector.broadcast %33 : vector<64x1xf32> to vector<64x8xf32>
    %35 = arith.mulf %30, %34 : vector<64x8xf32>
    %c0_17 = arith.constant 0 : index
    %c0_18 = arith.constant 0 : index
    %c0_19 = arith.constant 0 : index
    %36 = vector.load %arg9[%c0_17, %c0_18, %c0_19] : memref<1x64x8xf32, #tpu.memory_space<vmem>>, vector<1x64x8xf32>
    %37 = vector.shape_cast %36 : vector<1x64x8xf32> to vector<64x8xf32>
    %38 = vector.shape_cast %35 : vector<64x8xf32> to vector<1x64x8xf32>
    tpu.vector_store %arg9[%c0_17, %c0_18, %c0_19], %38 {strides = array<i32>} : memref<1x64x8xf32, #tpu.memory_space<vmem>>, vector<1x64x8xf32>,
    %c0_20 = arith.constant 0 : index
    %c0_21 = arith.constant 0 : index
    %39 = vector.load %arg5[%c0_20, %c0_21] : memref<1x8xf32, #tpu.memory_space<vmem>>, vector<1x8xf32>
    %40 = math.exp %39 : vector<1x8xf32>
    %41 = vector.broadcast %40 : vector<1x8xf32> to vector<64x8xf32>
    %42 = arith.mulf %35, %41 : vector<64x8xf32>
    %cst_22 = arith.constant dense<0xFF800000> : vector<8xf32>
    %43 = vector.multi_reduction <maximumf>, %42, %cst_22 [0] : vector<64x8xf32> to vector<8xf32>
    %44 = vector.shape_cast %43 : vector<8xf32> to vector<1x8xf32>
    %45 = vector.broadcast %44 : vector<1x8xf32> to vector<64x8xf32>
    %46 = arith.subf %42, %45 : vector<64x8xf32>
    %47 = math.exp %46 : vector<64x8xf32>
    %cst_23 = arith.constant dense<0.000000e+00> : vector<8xf32>
    %48 = vector.multi_reduction <add>, %47, %cst_23 [0] : vector<64x8xf32> to vector<8xf32>
    %49 = vector.shape_cast %48 : vector<8xf32> to vector<1x8xf32>
    %50 = tpu.reciprocal %49 {approx = true} : vector<1x8xf32> -> vector<1x8xf32>
    %51 = vector.broadcast %50 : vector<1x8xf32> to vector<64x8xf32>
    %52 = arith.mulf %47, %51 : vector<64x8xf32>
    %c0_24 = arith.constant 0 : index
    %c0_25 = arith.constant 0 : index
    %53 = vector.load %arg6[%c0_24, %c0_25] : memref<2048x8xf32, #tpu.memory_space<vmem>>, vector<2048x8xf32>
    %cst_26 = arith.constant dense<0.000000e+00> : vector<64x8xf32>
    %54 = tpu.matmul %4, %53, %cst_26 {dimension_numbers = #tpu.dot_dimension_numbers<[1], [0], [0], [1], [0, 0, 1, 1], [], []>} : vector<64x2048xf32>, vector<2048x8xf32>, vector<64x8xf32> -> vector<64x8xf32>
    %55 = arith.mulf %52, %54 : vector<64x8xf32>
    %cst_27 = arith.constant dense<0.000000e+00> : vector<8xf32>
    %56 = vector.multi_reduction <add>, %55, %cst_27 [0] : vector<64x8xf32> to vector<8xf32>
    %57 = vector.shape_cast %56 : vector<8xf32> to vector<1x8xf32>
    %c0_28 = arith.constant 0 : index
    %c0_29 = arith.constant 0 : index
    %58 = vector.load %arg7[%c0_28, %c0_29] : memref<1x8xf32, #tpu.memory_space<vmem>>, vector<1x8xf32>
    %59 = arith.addf %57, %58 : vector<1x8xf32>
    %cst_30 = arith.constant 0.000000e+00 : f32
    %60 = vector.broadcast %cst_30 : f32 to vector<1x8xf32>
    %61 = arith.subf %60, %59 : vector<1x8xf32>
    %62 = math.exp %61 : vector<1x8xf32>
    %cst_31 = arith.constant 1.000000e+00 : f32
    %63 = vector.broadcast %cst_31 : f32 to vector<1x8xf32>
    %64 = arith.addf %63, %62 : vector<1x8xf32>
    %65 = tpu.reciprocal %64 {approx = true} : vector<1x8xf32> -> vector<1x8xf32>
    %c0_32 = arith.constant 0 : index
    %c0_33 = arith.constant 0 : index
    %c0_34 = arith.constant 0 : index
    %66 = vector.load %arg8[%c0_32, %c0_33, %c0_34] : memref<1x1x8xf32, #tpu.memory_space<vmem>>, vector<1x1x8xf32>
    %67 = vector.shape_cast %66 : vector<1x1x8xf32> to vector<1x8xf32>
    %68 = vector.shape_cast %65 : vector<1x8xf32> to vector<1x1x8xf32>
    tpu.vector_store %arg8[%c0_32, %c0_33, %c0_34], %68 {strides = array<i32>} : memref<1x1x8xf32, #tpu.memory_space<vmem>>, vector<1x1x8xf32>,
    return
  }
  func.func @transform_0(%arg0: i32) -> (i32, i32, i32) {
    %c0_i32 = arith.constant 0 : i32
    %c0_i32_0 = arith.constant 0 : i32
    %c0_i32_1 = arith.constant 0 : i32
    return %arg0, %c0_i32, %c0_i32_0 : i32, i32, i32
  }
  func.func @transform_1(%arg0: i32) -> (i32, i32, i32) {
    %c0_i32 = arith.constant 0 : i32
    %c0_i32_0 = arith.constant 0 : i32
    %c0_i32_1 = arith.constant 0 : i32
    return %arg0, %c0_i32, %c0_i32_0 : i32, i32, i32
  }
  func.func @transform_2(%arg0: i32) -> (i32, i32) {
    %c0_i32 = arith.constant 0 : i32
    %c0_i32_0 = arith.constant 0 : i32
    %c0_i32_1 = arith.constant 0 : i32
    return %c0_i32, %c0_i32_0 : i32, i32
  }
  func.func @transform_3(%arg0: i32) -> (i32, i32) {
    %c0_i32 = arith.constant 0 : i32
    %c0_i32_0 = arith.constant 0 : i32
    %c0_i32_1 = arith.constant 0 : i32
    return %c0_i32, %c0_i32_0 : i32, i32
  }
  func.func @transform_4(%arg0: i32) -> (i32, i32) {
    %c0_i32 = arith.constant 0 : i32
    %c0_i32_0 = arith.constant 0 : i32
    %c0_i32_1 = arith.constant 0 : i32
    return %c0_i32, %c0_i32_0 : i32, i32
  }
  func.func @transform_5(%arg0: i32) -> (i32, i32) {
    %c0_i32 = arith.constant 0 : i32
    %c0_i32_0 = arith.constant 0 : i32
    %c0_i32_1 = arith.constant 0 : i32
    return %c0_i32, %c0_i32_0 : i32, i32
  }
  func.func @transform_6(%arg0: i32) -> (i32, i32) {
    %c0_i32 = arith.constant 0 : i32
    %c0_i32_0 = arith.constant 0 : i32
    %c0_i32_1 = arith.constant 0 : i32
    return %c0_i32, %c0_i32_0 : i32, i32
  }
  func.func @transform_7(%arg0: i32) -> (i32, i32, i32) {
    %c0_i32 = arith.constant 0 : i32
    %c0_i32_0 = arith.constant 0 : i32
    %c0_i32_1 = arith.constant 0 : i32
    return %arg0, %c0_i32, %c0_i32_0 : i32, i32, i32
  }
  func.func @transform_8(%arg0: i32) -> (i32, i32, i32) {
    %c0_i32 = arith.constant 0 : i32
    %c0_i32_0 = arith.constant 0 : i32
    %c0_i32_1 = arith.constant 0 : i32
    return %arg0, %c0_i32, %c0_i32_0 : i32, i32, i32
  }
}

</mosaic_0001>

<bundles_post_ra>
// kernel: tpu_custom_call.1
= control target key start
LH: loop header
LB: loop body
LE: loop exit
PB: predicated region body
PF: predicated region fallthrough
CT: control target
= control target key end

     0   :  { %s18877_s0 = inlined_call_operand.hbm [shape: bf16[2,64,2048], index: 0, kind: input, shape index: {}]   ;;  %s18878_s1 = inlined_call_operand.hbm [shape: bf16[2,64,64], index: 1, kind: input, shape index: {}]   ;;  %s18879_s2 = inlined_call_operand.hbm [shape: bf16[2048,1024], index: 2, kind: input, shape index: {}]   ;;  %s18880_s3 = inlined_call_operand.vmem [shape: f32[1024,8], index: 3, kind: input, shape index: {}]   ;;  %s18881_s4 = inlined_call_operand.hbm [shape: f32[1,8], index: 4, kind: input, shape index: {}]   ;;  %s18882_s5 = inlined_call_operand.vmem [shape: f32[2048,8], index: 5, kind: input, shape index: {}]   ;;  %s18883_s6 = inlined_call_operand.hbm [shape: f32[1,8], index: 6, kind: input, shape index: {}]   ;;  %s18884_s7 = inlined_call_operand.hbm [shape: f32[2,1,8], index: 7, kind: output, shape index: {0}]   ;;  %s18885_s8 = inlined_call_operand.vmem [shape: f32[2,64,8], index: 8, kind: output, shape index: {1}]  }
   0x1   :  { %19073 = sst [smem:[#allocation178_spill]] %s18877_s0 }
   0x2   :  { %19074 = sst [smem:[#allocation179_spill]] %s18879_s2 }
   0x3   :  { %19075 = sst [smem:[#allocation180_spill]] %s18881_s4 }
   0x4   :  { %19076 = sst [smem:[#allocation181_spill]] %s18883_s6 }
   0x5   :  { %14 = vsyncpa [#allocation3], 0 }
   0x6   :  { %16 = vsyncpa [#allocation3 + $0x1], 0 }
   0x7   :  { %17 = vsyncpa [#allocation6], 0 }
   0x8   :  { %19 = vsyncpa [#allocation6 + $0x1], 0 }
   0x9   :  { %20 = vsyncpa [#allocation9], 0 }
   0xa   :  { %21 = vsyncpa [#allocation4], 0 }
   0xb   :  { %23 = vsyncpa [#allocation4 + $0x1], 0  ;;  %s15782_s27 = smov 0   ;;  %s15784_s28 = smov 0  }
   0xc   :  { %s15786_s29 = smov 0   ;;  %s15788_s30 = smov 0  }
   0xd LB: > { %19077 = sst [smem:[#allocation17_spill]] %s15711_s27  ;;  %s15803_s9 = sadd.s32 4294967295, %s15723_s30   ;;  %s15723_s30 = sphi %s15788_s30, %s19465_s30   ;;  %s15719_s29 = sphi %s15786_s29, %s19464_s29   ;;  %s15715_s28 = sphi %s15784_s28, %s19463_s28   ;;  %s15711_s27 = sphi %s15782_s27, %s19462_s27  }
   0xe   : > { %s12411_s10 = sadd.s32 4294967294, %s15723_s30   ;;  %p49_p0 = scmp.ne.s32.totalorder %s15715_s28, %s15711_s27 }
   0xf   : > { %p18886_p1 = scmp.eq.s32.totalorder %s15803_s9, 0  ;;  %p210_p3 = scmp.eq.s32.totalorder %s12411_s10, 1 }
  0x10   : > { %p12412_p5 = scmp.ge.s32.totalorder %s15723_s30, 1  ;;  %p243_p7 = scmp.lt.s32.totalorder %s15723_s30, 3 }
  0x11   : > { %p15812_p4 = por %p18886_p1, %p49_p0  ;;  %p15817_p6 = por %p210_p3, %p49_p0 }
  0x12   : > { %p15822_p8 = pnand %p12412_p5, %p243_p7  ;;  %s15725_s14 = smov [#allocation7]  }
  0x13   : > { %s19078_s11 = scalar_select %p15812_p4, 1, 0 }
  0x14   : > { %s19079_s12 = scalar_select %p15817_p6, 1, 0 }
  0x15   : > { %s19081_s13 = scalar_select %p15822_p8, 1, 0 }
  0x16   : > { %19080 = sst [smem:[#allocation18_spill]] %s19079_s12  ;;  %s255_s15 = sshll.u32 %s15725_s14, 4  ;;  %s15826_s15 = int_to_ptr.vmem [resolvable:$true] %s255_s15 }
  0x17   : > { %p15083_p9 = pneg %p15822_p8  ;;  %s15726_s17 = smov [#allocation8]  }
  0x18   : > { %s272_s18 = sshll.u32 %s15726_s17, 4  ;;  %s15727_s19 = smov [#allocation10]   ;;  %s15837_s18 = int_to_ptr.vmem [resolvable:$true] %s272_s18 }
  0x19   : > { %p15833_p11 = pnand %p15083_p9, %p18886_p1  ;;  %s15839_s20 = sshll.u32 %s15727_s19, 4  ;;  %s287_s20 = int_to_ptr.vmem [resolvable:$true] %s15839_s20 }
  0x1a   : > { %s19083_s2 = sld [smem:[#allocation179_spill]] }
  0x1b   : > { %p15849_p13 = pneg %p15833_p11 }
  0x20   : > { %s15501_s23 = scalar_lea.hbm %s19083_s2, 131072 }
  0x21   : > { %p15502_p12 = scmp.ne.s32.totalorder %s19083_s2, %s15501_s23  ;;  %p15508_p5 = scmp.lt.u32.totalorder %s15501_s23, %s19083_s2 }
  0x23   : > { %p15504_p0 = pnand %p15849_p13, %p15502_p12 }
  0x25   : > { %p15505_p3 = pneg %p15504_p0 }
  0x27   : > { %p15510_p7 = pnand %p15508_p5, %p15505_p3 }
  0x29   : > { %15513 = shalt.err (!%p15510_p7)
}
  0x2a   : > { %s15514_s17 = scalar_lea.vmem %s15826_s15, 131072  ;;  %p15522_p2 = scmp.lt.s32.totalorder %s15826_s15, %s15826_s15 }
  0x2b   : > { %p15515_p9 = scmp.ne.s32.totalorder %s15826_s15, %s15514_s17  ;;  %p15523_p6 = scmp.lt.s32.totalorder %s15514_s17, %s15514_s17 }
  0x2d   : > { %p15517_p10 = pnand %p15515_p9, %p15849_p13  ;;  %p15524_p12 = por %p15523_p6, %p15522_p2 }
  0x2f   : > { %p15518_p1 = pneg %p15517_p10 }
  0x31   : > { %p15525_p0 = pnand %p15524_p12, %p15518_p1 }
  0x33   : > { %15528 = shalt.err (!%p15525_p0)
}
  0x34   : > { %s15728_s19 = smov 512   ;;  %s15729_s21 = smov 32  }
  0x35   : > { %15086 = dma.hbm_to_vmem [thread:$0]  (!%p15833_p11), %s19083_s2, 131072, %s15826_s15, [#allocation6], %s15728_s19, %s15728_s19, %s15729_s21  }
  0x36   : > { %s19085_s4 = sld [smem:[#allocation180_spill]] }
  0x3c   : > { %s15529_s10 = scalar_lea.hbm %s19085_s4, 16 }
  0x3d   : > { %p15530_p2 = scmp.ne.s32.totalorder %s19085_s4, %s15529_s10  ;;  %p15536_p10 = scmp.lt.u32.totalorder %s15529_s10, %s19085_s4 }
  0x3f   : > { %p15532_p1 = pnand %p15530_p2, %p15849_p13 }
  0x41   : > { %p15533_p6 = pneg %p15532_p1 }
  0x43   : > { %p15538_p3 = pnand %p15536_p10, %p15533_p6 }
  0x45   : > { %15541 = shalt.err (!%p15538_p3)
}
  0x46   : > { %s15542_s15 = scalar_lea.vmem %s15837_s18, 16  ;;  %s15549_s12 = scalar_lea.vmem %s15837_s18, 32 }
  0x47   : > { %p15543_p5 = scmp.ne.s32.totalorder %s15837_s18, %s15542_s15  ;;  %p15550_p12 = scmp.lt.s32.totalorder %s15837_s18, %s15837_s18 }
  0x48   : > { %p15551_p0 = scmp.lt.s32.totalorder %s15549_s12, %s15542_s15 }
  0x49   : > { %p15545_p7 = pnand %p15543_p5, %p15849_p13 }
  0x4a   : > { %p15552_p2 = por %p15551_p0, %p15550_p12 }
  0x4b   : > { %p15546_p9 = pneg %p15545_p7 }
  0x4d   : > { %p15553_p1 = pnand %p15552_p2, %p15546_p9 }
  0x4f   : > { %15556 = shalt.err (!%p15553_p1)
}
  0x50   : > { %15089 = dma.hbm_to_vmem [thread:$0]  (!%p15833_p11), %s19085_s4, 16, %s15837_s18, [#allocation9]  }
  0x51   : > { %s19086_s6 = sld [smem:[#allocation181_spill]] }
  0x57   : > { %s15557_s23 = scalar_lea.hbm %s19086_s6, 16 }
  0x58   : > { %p15558_p6 = scmp.ne.s32.totalorder %s19086_s6, %s15557_s23  ;;  %p15564_p5 = scmp.lt.u32.totalorder %s15557_s23, %s19086_s6 }
  0x5a   : > { %p15560_p10 = pnand %p15558_p6, %p15849_p13 }
  0x5c   : > { %p15561_p3 = pneg %p15560_p10 }
  0x5e   : > { %p15566_p7 = pnand %p15564_p5, %p15561_p3 }
  0x60   : > { %15569 = shalt.err (!%p15566_p7)
}
  0x61   : > { %s15570_s17 = scalar_lea.vmem %s287_s20, 16  ;;  %s15577_s18 = scalar_lea.vmem %s287_s20, 32 }
  0x62   : > { %p15571_p9 = scmp.ne.s32.totalorder %s287_s20, %s15570_s17  ;;  %p15578_p2 = scmp.lt.s32.totalorder %s287_s20, %s287_s20 }
  0x63   : > { %p15579_p1 = scmp.lt.s32.totalorder %s15577_s18, %s15570_s17 }
  0x64   : > { %p15573_p12 = pnand %p15571_p9, %p15849_p13 }
  0x65   : > { %p15580_p4 = por %p15579_p1, %p15578_p2 }
  0x66   : > { %p15574_p0 = pneg %p15573_p12 }
  0x68   : > { %p15581_p8 = pnand %p15580_p4, %p15574_p0 }
  0x6a   : > { %15584 = shalt.err (!%p15581_p8)
}
  0x6b   : > { %15092 = dma.hbm_to_vmem [thread:$0]  (!%p15833_p11), %s19086_s6, 16, %s287_s20, [#allocation9]  }
  0x6c   : > { %s15914_s26 = sadd.s32 1, %s15723_s30   ;;  %s36_s16 = sadd.s32 1, %s15719_s29 }
  0x6d   : > { %s33_s27 = ssub.s32 %s15723_s30, %s15914_s26  ;;  %p43_p8 = scmp.ne.s32.totalorder %s15719_s29, %s15715_s28 }
  0x6e   : > { %p34_p4 = scmp.eq.s32.totalorder %s33_s27, 0  ;;  %p44_p13 = scmp.eq.s32.totalorder %s15723_s30, 0 }
  0x6f   : > { %p15107_p6 = scmp.lt.s32.totalorder %s15723_s30, 2  ;;  %p19087_p3 = scmp.eq.s32.totalorder %s15803_s9, 1 }
  0x70   : > { %s15924_s19 = scalar_select %p34_p4, %s15719_s29, %s36_s16  }
  0x71   : > { %p45_p10 = por %p44_p13, %p43_p8  ;;  %p15928_p5 = por %p19087_p3, %p43_p8 }
  0x72   : > { %s15933_s22 = sand.u32 1, %s15719_s29   ;;  %s13558_s20 = sshll.u32 %s15723_s30, 13 }
  0x73   : > { %s12417_s23 = sshll.u32 %s15933_s22, 9  ;;  %s19089_s0 = sld [smem:[#allocation178_spill]] }
  0x74   : > { %s301_s14 = scalar_lea.vmem [#allocation2], %s12417_s23  ;;  %p15942_p11 = pnand %p15107_p6, %p45_p10 }
  0x75   : > { %s308_s17 = sshll.u32 %s301_s14, 4  ;;  %s298_s15 = scalar_lea.sflag [#allocation3], %s15933_s22  ;;  %s15946_s17 = int_to_ptr.vmem [resolvable:$true] %s308_s17 }
  0x76   : > { %p15587_p9 = pneg %p15942_p11 }
  0x79   : > { %s15940_s10 = scalar_lea.hbm %s19089_s0, %s13558_s20  ;;  %s15590_s20 = scalar_lea.hbm %s19089_s0, 16384 }
  0x7a   : > { %s15585_s12 = scalar_lea.hbm %s15940_s10, 8192  ;;  %p15591_p2 = scmp.lt.u32.totalorder %s15940_s10, %s19089_s0 }
  0x7b   : > { %p15586_p7 = scmp.ne.s32.totalorder %s15940_s10, %s15585_s12  ;;  %p15592_p1 = scmp.lt.u32.totalorder %s15590_s20, %s15585_s12 }
  0x7c   : > { %p15594_p8 = scmp.lt.u32.totalorder %s15585_s12, %s15940_s10 }
  0x7d   : > { %p15588_p12 = pnand %p15587_p9, %p15586_p7  ;;  %p15593_p4 = por %p15592_p1, %p15591_p2 }
  0x7f   : > { %p15589_p0 = pneg %p15588_p12  ;;  %p15595_p13 = por %p15594_p8, %p15593_p4 }
  0x81   : > { %p15596_p6 = pnand %p15595_p13, %p15589_p0 }
  0x83   : > { %15599 = shalt.err (!%p15596_p6)
}
  0x84   : > { %s15600_s25 = scalar_lea.vmem %s15946_s17, 8192  ;;  %s15730_s14 = smov [#allocation2]  }
  0x85   : > { %p15601_p10 = scmp.ne.s32.totalorder %s15946_s17, %s15600_s25  ;;  %s15605_s27 = sshll.u32 %s15730_s14, 4  ;;  %s15606_s27 = int_to_ptr.vmem [resolvable:$false] %s15605_s27 }
  0x86   : > { %s15607_s16 = scalar_lea.vmem %s15606_s27, 16384  ;;  %p15608_p12 = scmp.lt.s32.totalorder %s15946_s17, %s15606_s27 }
  0x87   : > { %p15603_p3 = pnand %p15601_p10, %p15587_p9  ;;  %p15609_p2 = scmp.lt.s32.totalorder %s15607_s16, %s15600_s25 }
  0x89   : > { %p15604_p7 = pneg %p15603_p3  ;;  %p15610_p1 = por %p15609_p2, %p15608_p12 }
  0x8b   : > { %p15611_p4 = pnand %p15610_p1, %p15604_p7 }
  0x8d   : > { %15614 = shalt.err (!%p15611_p4)
}
  0x8e   : > { %s15731_s12 = smov 1024   ;;  %s15732_s20 = smov 64  }
  0x8f   : > { %15096 = dma.hbm_to_vmem [thread:$0]  (!%p15942_p11), %s15940_s10, 8192, %s15946_s17, %s298_s15, %s15731_s12, %s15731_s12, %s15732_s20  }
  0x90   : > { %s318_s23 = sand.u32 1, %s15723_s30   ;;  %s12420_s24 = sshll.u32 %s15933_s22, 5 }
  0x91   : > { %s13559_s25 = sshll.u32 %s15723_s30, 9  ;;  %s322_s14 = scalar_lea.vmem [#allocation5], %s12420_s24 }
  0x92   : > { %s329_s27 = sshll.u32 %s322_s14, 4  ;;  %s15983_s2 = scalar_lea.hbm %s18878_s1, %s13559_s25  ;;  %s15985_s27 = int_to_ptr.vmem [resolvable:$true] %s329_s27 }
  0x93   : > { %s15987_s4 = scalar_lea.sflag [#allocation6], %s318_s23  ;;  %s15615_s6 = scalar_lea.hbm %s15983_s2, 512 }
  0x94   : > { %p15616_p0 = scmp.ne.s32.totalorder %s15983_s2, %s15615_s6  ;;  %s15620_s0 = scalar_lea.hbm %s18878_s1, 1024 }
  0x95   : > { %p15621_p6 = scmp.lt.u32.totalorder %s15983_s2, %s18878_s1  ;;  %p15622_p10 = scmp.lt.u32.totalorder %s15620_s0, %s15615_s6 }
  0x96   : > { %p15618_p8 = pnand %p15616_p0, %p15587_p9  ;;  %p15624_p7 = scmp.lt.u32.totalorder %s15615_s6, %s15983_s2 }
  0x97   : > { %p15623_p3 = por %p15622_p10, %p15621_p6 }
  0x98   : > { %p15619_p13 = pneg %p15618_p8 }
  0x99   : > { %p15625_p12 = por %p15624_p7, %p15623_p3 }
  0x9b   : > { %p15626_p2 = pnand %p15625_p12, %p15619_p13 }
  0x9d   : > { %15629 = shalt.err (!%p15626_p2)
}
  0x9e   : > { %s15630_s12 = scalar_lea.vmem %s15985_s27, 512  ;;  %s15733_s23 = smov [#allocation5]  }
  0x9f   : > { %p15631_p1 = scmp.ne.s32.totalorder %s15985_s27, %s15630_s12  ;;  %s15635_s24 = sshll.u32 %s15733_s23, 4  ;;  %s15636_s24 = int_to_ptr.vmem [resolvable:$false] %s15635_s24 }
  0xa0   : > { %s15637_s25 = scalar_lea.vmem %s15636_s24, 1024  ;;  %p15638_p8 = scmp.lt.s32.totalorder %s15985_s27, %s15636_s24 }
  0xa1   : > { %p15633_p4 = pnand %p15631_p1, %p15587_p9  ;;  %p15639_p6 = scmp.lt.s32.totalorder %s15637_s25, %s15630_s12 }
  0xa3   : > { %p15634_p0 = pneg %p15633_p4  ;;  %p15640_p10 = por %p15639_p6, %p15638_p8 }
  0xa5   : > { %p15641_p3 = pnand %p15640_p10, %p15634_p0 }
  0xa7   : > { %15644 = shalt.err (!%p15641_p3)
}
  0xa8   : > { %s15734_s6 = smov 4   ;;  %p19091_p9 = scmp.ne.s32.totalorder %s19081_s13, 0 }
  0xa9   : > { %15099 = dma.hbm_to_vmem [thread:$0]  (!%p15942_p11), %s15983_s2, 512, %s15985_s27, %s15987_s4, %s15732_s20, %s15732_s20, %s15734_s6  }
  0xaa   : > { %341 = sbr.rel (%p19091_p9) target bundleno = 2696 (0xa88), region = 48 }
  0xb1   : > { %s16018_s14 = sand.u32 1, %s15715_s28   ;;  %p19092_p13 = scmp.ne.s32.totalorder %s19078_s11, 0 }
  0xb2   : > { %s12424_s16 = sshll.u32 %s16018_s14, 9  ;;  %s344_s22 = scalar_lea.sflag [#allocation3], %s16018_s14 }
  0xb3   : > { %s16022_s10 = scalar_lea.vmem [#allocation2], %s12424_s16 }
  0xb4   : > { %15690 = dma.done.wait (%p19092_p13), %s344_s22, 8192  }
  0xb5   : > { %15692 = vsyncadd (%p19092_p13), %s344_s22, 4294959104  ;;  %s352_s2 = sand.u32 1, %s15803_s9   ;;  %s12425_s4 = sshll.u32 %s16018_s14, 5 }
  0xb6   : > { %s353_s13 = scalar_lea.sflag [#allocation6], %s352_s2  ;;  %s16030_s18 = scalar_lea.vmem [#allocation5], %s12425_s4 }
  0xb7   : > { %15694 = dma.done.wait (%p19092_p13), %s353_s13, 512  }
  0xb8   : > { %15696 = vsyncadd (%p19092_p13), %s353_s13, 4294966784  ;;  %p19093_p11 = scmp.eq.s32.totalorder %s15803_s9, 0 }
  0xba   : > { %15698 = dma.done.wait (%p19093_p11), [#allocation6], 131072   ;;  %p19094_p7 = pmov %p19093_p11 }
  0xbc   : > { %15700 = vsyncadd (%p19094_p7), [#allocation6], 4294836224  ;;  %p19095_p12 = pmov %p19094_p7 }
  0xbd   : > { %p19096_p2 = pmov %p19094_p7 }
  0xbe   : > { %15702 = dma.done.wait (%p19095_p12), [#allocation9], 32  }
  0xbf   : > { %15704 = vsyncadd (%p19096_p2), [#allocation9], 4294967264  ;;  %v15735_v0 = vmov 0   ;;  %v416_v1 = vld [vmem:[%s16022_s10] sm:$0xff]  ;;  %v417_v12 = vld [vmem:[%s16022_s10 + $0x8] sm:$0xff]  ;;  %vm828_vm0 = vcmask 523264  }
  0xc0   : > { %873 = vmatprep.mubr.bf16.mxu0 %v15735_v0  ;;  %946 = vmatprep.mubr.bf16.mxu1 %v15735_v0  ;;  %v424_v2 = vld [vmem:[%s16022_s10 + $0x40] sm:$0xff]  ;;  %v425_v14 = vld [vmem:[%s16022_s10 + $0x48] sm:$0xff]  ;;  %v418_v27 = vld [vmem:[%s16022_s10 + $0x10] sm:$0xff]  ;;  %vm10837_vm1 = vcmask 64512   ;;  %p410_p1 = scmp.lt.s32.totalorder %s15803_s9, 1  ;;  %s402_s11 = scalar_lea.vmem [#allocation11], %s16018_s14 }
  0xc1   : > { %v432_v3 = vld [vmem:[%s16022_s10 + $0x80] sm:$0xff]  ;;  %v12436_v4 = vcombine.high %v416_v1, %v424_v2  ;;  %v12435_v5 = vcombine.low %v416_v1, %v424_v2  ;;  %v12438_v16 = vcombine.high %v417_v12, %v425_v14  ;;  %v12437_v17 = vcombine.low %v417_v12, %v425_v14  ;;  %v433_v18 = vld [vmem:[%s16022_s10 + $0x88] sm:$0xff]  ;;  %v426_v28 = vld [vmem:[%s16022_s10 + $0x50] sm:$0xff]  ;;  %s12266_s20 = sshll.u32 %s402_s11, 4  ;;  %s12249_s15 = scalar_lea.sflag [#allocation4], %s16018_s14  ;;  %s18835_s20 = int_to_ptr.vmem [resolvable:$true] %s12266_s20 }
  0xc2   : > { %v440_v6 = vld [vmem:[%s16022_s10 + $0xc0] sm:$0xff]  ;;  %v441_v19 = vld [vmem:[%s16022_s10 + $0xc8] sm:$0xff]  ;;  %v12440_v33 = vcombine.high %v418_v27, %v426_v28  ;;  %v434_v35 = vld [vmem:[%s16022_s10 + $0x90] sm:$0xff]  ;;  %v12439_v40 = vcombine.low %v418_v27, %v426_v28  ;;  %s411_s22 = scalar_select %p410_p1, %s15803_s9, 1  ;;  %vm12246_vm2 = vcmask 57344  }
  0xc3   : > { %v12452_v7 = vcombine.high %v432_v3, %v440_v6  ;;  %v448_v8 = vld [vmem:[%s16022_s10 + $0x100] sm:$0xff]  ;;  %841 = vmatprep.subr.bf16.mxu0 %v12436_v4  ;;  %v12451_v10 = vcombine.low %v432_v3, %v440_v6  ;;  %v12454_v20 = vcombine.high %v433_v18, %v441_v19  ;;  %v449_v21 = vld [vmem:[%s16022_s10 + $0x108] sm:$0xff]  ;;  %914 = vmatprep.subr.bf16.mxu1 %v12438_v16  ;;  %v442_v36 = vld [vmem:[%s16022_s10 + $0xd0] sm:$0xff]  ;;  %s15645_s12 = scalar_lea.vmem %s18835_s20, 16 }
  0xc4   : > { %v456_v9 = vld [vmem:[%s16022_s10 + $0x140] sm:$0xff]  ;;  %842 = vmatpush1.bf16.msra.mxu0 %v12435_v5  ;;  %v457_v22 = vld [vmem:[%s16022_s10 + $0x148] sm:$0xff]  ;;  %915 = vmatpush1.bf16.msra.mxu1 %v12437_v17  ;;  %v12453_v25 = vcombine.low %v433_v18, %v441_v19  ;;  %v419_v38 = vld [vmem:[%s16022_s10 + $0x18] sm:$0xff]  ;;  %v12456_v42 = vcombine.high %v434_v35, %v442_v36  ;;  %v12455_v48 = vcombine.low %v434_v35, %v442_v36  ;;  %p15646_p4 = scmp.ne.s32.totalorder %s18835_s20, %s15645_s12 }
  0xc5   : > { %v464_v11 = vld [vmem:[%s16022_s10 + $0x180] sm:$0xff]  ;;  %843 = vmatprep.subr.bf16.mxu0 %v12452_v7  ;;  %v12468_v13 = vcombine.high %v448_v8, %v456_v9  ;;  %v12467_v23 = vcombine.low %v448_v8, %v456_v9  ;;  %916 = vmatprep.subr.bf16.mxu1 %v12454_v20  ;;  %v12470_v26 = vcombine.high %v449_v21, %v457_v22  ;;  %v465_v29 = vld [vmem:[%s16022_s10 + $0x188] sm:$0xff]  ;;  %v427_v39 = vld [vmem:[%s16022_s10 + $0x58] sm:$0xff] }
  0xc6   : > { %v472_v15 = vld [vmem:[%s16022_s10 + $0x1c0] sm:$0xff]  ;;  %v473_v30 = vld [vmem:[%s16022_s10 + $0x1c8] sm:$0xff]  ;;  %v12469_v32 = vcombine.low %v449_v21, %v457_v22  ;;  %v12442_v43 = vcombine.high %v419_v38, %v427_v39  ;;  %v435_v44 = vld [vmem:[%s16022_s10 + $0x98] sm:$0xff]  ;;  %v12441_v49 = vcombine.low %v419_v38, %v427_v39  ;;  %p15647_p0 = pnand %p15646_p4, %p15928_p5 }
  0xc7   : > { %v12484_v24 = vcombine.high %v464_v11, %v472_v15  ;;  %v12483_v31 = vcombine.low %v464_v11, %v472_v15  ;;  %v12486_v34 = vcombine.high %v465_v29, %v473_v30  ;;  %v16067_v37 = vld [vmem:[%s16030_s18] sm:$0xff]   ;;  %v12485_v41 = vcombine.low %v465_v29, %v473_v30  ;;  %v443_v45 = vld [vmem:[%s16022_s10 + $0xd8] sm:$0xff]  ;;  %v450_v46 = vld [vmem:[%s16022_s10 + $0x110] sm:$0xff] }
  0xc8   : > { %844 = vmatpush1.bf16.msra.mxu0 %v12451_v10  ;;  %917 = vmatpush1.bf16.msra.mxu1 %v12453_v25  ;;  %v458_v47 = vld [vmem:[%s16022_s10 + $0x150] sm:$0xff]  ;;  %v12458_v50 = vcombine.high %v435_v44, %v443_v45  ;;  %v16081_v54 = vld [vmem:[%s16030_s18 + $0x8] sm:$0xff]   ;;  %v451_v55 = vld [vmem:[%s16022_s10 + $0x118] sm:$0xff]  ;;  %v12457_v58 = vcombine.low %v435_v44, %v443_v45  ;;  %p15648_p8 = pneg %p15647_p0 }
  0xc9   : > { %845 = vmatprep.subr.bf16.mxu0 %v12468_v13  ;;  %918 = vmatprep.subr.bf16.mxu1 %v12470_v26  ;;  %v12472_v51 = vcombine.high %v450_v46, %v458_v47  ;;  %v466_v52 = vld [vmem:[%s16022_s10 + $0x190] sm:$0xff]  ;;  %v459_v56 = vld [vmem:[%s16022_s10 + $0x158] sm:$0xff]  ;;  %v12471_v57 = vcombine.low %v450_v46, %v458_v47  ;;  %v420_v63 = vld [vmem:[%s16022_s10 + $0x20] sm:$0xff] }
  0xca   : > { %v474_v53 = vld [vmem:[%s16022_s10 + $0x1d0] sm:$0xff]  ;;  %v12474_v60 = vcombine.high %v451_v55, %v459_v56  ;;  %v467_v61 = vld [vmem:[%s16022_s10 + $0x198] sm:$0xff]  ;;  %v428_v1 = vld [vmem:[%s16022_s10 + $0x60] sm:$0xff]  ;;  %v12473_v3 = vcombine.low %v451_v55, %v459_v56 }
  0xcb   : > { %v12488_v59 = vcombine.high %v466_v52, %v474_v53  ;;  %v475_v62 = vld [vmem:[%s16022_s10 + $0x1d8] sm:$0xff]  ;;  %v12487_v2 = vcombine.low %v466_v52, %v474_v53  ;;  %v12444_v5 = vcombine.high %v420_v63, %v428_v1  ;;  %v16096_v6 = vld [vmem:[%s16030_s18 + $0x10] sm:$0xff]   ;;  %v421_v7 = vld [vmem:[%s16022_s10 + $0x28] sm:$0xff]  ;;  %v12443_v14 = vcombine.low %v420_v63, %v428_v1 }
  0xcc   : > { %846 = vmatpush1.bf16.msra.mxu0 %v12467_v23  ;;  %919 = vmatpush1.bf16.msra.mxu1 %v12469_v32  ;;  %v12490_v4 = vcombine.high %v467_v61, %v475_v62  ;;  %v429_v8 = vld [vmem:[%s16022_s10 + $0x68] sm:$0xff]  ;;  %v12489_v9 = vcombine.low %v467_v61, %v475_v62  ;;  %v16107_v11 = vld [vmem:[%s16030_s18 + $0x18] sm:$0xff]   ;;  %v436_v12 = vld [vmem:[%s16022_s10 + $0xa0] sm:$0xff]  ;;  %s13555_s18 = sshll.u32 %s15803_s9, 4  ;;  %s15736_s9 = smov [#allocation11]  }
  0xcd   : > { %847 = vmatprep.subr.bf16.mxu0 %v12484_v24  ;;  %920 = vmatprep.subr.bf16.mxu1 %v12486_v34  ;;  %v12446_v10 = vcombine.high %v421_v7, %v429_v8  ;;  %v444_v13 = vld [vmem:[%s16022_s10 + $0xe0] sm:$0xff]  ;;  %v437_v16 = vld [vmem:[%s16022_s10 + $0xa8] sm:$0xff]  ;;  %v12445_v21 = vcombine.low %v421_v7, %v429_v8  ;;  %v422_v34 = vld [vmem:[%s16022_s10 + $0x30] sm:$0xff]  ;;  %s18833_s17 = scalar_lea.hbm %s18884_s7, %s13555_s18  ;;  %s15649_s23 = sshll.u32 %s15736_s9, 4  ;;  %s15650_s23 = int_to_ptr.vmem [resolvable:$false] %s15649_s23 }
  0xce   : > { %v12460_v15 = vcombine.high %v436_v12, %v444_v13  ;;  %v445_v17 = vld [vmem:[%s16022_s10 + $0xe8] sm:$0xff]  ;;  %v452_v18 = vld [vmem:[%s16022_s10 + $0x120] sm:$0xff]  ;;  %v12459_v20 = vcombine.low %v436_v12, %v444_v13  ;;  %v430_v35 = vld [vmem:[%s16022_s10 + $0x70] sm:$0xff]  ;;  %s15651_s24 = scalar_lea.vmem %s15650_s23, 32  ;;  %p15652_p6 = scmp.lt.s32.totalorder %s18835_s20, %s15650_s23 }
  0xcf   : > { %v460_v19 = vld [vmem:[%s16022_s10 + $0x160] sm:$0xff]  ;;  %v12462_v22 = vcombine.high %v437_v16, %v445_v17  ;;  %v453_v26 = vld [vmem:[%s16022_s10 + $0x128] sm:$0xff]  ;;  %v12461_v29 = vcombine.low %v437_v16, %v445_v17  ;;  %v438_v45 = vld [vmem:[%s16022_s10 + $0xb0] sm:$0xff]  ;;  %v12447_v47 = vcombine.low %v422_v34, %v430_v35  ;;  %p15653_p10 = scmp.lt.s32.totalorder %s15651_s24, %s15645_s12 }
  0xd0   : > { %848 = vmatpush1.bf16.msra.mxu0 %v12483_v31  ;;  %921 = vmatpush1.bf16.msra.mxu1 %v12485_v41  ;;  %v12476_v23 = vcombine.high %v452_v18, %v460_v19  ;;  %v468_v24 = vld [vmem:[%s16022_s10 + $0x1a0] sm:$0xff]  ;;  %v461_v27 = vld [vmem:[%s16022_s10 + $0x168] sm:$0xff]  ;;  %v12475_v28 = vcombine.low %v452_v18, %v460_v19  ;;  %v423_v41 = vld [vmem:[%s16022_s10 + $0x38] sm:$0xff] }
  0xd1   : > { %987 = vmatprep.subr.bf16.mxu0 %v12440_v33  ;;  %1060 = vmatprep.subr.bf16.mxu1 %v12442_v43  ;;  %v476_v25 = vld [vmem:[%s16022_s10 + $0x1e0] sm:$0xff]  ;;  %v12478_v31 = vcombine.high %v453_v26, %v461_v27  ;;  %v469_v32 = vld [vmem:[%s16022_s10 + $0x1a8] sm:$0xff]  ;;  %v12477_v38 = vcombine.low %v453_v26, %v461_v27  ;;  %v446_v46 = vld [vmem:[%s16022_s10 + $0xf0] sm:$0xff]  ;;  %p15654_p3 = por %p15653_p10, %p15652_p6 }
  0xd2   : > { %v12492_v30 = vcombine.high %v468_v24, %v476_v25  ;;  %v477_v33 = vld [vmem:[%s16022_s10 + $0x1e8] sm:$0xff]  ;;  %v12491_v36 = vcombine.low %v468_v24, %v476_v25  ;;  %v462_v52 = vld [vmem:[%s16022_s10 + $0x170] sm:$0xff]  ;;  %v12463_v53 = vcombine.low %v438_v45, %v446_v46  ;;  %v463_v61 = vld [vmem:[%s16022_s10 + $0x178] sm:$0xff] }
  0xd3   : > { %12499 = vmatmul.mubr.msk.bf16.vlgmr.msra.gmra.mrb[0].mxu0 %vm828_vm0, %v16067_v37  ;;  %12503 = vmatmul.mubr.msk.bf16.vlgmr.msra.gmra.mrb[0].mxu1 %vm828_vm0, %v16067_v37  ;;  %v12494_v39 = vcombine.high %v469_v32, %v477_v33  ;;  %v12493_v43 = vcombine.low %v469_v32, %v477_v33  ;;  %v1493_v7 = vld [vmem:[#allocation7 + $0x20] sm:$0xff]  ;;  %v1490_v13 = vld [vmem:[#allocation7 + $0x8] sm:$0xff]  ;;  %p15655_p9 = pnand %p15654_p3, %p15648_p8 }
  0xd4   : > { %883 = vmatprep.mubr.bf16.mxu0 %v15735_v0  ;;  %988 = vmatpush1.bf16.msra.mxu0 %v12439_v40  ;;  %v12448_v40 = vcombine.high %v422_v34, %v430_v35  ;;  %v1497_v17 = vld [vmem:[#allocation7 + $0x40] sm:$0xff]  ;;  %v1502_v24 = vld [vmem:[#allocation7 + $0x68] sm:$0xff] }
  0xd5   : > { %989 = vmatprep.subr.bf16.mxu0 %v12456_v42  ;;  %1061 = vmatpush1.bf16.msra.mxu1 %v12441_v49  ;;  %v431_v42 = vld [vmem:[%s16022_s10 + $0x78] sm:$0xff]  ;;  %v1501_v18 = vld [vmem:[#allocation7 + $0x60] sm:$0xff]  ;;  %v1510_v32 = vld [vmem:[#allocation7 + $0xa8] sm:$0xff] }
  0xd6   : > { %956 = vmatprep.mubr.bf16.mxu1 %v15735_v0  ;;  %1062 = vmatprep.subr.bf16.mxu1 %v12458_v50  ;;  %v12450_v44 = vcombine.high %v423_v41, %v431_v42  ;;  %v439_v49 = vld [vmem:[%s16022_s10 + $0xb8] sm:$0xff]  ;;  %v12449_v55 = vcombine.low %v423_v41, %v431_v42  ;;  %v12539_v25 = vcombine.low %v1497_v17, %v1501_v18  ;;  %v1518_v41 = vld [vmem:[#allocation7 + $0xe8] sm:$0xff] }
  0xd7   : > { %v447_v50 = vld [vmem:[%s16022_s10 + $0xf8] sm:$0xff] }
  0xd8   : > { %990 = vmatpush1.bf16.msra.mxu0 %v12455_v48  ;;  %v12464_v48 = vcombine.high %v438_v45, %v446_v46  ;;  %v12466_v56 = vcombine.high %v439_v49, %v447_v50  ;;  %v12465_v63 = vcombine.low %v439_v49, %v447_v50  ;;  %v1529_v45 = vld [vmem:[#allocation7 + $0x140] sm:$0xff] }
  0xd9   : > { %991 = vmatprep.subr.bf16.mxu0 %v12472_v51  ;;  %1063 = vmatpush1.bf16.msra.mxu1 %v12457_v58  ;;  %v454_v51 = vld [vmem:[%s16022_s10 + $0x130] sm:$0xff]  ;;  %v1533_v46 = vld [vmem:[#allocation7 + $0x160] sm:$0xff] }
  0xda   : > { %1064 = vmatprep.subr.bf16.mxu1 %v12474_v60  ;;  %v470_v58 = vld [vmem:[%s16022_s10 + $0x1b0] sm:$0xff]  ;;  %v455_v60 = vld [vmem:[%s16022_s10 + $0x138] sm:$0xff]  ;;  %v12479_v62 = vcombine.low %v454_v51, %v462_v52 }
  0xdb   : > { %12500 = vmatmul.mubr.msk.bf16.gmra.mrb[4].mxu0 %vm828_vm0, %v16081_v54  ;;  %12504 = vmatmul.mubr.msk.bf16.gmra.mrb[4].mxu1 %vm828_vm0, %v16081_v54 }
  0xdc   : > { %893 = vmatprep.mubr.bf16.mxu0 %v15735_v0  ;;  %992 = vmatpush1.bf16.msra.mxu0 %v12471_v57  ;;  %v12480_v57 = vcombine.high %v454_v51, %v462_v52  ;;  %v12572_v51 = vcombine.high %v1529_v45, %v1533_v46 }
  0xdd   : > { %993 = vmatprep.subr.bf16.mxu0 %v12488_v59  ;;  %966 = vmatprep.mubr.bf16.mxu1 %v15735_v0  ;;  %v478_v59 = vld [vmem:[%s16022_s10 + $0x1f0] sm:$0xff] }
  0xde   : > { %1065 = vmatpush1.bf16.msra.mxu1 %v12473_v3  ;;  %v12496_v1 = vcombine.high %v470_v58, %v478_v59  ;;  %v471_v3 = vld [vmem:[%s16022_s10 + $0x1b8] sm:$0xff]  ;;  %v12495_v8 = vcombine.low %v470_v58, %v478_v59  ;;  %v12571_v58 = vcombine.low %v1529_v45, %v1533_v46  ;;  %v1593_v45 = vld [vmem:[#allocation7 + $0x340] sm:$0xff] }
  0xdf   : > { %1066 = vmatprep.subr.bf16.mxu1 %v12490_v4  ;;  %v479_v4 = vld [vmem:[%s16022_s10 + $0x1f8] sm:$0xff]  ;;  %v1597_v46 = vld [vmem:[#allocation7 + $0x360] sm:$0xff]  ;;  %s13560_s10 = sshll.u32 %s411_s22, 6 }
  0xe0   : > { %994 = vmatpush1.bf16.msra.mxu0 %v12487_v2  ;;  %v12482_v2 = vcombine.high %v455_v60, %v463_v61  ;;  %s18778_s13 = scalar_lea.vmem %s18885_s8, %s13560_s10 }
  0xe1   : > { %1133 = vmatprep.subr.bf16.mxu0 %v12444_v5  ;;  %v1489_v5 = vld [vmem:[#allocation7] sm:$0xff] }
  0xe2   : > { %1067 = vmatpush1.bf16.msra.mxu1 %v12489_v9  ;;  %v12481_v9 = vcombine.low %v455_v60, %v463_v61  ;;  %v12532_v12 = vcombine.high %v1489_v5, %v1493_v7  ;;  %v12531_v19 = vcombine.low %v1489_v5, %v1493_v7  ;;  %v1545_v61 = vld [vmem:[#allocation7 + $0x1c0] sm:$0xff] }
  0xe3   : > { %12501 = vmatmul.mubr.msk.bf16.gmra.mrb[8].mxu0 %vm828_vm0, %v16096_v6  ;;  %1206 = vmatprep.subr.bf16.mxu1 %v12446_v10  ;;  %v12498_v10 = vcombine.high %v471_v3, %v479_v4  ;;  %v1553_v7 = vld [vmem:[#allocation7 + $0x200] sm:$0xff] }
  0xe4   : > { %903 = vmatprep.mubr.bf16.mxu0 %v15735_v0  ;;  %12505 = vmatmul.mubr.msk.bf16.gmra.mrb[8].mxu1 %vm828_vm0, %v16096_v6 }
  0xe5   : > { %976 = vmatprep.mubr.bf16.mxu1 %v15735_v0 }
  0xeb   : > { %12502 = vmatmul.mubr.msk.bf16.gmra.mrb[12].mxu0 %vm828_vm0, %v16107_v11 }
  0xec   : > { %1019 = vmatprep.mubr.bf16.mxu0 %v15735_v0  ;;  %12506 = vmatmul.mubr.msk.bf16.gmra.mrb[12].mxu1 %vm828_vm0, %v16107_v11 }
  0xed   : > { %1092 = vmatprep.mubr.bf16.mxu1 %v15735_v0 }
  0xf3   : > { %12507 = vmatmul.mubr.msk.bf16.vlgmr.msra.gmra.mrb[16].mxu0 %vm828_vm0, %v16067_v37 }
  0xf4   : > { %1134 = vmatpush1.bf16.msra.mxu0 %v12443_v14  ;;  %1029 = vmatprep.mubr.bf16.mxu0 %v15735_v0  ;;  %v1494_v14 = vld [vmem:[#allocation7 + $0x28] sm:$0xff] }
  0xf5   : > { %1135 = vmatprep.subr.bf16.mxu0 %v12460_v15  ;;  %12511 = vmatmul.mubr.msk.bf16.vlgmr.msra.gmra.mrb[16].mxu1 %vm828_vm0, %v16067_v37  ;;  %v12497_v15 = vcombine.low %v471_v3, %v479_v4  ;;  %v12534_v16 = vcombine.high %v1490_v13, %v1494_v14  ;;  %v12533_v26 = vcombine.low %v1490_v13, %v1494_v14 }
  0xf6   : > { %1207 = vmatpush1.bf16.msra.mxu1 %v12445_v21  ;;  %1102 = vmatprep.mubr.bf16.mxu1 %v15735_v0  ;;  %v1505_v21 = vld [vmem:[#allocation7 + $0x80] sm:$0xff] }
  0xf7   : > { %1208 = vmatprep.subr.bf16.mxu1 %v12462_v22  ;;  %v1509_v22 = vld [vmem:[#allocation7 + $0xa0] sm:$0xff] }
  0xf8   : > { %1136 = vmatpush1.bf16.msra.mxu0 %v12459_v20  ;;  %v12540_v20 = vcombine.high %v1497_v17, %v1501_v18  ;;  %v12548_v27 = vcombine.high %v1505_v21, %v1509_v22  ;;  %v12547_v33 = vcombine.low %v1505_v21, %v1509_v22  ;;  %v1554_v17 = vld [vmem:[#allocation7 + $0x208] sm:$0xff]  ;;  %v1569_v22 = vld [vmem:[#allocation7 + $0x280] sm:$0xff] }
  0xf9   : > { %1137 = vmatprep.subr.bf16.mxu0 %v12476_v23  ;;  %v1498_v23 = vld [vmem:[#allocation7 + $0x48] sm:$0xff] }
  0xfa   : > { %1209 = vmatpush1.bf16.msra.mxu1 %v12461_v29  ;;  %v1513_v29 = vld [vmem:[#allocation7 + $0xc0] sm:$0xff]  ;;  %v12541_v34 = vcombine.low %v1498_v23, %v1502_v24  ;;  %v1558_v18 = vld [vmem:[#allocation7 + $0x228] sm:$0xff] }
  0xfb   : > { %12508 = vmatmul.mubr.msk.bf16.gmra.mrb[20].mxu0 %vm828_vm0, %v16081_v54  ;;  %1210 = vmatprep.subr.bf16.mxu1 %v12478_v31  ;;  %v1506_v31 = vld [vmem:[#allocation7 + $0x88] sm:$0xff]  ;;  %v12598_v21 = vcombine.high %v1554_v17, %v1558_v18 }
  0xfc   : > { %1039 = vmatprep.mubr.bf16.mxu0 %v15735_v0  ;;  %1138 = vmatpush1.bf16.msra.mxu0 %v12475_v28  ;;  %v12542_v28 = vcombine.high %v1498_v23, %v1502_v24  ;;  %v1573_v23 = vld [vmem:[#allocation7 + $0x2a0] sm:$0xff]  ;;  %v1562_v24 = vld [vmem:[#allocation7 + $0x248] sm:$0xff] }
  0xfd   : > { %1139 = vmatprep.subr.bf16.mxu0 %v12492_v30  ;;  %12512 = vmatmul.mubr.msk.bf16.gmra.mrb[20].mxu1 %vm828_vm0, %v16081_v54  ;;  %v1517_v30 = vld [vmem:[#allocation7 + $0xe0] sm:$0xff] }
  0xfe   : > { %1112 = vmatprep.mubr.bf16.mxu1 %v15735_v0  ;;  %1211 = vmatpush1.bf16.msra.mxu1 %v12477_v38  ;;  %v12556_v35 = vcombine.high %v1513_v29, %v1517_v30  ;;  %v1521_v38 = vld [vmem:[#allocation7 + $0x100] sm:$0xff]  ;;  %v12555_v42 = vcombine.low %v1513_v29, %v1517_v30 }
  0xff   : > { %1212 = vmatprep.subr.bf16.mxu1 %v12494_v39  ;;  %v1525_v39 = vld [vmem:[#allocation7 + $0x120] sm:$0xff] }
 0x100   : > { %1140 = vmatpush1.bf16.msra.mxu0 %v12491_v36  ;;  %v12550_v36 = vcombine.high %v1506_v31, %v1510_v32  ;;  %v12563_v49 = vcombine.low %v1521_v38, %v1525_v39  ;;  %v1577_v30 = vld [vmem:[#allocation7 + $0x2c0] sm:$0xff] }
 0x101   : > { %1279 = vmatprep.subr.bf16.mxu0 %v12448_v40  ;;  %v1514_v40 = vld [vmem:[#allocation7 + $0xc8] sm:$0xff] }
 0x102   : > { %1213 = vmatpush1.bf16.msra.mxu1 %v12493_v43  ;;  %v12564_v43 = vcombine.high %v1521_v38, %v1525_v39  ;;  %v12557_v50 = vcombine.low %v1514_v40, %v1518_v41  ;;  %v1585_v38 = vld [vmem:[#allocation7 + $0x300] sm:$0xff] }
 0x103   : > { %12509 = vmatmul.mubr.msk.bf16.gmra.mrb[24].mxu0 %vm828_vm0, %v16096_v6  ;;  %1352 = vmatprep.subr.bf16.mxu1 %v12450_v44  ;;  %v12558_v44 = vcombine.high %v1514_v40, %v1518_v41  ;;  %v1589_v39 = vld [vmem:[#allocation7 + $0x320] sm:$0xff]  ;;  %v1578_v40 = vld [vmem:[#allocation7 + $0x2c8] sm:$0xff] }
 0x104   : > { %1049 = vmatprep.mubr.bf16.mxu0 %v15735_v0  ;;  %v1582_v41 = vld [vmem:[#allocation7 + $0x2e8] sm:$0xff] }
 0x105   : > { %12513 = vmatmul.mubr.msk.bf16.gmra.mrb[24].mxu1 %vm828_vm0, %v16096_v6 }
 0x106   : > { %1122 = vmatprep.mubr.bf16.mxu1 %v15735_v0 }
 0x10b   : > { %12510 = vmatmul.mubr.msk.bf16.gmra.mrb[28].mxu0 %vm828_vm0, %v16107_v11 }
 0x10c   : > { %1165 = vmatprep.mubr.bf16.mxu0 %v15735_v0 }
 0x10d   : > { %12514 = vmatmul.mubr.msk.bf16.gmra.mrb[28].mxu1 %vm828_vm0, %v16107_v11 }
 0x10e   : > { %1238 = vmatprep.mubr.bf16.mxu1 %v15735_v0 }
 0x113   : > { %12515 = vmatmul.mubr.msk.bf16.vlgmr.msra.gmra.mrb[32].mxu0 %vm828_vm0, %v16067_v37 }
 0x114   : > { %1280 = vmatpush1.bf16.msra.mxu0 %v12447_v47  ;;  %1175 = vmatprep.mubr.bf16.mxu0 %v15735_v0  ;;  %v1522_v47 = vld [vmem:[#allocation7 + $0x108] sm:$0xff] }
 0x115   : > { %1281 = vmatprep.subr.bf16.mxu0 %v12464_v48  ;;  %12519 = vmatmul.mubr.msk.bf16.vlgmr.msra.gmra.mrb[32].mxu1 %vm828_vm0, %v16067_v37  ;;  %v1526_v48 = vld [vmem:[#allocation7 + $0x128] sm:$0xff] }
 0x116   : > { %1353 = vmatpush1.bf16.msra.mxu1 %v12449_v55  ;;  %1248 = vmatprep.mubr.bf16.mxu1 %v15735_v0  ;;  %v12566_v52 = vcombine.high %v1522_v47, %v1526_v48  ;;  %v1541_v55 = vld [vmem:[#allocation7 + $0x1a0] sm:$0xff] }
 0x117   : > { %1354 = vmatprep.subr.bf16.mxu1 %v12466_v56  ;;  %v1530_v56 = vld [vmem:[#allocation7 + $0x148] sm:$0xff] }
 0x118   : > { %1282 = vmatpush1.bf16.msra.mxu0 %v12463_v53  ;;  %v1537_v53 = vld [vmem:[#allocation7 + $0x180] sm:$0xff] }
 0x119   : > { %1283 = vmatprep.subr.bf16.mxu0 %v12480_v57  ;;  %v1534_v57 = vld [vmem:[#allocation7 + $0x168] sm:$0xff]  ;;  %v12580_v59 = vcombine.high %v1537_v53, %v1541_v55 }
 0x11a   : > { %1355 = vmatpush1.bf16.msra.mxu1 %v12465_v63  ;;  %v12574_v60 = vcombine.high %v1530_v56, %v1534_v57  ;;  %v1538_v63 = vld [vmem:[#allocation7 + $0x188] sm:$0xff]  ;;  %v12573_v3 = vcombine.low %v1530_v56, %v1534_v57 }
 0x11b   : > { %12516 = vmatmul.mubr.msk.bf16.gmra.mrb[36].mxu0 %vm828_vm0, %v16081_v54  ;;  %1356 = vmatprep.subr.bf16.mxu1 %v12482_v2  ;;  %v12579_v2 = vcombine.low %v1537_v53, %v1541_v55  ;;  %v1601_v53 = vld [vmem:[#allocation7 + $0x380] sm:$0xff]  ;;  %v1594_v56 = vld [vmem:[#allocation7 + $0x348] sm:$0xff] }
 0x11c   : > { %1185 = vmatprep.mubr.bf16.mxu0 %v15735_v0  ;;  %1284 = vmatpush1.bf16.msra.mxu0 %v12479_v62  ;;  %v1549_v62 = vld [vmem:[#allocation7 + $0x1e0] sm:$0xff]  ;;  %v1598_v57 = vld [vmem:[#allocation7 + $0x368] sm:$0xff] }
 0x11d   : > { %1285 = vmatprep.subr.bf16.mxu0 %v12496_v1  ;;  %12520 = vmatmul.mubr.msk.bf16.gmra.mrb[36].mxu1 %vm828_vm0, %v16081_v54  ;;  %v1542_v1 = vld [vmem:[#allocation7 + $0x1a8] sm:$0xff]  ;;  %v12588_v4 = vcombine.high %v1545_v61, %v1549_v62  ;;  %v1605_v55 = vld [vmem:[#allocation7 + $0x3a0] sm:$0xff] }
 0x11e   : > { %1258 = vmatprep.mubr.bf16.mxu1 %v15735_v0  ;;  %1357 = vmatpush1.bf16.msra.mxu1 %v12481_v9  ;;  %v12582_v5 = vcombine.high %v1538_v63, %v1542_v1  ;;  %v1546_v9 = vld [vmem:[#allocation7 + $0x1c8] sm:$0xff]  ;;  %v12581_v13 = vcombine.low %v1538_v63, %v1542_v1 }
 0x11f   : > { %1358 = vmatprep.subr.bf16.mxu1 %v12498_v10  ;;  %v1550_v10 = vld [vmem:[#allocation7 + $0x1e8] sm:$0xff] }
 0x120   : > { %1286 = vmatpush1.bf16.msra.mxu0 %v12495_v8  ;;  %v1557_v8 = vld [vmem:[#allocation7 + $0x220] sm:$0xff]  ;;  %v12590_v14 = vcombine.high %v1546_v9, %v1550_v10  ;;  %v1602_v63 = vld [vmem:[#allocation7 + $0x388] sm:$0xff] }
 0x121   : > { %7633 = vmatprep.subr.bf16.mxu0 %v12532_v12  ;;  %v12587_v12 = vcombine.low %v1545_v61, %v1549_v62  ;;  %v1609_v61 = vld [vmem:[#allocation7 + $0x3c0] sm:$0xff]  ;;  %v1606_v1 = vld [vmem:[#allocation7 + $0x3a8] sm:$0xff] }
 0x122   : > { %1359 = vmatpush1.bf16.msra.mxu1 %v12497_v15  ;;  %v1561_v15 = vld [vmem:[#allocation7 + $0x240] sm:$0xff] }
 0x123   : > { %12517 = vmatmul.mubr.msk.bf16.gmra.mrb[40].mxu0 %vm828_vm0, %v16096_v6  ;;  %8217 = vmatprep.subr.bf16.mxu1 %v12534_v16  ;;  %v1565_v16 = vld [vmem:[#allocation7 + $0x260] sm:$0xff] }
 0x124   : > { %1195 = vmatprep.mubr.bf16.mxu0 %v15735_v0  ;;  %v1613_v62 = vld [vmem:[#allocation7 + $0x3e0] sm:$0xff] }
 0x125   : > { %12521 = vmatmul.mubr.msk.bf16.gmra.mrb[40].mxu1 %vm828_vm0, %v16096_v6 }
 0x126   : > { %1268 = vmatprep.mubr.bf16.mxu1 %v15735_v0 }
 0x12b   : > { %12518 = vmatmul.mubr.msk.bf16.gmra.mrb[44].mxu0 %vm828_vm0, %v16107_v11 }
 0x12c   : > { %1311 = vmatprep.mubr.bf16.mxu0 %v15735_v0 }
 0x12d   : > { %12522 = vmatmul.mubr.msk.bf16.gmra.mrb[44].mxu1 %vm828_vm0, %v16107_v11 }
 0x12e   : > { %1384 = vmatprep.mubr.bf16.mxu1 %v15735_v0 }
 0x133   : > { %12523 = vmatmul.mubr.msk.bf16.vlgmr.msra.gmra.mrb[48].mxu0 %vm828_vm0, %v16067_v37 }
 0x134   : > { %7634 = vmatpush1.bf16.msra.mxu0 %v12531_v19  ;;  %1321 = vmatprep.mubr.bf16.mxu0 %v15735_v0  ;;  %v12595_v19 = vcombine.low %v1553_v7, %v1557_v8 }
 0x135   : > { %7635 = vmatprep.subr.bf16.mxu0 %v12540_v20  ;;  %12527 = vmatmul.mubr.msk.bf16.vlgmr.msra.gmra.mrb[48].mxu1 %vm828_vm0, %v16067_v37  ;;  %v12549_v37 = vcombine.low %v1506_v31, %v1510_v32  ;;  %v12604_v20 = vcombine.high %v1561_v15, %v1565_v16  ;;  %v1570_v31 = vld [vmem:[#allocation7 + $0x288] sm:$0xff] }
 0x136   : > { %8218 = vmatpush1.bf16.msra.mxu1 %v12533_v26  ;;  %1394 = vmatprep.mubr.bf16.mxu1 %v15735_v0  ;;  %v12603_v26 = vcombine.low %v1561_v15, %v1565_v16  ;;  %v1574_v32 = vld [vmem:[#allocation7 + $0x2a8] sm:$0xff] }
 0x137   : > { %8219 = vmatprep.subr.bf16.mxu1 %v12542_v28  ;;  %v12612_v28 = vcombine.high %v1569_v22, %v1573_v23  ;;  %v1618_v15 = vld [vmem:[#allocation7 + $0x408] sm:$0xff] }
 0x138   : > { %7636 = vmatpush1.bf16.msra.mxu0 %v12539_v25  ;;  %v1566_v25 = vld [vmem:[#allocation7 + $0x268] sm:$0xff] }
 0x139   : > { %7637 = vmatprep.subr.bf16.mxu0 %v12548_v27  ;;  %v12597_v27 = vcombine.low %v1554_v17, %v1558_v18  ;;  %v12606_v29 = vcombine.high %v1562_v24, %v1566_v25  ;;  %v1622_v16 = vld [vmem:[#allocation7 + $0x428] sm:$0xff] }
 0x13a   : > { %8220 = vmatpush1.bf16.msra.mxu1 %v12541_v34  ;;  %v12605_v34 = vcombine.low %v1562_v24, %v1566_v25  ;;  %v12662_v18 = vcombine.high %v1618_v15, %v1622_v16  ;;  %v1630_v24 = vld [vmem:[#allocation7 + $0x468] sm:$0xff] }
 0x13b   : > { %12524 = vmatmul.mubr.msk.bf16.gmra.mrb[52].mxu0 %vm828_vm0, %v16081_v54  ;;  %8221 = vmatprep.subr.bf16.mxu1 %v12550_v36  ;;  %v12614_v36 = vcombine.high %v1570_v31, %v1574_v32 }
 0x13c   : > { %7638 = vmatpush1.bf16.msra.mxu0 %v12547_v33  ;;  %1331 = vmatprep.mubr.bf16.mxu0 %v15735_v0  ;;  %v12611_v33 = vcombine.low %v1569_v22, %v1573_v23  ;;  %v1629_v22 = vld [vmem:[#allocation7 + $0x460] sm:$0xff]  ;;  %v1626_v23 = vld [vmem:[#allocation7 + $0x448] sm:$0xff] }
 0x13d   : > { %7639 = vmatprep.subr.bf16.mxu0 %v12556_v35  ;;  %12528 = vmatmul.mubr.msk.bf16.gmra.mrb[52].mxu1 %vm828_vm0, %v16081_v54  ;;  %v12565_v54 = vcombine.low %v1522_v47, %v1526_v48  ;;  %v1586_v47 = vld [vmem:[#allocation7 + $0x308] sm:$0xff] }
 0x13e   : > { %8222 = vmatpush1.bf16.msra.mxu1 %v12549_v37  ;;  %1404 = vmatprep.mubr.bf16.mxu1 %v15735_v0  ;;  %v12613_v37 = vcombine.low %v1570_v31, %v1574_v32  ;;  %v1590_v48 = vld [vmem:[#allocation7 + $0x328] sm:$0xff]  ;;  %v1633_v31 = vld [vmem:[#allocation7 + $0x480] sm:$0xff] }
 0x13f   : > { %8223 = vmatprep.subr.bf16.mxu1 %v12558_v44  ;;  %v12622_v44 = vcombine.high %v1578_v40, %v1582_v41 }
 0x140   : > { %7640 = vmatpush1.bf16.msra.mxu0 %v12555_v42 }
 0x141   : > { %7641 = vmatprep.subr.bf16.mxu0 %v12564_v43  ;;  %v12628_v43 = vcombine.high %v1585_v38, %v1589_v39 }
 0x142   : > { %8224 = vmatpush1.bf16.msra.mxu1 %v12557_v50  ;;  %v12621_v50 = vcombine.low %v1578_v40, %v1582_v41  ;;  %v12669_v40 = vcombine.low %v1626_v23, %v1630_v24 }
 0x143   : > { %12525 = vmatmul.mubr.msk.bf16.gmra.mrb[56].mxu0 %vm828_vm0, %v16096_v6  ;;  %8225 = vmatprep.subr.bf16.mxu1 %v12566_v52  ;;  %v12630_v52 = vcombine.high %v1586_v47, %v1590_v48 }
 0x144   : > { %7642 = vmatpush1.bf16.msra.mxu0 %v12563_v49  ;;  %1341 = vmatprep.mubr.bf16.mxu0 %v15735_v0  ;;  %v12627_v49 = vcombine.low %v1585_v38, %v1589_v39 }
 0x145   : > { %7643 = vmatprep.subr.bf16.mxu0 %v12572_v51  ;;  %12529 = vmatmul.mubr.msk.bf16.gmra.mrb[56].mxu1 %vm828_vm0, %v16096_v6  ;;  %v12596_v6 = vcombine.high %v1553_v7, %v1557_v8  ;;  %v12636_v51 = vcombine.high %v1593_v45, %v1597_v46  ;;  %v1617_v7 = vld [vmem:[#allocation7 + $0x400] sm:$0xff] }
 0x146   : > { %8226 = vmatpush1.bf16.msra.mxu1 %v12565_v54  ;;  %1414 = vmatprep.mubr.bf16.mxu1 %v15735_v0  ;;  %v12589_v0 = vcombine.low %v1546_v9, %v1550_v10  ;;  %v12629_v54 = vcombine.low %v1586_v47, %v1590_v48  ;;  %v1621_v8 = vld [vmem:[#allocation7 + $0x420] sm:$0xff]  ;;  %v1610_v9 = vld [vmem:[#allocation7 + $0x3c8] sm:$0xff] }
 0x147   : > { %8227 = vmatprep.subr.bf16.mxu1 %v12574_v60  ;;  %v12638_v60 = vcombine.high %v1594_v56, %v1598_v57  ;;  %v1614_v10 = vld [vmem:[#allocation7 + $0x3e8] sm:$0xff]  ;;  %v1645_v48 = vld [vmem:[#allocation7 + $0x4e0] sm:$0xff] }
 0x148   : > { %7644 = vmatpush1.bf16.msra.mxu0 %v12571_v58  ;;  %v12635_v58 = vcombine.low %v1593_v45, %v1597_v46  ;;  %v12653_v17 = vcombine.low %v1610_v9, %v1614_v10  ;;  %v1641_v45 = vld [vmem:[#allocation7 + $0x4c0] sm:$0xff] }
 0x149   : > { %7645 = vmatprep.subr.bf16.mxu0 %v12580_v59  ;;  %v12644_v59 = vcombine.high %v1601_v53, %v1605_v55 }
 0x14a   : > { %8228 = vmatpush1.bf16.msra.mxu1 %v12573_v3  ;;  %v12637_v3 = vcombine.low %v1594_v56, %v1598_v57 }
 0x14b   : > { %12526 = vmatmul.mubr.msk.bf16.gmra.mrb[60].mxu0 %vm828_vm0, %v16107_v11  ;;  %8229 = vmatprep.subr.bf16.mxu1 %v12582_v5  ;;  %v12646_v5 = vcombine.high %v1602_v63, %v1606_v1 }
 0x14c   : > { %7646 = vmatpush1.bf16.msra.mxu0 %v12579_v2  ;;  %v12643_v2 = vcombine.low %v1601_v53, %v1605_v55 }
 0x14d   : > { %7647 = vmatprep.subr.bf16.mxu0 %v12588_v4  ;;  %12530 = vmatmul.mubr.msk.bf16.gmra.mrb[60].mxu1 %vm828_vm0, %v16107_v11  ;;  %v1581_v11 = vld [vmem:[#allocation7 + $0x2e0] sm:$0xff]  ;;  %v12652_v4 = vcombine.high %v1609_v61, %v1613_v62 }
 0x14e   : > { %8230 = vmatpush1.bf16.msra.mxu1 %v12581_v13  ;;  %v12620_v35 = vcombine.high %v1577_v30, %v1581_v11  ;;  %v12619_v42 = vcombine.low %v1577_v30, %v1581_v11  ;;  %v12645_v13 = vcombine.low %v1602_v63, %v1606_v1  ;;  %v12670_v11 = vcombine.high %v1626_v23, %v1630_v24  ;;  %v1654_v63 = vld [vmem:[#allocation7 + $0x528] sm:$0xff] }
 0x14f   : > { %8231 = vmatprep.subr.bf16.mxu1 %v12590_v14  ;;  %v12654_v14 = vcombine.high %v1610_v9, %v1614_v10 }
 0x150   : > { %7648 = vmatpush1.bf16.msra.mxu0 %v12587_v12  ;;  %v12651_v12 = vcombine.low %v1609_v61, %v1613_v62  ;;  %v1653_v61 = vld [vmem:[#allocation7 + $0x520] sm:$0xff]  ;;  %v1650_v62 = vld [vmem:[#allocation7 + $0x508] sm:$0xff] }
 0x151   : > { %7649 = vmatprep.subr.bf16.mxu0 %v12596_v6  ;;  %v12660_v6 = vcombine.high %v1617_v7, %v1621_v8  ;;  %v12694_v10 = vcombine.high %v1650_v62, %v1654_v63  ;;  %v12693_v23 = vcombine.low %v1650_v62, %v1654_v63 }
 0x152   : > { %8232 = vmatpush1.bf16.msra.mxu1 %v12589_v0 }
 0x153   : > { %8233 = vmatprep.subr.bf16.mxu1 %v12598_v21 }
 0x154   : > { %7650 = vmatpush1.bf16.msra.mxu0 %v12595_v19 }
 0x155   : > { %7651 = vmatprep.subr.bf16.mxu0 %v12604_v20  ;;  %v1625_v20 = vld [vmem:[#allocation7 + $0x440] sm:$0xff] }
 0x156   : > { %8234 = vmatpush1.bf16.msra.mxu1 %v12597_v27  ;;  %v12668_v30 = vcombine.high %v1625_v20, %v1629_v22  ;;  %v12667_v39 = vcombine.low %v1625_v20, %v1629_v22 }
 0x157   : > { %8235 = vmatprep.subr.bf16.mxu1 %v12606_v29  ;;  %v12661_v29 = vcombine.low %v1618_v15, %v1622_v16  ;;  %v1658_v15 = vld [vmem:[#allocation7 + $0x548] sm:$0xff] }
 0x158   : > { %7652 = vmatpush1.bf16.msra.mxu0 %v12603_v26  ;;  %v1662_v16 = vld [vmem:[#allocation7 + $0x568] sm:$0xff] }
 0x159   : > { %7653 = vmatprep.subr.bf16.mxu0 %v12612_v28  ;;  %v12659_v28 = vcombine.low %v1617_v7, %v1621_v8 }
 0x15a   : > { %8236 = vmatpush1.bf16.msra.mxu1 %v12605_v34  ;;  %v1634_v34 = vld [vmem:[#allocation7 + $0x488] sm:$0xff] }
 0x15b   : > { %8237 = vmatprep.subr.bf16.mxu1 %v12614_v36 }
 0x15c   : > { %7654 = vmatpush1.bf16.msra.mxu0 %v12611_v33  ;;  %v1637_v33 = vld [vmem:[#allocation7 + $0x4a0] sm:$0xff] }
 0x15d   : > { %7655 = vmatprep.subr.bf16.mxu0 %v12620_v35  ;;  %v1638_v35 = vld [vmem:[#allocation7 + $0x4a8] sm:$0xff]  ;;  %v12675_v55 = vcombine.low %v1633_v31, %v1637_v33 }
 0x15e   : > { %8238 = vmatpush1.bf16.msra.mxu1 %v12613_v37  ;;  %v12677_v56 = vcombine.low %v1634_v34, %v1638_v35 }
 0x15f   : > { %8239 = vmatprep.subr.bf16.mxu1 %v12622_v44  ;;  %v12678_v44 = vcombine.high %v1634_v34, %v1638_v35  ;;  %v1670_v34 = vld [vmem:[#allocation7 + $0x5a8] sm:$0xff] }
 0x160   : > { %7656 = vmatpush1.bf16.msra.mxu0 %v12619_v42 }
 0x161   : > { %7657 = vmatprep.subr.bf16.mxu0 %v12628_v43  ;;  %v12676_v43 = vcombine.high %v1633_v31, %v1637_v33  ;;  %v1669_v31 = vld [vmem:[#allocation7 + $0x5a0] sm:$0xff]  ;;  %v1666_v33 = vld [vmem:[#allocation7 + $0x588] sm:$0xff] }
 0x162   : > { %8240 = vmatpush1.bf16.msra.mxu1 %v12621_v50  ;;  %v1646_v50 = vld [vmem:[#allocation7 + $0x4e8] sm:$0xff] }
 0x163   : > { %8241 = vmatprep.subr.bf16.mxu1 %v12630_v52 }
 0x164   : > { %7658 = vmatpush1.bf16.msra.mxu0 %v12627_v49  ;;  %v1642_v49 = vld [vmem:[#allocation7 + $0x4c8] sm:$0xff] }
 0x165   : > { %7659 = vmatprep.subr.bf16.mxu0 %v12636_v51 }
 0x166   : > { %8242 = vmatpush1.bf16.msra.mxu1 %v12629_v54  ;;  %v12686_v54 = vcombine.high %v1642_v49, %v1646_v50 }
 0x167   : > { %8243 = vmatprep.subr.bf16.mxu1 %v12638_v60 }
 0x168   : > { %7660 = vmatpush1.bf16.msra.mxu0 %v12635_v58  ;;  %v12684_v58 = vcombine.high %v1641_v45, %v1645_v48 }
 0x169   : > { %7661 = vmatprep.subr.bf16.mxu0 %v12644_v59  ;;  %v1649_v59 = vld [vmem:[#allocation7 + $0x500] sm:$0xff] }
 0x16a   : > { %8244 = vmatpush1.bf16.msra.mxu1 %v12637_v3  ;;  %v12683_v3 = vcombine.low %v1641_v45, %v1645_v48  ;;  %v12692_v9 = vcombine.high %v1649_v59, %v1653_v61  ;;  %v12691_v22 = vcombine.low %v1649_v59, %v1653_v61  ;;  %v1674_v59 = vld [vmem:[#allocation7 + $0x5c8] sm:$0xff] }
 0x16b   : > { %8245 = vmatprep.subr.bf16.mxu1 %v12646_v5  ;;  %v1678_v61 = vld [vmem:[#allocation7 + $0x5e8] sm:$0xff] }
 0x16c   : > { %7662 = vmatpush1.bf16.msra.mxu0 %v12643_v2 }
 0x16d   : > { %7663 = vmatprep.subr.bf16.mxu0 %v12652_v4  ;;  %v12685_v4 = vcombine.low %v1642_v49, %v1646_v50  ;;  %v12710_v50 = vcombine.high %v1666_v33, %v1670_v34 }
 0x16e   : > { %8246 = vmatpush1.bf16.msra.mxu1 %v12645_v13 }
 0x16f   : > { %8247 = vmatprep.subr.bf16.mxu1 %v12654_v14  ;;  %v1661_v14 = vld [vmem:[#allocation7 + $0x560] sm:$0xff] }
 0x170   : > { %7664 = vmatpush1.bf16.msra.mxu0 %v12651_v12  ;;  %v1657_v12 = vld [vmem:[#allocation7 + $0x540] sm:$0xff] }
 0x171   : > { %7706 = vmatprep.subr.bf16.mxu0 %v12660_v6 }
 0x172   : > { %8248 = vmatpush1.bf16.msra.mxu1 %v12653_v17 }
 0x173   : > { %8290 = vmatprep.subr.bf16.mxu1 %v12662_v18 }
 0x1a6   : > { %v16216_v19 = vpop.f32.mrb[0].mxu0  ;;  %v16232_v32 = vpop.f32.mrb[0].mxu1 }
 0x1a7   : > { %19097 = vst [vmem:[#allocation19_spill] sm:$0xff] %v16216_v19  ;;  %v16218_v0 = vpop.f32.mrb[1].mxu0  ;;  %19103 = vst [vmem:[#allocation25_spill] sm:$0xff] %v16232_v32  ;;  %v16236_v36 = vpop.f32.mrb[1].mxu1 }
 0x1a8   : > { %19098 = vst [vmem:[#allocation20_spill] sm:$0xff] %v16218_v0  ;;  %v16220_v21 = vpop.f32.mrb[2].mxu0  ;;  %19104 = vst [vmem:[#allocation26_spill] sm:$0xff] %v16236_v36  ;;  %v16240_v38 = vpop.f32.mrb[2].mxu1 }
 0x1a9   : > { %19099 = vst [vmem:[#allocation21_spill] sm:$0xff] %v16220_v21  ;;  %v16224_v25 = vpack.c.bf16 %v16220_v21, %v16216_v19  ;;  %v16226_v26 = vpop.f32.mrb[3].mxu0  ;;  %19105 = vst [vmem:[#allocation27_spill] sm:$0xff] %v16240_v38  ;;  %v16246_v42 = vpack.c.bf16 %v16240_v38, %v16232_v32  ;;  %v16248_v37 = vpop.f32.mrb[3].mxu1  ;;  %v1765_v38 = vld [vmem:[#allocation7 + $0x8a0] sm:$0xff]  ;;  %v1774_v21 = vld [vmem:[#allocation7 + $0x8e8] sm:$0xff] }
 0x1aa   : > { %19101 = vst [vmem:[#allocation23_spill] sm:$0xff] %v16226_v26  ;;  %v16230_v27 = vpack.c.bf16 %v16226_v26, %v16218_v0  ;;  %19108 = vst [vmem:[#allocation30_spill] sm:$0xff] %v16248_v37  ;;  %v16254_v47 = vpack.c.bf16 %v16248_v37, %v16236_v36  ;;  %v1777_v26 = vld [vmem:[#allocation7 + $0x900] sm:$0xff]  ;;  %v1790_v19 = vld [vmem:[#allocation7 + $0x968] sm:$0xff] }
 0x1ab   : > { %19100 = vst [vmem:[#allocation22_spill] sm:$0xff] %v16224_v25  ;;  %19107 = vst [vmem:[#allocation29_spill] sm:$0xff] %v16246_v42  ;;  %v1781_v32 = vld [vmem:[#allocation7 + $0x920] sm:$0xff] }
 0x1ac   : > { %19102 = vst [vmem:[#allocation24_spill] sm:$0xff] %v16230_v27  ;;  %7665 = vmatprep.mubr.bf16.mxu0 %v16230_v27  ;;  %8249 = vmatprep.mubr.bf16.mxu1 %v16230_v27  ;;  %19110 = vst [vmem:[#allocation32_spill] sm:$0xff] %v16254_v47  ;;  %v1793_v0 = vld [vmem:[#allocation7 + $0x980] sm:$0xff] }
 0x1ad   : > { %7666 = vmatmul.mubr.bf16.vlgmr.msra.gmra.mrb[64].mxu0 %v16224_v25  ;;  %8250 = vmatmul.mubr.bf16.vlgmr.msra.gmra.mrb[64].mxu1 %v16224_v25  ;;  %v1857_v25 = vld [vmem:[#allocation7 + $0xb80] sm:$0xff] }
 0x1ae   : > { %7707 = vmatpush1.bf16.msra.mxu0 %v12659_v28  ;;  %8291 = vmatpush1.bf16.msra.mxu1 %v12661_v29  ;;  %v16242_v41 = vpop.f32.mrb[4].mxu0  ;;  %v16268_v60 = vpop.f32.mrb[4].mxu1  ;;  %v12700_v28 = vcombine.high %v1657_v12, %v1661_v14  ;;  %v12702_v29 = vcombine.high %v1658_v15, %v1662_v16  ;;  %v1861_v27 = vld [vmem:[#allocation7 + $0xba0] sm:$0xff] }
 0x1af   : > { %19106 = vst [vmem:[#allocation28_spill] sm:$0xff] %v16242_v41  ;;  %7708 = vmatprep.subr.bf16.mxu0 %v12668_v30  ;;  %8292 = vmatprep.subr.bf16.mxu1 %v12670_v11  ;;  %v16250_v46 = vpop.f32.mrb[5].mxu0  ;;  %19115 = vst [vmem:[#allocation37_spill] sm:$0xff] %v16268_v60  ;;  %v16272_v1 = vpop.f32.mrb[5].mxu1  ;;  %v1665_v30 = vld [vmem:[#allocation7 + $0x580] sm:$0xff] }
 0x1b0   : > { %19109 = vst [vmem:[#allocation31_spill] sm:$0xff] %v16250_v46  ;;  %v16256_v51 = vpop.f32.mrb[6].mxu0  ;;  %19116 = vst [vmem:[#allocation38_spill] sm:$0xff] %v16272_v1  ;;  %v16276_v2 = vpop.f32.mrb[6].mxu1  ;;  %v12708_v49 = vcombine.high %v1665_v30, %v1669_v31 }
 0x1b1   : > { %19111 = vst [vmem:[#allocation33_spill] sm:$0xff] %v16256_v51  ;;  %v16260_v52 = vpack.c.bf16 %v16256_v51, %v16242_v41  ;;  %v16262_v53 = vpop.f32.mrb[7].mxu0  ;;  %19117 = vst [vmem:[#allocation39_spill] sm:$0xff] %v16276_v2  ;;  %v16282_v7 = vpack.c.bf16 %v16276_v2, %v16268_v60  ;;  %v16284_v8 = vpop.f32.mrb[7].mxu1  ;;  %v1733_v2 = vld [vmem:[#allocation7 + $0x7a0] sm:$0xff] }
 0x1b2   : > { %19113 = vst [vmem:[#allocation35_spill] sm:$0xff] %v16262_v53  ;;  %7709 = vmatpush1.bf16.msra.mxu0 %v12667_v39  ;;  %8293 = vmatpush1.bf16.msra.mxu1 %v12669_v40  ;;  %v16266_v57 = vpack.c.bf16 %v16262_v53, %v16250_v46  ;;  %19120 = vst [vmem:[#allocation42_spill] sm:$0xff] %v16284_v8  ;;  %v16290_v6 = vpack.c.bf16 %v16284_v8, %v16272_v1  ;;  %v1745_v8 = vld [vmem:[#allocation7 + $0x800] sm:$0xff] }
 0x1b3   : > { %19112 = vst [vmem:[#allocation34_spill] sm:$0xff] %v16260_v52  ;;  %7710 = vmatprep.subr.bf16.mxu0 %v12676_v43  ;;  %8294 = vmatprep.subr.bf16.mxu1 %v12678_v44  ;;  %19119 = vst [vmem:[#allocation41_spill] sm:$0xff] %v16282_v7  ;;  %v12699_v40 = vcombine.low %v1657_v12, %v1661_v14  ;;  %v12701_v43 = vcombine.low %v1658_v15, %v1662_v16  ;;  %v1681_v15 = vld [vmem:[#allocation7 + $0x600] sm:$0xff] }
 0x1b4   : > { %19114 = vst [vmem:[#allocation36_spill] sm:$0xff] %v16266_v57  ;;  %7675 = vmatprep.mubr.bf16.mxu0 %v16266_v57  ;;  %8259 = vmatprep.mubr.bf16.mxu1 %v16266_v57  ;;  %19122 = vst [vmem:[#allocation44_spill] sm:$0xff] %v16290_v6  ;;  %v12718_v14 = vcombine.high %v1674_v59, %v1678_v61  ;;  %v1749_v60 = vld [vmem:[#allocation7 + $0x820] sm:$0xff] }
 0x1b5   : > { %7676 = vmatmul.mubr.bf16.gmra.mrb[68].mxu0 %v16260_v52  ;;  %8260 = vmatmul.mubr.bf16.gmra.mrb[68].mxu1 %v16260_v52  ;;  %v1761_v46 = vld [vmem:[#allocation7 + $0x880] sm:$0xff]  ;;  %v1846_v52 = vld [vmem:[#allocation7 + $0xb28] sm:$0xff] }
 0x1b6   : > { %7711 = vmatpush1.bf16.msra.mxu0 %v12675_v55  ;;  %8295 = vmatpush1.bf16.msra.mxu1 %v12677_v56  ;;  %v16278_v5 = vpop.f32.mrb[8].mxu0  ;;  %v1673_v55 = vld [vmem:[#allocation7 + $0x5c0] sm:$0xff] }
 0x1b7   : > { %19118 = vst [vmem:[#allocation40_spill] sm:$0xff] %v16278_v5  ;;  %7712 = vmatprep.subr.bf16.mxu0 %v12684_v58  ;;  %8296 = vmatprep.subr.bf16.mxu1 %v12686_v54  ;;  %v16286_v13 = vpop.f32.mrb[9].mxu0  ;;  %v16304_v11 = vpop.f32.mrb[8].mxu1  ;;  %v1677_v54 = vld [vmem:[#allocation7 + $0x5e0] sm:$0xff] }
 0x1b8   : > { %19121 = vst [vmem:[#allocation43_spill] sm:$0xff] %v16286_v13  ;;  %v16292_v17 = vpop.f32.mrb[10].mxu0  ;;  %19127 = vst [vmem:[#allocation49_spill] sm:$0xff] %v16304_v11  ;;  %v16308_v35 = vpop.f32.mrb[9].mxu1  ;;  %v12716_v12 = vcombine.high %v1673_v55, %v1677_v54 }
 0x1b9   : > { %19123 = vst [vmem:[#allocation45_spill] sm:$0xff] %v16292_v17  ;;  %v16296_v18 = vpack.c.bf16 %v16292_v17, %v16278_v5  ;;  %v16298_v20 = vpop.f32.mrb[11].mxu0  ;;  %19128 = vst [vmem:[#allocation50_spill] sm:$0xff] %v16308_v35  ;;  %v16312_v39 = vpop.f32.mrb[10].mxu1 }
 0x1ba   : > { %19125 = vst [vmem:[#allocation47_spill] sm:$0xff] %v16298_v20  ;;  %7713 = vmatpush1.bf16.msra.mxu0 %v12683_v3  ;;  %8297 = vmatpush1.bf16.msra.mxu1 %v12685_v4  ;;  %v16302_v24 = vpack.c.bf16 %v16298_v20, %v16286_v13  ;;  %19129 = vst [vmem:[#allocation51_spill] sm:$0xff] %v16312_v39  ;;  %v16318_v45 = vpack.c.bf16 %v16312_v39, %v16304_v11  ;;  %v16320_v48 = vpop.f32.mrb[11].mxu1  ;;  %v1701_v39 = vld [vmem:[#allocation7 + $0x6a0] sm:$0xff] }
 0x1bb   : > { %19124 = vst [vmem:[#allocation46_spill] sm:$0xff] %v16296_v18  ;;  %7714 = vmatprep.subr.bf16.mxu0 %v12692_v9  ;;  %8298 = vmatprep.subr.bf16.mxu1 %v12694_v10  ;;  %19132 = vst [vmem:[#allocation54_spill] sm:$0xff] %v16320_v48  ;;  %v16326_v58 = vpack.c.bf16 %v16320_v48, %v16308_v35  ;;  %v12707_v4 = vcombine.low %v1665_v30, %v1669_v31  ;;  %v1713_v48 = vld [vmem:[#allocation7 + $0x700] sm:$0xff] }
 0x1bc   : > { %19126 = vst [vmem:[#allocation48_spill] sm:$0xff] %v16302_v24  ;;  %7685 = vmatprep.mubr.bf16.mxu0 %v16302_v24  ;;  %8269 = vmatprep.mubr.bf16.mxu1 %v16302_v24  ;;  %19131 = vst [vmem:[#allocation53_spill] sm:$0xff] %v16318_v45  ;;  %v12709_v9 = vcombine.low %v1666_v33, %v1670_v34  ;;  %v12715_v31 = vcombine.low %v1673_v55, %v1677_v54  ;;  %v1693_v55 = vld [vmem:[#allocation7 + $0x660] sm:$0xff]  ;;  %v1690_v54 = vld [vmem:[#allocation7 + $0x648] sm:$0xff] }
 0x1bd   : > { %7686 = vmatmul.mubr.bf16.gmra.mrb[72].mxu0 %v16296_v18  ;;  %8270 = vmatmul.mubr.bf16.gmra.mrb[72].mxu1 %v16296_v18  ;;  %19134 = vst [vmem:[#allocation56_spill] sm:$0xff] %v16326_v58  ;;  %v12717_v33 = vcombine.low %v1674_v59, %v1678_v61  ;;  %v1694_v59 = vld [vmem:[#allocation7 + $0x668] sm:$0xff]  ;;  %v1717_v11 = vld [vmem:[#allocation7 + $0x720] sm:$0xff] }
 0x1be   : > { %7715 = vmatpush1.bf16.msra.mxu0 %v12691_v22  ;;  %8299 = vmatpush1.bf16.msra.mxu1 %v12693_v23  ;;  %v16314_v44 = vpop.f32.mrb[12].mxu0  ;;  %v1685_v22 = vld [vmem:[#allocation7 + $0x620] sm:$0xff]  ;;  %v1682_v23 = vld [vmem:[#allocation7 + $0x608] sm:$0xff] }
 0x1bf   : > { %19130 = vst [vmem:[#allocation52_spill] sm:$0xff] %v16314_v44  ;;  %7716 = vmatprep.subr.bf16.mxu0 %v12700_v28  ;;  %8300 = vmatprep.subr.bf16.mxu1 %v12702_v29  ;;  %v16322_v56 = vpop.f32.mrb[13].mxu0  ;;  %v16340_v16 = vpop.f32.mrb[12].mxu1  ;;  %v1686_v28 = vld [vmem:[#allocation7 + $0x628] sm:$0xff]  ;;  %v1729_v35 = vld [vmem:[#allocation7 + $0x780] sm:$0xff] }
 0x1c0   : > { %19133 = vst [vmem:[#allocation55_spill] sm:$0xff] %v16322_v56  ;;  %v16328_v62 = vpop.f32.mrb[14].mxu0  ;;  %19139 = vst [vmem:[#allocation61_spill] sm:$0xff] %v16340_v16  ;;  %v16344_v29 = vpop.f32.mrb[13].mxu1  ;;  %v1841_v18 = vld [vmem:[#allocation7 + $0xb00] sm:$0xff] }
 0x1c1   : > { %19135 = vst [vmem:[#allocation57_spill] sm:$0xff] %v16328_v62  ;;  %v16332_v63 = vpack.c.bf16 %v16328_v62, %v16314_v44  ;;  %v16334_v3 = vpop.f32.mrb[15].mxu0  ;;  %19140 = vst [vmem:[#allocation62_spill] sm:$0xff] %v16344_v29  ;;  %v16348_v30 = vpop.f32.mrb[14].mxu1  ;;  %v1689_v62 = vld [vmem:[#allocation7 + $0x640] sm:$0xff]  ;;  %v12734_v44 = vcombine.high %v1690_v54, %v1694_v59 }
 0x1c2   : > { %19137 = vst [vmem:[#allocation59_spill] sm:$0xff] %v16334_v3  ;;  %7717 = vmatpush1.bf16.msra.mxu0 %v12699_v40  ;;  %8301 = vmatpush1.bf16.msra.mxu1 %v12701_v43  ;;  %v16338_v10 = vpack.c.bf16 %v16334_v3, %v16322_v56  ;;  %19141 = vst [vmem:[#allocation63_spill] sm:$0xff] %v16348_v30  ;;  %v16352_v34 = vpack.c.bf16 %v16348_v30, %v16340_v16  ;;  %v16354_v40 = vpop.f32.mrb[15].mxu1  ;;  %v1845_v24 = vld [vmem:[#allocation7 + $0xb20] sm:$0xff] }
 0x1c3   : > { %19136 = vst [vmem:[#allocation58_spill] sm:$0xff] %v16332_v63  ;;  %7718 = vmatprep.subr.bf16.mxu0 %v12708_v49  ;;  %8302 = vmatprep.subr.bf16.mxu1 %v12710_v50  ;;  %19143 = vst [vmem:[#allocation65_spill] sm:$0xff] %v16354_v40  ;;  %v12724_v49 = vcombine.high %v1681_v15, %v1685_v22  ;;  %v12726_v50 = vcombine.high %v1682_v23, %v1686_v28 }
 0x1c4   : > { %19138 = vst [vmem:[#allocation60_spill] sm:$0xff] %v16338_v10  ;;  %7695 = vmatprep.mubr.bf16.mxu0 %v16338_v10  ;;  %8279 = vmatprep.mubr.bf16.mxu1 %v16338_v10  ;;  %19142 = vst [vmem:[#allocation64_spill] sm:$0xff] %v16352_v34  ;;  %v16360_v3 = vpack.c.bf16 %v16354_v40, %v16344_v29  ;;  %v12725_v30 = vcombine.low %v1682_v23, %v1686_v28  ;;  %v1697_v29 = vld [vmem:[#allocation7 + $0x680] sm:$0xff] }
 0x1c5   : > { %7696 = vmatmul.mubr.bf16.gmra.mrb[76].mxu0 %v16332_v63  ;;  %8280 = vmatmul.mubr.bf16.gmra.mrb[76].mxu1 %v16332_v63  ;;  %v12732_v16 = vcombine.high %v1689_v62, %v1693_v55  ;;  %v1830_v63 = vld [vmem:[#allocation7 + $0xaa8] sm:$0xff] }
 0x1c6   : > { %7719 = vmatpush1.bf16.msra.mxu0 %v12707_v4  ;;  %8303 = vmatpush1.bf16.msra.mxu1 %v12709_v9  ;;  %v16356_v43 = vpop.f32.mrb[16].mxu0  ;;  %19145 = vst [vmem:[#allocation67_spill] sm:$0xff] %v16360_v3 }
 0x1c7   : > { %19144 = vst [vmem:[#allocation66_spill] sm:$0xff] %v16356_v43  ;;  %7720 = vmatprep.subr.bf16.mxu0 %v12716_v12  ;;  %8304 = vmatprep.subr.bf16.mxu1 %v12718_v14  ;;  %v16362_v4 = vpop.f32.mrb[17].mxu0  ;;  %v12723_v14 = vcombine.low %v1681_v15, %v1685_v22  ;;  %v12731_v15 = vcombine.low %v1689_v62, %v1693_v55  ;;  %v1709_v62 = vld [vmem:[#allocation7 + $0x6e0] sm:$0xff]  ;;  %v1706_v55 = vld [vmem:[#allocation7 + $0x6c8] sm:$0xff] }
 0x1c8   : > { %19146 = vst [vmem:[#allocation68_spill] sm:$0xff] %v16362_v4  ;;  %7738 = vmatprep.mubr.bf16.mxu0 %v16254_v47  ;;  %8322 = vmatprep.mubr.bf16.mxu1 %v16254_v47  ;;  %v16366_v61 = vpop.f32.mrb[18].mxu0  ;;  %v16378_v56 = vpop.f32.mrb[16].mxu1  ;;  %v12733_v22 = vcombine.low %v1690_v54, %v1694_v59  ;;  %v1710_v54 = vld [vmem:[#allocation7 + $0x6e8] sm:$0xff]  ;;  %v1829_v47 = vld [vmem:[#allocation7 + $0xaa0] sm:$0xff] }
 0x1c9   : > { %19147 = vst [vmem:[#allocation69_spill] sm:$0xff] %v16366_v61  ;;  %v16370_v9 = vpack.c.bf16 %v16366_v61, %v16356_v43  ;;  %v16372_v12 = vpop.f32.mrb[19].mxu0  ;;  %19151 = vst [vmem:[#allocation73_spill] sm:$0xff] %v16378_v56  ;;  %v1698_v61 = vld [vmem:[#allocation7 + $0x688] sm:$0xff]  ;;  %v16380_v17 = vpop.f32.mrb[17].mxu1 }
 0x1ca   : > { %19149 = vst [vmem:[#allocation71_spill] sm:$0xff] %v16372_v12  ;;  %7721 = vmatpush1.bf16.msra.mxu0 %v12715_v31  ;;  %8305 = vmatpush1.bf16.msra.mxu1 %v12717_v33  ;;  %v16376_v40 = vpack.c.bf16 %v16372_v12, %v16362_v4  ;;  %v1702_v43 = vld [vmem:[#allocation7 + $0x6a8] sm:$0xff]  ;;  %19152 = vst [vmem:[#allocation74_spill] sm:$0xff] %v16380_v17  ;;  %v16382_v31 = vpop.f32.mrb[18].mxu1  ;;  %v1705_v12 = vld [vmem:[#allocation7 + $0x6c0] sm:$0xff] }
 0x1cb   : > { %19148 = vst [vmem:[#allocation70_spill] sm:$0xff] %v16370_v9  ;;  %7722 = vmatprep.subr.bf16.mxu0 %v12724_v49  ;;  %8306 = vmatprep.subr.bf16.mxu1 %v12726_v50  ;;  %19153 = vst [vmem:[#allocation75_spill] sm:$0xff] %v16382_v31  ;;  %v16386_v23 = vpack.c.bf16 %v16382_v31, %v16378_v56  ;;  %v16388_v28 = vpop.f32.mrb[19].mxu1  ;;  %v12740_v49 = vcombine.high %v1697_v29, %v1701_v39 }
 0x1cc   : > { %19150 = vst [vmem:[#allocation72_spill] sm:$0xff] %v16376_v40  ;;  %19154 = vst [vmem:[#allocation76_spill] sm:$0xff] %v16388_v28  ;;  %v12742_v50 = vcombine.high %v1698_v61, %v1702_v43  ;;  %v16394_v4 = vpack.c.bf16 %v16388_v28, %v16380_v17  ;;  %v12741_v31 = vcombine.low %v1698_v61, %v1702_v43 }
 0x1cd   : > { %v12748_v56 = vcombine.high %v1705_v12, %v1709_v62  ;;  %v12750_v17 = vcombine.high %v1706_v55, %v1710_v54 }
 0x1ce   : > { %7723 = vmatpush1.bf16.msra.mxu0 %v12723_v14  ;;  %8307 = vmatpush1.bf16.msra.mxu1 %v12725_v30  ;;  %v16390_v33 = vpop.f32.mrb[20].mxu0  ;;  %19156 = vst [vmem:[#allocation78_spill] sm:$0xff] %v16394_v4 }
 0x1cf   : > { %19155 = vst [vmem:[#allocation77_spill] sm:$0xff] %v16390_v33  ;;  %7724 = vmatprep.subr.bf16.mxu0 %v12732_v16  ;;  %8308 = vmatprep.subr.bf16.mxu1 %v12734_v44  ;;  %v16396_v30 = vpop.f32.mrb[21].mxu0  ;;  %v12739_v44 = vcombine.low %v1697_v29, %v1701_v39  ;;  %v12747_v39 = vcombine.low %v1705_v12, %v1709_v62  ;;  %v1725_v12 = vld [vmem:[#allocation7 + $0x760] sm:$0xff]  ;;  %v1722_v62 = vld [vmem:[#allocation7 + $0x748] sm:$0xff] }
 0x1d0   : > { %19157 = vst [vmem:[#allocation79_spill] sm:$0xff] %v16396_v30  ;;  %v16398_v59 = vpop.f32.mrb[22].mxu0  ;;  %v16410_v20 = vpop.f32.mrb[20].mxu1  ;;  %v12749_v29 = vcombine.low %v1706_v55, %v1710_v54  ;;  %v1726_v55 = vld [vmem:[#allocation7 + $0x768] sm:$0xff] }
 0x1d1   : > { %19158 = vst [vmem:[#allocation80_spill] sm:$0xff] %v16398_v59  ;;  %v16402_v14 = vpack.c.bf16 %v16398_v59, %v16390_v33  ;;  %v16404_v16 = vpop.f32.mrb[23].mxu0  ;;  %19160 = vst [vmem:[#allocation82_spill] sm:$0xff] %v16410_v20  ;;  %v1714_v59 = vld [vmem:[#allocation7 + $0x708] sm:$0xff]  ;;  %v16412_v5 = vpop.f32.mrb[21].mxu1 }
 0x1d2   : > { %19159 = vst [vmem:[#allocation81_spill] sm:$0xff] %v16404_v16  ;;  %7725 = vmatpush1.bf16.msra.mxu0 %v12731_v15  ;;  %8309 = vmatpush1.bf16.msra.mxu1 %v12733_v22  ;;  %v16408_v28 = vpack.c.bf16 %v16404_v16, %v16396_v30  ;;  %v1718_v33 = vld [vmem:[#allocation7 + $0x728] sm:$0xff]  ;;  %19161 = vst [vmem:[#allocation83_spill] sm:$0xff] %v16412_v5  ;;  %v16414_v15 = vpop.f32.mrb[22].mxu1  ;;  %v1721_v16 = vld [vmem:[#allocation7 + $0x740] sm:$0xff] }
 0x1d3   : > { %7726 = vmatprep.subr.bf16.mxu0 %v12740_v49  ;;  %8310 = vmatprep.subr.bf16.mxu1 %v12742_v50  ;;  %19162 = vst [vmem:[#allocation84_spill] sm:$0xff] %v16414_v15  ;;  %v16418_v43 = vpack.c.bf16 %v16414_v15, %v16410_v20  ;;  %v16420_v61 = vpop.f32.mrb[23].mxu1  ;;  %v12756_v49 = vcombine.high %v1713_v48, %v1717_v11 }
 0x1d4   : > { %19163 = vst [vmem:[#allocation85_spill] sm:$0xff] %v16420_v61  ;;  %v12758_v50 = vcombine.high %v1714_v59, %v1718_v33  ;;  %v16426_v30 = vpack.c.bf16 %v16420_v61, %v16412_v5  ;;  %v12757_v15 = vcombine.low %v1714_v59, %v1718_v33  ;;  %v12764_v20 = vcombine.high %v1721_v16, %v1725_v12 }
 0x1d5   : > { %v12766_v5 = vcombine.high %v1722_v62, %v1726_v55 }
 0x1d6   : > { %7727 = vmatpush1.bf16.msra.mxu0 %v12739_v44  ;;  %8311 = vmatpush1.bf16.msra.mxu1 %v12741_v31  ;;  %v16422_v22 = vpop.f32.mrb[24].mxu0 }
 0x1d7   : > { %19164 = vst [vmem:[#allocation86_spill] sm:$0xff] %v16422_v22  ;;  %7728 = vmatprep.subr.bf16.mxu0 %v12748_v56  ;;  %8312 = vmatprep.subr.bf16.mxu1 %v12750_v17  ;;  %v16428_v31 = vpop.f32.mrb[25].mxu0  ;;  %v12755_v17 = vcombine.low %v1713_v48, %v1717_v11  ;;  %v12763_v11 = vcombine.low %v1721_v16, %v1725_v12  ;;  %v1741_v16 = vld [vmem:[#allocation7 + $0x7e0] sm:$0xff]  ;;  %v1738_v12 = vld [vmem:[#allocation7 + $0x7c8] sm:$0xff] }
 0x1d8   : > { %19165 = vst [vmem:[#allocation87_spill] sm:$0xff] %v16428_v31  ;;  %v16430_v54 = vpop.f32.mrb[26].mxu0  ;;  %v16442_v13 = vpop.f32.mrb[24].mxu1  ;;  %v12765_v48 = vcombine.low %v1722_v62, %v1726_v55  ;;  %v1742_v62 = vld [vmem:[#allocation7 + $0x7e8] sm:$0xff] }
 0x1d9   : > { %19166 = vst [vmem:[#allocation88_spill] sm:$0xff] %v16430_v54  ;;  %v16434_v44 = vpack.c.bf16 %v16430_v54, %v16422_v22  ;;  %v16436_v56 = vpop.f32.mrb[27].mxu0  ;;  %19168 = vst [vmem:[#allocation90_spill] sm:$0xff] %v16442_v13  ;;  %v1730_v54 = vld [vmem:[#allocation7 + $0x788] sm:$0xff]  ;;  %v16444_v51 = vpop.f32.mrb[25].mxu1 }
 0x1da   : > { %19167 = vst [vmem:[#allocation89_spill] sm:$0xff] %v16436_v56  ;;  %7729 = vmatpush1.bf16.msra.mxu0 %v12747_v39  ;;  %8313 = vmatpush1.bf16.msra.mxu1 %v12749_v29  ;;  %v16440_v61 = vpack.c.bf16 %v16436_v56, %v16428_v31  ;;  %v1734_v22 = vld [vmem:[#allocation7 + $0x7a8] sm:$0xff]  ;;  %19169 = vst [vmem:[#allocation91_spill] sm:$0xff] %v16444_v51  ;;  %v16446_v39 = vpop.f32.mrb[26].mxu1  ;;  %v1737_v56 = vld [vmem:[#allocation7 + $0x7c0] sm:$0xff] }
 0x1db   : > { %7730 = vmatprep.subr.bf16.mxu0 %v12756_v49  ;;  %8314 = vmatprep.subr.bf16.mxu1 %v12758_v50  ;;  %19170 = vst [vmem:[#allocation92_spill] sm:$0xff] %v16446_v39  ;;  %v16450_v33 = vpack.c.bf16 %v16446_v39, %v16442_v13  ;;  %v16452_v59 = vpop.f32.mrb[27].mxu1  ;;  %v12772_v49 = vcombine.high %v1729_v35, %v1733_v2 }
 0x1dc   : > { %19171 = vst [vmem:[#allocation93_spill] sm:$0xff] %v16452_v59  ;;  %v12774_v50 = vcombine.high %v1730_v54, %v1734_v22  ;;  %v16458_v31 = vpack.c.bf16 %v16452_v59, %v16444_v51  ;;  %v12773_v39 = vcombine.low %v1730_v54, %v1734_v22  ;;  %v12780_v13 = vcombine.high %v1737_v56, %v1741_v16 }
 0x1dd   : > { %v12782_v51 = vcombine.high %v1738_v12, %v1742_v62 }
 0x1de   : > { %7731 = vmatpush1.bf16.msra.mxu0 %v12755_v17  ;;  %8315 = vmatpush1.bf16.msra.mxu1 %v12757_v15  ;;  %v16454_v29 = vpop.f32.mrb[28].mxu0 }
 0x1df   : > { %19172 = vst [vmem:[#allocation94_spill] sm:$0xff] %v16454_v29  ;;  %7732 = vmatprep.subr.bf16.mxu0 %v12764_v20  ;;  %8316 = vmatprep.subr.bf16.mxu1 %v12766_v5  ;;  %v16460_v15 = vpop.f32.mrb[29].mxu0  ;;  %v12771_v5 = vcombine.low %v1729_v35, %v1733_v2  ;;  %v12779_v2 = vcombine.low %v1737_v56, %v1741_v16  ;;  %v1753_v56 = vld [vmem:[#allocation7 + $0x840] sm:$0xff] }
 0x1e0   : > { %19173 = vst [vmem:[#allocation95_spill] sm:$0xff] %v16460_v15  ;;  %v16462_v55 = vpop.f32.mrb[30].mxu0  ;;  %v16474_v53 = vpop.f32.mrb[28].mxu1  ;;  %v12781_v35 = vcombine.low %v1738_v12, %v1742_v62  ;;  %v1757_v16 = vld [vmem:[#allocation7 + $0x860] sm:$0xff]  ;;  %v1754_v12 = vld [vmem:[#allocation7 + $0x848] sm:$0xff] }
 0x1e1   : > { %19174 = vst [vmem:[#allocation96_spill] sm:$0xff] %v16462_v55  ;;  %v16466_v17 = vpack.c.bf16 %v16462_v55, %v16454_v29  ;;  %v16468_v20 = vpop.f32.mrb[31].mxu0  ;;  %19176 = vst [vmem:[#allocation98_spill] sm:$0xff] %v16474_v53  ;;  %v1746_v55 = vld [vmem:[#allocation7 + $0x808] sm:$0xff]  ;;  %v16476_v41 = vpop.f32.mrb[29].mxu1 }
 0x1e2   : > { %19175 = vst [vmem:[#allocation97_spill] sm:$0xff] %v16468_v20  ;;  %7733 = vmatpush1.bf16.msra.mxu0 %v12763_v11  ;;  %8317 = vmatpush1.bf16.msra.mxu1 %v12765_v48  ;;  %v16472_v59 = vpack.c.bf16 %v16468_v20, %v16460_v15  ;;  %v1750_v29 = vld [vmem:[#allocation7 + $0x828] sm:$0xff]  ;;  %19177 = vst [vmem:[#allocation99_spill] sm:$0xff] %v16476_v41  ;;  %v16478_v11 = vpop.f32.mrb[30].mxu1  ;;  %v12796_v15 = vcombine.high %v1753_v56, %v1757_v16 }
 0x1e3   : > { %7734 = vmatprep.subr.bf16.mxu0 %v12772_v49  ;;  %8318 = vmatprep.subr.bf16.mxu1 %v12774_v50  ;;  %19178 = vst [vmem:[#allocation100_spill] sm:$0xff] %v16478_v11  ;;  %v16482_v22 = vpack.c.bf16 %v16478_v11, %v16474_v53  ;;  %v16484_v54 = vpop.f32.mrb[31].mxu1  ;;  %v12788_v49 = vcombine.high %v1745_v8, %v1749_v60  ;;  %v1758_v62 = vld [vmem:[#allocation7 + $0x868] sm:$0xff] }
 0x1e4   : > { %19179 = vst [vmem:[#allocation101_spill] sm:$0xff] %v16484_v54  ;;  %v12790_v50 = vcombine.high %v1746_v55, %v1750_v29  ;;  %v16490_v20 = vpack.c.bf16 %v16484_v54, %v16476_v41  ;;  %v12789_v53 = vcombine.low %v1746_v55, %v1750_v29  ;;  %v12798_v1 = vcombine.high %v1754_v12, %v1758_v62 }
 0x1e5   : > { %v12795_v29 = vcombine.low %v1753_v56, %v1757_v16  ;;  %v1769_v16 = vld [vmem:[#allocation7 + $0x8c0] sm:$0xff] }
 0x1e6   : > { %7735 = vmatpush1.bf16.msra.mxu0 %v12771_v5  ;;  %8319 = vmatpush1.bf16.msra.mxu1 %v12773_v39  ;;  %v16486_v48 = vpop.f32.mrb[32].mxu0 }
 0x1e7   : > { %19180 = vst [vmem:[#allocation102_spill] sm:$0xff] %v16486_v48  ;;  %7736 = vmatprep.subr.bf16.mxu0 %v12780_v13  ;;  %8320 = vmatprep.subr.bf16.mxu1 %v12782_v51  ;;  %v16492_v5 = vpop.f32.mrb[33].mxu0  ;;  %v12787_v51 = vcombine.low %v1745_v8, %v1749_v60  ;;  %v1762_v60 = vld [vmem:[#allocation7 + $0x888] sm:$0xff] }
 0x1e8   : > { %19181 = vst [vmem:[#allocation103_spill] sm:$0xff] %v16492_v5  ;;  %v16494_v39 = vpop.f32.mrb[34].mxu0  ;;  %v16506_v41 = vpop.f32.mrb[32].mxu1  ;;  %v1766_v8 = vld [vmem:[#allocation7 + $0x8a8] sm:$0xff] }
 0x1e9   : > { %19182 = vst [vmem:[#allocation104_spill] sm:$0xff] %v16494_v39  ;;  %v16498_v11 = vpack.c.bf16 %v16494_v39, %v16486_v48  ;;  %v16500_v13 = vpop.f32.mrb[35].mxu0  ;;  %19184 = vst [vmem:[#allocation106_spill] sm:$0xff] %v16506_v41  ;;  %v16508_v39 = vpop.f32.mrb[33].mxu1  ;;  %v12806_v56 = vcombine.high %v1762_v60, %v1766_v8 }
 0x1ea   : > { %19183 = vst [vmem:[#allocation105_spill] sm:$0xff] %v16500_v13  ;;  %7737 = vmatpush1.bf16.msra.mxu0 %v12779_v2  ;;  %8321 = vmatpush1.bf16.msra.mxu1 %v12781_v35  ;;  %v16504_v54 = vpack.c.bf16 %v16500_v13, %v16492_v5  ;;  %19185 = vst [vmem:[#allocation107_spill] sm:$0xff] %v16508_v39  ;;  %v16512_v2 = vpop.f32.mrb[34].mxu1  ;;  %v12804_v13 = vcombine.high %v1761_v46, %v1765_v38 }
 0x1eb   : > { %7779 = vmatprep.subr.bf16.mxu0 %v12788_v49  ;;  %8363 = vmatprep.subr.bf16.mxu1 %v12790_v50  ;;  %19186 = vst [vmem:[#allocation108_spill] sm:$0xff] %v16512_v2  ;;  %v16517_v55 = vpack.c.bf16 %v16512_v2, %v16506_v41  ;;  %v16519_v35 = vpop.f32.mrb[35].mxu1  ;;  %v12797_v50 = vcombine.low %v1754_v12, %v1758_v62  ;;  %v1773_v2 = vld [vmem:[#allocation7 + $0x8e0] sm:$0xff]  ;;  %v1770_v41 = vld [vmem:[#allocation7 + $0x8c8] sm:$0xff] }
 0x1ec   : > { %19187 = vst [vmem:[#allocation109_spill] sm:$0xff] %v16519_v35  ;;  %v16526_v48 = vpack.c.bf16 %v16519_v35, %v16508_v39  ;;  %v12803_v62 = vcombine.low %v1761_v46, %v1765_v38  ;;  %v12812_v39 = vcombine.high %v1769_v16, %v1773_v2  ;;  %v12814_v37 = vcombine.high %v1770_v41, %v1774_v21  ;;  %v1778_v38 = vld [vmem:[#allocation7 + $0x908] sm:$0xff] }
 0x1ed   : > { %7739 = vmatmul.mubr.bf16.vlgmr.msra.gmra.mrb[64].mxu0 %v16246_v42  ;;  %8323 = vmatmul.mubr.bf16.vlgmr.msra.gmra.mrb[64].mxu1 %v16246_v42  ;;  %v1782_v46 = vld [vmem:[#allocation7 + $0x928] sm:$0xff]  ;;  %v1825_v42 = vld [vmem:[#allocation7 + $0xa80] sm:$0xff] }
 0x1ee   : > { %7748 = vmatprep.mubr.bf16.mxu0 %v16290_v6  ;;  %7780 = vmatpush1.bf16.msra.mxu0 %v12787_v51  ;;  %v16521_v49 = vpop.f32.mrb[36].mxu0 }
 0x1ef   : > { %19188 = vst [vmem:[#allocation110_spill] sm:$0xff] %v16521_v49  ;;  %8332 = vmatprep.mubr.bf16.mxu1 %v16290_v6  ;;  %8364 = vmatpush1.bf16.msra.mxu1 %v12789_v53  ;;  %v16528_v5 = vpop.f32.mrb[37].mxu0  ;;  %v1813_v6 = vld [vmem:[#allocation7 + $0xa20] sm:$0xff] }
 0x1f0   : > { %19189 = vst [vmem:[#allocation111_spill] sm:$0xff] %v16528_v5  ;;  %7781 = vmatprep.subr.bf16.mxu0 %v12796_v15  ;;  %8365 = vmatprep.subr.bf16.mxu1 %v12798_v1  ;;  %v16530_v51 = vpop.f32.mrb[38].mxu0  ;;  %v12805_v1 = vcombine.low %v1762_v60, %v1766_v8  ;;  %v16542_v15 = vpop.f32.mrb[36].mxu1 }
 0x1f1   : > { %19190 = vst [vmem:[#allocation112_spill] sm:$0xff] %v16530_v51  ;;  %v16534_v53 = vpack.c.bf16 %v16530_v51, %v16521_v49  ;;  %v16536_v12 = vpop.f32.mrb[39].mxu0  ;;  %19192 = vst [vmem:[#allocation114_spill] sm:$0xff] %v16542_v15  ;;  %v16544_v51 = vpop.f32.mrb[37].mxu1 }
 0x1f2   : > { %19191 = vst [vmem:[#allocation113_spill] sm:$0xff] %v16536_v12  ;;  %7782 = vmatpush1.bf16.msra.mxu0 %v12795_v29  ;;  %v16540_v35 = vpack.c.bf16 %v16536_v12, %v16528_v5  ;;  %19193 = vst [vmem:[#allocation115_spill] sm:$0xff] %v16544_v51  ;;  %v16548_v29 = vpop.f32.mrb[38].mxu1  ;;  %v12820_v12 = vcombine.high %v1777_v26, %v1781_v32 }
 0x1f3   : > { %8366 = vmatpush1.bf16.msra.mxu1 %v12797_v50  ;;  %7783 = vmatprep.subr.bf16.mxu0 %v12804_v13  ;;  %19194 = vst [vmem:[#allocation116_spill] sm:$0xff] %v16548_v29  ;;  %v12811_v13 = vcombine.low %v1769_v16, %v1773_v2  ;;  %v16553_v60 = vpack.c.bf16 %v16548_v29, %v16542_v15  ;;  %v16555_v8 = vpop.f32.mrb[39].mxu1  ;;  %v1785_v16 = vld [vmem:[#allocation7 + $0x940] sm:$0xff]  ;;  %v1786_v15 = vld [vmem:[#allocation7 + $0x948] sm:$0xff] }
 0x1f4   : > { %8367 = vmatprep.subr.bf16.mxu1 %v12806_v56  ;;  %19195 = vst [vmem:[#allocation117_spill] sm:$0xff] %v16555_v8  ;;  %v12813_v56 = vcombine.low %v1770_v41, %v1774_v21  ;;  %v16562_v49 = vpack.c.bf16 %v16555_v8, %v16544_v51  ;;  %v12822_v2 = vcombine.high %v1778_v38, %v1782_v46  ;;  %v1789_v29 = vld [vmem:[#allocation7 + $0x960] sm:$0xff] }
 0x1f5   : > { %7749 = vmatmul.mubr.bf16.gmra.mrb[68].mxu0 %v16282_v7  ;;  %8333 = vmatmul.mubr.bf16.gmra.mrb[68].mxu1 %v16282_v7  ;;  %v12819_v41 = vcombine.low %v1777_v26, %v1781_v32  ;;  %v12828_v51 = vcombine.high %v1785_v16, %v1789_v29  ;;  %v12830_v36 = vcombine.high %v1786_v15, %v1790_v19  ;;  %v1794_v26 = vld [vmem:[#allocation7 + $0x988] sm:$0xff]  ;;  %v1809_v7 = vld [vmem:[#allocation7 + $0xa00] sm:$0xff] }
 0x1f6   : > { %7758 = vmatprep.mubr.bf16.mxu0 %v16326_v58  ;;  %7784 = vmatpush1.bf16.msra.mxu0 %v12803_v62  ;;  %v16557_v50 = vpop.f32.mrb[40].mxu0  ;;  %v1798_v32 = vld [vmem:[#allocation7 + $0x9a8] sm:$0xff] }
 0x1f7   : > { %19196 = vst [vmem:[#allocation118_spill] sm:$0xff] %v16557_v50  ;;  %8342 = vmatprep.mubr.bf16.mxu1 %v16326_v58  ;;  %8368 = vmatpush1.bf16.msra.mxu1 %v12805_v1  ;;  %v16564_v5 = vpop.f32.mrb[41].mxu0  ;;  %v1797_v58 = vld [vmem:[#allocation7 + $0x9a0] sm:$0xff] }
 0x1f8   : > { %19197 = vst [vmem:[#allocation119_spill] sm:$0xff] %v16564_v5  ;;  %7785 = vmatprep.subr.bf16.mxu0 %v12812_v39  ;;  %8369 = vmatprep.subr.bf16.mxu1 %v12814_v37  ;;  %v16566_v62 = vpop.f32.mrb[42].mxu0  ;;  %v12821_v37 = vcombine.low %v1778_v38, %v1782_v46  ;;  %v16578_v39 = vpop.f32.mrb[40].mxu1 }
 0x1f9   : > { %19198 = vst [vmem:[#allocation120_spill] sm:$0xff] %v16566_v62  ;;  %v16570_v1 = vpack.c.bf16 %v16566_v62, %v16557_v50  ;;  %v16572_v21 = vpop.f32.mrb[43].mxu0  ;;  %19200 = vst [vmem:[#allocation122_spill] sm:$0xff] %v16578_v39  ;;  %v16580_v62 = vpop.f32.mrb[41].mxu1 }
 0x1fa   : > { %19199 = vst [vmem:[#allocation121_spill] sm:$0xff] %v16572_v21  ;;  %7786 = vmatpush1.bf16.msra.mxu0 %v12811_v13  ;;  %v16576_v8 = vpack.c.bf16 %v16572_v21, %v16564_v5  ;;  %19201 = vst [vmem:[#allocation123_spill] sm:$0xff] %v16580_v62  ;;  %v16584_v13 = vpop.f32.mrb[42].mxu1  ;;  %v12836_v21 = vcombine.high %v1793_v0, %v1797_v58 }
 0x1fb   : > { %8370 = vmatpush1.bf16.msra.mxu1 %v12813_v56  ;;  %7787 = vmatprep.subr.bf16.mxu0 %v12820_v12  ;;  %19202 = vst [vmem:[#allocation124_spill] sm:$0xff] %v16584_v13  ;;  %v12827_v12 = vcombine.low %v1785_v16, %v1789_v29  ;;  %v16589_v38 = vpack.c.bf16 %v16584_v13, %v16578_v39  ;;  %v16591_v46 = vpop.f32.mrb[43].mxu1  ;;  %v1801_v16 = vld [vmem:[#allocation7 + $0x9c0] sm:$0xff]  ;;  %v1802_v39 = vld [vmem:[#allocation7 + $0x9c8] sm:$0xff] }
 0x1fc   : > { %8371 = vmatprep.subr.bf16.mxu1 %v12822_v2  ;;  %19203 = vst [vmem:[#allocation125_spill] sm:$0xff] %v16591_v46  ;;  %v12829_v2 = vcombine.low %v1786_v15, %v1790_v19  ;;  %v16598_v50 = vpack.c.bf16 %v16591_v46, %v16580_v62  ;;  %v12838_v29 = vcombine.high %v1794_v26, %v1798_v32  ;;  %v1805_v13 = vld [vmem:[#allocation7 + $0x9e0] sm:$0xff] }
 0x1fd   : > { %7759 = vmatmul.mubr.bf16.gmra.mrb[72].mxu0 %v16318_v45  ;;  %8343 = vmatmul.mubr.bf16.gmra.mrb[72].mxu1 %v16318_v45  ;;  %v1806_v45 = vld [vmem:[#allocation7 + $0x9e8] sm:$0xff]  ;;  %v12835_v15 = vcombine.low %v1793_v0, %v1797_v58  ;;  %v12844_v62 = vcombine.high %v1801_v16, %v1805_v13 }
 0x1fe   : > { %7768 = vmatprep.mubr.bf16.mxu0 %v16360_v3  ;;  %7788 = vmatpush1.bf16.msra.mxu0 %v12819_v41  ;;  %v16593_v56 = vpop.f32.mrb[44].mxu0  ;;  %v1810_v0 = vld [vmem:[#allocation7 + $0xa08] sm:$0xff] }
 0x1ff   : > { %19204 = vst [vmem:[#allocation126_spill] sm:$0xff] %v16593_v56  ;;  %8352 = vmatprep.mubr.bf16.mxu1 %v16360_v3  ;;  %8372 = vmatpush1.bf16.msra.mxu1 %v12821_v37  ;;  %v16600_v5 = vpop.f32.mrb[45].mxu0  ;;  %v12846_v3 = vcombine.high %v1802_v39, %v1806_v45  ;;  %v1814_v58 = vld [vmem:[#allocation7 + $0xa28] sm:$0xff] }
 0x200   : > { %19205 = vst [vmem:[#allocation127_spill] sm:$0xff] %v16600_v5  ;;  %7789 = vmatprep.subr.bf16.mxu0 %v12828_v51  ;;  %8373 = vmatprep.subr.bf16.mxu1 %v12830_v36  ;;  %v16602_v41 = vpop.f32.mrb[46].mxu0  ;;  %v12837_v36 = vcombine.low %v1794_v26, %v1798_v32  ;;  %v16614_v51 = vpop.f32.mrb[44].mxu1 }
 0x201   : > { %19206 = vst [vmem:[#allocation128_spill] sm:$0xff] %v16602_v41  ;;  %v16606_v37 = vpack.c.bf16 %v16602_v41, %v16593_v56  ;;  %v16608_v19 = vpop.f32.mrb[47].mxu0  ;;  %19208 = vst [vmem:[#allocation130_spill] sm:$0xff] %v16614_v51  ;;  %v16616_v41 = vpop.f32.mrb[45].mxu1 }
 0x202   : > { %19207 = vst [vmem:[#allocation129_spill] sm:$0xff] %v16608_v19  ;;  %7790 = vmatpush1.bf16.msra.mxu0 %v12827_v12  ;;  %v16612_v46 = vpack.c.bf16 %v16608_v19, %v16600_v5  ;;  %19209 = vst [vmem:[#allocation131_spill] sm:$0xff] %v16616_v41  ;;  %v16620_v12 = vpop.f32.mrb[46].mxu1  ;;  %v12852_v19 = vcombine.high %v1809_v7, %v1813_v6  ;;  %v1818_v5 = vld [vmem:[#allocation7 + $0xa48] sm:$0xff] }
 0x203   : > { %8374 = vmatpush1.bf16.msra.mxu1 %v12829_v2  ;;  %7791 = vmatprep.subr.bf16.mxu0 %v12836_v21  ;;  %19210 = vst [vmem:[#allocation132_spill] sm:$0xff] %v16620_v12  ;;  %v12843_v21 = vcombine.low %v1801_v16, %v1805_v13  ;;  %v16625_v26 = vpack.c.bf16 %v16620_v12, %v16614_v51  ;;  %v16627_v32 = vpop.f32.mrb[47].mxu1  ;;  %v1817_v16 = vld [vmem:[#allocation7 + $0xa40] sm:$0xff] }
 0x204   : > { %8375 = vmatprep.subr.bf16.mxu1 %v12838_v29  ;;  %19211 = vst [vmem:[#allocation133_spill] sm:$0xff] %v16627_v32  ;;  %v12845_v29 = vcombine.low %v1802_v39, %v1806_v45  ;;  %v16634_v56 = vpack.c.bf16 %v16627_v32, %v16616_v41  ;;  %v12854_v13 = vcombine.high %v1810_v0, %v1814_v58  ;;  %v1821_v12 = vld [vmem:[#allocation7 + $0xa60] sm:$0xff] }
 0x205   : > { %7769 = vmatmul.mubr.bf16.gmra.mrb[76].mxu0 %v16352_v34  ;;  %8353 = vmatmul.mubr.bf16.gmra.mrb[76].mxu1 %v16352_v34  ;;  %v1822_v34 = vld [vmem:[#allocation7 + $0xa68] sm:$0xff]  ;;  %v12851_v39 = vcombine.low %v1809_v7, %v1813_v6  ;;  %v12859_v7 = vcombine.low %v1817_v16, %v1821_v12 }
 0x206   : > { %7792 = vmatpush1.bf16.msra.mxu0 %v12835_v15  ;;  %7811 = vmatprep.mubr.bf16.mxu0 %v16376_v40  ;;  %v16629_v2 = vpop.f32.mrb[48].mxu0 }
 0x207   : > { %19212 = vst [vmem:[#allocation134_spill] sm:$0xff] %v16629_v2  ;;  %8376 = vmatpush1.bf16.msra.mxu1 %v12837_v36  ;;  %8395 = vmatprep.mubr.bf16.mxu1 %v16376_v40  ;;  %v16636_v15 = vpop.f32.mrb[49].mxu0  ;;  %v12862_v40 = vcombine.high %v1818_v5, %v1822_v34 }
 0x208   : > { %19213 = vst [vmem:[#allocation135_spill] sm:$0xff] %v16636_v15  ;;  %7793 = vmatprep.subr.bf16.mxu0 %v12844_v62  ;;  %8377 = vmatprep.subr.bf16.mxu1 %v12846_v3  ;;  %v16638_v51 = vpop.f32.mrb[50].mxu0  ;;  %v12853_v3 = vcombine.low %v1810_v0, %v1814_v58  ;;  %v12860_v62 = vcombine.high %v1817_v16, %v1821_v12  ;;  %v16650_v41 = vpop.f32.mrb[48].mxu1  ;;  %v1833_v16 = vld [vmem:[#allocation7 + $0xac0] sm:$0xff] }
 0x209   : > { %19214 = vst [vmem:[#allocation136_spill] sm:$0xff] %v16638_v51  ;;  %v16642_v36 = vpack.c.bf16 %v16638_v51, %v16629_v2  ;;  %v16644_v45 = vpop.f32.mrb[51].mxu0  ;;  %19216 = vst [vmem:[#allocation138_spill] sm:$0xff] %v16650_v41  ;;  %v16652_v51 = vpop.f32.mrb[49].mxu1  ;;  %v1826_v2 = vld [vmem:[#allocation7 + $0xa88] sm:$0xff]  ;;  %v12861_v58 = vcombine.low %v1818_v5, %v1822_v34  ;;  %v12867_v5 = vcombine.low %v1825_v42, %v1829_v47 }
 0x20a   : > { %19215 = vst [vmem:[#allocation137_spill] sm:$0xff] %v16644_v45  ;;  %7794 = vmatpush1.bf16.msra.mxu0 %v12843_v21  ;;  %v16648_v32 = vpack.c.bf16 %v16644_v45, %v16636_v15  ;;  %19217 = vst [vmem:[#allocation139_spill] sm:$0xff] %v16652_v51  ;;  %v16654_v21 = vpop.f32.mrb[50].mxu1  ;;  %v12870_v12 = vcombine.high %v1826_v2, %v1830_v63  ;;  %v1838_v15 = vld [vmem:[#allocation7 + $0xae8] sm:$0xff] }
 0x20b   : > { %8378 = vmatpush1.bf16.msra.mxu1 %v12845_v29  ;;  %7795 = vmatprep.subr.bf16.mxu0 %v12852_v19  ;;  %19218 = vst [vmem:[#allocation140_spill] sm:$0xff] %v16654_v21  ;;  %v16658_v6 = vpack.c.bf16 %v16654_v21, %v16650_v41  ;;  %v16660_v19 = vpop.f32.mrb[51].mxu1  ;;  %v12868_v29 = vcombine.high %v1825_v42, %v1829_v47  ;;  %v1834_v41 = vld [vmem:[#allocation7 + $0xac8] sm:$0xff] }
 0x20c   : > { %8379 = vmatprep.subr.bf16.mxu1 %v12854_v13  ;;  %19220 = vst [vmem:[#allocation142_spill] sm:$0xff] %v16660_v19  ;;  %v16666_v13 = vpack.c.bf16 %v16660_v19, %v16652_v51  ;;  %v12878_v10 = vcombine.high %v1834_v41, %v1838_v15 }
 0x20d   : > { %19219 = vst [vmem:[#allocation141_spill] sm:$0xff] %v16658_v6  ;;  %v1878_v6 = vld [vmem:[#allocation7 + $0xc28] sm:$0xff] }
 0x20e   : > { %7796 = vmatpush1.bf16.msra.mxu0 %v12851_v39  ;;  %v16662_v0 = vpop.f32.mrb[52].mxu0  ;;  %19222 = vst [vmem:[#allocation144_spill] sm:$0xff] %v16666_v13  ;;  %v1837_v39 = vld [vmem:[#allocation7 + $0xae0] sm:$0xff] }
 0x20f   : > { %19221 = vst [vmem:[#allocation143_spill] sm:$0xff] %v16662_v0  ;;  %8380 = vmatpush1.bf16.msra.mxu1 %v12853_v3  ;;  %7797 = vmatprep.subr.bf16.mxu0 %v12860_v62  ;;  %v16668_v45 = vpop.f32.mrb[53].mxu0  ;;  %v12876_v19 = vcombine.high %v1833_v16, %v1837_v39  ;;  %v12875_v42 = vcombine.low %v1833_v16, %v1837_v39  ;;  %v1849_v39 = vld [vmem:[#allocation7 + $0xb40] sm:$0xff] }
 0x210   : > { %19223 = vst [vmem:[#allocation145_spill] sm:$0xff] %v16668_v45  ;;  %8381 = vmatprep.subr.bf16.mxu1 %v12862_v40  ;;  %v16670_v21 = vpop.f32.mrb[54].mxu0  ;;  %v12869_v40 = vcombine.low %v1826_v2, %v1830_v63  ;;  %v16682_v51 = vpop.f32.mrb[52].mxu1 }
 0x211   : > { %19224 = vst [vmem:[#allocation146_spill] sm:$0xff] %v16670_v21  ;;  %v16674_v3 = vpack.c.bf16 %v16670_v21, %v16662_v0  ;;  %v16676_v34 = vpop.f32.mrb[55].mxu0  ;;  %19226 = vst [vmem:[#allocation148_spill] sm:$0xff] %v16682_v51  ;;  %v16684_v21 = vpop.f32.mrb[53].mxu1  ;;  %v1842_v0 = vld [vmem:[#allocation7 + $0xb08] sm:$0xff] }
 0x212   : > { %19225 = vst [vmem:[#allocation147_spill] sm:$0xff] %v16676_v34  ;;  %7798 = vmatpush1.bf16.msra.mxu0 %v12859_v7  ;;  %v16680_v62 = vpack.c.bf16 %v16676_v34, %v16668_v45  ;;  %19227 = vst [vmem:[#allocation149_spill] sm:$0xff] %v16684_v21  ;;  %v16686_v7 = vpop.f32.mrb[54].mxu1  ;;  %v12886_v16 = vcombine.high %v1842_v0, %v1846_v52  ;;  %v1854_v45 = vld [vmem:[#allocation7 + $0xb68] sm:$0xff] }
 0x213   : > { %8382 = vmatpush1.bf16.msra.mxu1 %v12861_v58  ;;  %7799 = vmatprep.subr.bf16.mxu0 %v12868_v29  ;;  %19228 = vst [vmem:[#allocation150_spill] sm:$0xff] %v16686_v7  ;;  %v16690_v47 = vpack.c.bf16 %v16686_v7, %v16682_v51  ;;  %v16692_v63 = vpop.f32.mrb[55].mxu1  ;;  %v12877_v58 = vcombine.low %v1834_v41, %v1838_v15  ;;  %v1850_v51 = vld [vmem:[#allocation7 + $0xb48] sm:$0xff] }
 0x214   : > { %8383 = vmatprep.subr.bf16.mxu1 %v12870_v12  ;;  %19230 = vst [vmem:[#allocation152_spill] sm:$0xff] %v16692_v63  ;;  %v12884_v29 = vcombine.high %v1841_v18, %v1845_v24  ;;  %v16698_v12 = vpack.c.bf16 %v16692_v63, %v16684_v21  ;;  %v12883_v15 = vcombine.low %v1841_v18, %v1845_v24 }
 0x215   : > { %19229 = vst [vmem:[#allocation151_spill] sm:$0xff] %v16690_v47  ;;  %v12894_v57 = vcombine.high %v1850_v51, %v1854_v45  ;;  %v1862_v47 = vld [vmem:[#allocation7 + $0xba8] sm:$0xff] }
 0x216   : > { %7800 = vmatpush1.bf16.msra.mxu0 %v12867_v5  ;;  %v16694_v2 = vpop.f32.mrb[56].mxu0  ;;  %19232 = vst [vmem:[#allocation154_spill] sm:$0xff] %v16698_v12  ;;  %v1853_v5 = vld [vmem:[#allocation7 + $0xb60] sm:$0xff] }
 0x217   : > { %19231 = vst [vmem:[#allocation153_spill] sm:$0xff] %v16694_v2  ;;  %8384 = vmatpush1.bf16.msra.mxu1 %v12869_v40  ;;  %7801 = vmatprep.subr.bf16.mxu0 %v12876_v19  ;;  %v16700_v34 = vpop.f32.mrb[57].mxu0  ;;  %v12892_v63 = vcombine.high %v1849_v39, %v1853_v5  ;;  %v12891_v18 = vcombine.low %v1849_v39, %v1853_v5  ;;  %v1865_v5 = vld [vmem:[#allocation7 + $0xbc0] sm:$0xff] }
 0x218   : > { %19233 = vst [vmem:[#allocation155_spill] sm:$0xff] %v16700_v34  ;;  %8385 = vmatprep.subr.bf16.mxu1 %v12878_v10  ;;  %v16702_v7 = vpop.f32.mrb[58].mxu0  ;;  %v12885_v10 = vcombine.low %v1842_v0, %v1846_v52  ;;  %v16714_v21 = vpop.f32.mrb[56].mxu1  ;;  %v1877_v12 = vld [vmem:[#allocation7 + $0xc20] sm:$0xff] }
 0x219   : > { %19234 = vst [vmem:[#allocation156_spill] sm:$0xff] %v16702_v7  ;;  %v16706_v40 = vpack.c.bf16 %v16702_v7, %v16694_v2  ;;  %v16708_v41 = vpop.f32.mrb[59].mxu0  ;;  %19236 = vst [vmem:[#allocation158_spill] sm:$0xff] %v16714_v21  ;;  %v16716_v7 = vpop.f32.mrb[57].mxu1  ;;  %v1858_v2 = vld [vmem:[#allocation7 + $0xb88] sm:$0xff] }
 0x21a   : > { %19235 = vst [vmem:[#allocation157_spill] sm:$0xff] %v16708_v41  ;;  %7802 = vmatpush1.bf16.msra.mxu0 %v12875_v42  ;;  %v16712_v19 = vpack.c.bf16 %v16708_v41, %v16700_v34  ;;  %19237 = vst [vmem:[#allocation159_spill] sm:$0xff] %v16716_v7  ;;  %v16718_v42 = vpop.f32.mrb[58].mxu1  ;;  %v12902_v39 = vcombine.high %v1858_v2, %v1862_v47  ;;  %v1870_v34 = vld [vmem:[#allocation7 + $0xbe8] sm:$0xff] }
 0x21b   : > { %8386 = vmatpush1.bf16.msra.mxu1 %v12877_v58  ;;  %7803 = vmatprep.subr.bf16.mxu0 %v12884_v29  ;;  %19238 = vst [vmem:[#allocation160_spill] sm:$0xff] %v16718_v42  ;;  %v16722_v24 = vpack.c.bf16 %v16718_v42, %v16714_v21  ;;  %v16724_v52 = vpop.f32.mrb[59].mxu1  ;;  %v12893_v58 = vcombine.low %v1850_v51, %v1854_v45  ;;  %v1866_v21 = vld [vmem:[#allocation7 + $0xbc8] sm:$0xff] }
 0x21c   : > { %8387 = vmatprep.subr.bf16.mxu1 %v12886_v16  ;;  %19240 = vst [vmem:[#allocation162_spill] sm:$0xff] %v16724_v52  ;;  %v12900_v29 = vcombine.high %v1857_v25, %v1861_v27  ;;  %v16730_v16 = vpack.c.bf16 %v16724_v52, %v16716_v7  ;;  %v12899_v45 = vcombine.low %v1857_v25, %v1861_v27 }
 0x21d   : > { %19239 = vst [vmem:[#allocation161_spill] sm:$0xff] %v16722_v24  ;;  %v12910_v24 = vcombine.high %v1866_v21, %v1870_v34 }
 0x21e   : > { %7804 = vmatpush1.bf16.msra.mxu0 %v12883_v15  ;;  %v16726_v0 = vpop.f32.mrb[60].mxu0  ;;  %19242 = vst [vmem:[#allocation164_spill] sm:$0xff] %v16730_v16  ;;  %v1869_v15 = vld [vmem:[#allocation7 + $0xbe0] sm:$0xff] }
 0x21f   : > { %19241 = vst [vmem:[#allocation163_spill] sm:$0xff] %v16726_v0  ;;  %8388 = vmatpush1.bf16.msra.mxu1 %v12885_v10  ;;  %7805 = vmatprep.subr.bf16.mxu0 %v12892_v63  ;;  %v16732_v41 = vpop.f32.mrb[61].mxu0  ;;  %v12908_v52 = vcombine.high %v1865_v5, %v1869_v15  ;;  %v1873_v16 = vld [vmem:[#allocation7 + $0xc00] sm:$0xff]  ;;  %v12907_v25 = vcombine.low %v1865_v5, %v1869_v15  ;;  %v1882_v5 = vld [vmem:[#allocation7 + $0xc48] sm:$0xff] }
 0x220   : > { %19243 = vst [vmem:[#allocation165_spill] sm:$0xff] %v16732_v41  ;;  %8389 = vmatprep.subr.bf16.mxu1 %v12894_v57  ;;  %v16734_v42 = vpop.f32.mrb[62].mxu0  ;;  %v12901_v57 = vcombine.low %v1858_v2, %v1862_v47  ;;  %v16746_v7 = vpop.f32.mrb[60].mxu1  ;;  %v12909_v2 = vcombine.low %v1866_v21, %v1870_v34  ;;  %v1886_v15 = vld [vmem:[#allocation7 + $0xc68] sm:$0xff]  ;;  %v1889_v34 = vld [vmem:[#allocation7 + $0xc80] sm:$0xff] }
 0x221   : > { %19244 = vst [vmem:[#allocation166_spill] sm:$0xff] %v16734_v42  ;;  %v16738_v10 = vpack.c.bf16 %v16734_v42, %v16726_v0  ;;  %v16740_v51 = vpop.f32.mrb[63].mxu0  ;;  %19246 = vst [vmem:[#allocation168_spill] sm:$0xff] %v16746_v7  ;;  %v16748_v42 = vpop.f32.mrb[61].mxu1  ;;  %v1874_v0 = vld [vmem:[#allocation7 + $0xc08] sm:$0xff]  ;;  %v12926_v21 = vcombine.high %v1882_v5, %v1886_v15 }
 0x222   : > { %19245 = vst [vmem:[#allocation167_spill] sm:$0xff] %v16740_v51  ;;  %7806 = vmatpush1.bf16.msra.mxu0 %v12891_v18  ;;  %v16744_v63 = vpack.c.bf16 %v16740_v51, %v16732_v41  ;;  %19247 = vst [vmem:[#allocation169_spill] sm:$0xff] %v16748_v42  ;;  %v16750_v18 = vpop.f32.mrb[62].mxu1  ;;  %v1881_v51 = vld [vmem:[#allocation7 + $0xc40] sm:$0xff] }
 0x223   : > { %8390 = vmatpush1.bf16.msra.mxu1 %v12893_v58  ;;  %7807 = vmatprep.subr.bf16.mxu0 %v12900_v29  ;;  %19248 = vst [vmem:[#allocation170_spill] sm:$0xff] %v16750_v18  ;;  %v16754_v27 = vpack.c.bf16 %v16750_v18, %v16746_v7  ;;  %v16756_v47 = vpop.f32.mrb[63].mxu1  ;;  %v12916_v58 = vcombine.high %v1873_v16, %v1877_v12  ;;  %v1885_v41 = vld [vmem:[#allocation7 + $0xc60] sm:$0xff] }
 0x224   : > { %8391 = vmatprep.subr.bf16.mxu1 %v12902_v39  ;;  %19250 = vst [vmem:[#allocation172_spill] sm:$0xff] %v16756_v47  ;;  %v16760_v29 = vpack.c.bf16 %v16756_v47, %v16748_v42  ;;  %v12918_v39 = vcombine.high %v1874_v0, %v1878_v6  ;;  %v12917_v18 = vcombine.low %v1874_v0, %v1878_v6  ;;  %v1894_v47 = vld [vmem:[#allocation7 + $0xca8] sm:$0xff] }
 0x225   : > { %19249 = vst [vmem:[#allocation171_spill] sm:$0xff] %v16754_v27  ;;  %v12925_v6 = vcombine.low %v1882_v5, %v1886_v15  ;;  %v1906_v5 = vld [vmem:[#allocation7 + $0xd08] sm:$0xff] }
 0x226   : > { %7808 = vmatpush1.bf16.msra.mxu0 %v12899_v45  ;;  %19251 = vst [vmem:[#allocation173_spill] sm:$0xff] %v16760_v29  ;;  %v12915_v45 = vcombine.low %v1873_v16, %v1877_v12  ;;  %v1897_v16 = vld [vmem:[#allocation7 + $0xcc0] sm:$0xff]  ;;  %v1910_v15 = vld [vmem:[#allocation7 + $0xd28] sm:$0xff] }
 0x227   : > { %8392 = vmatpush1.bf16.msra.mxu1 %v12901_v57  ;;  %7809 = vmatprep.subr.bf16.mxu0 %v12908_v52  ;;  %v12924_v57 = vcombine.high %v1881_v51, %v1885_v41  ;;  %v1893_v52 = vld [vmem:[#allocation7 + $0xca0] sm:$0xff] }
 0x228   : > { %8393 = vmatprep.subr.bf16.mxu1 %v12910_v24  ;;  %v1890_v24 = vld [vmem:[#allocation7 + $0xc88] sm:$0xff]  ;;  %v12932_v12 = vcombine.high %v1889_v34, %v1893_v52  ;;  %v12931_v7 = vcombine.low %v1889_v34, %v1893_v52  ;;  %v1913_v34 = vld [vmem:[#allocation7 + $0xd40] sm:$0xff] }
 0x229   : > { %v12934_v0 = vcombine.high %v1890_v24, %v1894_v47  ;;  %v12933_v42 = vcombine.low %v1890_v24, %v1894_v47  ;;  %v1917_v52 = vld [vmem:[#allocation7 + $0xd60] sm:$0xff]  ;;  %v1914_v24 = vld [vmem:[#allocation7 + $0xd48] sm:$0xff] }
 0x22a   : > { %7810 = vmatpush1.bf16.msra.mxu0 %v12907_v25  ;;  %v12923_v25 = vcombine.low %v1881_v51, %v1885_v41  ;;  %v1905_v51 = vld [vmem:[#allocation7 + $0xd00] sm:$0xff] }
 0x22b   : > { %8394 = vmatpush1.bf16.msra.mxu1 %v12909_v2  ;;  %7852 = vmatprep.subr.bf16.mxu0 %v12916_v58  ;;  %v1901_v2 = vld [vmem:[#allocation7 + $0xce0] sm:$0xff]  ;;  %v1898_v58 = vld [vmem:[#allocation7 + $0xcc8] sm:$0xff] }
 0x22c   : > { %8436 = vmatprep.subr.bf16.mxu1 %v12918_v39  ;;  %v1902_v39 = vld [vmem:[#allocation7 + $0xce8] sm:$0xff] }
 0x22d   : > { %7812 = vmatmul.mubr.bf16.vlgmr.msra.gmra.mrb[64].mxu0 %v16370_v9  ;;  %v12942_v41 = vcombine.high %v1898_v58, %v1902_v39  ;;  %v12941_v47 = vcombine.low %v1898_v58, %v1902_v39  ;;  %v12955_v58 = vcombine.low %v1913_v34, %v1917_v52 }
 0x22e   : > { %8396 = vmatmul.mubr.bf16.vlgmr.msra.gmra.mrb[64].mxu1 %v16370_v9  ;;  %7821 = vmatprep.mubr.bf16.mxu0 %v16408_v28  ;;  %v12940_v9 = vcombine.high %v1897_v16, %v1901_v2 }
 0x22f   : > { %7853 = vmatpush1.bf16.msra.mxu0 %v12915_v45  ;;  %8405 = vmatprep.mubr.bf16.mxu1 %v16408_v28  ;;  %v12939_v45 = vcombine.low %v1897_v16, %v1901_v2  ;;  %v1922_v16 = vld [vmem:[#allocation7 + $0xd88] sm:$0xff] }
 0x230   : > { %8437 = vmatpush1.bf16.msra.mxu1 %v12917_v18  ;;  %7854 = vmatprep.subr.bf16.mxu0 %v12924_v57  ;;  %v1909_v18 = vld [vmem:[#allocation7 + $0xd20] sm:$0xff]  ;;  %v1926_v2 = vld [vmem:[#allocation7 + $0xda8] sm:$0xff] }
 0x231   : > { %8438 = vmatprep.subr.bf16.mxu1 %v12926_v21  ;;  %v12948_v57 = vcombine.high %v1905_v51, %v1909_v18  ;;  %v12950_v21 = vcombine.high %v1906_v5, %v1910_v15 }
 0x233   : > { %7855 = vmatpush1.bf16.msra.mxu0 %v12923_v25  ;;  %v1918_v25 = vld [vmem:[#allocation7 + $0xd68] sm:$0xff] }
 0x234   : > { %8439 = vmatpush1.bf16.msra.mxu1 %v12925_v6  ;;  %7856 = vmatprep.subr.bf16.mxu0 %v12932_v12  ;;  %v12947_v6 = vcombine.low %v1905_v51, %v1909_v18  ;;  %v12949_v12 = vcombine.low %v1906_v5, %v1910_v15  ;;  %v12957_v39 = vcombine.low %v1914_v24, %v1918_v25  ;;  %v1929_v18 = vld [vmem:[#allocation7 + $0xdc0] sm:$0xff]  ;;  %v1930_v15 = vld [vmem:[#allocation7 + $0xdc8] sm:$0xff] }
 0x235   : > { %7822 = vmatmul.mubr.bf16.gmra.mrb[68].mxu0 %v16402_v14  ;;  %8440 = vmatprep.subr.bf16.mxu1 %v12934_v0  ;;  %v12956_v0 = vcombine.high %v1913_v34, %v1917_v52  ;;  %v12966_v51 = vcombine.high %v1922_v16, %v1926_v2  ;;  %v1933_v5 = vld [vmem:[#allocation7 + $0xde0] sm:$0xff] }
 0x236   : > { %8406 = vmatmul.mubr.bf16.gmra.mrb[68].mxu1 %v16402_v14  ;;  %7831 = vmatprep.mubr.bf16.mxu0 %v16440_v61  ;;  %v1937_v52 = vld [vmem:[#allocation7 + $0xe00] sm:$0xff] }
 0x237   : > { %7857 = vmatpush1.bf16.msra.mxu0 %v12931_v7  ;;  %8415 = vmatprep.mubr.bf16.mxu1 %v16440_v61  ;;  %v12958_v7 = vcombine.high %v1914_v24, %v1918_v25  ;;  %v1938_v24 = vld [vmem:[#allocation7 + $0xe08] sm:$0xff] }
 0x238   : > { %8441 = vmatpush1.bf16.msra.mxu1 %v12933_v42  ;;  %7858 = vmatprep.subr.bf16.mxu0 %v12940_v9  ;;  %v1921_v42 = vld [vmem:[#allocation7 + $0xd80] sm:$0xff]  ;;  %v1942_v25 = vld [vmem:[#allocation7 + $0xe28] sm:$0xff] }
 0x239   : > { %8442 = vmatprep.subr.bf16.mxu1 %v12942_v41  ;;  %v1925_v9 = vld [vmem:[#allocation7 + $0xda0] sm:$0xff] }
 0x23a   : > { %v12964_v41 = vcombine.high %v1921_v42, %v1925_v9 }
 0x23b   : > { %7859 = vmatpush1.bf16.msra.mxu0 %v12939_v45  ;;  %v1934_v45 = vld [vmem:[#allocation7 + $0xde8] sm:$0xff] }
 0x23c   : > { %8443 = vmatpush1.bf16.msra.mxu1 %v12941_v47  ;;  %7860 = vmatprep.subr.bf16.mxu0 %v12948_v57  ;;  %v12963_v47 = vcombine.low %v1921_v42, %v1925_v9  ;;  %v12965_v57 = vcombine.low %v1922_v16, %v1926_v2  ;;  %v12974_v34 = vcombine.high %v1930_v15, %v1934_v45  ;;  %v1945_v9 = vld [vmem:[#allocation7 + $0xe40] sm:$0xff]  ;;  %v1946_v2 = vld [vmem:[#allocation7 + $0xe48] sm:$0xff] }
 0x23d   : > { %7832 = vmatmul.mubr.bf16.gmra.mrb[72].mxu0 %v16434_v44  ;;  %8444 = vmatprep.subr.bf16.mxu1 %v12950_v21  ;;  %v12972_v21 = vcombine.high %v1929_v18, %v1933_v5  ;;  %v12982_v42 = vcombine.high %v1938_v24, %v1942_v25  ;;  %v1949_v16 = vld [vmem:[#allocation7 + $0xe60] sm:$0xff] }
 0x23e   : > { %8416 = vmatmul.mubr.bf16.gmra.mrb[72].mxu1 %v16434_v44  ;;  %7841 = vmatprep.mubr.bf16.mxu0 %v16472_v59 }
 0x23f   : > { %7861 = vmatpush1.bf16.msra.mxu0 %v12947_v6  ;;  %8425 = vmatprep.mubr.bf16.mxu1 %v16472_v59  ;;  %v1941_v6 = vld [vmem:[#allocation7 + $0xe20] sm:$0xff] }
 0x240   : > { %8445 = vmatpush1.bf16.msra.mxu1 %v12949_v12  ;;  %7862 = vmatprep.subr.bf16.mxu0 %v12956_v0  ;;  %v12971_v12 = vcombine.low %v1929_v18, %v1933_v5  ;;  %v12973_v0 = vcombine.low %v1930_v15, %v1934_v45  ;;  %v1957_v18 = vld [vmem:[#allocation7 + $0xea0] sm:$0xff]  ;;  %v1954_v5 = vld [vmem:[#allocation7 + $0xe88] sm:$0xff]  ;;  %v12987_v15 = vcombine.low %v1945_v9, %v1949_v16 }
 0x241   : > { %8446 = vmatprep.subr.bf16.mxu1 %v12958_v7  ;;  %v12980_v7 = vcombine.high %v1937_v52, %v1941_v6 }
 0x243   : > { %7863 = vmatpush1.bf16.msra.mxu0 %v12955_v58  ;;  %v1950_v58 = vld [vmem:[#allocation7 + $0xe68] sm:$0xff] }
 0x244   : > { %8447 = vmatpush1.bf16.msra.mxu1 %v12957_v39  ;;  %7864 = vmatprep.subr.bf16.mxu0 %v12964_v41  ;;  %v12979_v39 = vcombine.low %v1937_v52, %v1941_v6  ;;  %v12981_v41 = vcombine.low %v1938_v24, %v1942_v25  ;;  %v12989_v45 = vcombine.low %v1946_v2, %v1950_v58  ;;  %v1965_v52 = vld [vmem:[#allocation7 + $0xee0] sm:$0xff]  ;;  %v1962_v6 = vld [vmem:[#allocation7 + $0xec8] sm:$0xff] }
 0x245   : > { %7842 = vmatmul.mubr.bf16.gmra.mrb[76].mxu0 %v16466_v17  ;;  %8448 = vmatprep.subr.bf16.mxu1 %v12966_v51  ;;  %v12988_v51 = vcombine.high %v1945_v9, %v1949_v16  ;;  %v1973_v9 = vld [vmem:[#allocation7 + $0xf20] sm:$0xff]  ;;  %v1970_v16 = vld [vmem:[#allocation7 + $0xf08] sm:$0xff] }
 0x246   : > { %8426 = vmatmul.mubr.bf16.gmra.mrb[76].mxu1 %v16466_v17  ;;  %7884 = vmatprep.mubr.bf16.mxu0 %v16394_v4 }
 0x247   : > { %7865 = vmatpush1.bf16.msra.mxu0 %v12963_v47  ;;  %8468 = vmatprep.mubr.bf16.mxu1 %v16394_v4  ;;  %v12990_v47 = vcombine.high %v1946_v2, %v1950_v58  ;;  %v1953_v4 = vld [vmem:[#allocation7 + $0xe80] sm:$0xff] }
 0x248   : > { %8449 = vmatpush1.bf16.msra.mxu1 %v12965_v57  ;;  %7866 = vmatprep.subr.bf16.mxu0 %v12972_v21  ;;  %v1958_v57 = vld [vmem:[#allocation7 + $0xea8] sm:$0xff]  ;;  %v12996_v21 = vcombine.high %v1953_v4, %v1957_v18  ;;  %v12995_v24 = vcombine.low %v1953_v4, %v1957_v18  ;;  %v1981_v4 = vld [vmem:[#allocation7 + $0xf60] sm:$0xff] }
 0x249   : > { %8450 = vmatprep.subr.bf16.mxu1 %v12974_v34  ;;  %v12998_v34 = vcombine.high %v1954_v5, %v1958_v57  ;;  %v12997_v25 = vcombine.low %v1954_v5, %v1958_v57  ;;  %v1978_v18 = vld [vmem:[#allocation7 + $0xf48] sm:$0xff] }
 0x24b   : > { %7867 = vmatpush1.bf16.msra.mxu0 %v12971_v12  ;;  %v1961_v12 = vld [vmem:[#allocation7 + $0xec0] sm:$0xff] }
 0x24c   : > { %8451 = vmatpush1.bf16.msra.mxu1 %v12973_v0  ;;  %7868 = vmatprep.subr.bf16.mxu0 %v12980_v7  ;;  %v1966_v0 = vld [vmem:[#allocation7 + $0xee8] sm:$0xff]  ;;  %v13004_v7 = vcombine.high %v1961_v12, %v1965_v52  ;;  %v13003_v2 = vcombine.low %v1961_v12, %v1965_v52  ;;  %v1989_v12 = vld [vmem:[#allocation7 + $0xfa0] sm:$0xff] }
 0x24d   : > { %8452 = vmatprep.subr.bf16.mxu1 %v12982_v42  ;;  %v13006_v42 = vcombine.high %v1962_v6, %v1966_v0  ;;  %v13005_v58 = vcombine.low %v1962_v6, %v1966_v0  ;;  %v1986_v52 = vld [vmem:[#allocation7 + $0xf88] sm:$0xff] }
 0x24f   : > { %7869 = vmatpush1.bf16.msra.mxu0 %v12979_v39  ;;  %v1969_v39 = vld [vmem:[#allocation7 + $0xf00] sm:$0xff] }
 0x250   : > { %8453 = vmatpush1.bf16.msra.mxu1 %v12981_v41  ;;  %7870 = vmatprep.subr.bf16.mxu0 %v12988_v51  ;;  %v1974_v41 = vld [vmem:[#allocation7 + $0xf28] sm:$0xff]  ;;  %v13012_v51 = vcombine.high %v1969_v39, %v1973_v9  ;;  %v13011_v5 = vcombine.low %v1969_v39, %v1973_v9  ;;  %v1997_v39 = vld [vmem:[#allocation7 + $0xfe0] sm:$0xff] }
 0x251   : > { %8454 = vmatprep.subr.bf16.mxu1 %v12990_v47  ;;  %v13014_v47 = vcombine.high %v1970_v16, %v1974_v41  ;;  %v13013_v57 = vcombine.low %v1970_v16, %v1974_v41  ;;  %v1994_v9 = vld [vmem:[#allocation7 + $0xfc8] sm:$0xff] }
 0x253   : > { %7871 = vmatpush1.bf16.msra.mxu0 %v12987_v15  ;;  %v1977_v15 = vld [vmem:[#allocation7 + $0xf40] sm:$0xff] }
 0x254   : > { %8455 = vmatpush1.bf16.msra.mxu1 %v12989_v45  ;;  %7872 = vmatprep.subr.bf16.mxu0 %v12996_v21  ;;  %v1982_v45 = vld [vmem:[#allocation7 + $0xf68] sm:$0xff]  ;;  %v13020_v21 = vcombine.high %v1977_v15, %v1981_v4  ;;  %v13019_v6 = vcombine.low %v1977_v15, %v1981_v4  ;;  %v2005_v15 = vld [vmem:[#allocation7 + $0x1020] sm:$0xff] }
 0x255   : > { %8456 = vmatprep.subr.bf16.mxu1 %v12998_v34  ;;  %v13022_v34 = vcombine.high %v1978_v18, %v1982_v45  ;;  %v13021_v0 = vcombine.low %v1978_v18, %v1982_v45  ;;  %v2002_v4 = vld [vmem:[#allocation7 + $0x1008] sm:$0xff] }
 0x257   : > { %7873 = vmatpush1.bf16.msra.mxu0 %v12995_v24  ;;  %v1985_v24 = vld [vmem:[#allocation7 + $0xf80] sm:$0xff] }
 0x258   : > { %8457 = vmatpush1.bf16.msra.mxu1 %v12997_v25  ;;  %7874 = vmatprep.subr.bf16.mxu0 %v13004_v7  ;;  %v1990_v25 = vld [vmem:[#allocation7 + $0xfa8] sm:$0xff]  ;;  %v13028_v7 = vcombine.high %v1985_v24, %v1989_v12  ;;  %v13027_v16 = vcombine.low %v1985_v24, %v1989_v12  ;;  %v2013_v24 = vld [vmem:[#allocation7 + $0x1060] sm:$0xff] }
 0x259   : > { %8458 = vmatprep.subr.bf16.mxu1 %v13006_v42  ;;  %v13030_v42 = vcombine.high %v1986_v52, %v1990_v25  ;;  %v13029_v41 = vcombine.low %v1986_v52, %v1990_v25  ;;  %v2010_v12 = vld [vmem:[#allocation7 + $0x1048] sm:$0xff] }
 0x25a   : > { %v2014_v52 = vld [vmem:[#allocation7 + $0x1068] sm:$0xff] }
 0x25b   : > { %7875 = vmatpush1.bf16.msra.mxu0 %v13003_v2  ;;  %v1993_v2 = vld [vmem:[#allocation7 + $0xfc0] sm:$0xff] }
 0x25c   : > { %8459 = vmatpush1.bf16.msra.mxu1 %v13005_v58  ;;  %7876 = vmatprep.subr.bf16.mxu0 %v13012_v51  ;;  %v1998_v58 = vld [vmem:[#allocation7 + $0xfe8] sm:$0xff]  ;;  %v13036_v51 = vcombine.high %v1993_v2, %v1997_v39  ;;  %v13035_v18 = vcombine.low %v1993_v2, %v1997_v39  ;;  %v2017_v2 = vld [vmem:[#allocation7 + $0x1080] sm:$0xff] }
 0x25d   : > { %8460 = vmatprep.subr.bf16.mxu1 %v13014_v47  ;;  %v13038_v47 = vcombine.high %v1994_v9, %v1998_v58  ;;  %v13037_v45 = vcombine.low %v1994_v9, %v1998_v58  ;;  %v2021_v39 = vld [vmem:[#allocation7 + $0x10a0] sm:$0xff]  ;;  %v2018_v9 = vld [vmem:[#allocation7 + $0x1088] sm:$0xff] }
 0x25e   : > { %v2022_v58 = vld [vmem:[#allocation7 + $0x10a8] sm:$0xff] }
 0x25f   : > { %7877 = vmatpush1.bf16.msra.mxu0 %v13011_v5  ;;  %v2001_v5 = vld [vmem:[#allocation7 + $0x1000] sm:$0xff] }
 0x260   : > { %8461 = vmatpush1.bf16.msra.mxu1 %v13013_v57  ;;  %7878 = vmatprep.subr.bf16.mxu0 %v13020_v21  ;;  %v2006_v57 = vld [vmem:[#allocation7 + $0x1028] sm:$0xff]  ;;  %v13044_v21 = vcombine.high %v2001_v5, %v2005_v15  ;;  %v13043_v25 = vcombine.low %v2001_v5, %v2005_v15  ;;  %v2025_v5 = vld [vmem:[#allocation7 + $0x10c0] sm:$0xff] }
 0x261   : > { %8462 = vmatprep.subr.bf16.mxu1 %v13022_v34  ;;  %v13046_v34 = vcombine.high %v2002_v4, %v2006_v57  ;;  %v2029_v15 = vld [vmem:[#allocation7 + $0x10e0] sm:$0xff] }
 0x263   : > { %7879 = vmatpush1.bf16.msra.mxu0 %v13019_v6  ;;  %v2009_v6 = vld [vmem:[#allocation7 + $0x1040] sm:$0xff] }
 0x264   : > { %8463 = vmatpush1.bf16.msra.mxu1 %v13021_v0  ;;  %7880 = vmatprep.subr.bf16.mxu0 %v13028_v7  ;;  %v13045_v0 = vcombine.low %v2002_v4, %v2006_v57  ;;  %v13052_v7 = vcombine.high %v2009_v6, %v2013_v24  ;;  %v2026_v4 = vld [vmem:[#allocation7 + $0x10c8] sm:$0xff] }
 0x265   : > { %8464 = vmatprep.subr.bf16.mxu1 %v13030_v42  ;;  %v13054_v42 = vcombine.high %v2010_v12, %v2014_v52  ;;  %v2030_v57 = vld [vmem:[#allocation7 + $0x10e8] sm:$0xff] }
 0x267   : > { %7881 = vmatpush1.bf16.msra.mxu0 %v13027_v16  ;;  %v13051_v16 = vcombine.low %v2009_v6, %v2013_v24  ;;  %v2033_v6 = vld [vmem:[#allocation7 + $0x1100] sm:$0xff] }
 0x268   : > { %8465 = vmatpush1.bf16.msra.mxu1 %v13029_v41  ;;  %7882 = vmatprep.subr.bf16.mxu0 %v13036_v51  ;;  %v13053_v41 = vcombine.low %v2010_v12, %v2014_v52  ;;  %v13060_v51 = vcombine.high %v2017_v2, %v2021_v39  ;;  %v2037_v24 = vld [vmem:[#allocation7 + $0x1120] sm:$0xff]  ;;  %v2034_v12 = vld [vmem:[#allocation7 + $0x1108] sm:$0xff] }
 0x269   : > { %8466 = vmatprep.subr.bf16.mxu1 %v13038_v47  ;;  %v13062_v47 = vcombine.high %v2018_v9, %v2022_v58  ;;  %v2038_v52 = vld [vmem:[#allocation7 + $0x1128] sm:$0xff] }
 0x26b   : > { %7883 = vmatpush1.bf16.msra.mxu0 %v13035_v18  ;;  %v13059_v18 = vcombine.low %v2017_v2, %v2021_v39  ;;  %v2041_v2 = vld [vmem:[#allocation7 + $0x1140] sm:$0xff] }
 0x26c   : > { %8467 = vmatpush1.bf16.msra.mxu1 %v13037_v45  ;;  %7925 = vmatprep.subr.bf16.mxu0 %v13044_v21  ;;  %v13061_v45 = vcombine.low %v2018_v9, %v2022_v58  ;;  %v13068_v21 = vcombine.high %v2025_v5, %v2029_v15  ;;  %v2045_v39 = vld [vmem:[#allocation7 + $0x1160] sm:$0xff]  ;;  %v2042_v9 = vld [vmem:[#allocation7 + $0x1148] sm:$0xff] }
 0x26d   : > { %8509 = vmatprep.subr.bf16.mxu1 %v13046_v34  ;;  %v13070_v34 = vcombine.high %v2026_v4, %v2030_v57  ;;  %v2046_v58 = vld [vmem:[#allocation7 + $0x1168] sm:$0xff] }
 0x26e   : > { %7885 = vmatmul.mubr.bf16.vlgmr.msra.gmra.mrb[64].mxu0 %v16386_v23 }
 0x26f   : > { %8469 = vmatmul.mubr.bf16.vlgmr.msra.gmra.mrb[64].mxu1 %v16386_v23  ;;  %7894 = vmatprep.mubr.bf16.mxu0 %v16426_v30 }
 0x270   : > { %7926 = vmatpush1.bf16.msra.mxu0 %v13043_v25  ;;  %8478 = vmatprep.mubr.bf16.mxu1 %v16426_v30  ;;  %v13067_v25 = vcombine.low %v2025_v5, %v2029_v15  ;;  %v2049_v5 = vld [vmem:[#allocation7 + $0x1180] sm:$0xff] }
 0x271   : > { %8510 = vmatpush1.bf16.msra.mxu1 %v13045_v0  ;;  %7927 = vmatprep.subr.bf16.mxu0 %v13052_v7  ;;  %v13069_v0 = vcombine.low %v2026_v4, %v2030_v57  ;;  %v13076_v7 = vcombine.high %v2033_v6, %v2037_v24  ;;  %v2053_v15 = vld [vmem:[#allocation7 + $0x11a0] sm:$0xff]  ;;  %v2050_v4 = vld [vmem:[#allocation7 + $0x1188] sm:$0xff] }
 0x272   : > { %8511 = vmatprep.subr.bf16.mxu1 %v13054_v42  ;;  %v13078_v42 = vcombine.high %v2034_v12, %v2038_v52  ;;  %v2054_v57 = vld [vmem:[#allocation7 + $0x11a8] sm:$0xff] }
 0x274   : > { %7928 = vmatpush1.bf16.msra.mxu0 %v13051_v16  ;;  %v13075_v16 = vcombine.low %v2033_v6, %v2037_v24  ;;  %v2057_v6 = vld [vmem:[#allocation7 + $0x11c0] sm:$0xff] }
 0x275   : > { %8512 = vmatpush1.bf16.msra.mxu1 %v13053_v41  ;;  %7929 = vmatprep.subr.bf16.mxu0 %v13060_v51  ;;  %v13077_v41 = vcombine.low %v2034_v12, %v2038_v52  ;;  %v13084_v51 = vcombine.high %v2041_v2, %v2045_v39  ;;  %v2061_v24 = vld [vmem:[#allocation7 + $0x11e0] sm:$0xff]  ;;  %v2058_v12 = vld [vmem:[#allocation7 + $0x11c8] sm:$0xff] }
 0x276   : > { %7895 = vmatmul.mubr.bf16.gmra.mrb[68].mxu0 %v16418_v43  ;;  %8513 = vmatprep.subr.bf16.mxu1 %v13062_v47  ;;  %v13086_v47 = vcombine.high %v2042_v9, %v2046_v58  ;;  %v2062_v52 = vld [vmem:[#allocation7 + $0x11e8] sm:$0xff] }
 0x277   : > { %8479 = vmatmul.mubr.bf16.gmra.mrb[68].mxu1 %v16418_v43  ;;  %7904 = vmatprep.mubr.bf16.mxu0 %v16458_v31 }
 0x278   : > { %7930 = vmatpush1.bf16.msra.mxu0 %v13059_v18  ;;  %8488 = vmatprep.mubr.bf16.mxu1 %v16458_v31  ;;  %v13083_v18 = vcombine.low %v2041_v2, %v2045_v39  ;;  %v2065_v2 = vld [vmem:[#allocation7 + $0x1200] sm:$0xff] }
 0x279   : > { %8514 = vmatpush1.bf16.msra.mxu1 %v13061_v45  ;;  %7931 = vmatprep.subr.bf16.mxu0 %v13068_v21  ;;  %v13085_v45 = vcombine.low %v2042_v9, %v2046_v58  ;;  %v13092_v21 = vcombine.high %v2049_v5, %v2053_v15  ;;  %v2069_v39 = vld [vmem:[#allocation7 + $0x1220] sm:$0xff]  ;;  %v2066_v9 = vld [vmem:[#allocation7 + $0x1208] sm:$0xff] }
 0x27a   : > { %8515 = vmatprep.subr.bf16.mxu1 %v13070_v34  ;;  %v13094_v34 = vcombine.high %v2050_v4, %v2054_v57  ;;  %v2070_v58 = vld [vmem:[#allocation7 + $0x1228] sm:$0xff] }
 0x27c   : > { %7932 = vmatpush1.bf16.msra.mxu0 %v13067_v25  ;;  %v13091_v25 = vcombine.low %v2049_v5, %v2053_v15  ;;  %v2073_v5 = vld [vmem:[#allocation7 + $0x1240] sm:$0xff] }
 0x27d   : > { %8516 = vmatpush1.bf16.msra.mxu1 %v13069_v0  ;;  %7933 = vmatprep.subr.bf16.mxu0 %v13076_v7  ;;  %v13093_v0 = vcombine.low %v2050_v4, %v2054_v57  ;;  %v13100_v7 = vcombine.high %v2057_v6, %v2061_v24  ;;  %v2077_v15 = vld [vmem:[#allocation7 + $0x1260] sm:$0xff]  ;;  %v2074_v4 = vld [vmem:[#allocation7 + $0x1248] sm:$0xff] }
 0x27e   : > { %7905 = vmatmul.mubr.bf16.gmra.mrb[72].mxu0 %v16450_v33  ;;  %8517 = vmatprep.subr.bf16.mxu1 %v13078_v42  ;;  %v13102_v42 = vcombine.high %v2058_v12, %v2062_v52  ;;  %v2078_v57 = vld [vmem:[#allocation7 + $0x1268] sm:$0xff] }
 0x27f   : > { %8489 = vmatmul.mubr.bf16.gmra.mrb[72].mxu1 %v16450_v33  ;;  %7914 = vmatprep.mubr.bf16.mxu0 %v16490_v20 }
 0x280   : > { %7934 = vmatpush1.bf16.msra.mxu0 %v13075_v16  ;;  %8498 = vmatprep.mubr.bf16.mxu1 %v16490_v20  ;;  %v13099_v16 = vcombine.low %v2057_v6, %v2061_v24  ;;  %v2085_v6 = vld [vmem:[#allocation7 + $0x12a0] sm:$0xff]  ;;  %v2082_v24 = vld [vmem:[#allocation7 + $0x1288] sm:$0xff] }
 0x281   : > { %8518 = vmatpush1.bf16.msra.mxu1 %v13077_v41  ;;  %7935 = vmatprep.subr.bf16.mxu0 %v13084_v51  ;;  %v13101_v41 = vcombine.low %v2058_v12, %v2062_v52  ;;  %v13108_v51 = vcombine.high %v2065_v2, %v2069_v39  ;;  %v13115_v12 = vcombine.low %v2073_v5, %v2077_v15 }
 0x282   : > { %8519 = vmatprep.subr.bf16.mxu1 %v13086_v47  ;;  %v13110_v47 = vcombine.high %v2066_v9, %v2070_v58  ;;  %v13117_v52 = vcombine.low %v2074_v4, %v2078_v57 }
 0x284   : > { %7936 = vmatpush1.bf16.msra.mxu0 %v13083_v18  ;;  %v13107_v18 = vcombine.low %v2065_v2, %v2069_v39  ;;  %v2093_v2 = vld [vmem:[#allocation7 + $0x12e0] sm:$0xff]  ;;  %v2090_v39 = vld [vmem:[#allocation7 + $0x12c8] sm:$0xff] }
 0x285   : > { %8520 = vmatpush1.bf16.msra.mxu1 %v13085_v45  ;;  %7937 = vmatprep.subr.bf16.mxu0 %v13092_v21  ;;  %v13109_v45 = vcombine.low %v2066_v9, %v2070_v58  ;;  %v13116_v21 = vcombine.high %v2073_v5, %v2077_v15  ;;  %v2101_v5 = vld [vmem:[#allocation7 + $0x1320] sm:$0xff]  ;;  %v2098_v15 = vld [vmem:[#allocation7 + $0x1308] sm:$0xff] }
 0x286   : > { %7915 = vmatmul.mubr.bf16.gmra.mrb[76].mxu0 %v16482_v22  ;;  %8521 = vmatprep.subr.bf16.mxu1 %v13094_v34  ;;  %v13118_v34 = vcombine.high %v2074_v4, %v2078_v57 }
 0x287   : > { %8499 = vmatmul.mubr.bf16.gmra.mrb[76].mxu1 %v16482_v22  ;;  %7957 = vmatprep.mubr.bf16.mxu0 %v16504_v54 }
 0x288   : > { %7938 = vmatpush1.bf16.msra.mxu0 %v13091_v25  ;;  %8541 = vmatprep.mubr.bf16.mxu1 %v16504_v54  ;;  %v2081_v25 = vld [vmem:[#allocation7 + $0x1280] sm:$0xff] }
 0x289   : > { %8522 = vmatpush1.bf16.msra.mxu1 %v13093_v0  ;;  %7939 = vmatprep.subr.bf16.mxu0 %v13100_v7  ;;  %v2086_v0 = vld [vmem:[#allocation7 + $0x12a8] sm:$0xff]  ;;  %v13124_v7 = vcombine.high %v2081_v25, %v2085_v6  ;;  %v13123_v9 = vcombine.low %v2081_v25, %v2085_v6  ;;  %v2109_v25 = vld [vmem:[#allocation7 + $0x1360] sm:$0xff] }
 0x28a   : > { %8523 = vmatprep.subr.bf16.mxu1 %v13102_v42  ;;  %v13126_v42 = vcombine.high %v2082_v24, %v2086_v0  ;;  %v13125_v58 = vcombine.low %v2082_v24, %v2086_v0  ;;  %v2106_v6 = vld [vmem:[#allocation7 + $0x1348] sm:$0xff] }
 0x28c   : > { %7940 = vmatpush1.bf16.msra.mxu0 %v13099_v16  ;;  %v2089_v16 = vld [vmem:[#allocation7 + $0x12c0] sm:$0xff] }
 0x28d   : > { %8524 = vmatpush1.bf16.msra.mxu1 %v13101_v41  ;;  %7941 = vmatprep.subr.bf16.mxu0 %v13108_v51  ;;  %v2094_v41 = vld [vmem:[#allocation7 + $0x12e8] sm:$0xff]  ;;  %v13132_v51 = vcombine.high %v2089_v16, %v2093_v2  ;;  %v13131_v4 = vcombine.low %v2089_v16, %v2093_v2  ;;  %v2117_v16 = vld [vmem:[#allocation7 + $0x13a0] sm:$0xff] }
 0x28e   : > { %8525 = vmatprep.subr.bf16.mxu1 %v13110_v47  ;;  %v13134_v47 = vcombine.high %v2090_v39, %v2094_v41  ;;  %v13133_v57 = vcombine.low %v2090_v39, %v2094_v41  ;;  %v2114_v2 = vld [vmem:[#allocation7 + $0x1388] sm:$0xff] }
 0x290   : > { %7942 = vmatpush1.bf16.msra.mxu0 %v13107_v18  ;;  %v2097_v18 = vld [vmem:[#allocation7 + $0x1300] sm:$0xff] }
 0x291   : > { %8526 = vmatpush1.bf16.msra.mxu1 %v13109_v45  ;;  %7943 = vmatprep.subr.bf16.mxu0 %v13116_v21  ;;  %v2102_v45 = vld [vmem:[#allocation7 + $0x1328] sm:$0xff]  ;;  %v13140_v21 = vcombine.high %v2097_v18, %v2101_v5  ;;  %v13139_v24 = vcombine.low %v2097_v18, %v2101_v5  ;;  %v2125_v18 = vld [vmem:[#allocation7 + $0x13e0] sm:$0xff] }
 0x292   : > { %8527 = vmatprep.subr.bf16.mxu1 %v13118_v34  ;;  %v13142_v34 = vcombine.high %v2098_v15, %v2102_v45  ;;  %v13141_v0 = vcombine.low %v2098_v15, %v2102_v45  ;;  %v2122_v5 = vld [vmem:[#allocation7 + $0x13c8] sm:$0xff] }
 0x294   : > { %7944 = vmatpush1.bf16.msra.mxu0 %v13115_v12  ;;  %v2105_v12 = vld [vmem:[#allocation7 + $0x1340] sm:$0xff] }
 0x295   : > { %8528 = vmatpush1.bf16.msra.mxu1 %v13117_v52  ;;  %7945 = vmatprep.subr.bf16.mxu0 %v13124_v7  ;;  %v2110_v52 = vld [vmem:[#allocation7 + $0x1368] sm:$0xff]  ;;  %v13148_v7 = vcombine.high %v2105_v12, %v2109_v25  ;;  %v13147_v39 = vcombine.low %v2105_v12, %v2109_v25  ;;  %v2133_v12 = vld [vmem:[#allocation7 + $0x1420] sm:$0xff] }
 0x296   : > { %8529 = vmatprep.subr.bf16.mxu1 %v13126_v42  ;;  %v13150_v42 = vcombine.high %v2106_v6, %v2110_v52  ;;  %v13149_v41 = vcombine.low %v2106_v6, %v2110_v52  ;;  %v2130_v25 = vld [vmem:[#allocation7 + $0x1408] sm:$0xff] }
 0x298   : > { %7946 = vmatpush1.bf16.msra.mxu0 %v13123_v9  ;;  %v2113_v9 = vld [vmem:[#allocation7 + $0x1380] sm:$0xff] }
 0x299   : > { %8530 = vmatpush1.bf16.msra.mxu1 %v13125_v58  ;;  %7947 = vmatprep.subr.bf16.mxu0 %v13132_v51  ;;  %v2118_v58 = vld [vmem:[#allocation7 + $0x13a8] sm:$0xff]  ;;  %v13156_v51 = vcombine.high %v2113_v9, %v2117_v16  ;;  %v13155_v15 = vcombine.low %v2113_v9, %v2117_v16  ;;  %v2141_v9 = vld [vmem:[#allocation7 + $0x1460] sm:$0xff] }
 0x29a   : > { %8531 = vmatprep.subr.bf16.mxu1 %v13134_v47  ;;  %v13158_v47 = vcombine.high %v2114_v2, %v2118_v58  ;;  %v13157_v45 = vcombine.low %v2114_v2, %v2118_v58  ;;  %v2138_v16 = vld [vmem:[#allocation7 + $0x1448] sm:$0xff] }
 0x29b   : > { %v2142_v2 = vld [vmem:[#allocation7 + $0x1468] sm:$0xff] }
 0x29c   : > { %7948 = vmatpush1.bf16.msra.mxu0 %v13131_v4  ;;  %v2121_v4 = vld [vmem:[#allocation7 + $0x13c0] sm:$0xff] }
 0x29d   : > { %8532 = vmatpush1.bf16.msra.mxu1 %v13133_v57  ;;  %7949 = vmatprep.subr.bf16.mxu0 %v13140_v21  ;;  %v2126_v57 = vld [vmem:[#allocation7 + $0x13e8] sm:$0xff]  ;;  %v13164_v21 = vcombine.high %v2121_v4, %v2125_v18  ;;  %v13163_v6 = vcombine.low %v2121_v4, %v2125_v18  ;;  %v2145_v4 = vld [vmem:[#allocation7 + $0x1480] sm:$0xff] }
 0x29e   : > { %8533 = vmatprep.subr.bf16.mxu1 %v13142_v34  ;;  %v13166_v34 = vcombine.high %v2122_v5, %v2126_v57  ;;  %v13165_v52 = vcombine.low %v2122_v5, %v2126_v57  ;;  %v2149_v18 = vld [vmem:[#allocation7 + $0x14a0] sm:$0xff]  ;;  %v2146_v5 = vld [vmem:[#allocation7 + $0x1488] sm:$0xff] }
 0x29f   : > { %v2150_v57 = vld [vmem:[#allocation7 + $0x14a8] sm:$0xff] }
 0x2a0   : > { %7950 = vmatpush1.bf16.msra.mxu0 %v13139_v24  ;;  %v2129_v24 = vld [vmem:[#allocation7 + $0x1400] sm:$0xff] }
 0x2a1   : > { %8534 = vmatpush1.bf16.msra.mxu1 %v13141_v0  ;;  %7951 = vmatprep.subr.bf16.mxu0 %v13148_v7  ;;  %v2134_v0 = vld [vmem:[#allocation7 + $0x1428] sm:$0xff]  ;;  %v13172_v7 = vcombine.high %v2129_v24, %v2133_v12  ;;  %v13171_v58 = vcombine.low %v2129_v24, %v2133_v12  ;;  %v2153_v24 = vld [vmem:[#allocation7 + $0x14c0] sm:$0xff] }
 0x2a2   : > { %8535 = vmatprep.subr.bf16.mxu1 %v13150_v42  ;;  %v13174_v42 = vcombine.high %v2130_v25, %v2134_v0  ;;  %v2157_v12 = vld [vmem:[#allocation7 + $0x14e0] sm:$0xff] }
 0x2a4   : > { %7952 = vmatpush1.bf16.msra.mxu0 %v13147_v39  ;;  %v2137_v39 = vld [vmem:[#allocation7 + $0x1440] sm:$0xff] }
 0x2a5   : > { %8536 = vmatpush1.bf16.msra.mxu1 %v13149_v41  ;;  %7953 = vmatprep.subr.bf16.mxu0 %v13156_v51  ;;  %v13173_v41 = vcombine.low %v2130_v25, %v2134_v0  ;;  %v13180_v51 = vcombine.high %v2137_v39, %v2141_v9  ;;  %v2154_v25 = vld [vmem:[#allocation7 + $0x14c8] sm:$0xff] }
 0x2a6   : > { %8537 = vmatprep.subr.bf16.mxu1 %v13158_v47  ;;  %v13182_v47 = vcombine.high %v2138_v16, %v2142_v2  ;;  %v2158_v0 = vld [vmem:[#allocation7 + $0x14e8] sm:$0xff] }
 0x2a8   : > { %7954 = vmatpush1.bf16.msra.mxu0 %v13155_v15  ;;  %v13179_v15 = vcombine.low %v2137_v39, %v2141_v9  ;;  %v2161_v39 = vld [vmem:[#allocation7 + $0x1500] sm:$0xff] }
 0x2a9   : > { %8538 = vmatpush1.bf16.msra.mxu1 %v13157_v45  ;;  %7955 = vmatprep.subr.bf16.mxu0 %v13164_v21  ;;  %v13181_v45 = vcombine.low %v2138_v16, %v2142_v2  ;;  %v13188_v21 = vcombine.high %v2145_v4, %v2149_v18  ;;  %v2165_v9 = vld [vmem:[#allocation7 + $0x1520] sm:$0xff]  ;;  %v2162_v16 = vld [vmem:[#allocation7 + $0x1508] sm:$0xff] }
 0x2aa   : > { %8539 = vmatprep.subr.bf16.mxu1 %v13166_v34  ;;  %v13190_v34 = vcombine.high %v2146_v5, %v2150_v57  ;;  %v2166_v2 = vld [vmem:[#allocation7 + $0x1528] sm:$0xff] }
 0x2ac   : > { %7956 = vmatpush1.bf16.msra.mxu0 %v13163_v6  ;;  %v13187_v6 = vcombine.low %v2145_v4, %v2149_v18  ;;  %v2169_v4 = vld [vmem:[#allocation7 + $0x1540] sm:$0xff] }
 0x2ad   : > { %8540 = vmatpush1.bf16.msra.mxu1 %v13165_v52  ;;  %7998 = vmatprep.subr.bf16.mxu0 %v13172_v7  ;;  %v13189_v52 = vcombine.low %v2146_v5, %v2150_v57  ;;  %v13196_v7 = vcombine.high %v2153_v24, %v2157_v12  ;;  %v2173_v18 = vld [vmem:[#allocation7 + $0x1560] sm:$0xff]  ;;  %v2170_v5 = vld [vmem:[#allocation7 + $0x1548] sm:$0xff] }
 0x2ae   : > { %8582 = vmatprep.subr.bf16.mxu1 %v13174_v42  ;;  %v13198_v42 = vcombine.high %v2154_v25, %v2158_v0  ;;  %v2174_v57 = vld [vmem:[#allocation7 + $0x1568] sm:$0xff] }
 0x2af   : > { %7958 = vmatmul.mubr.bf16.vlgmr.msra.gmra.mrb[64].mxu0 %v16498_v11 }
 0x2b0   : > { %8542 = vmatmul.mubr.bf16.vlgmr.msra.gmra.mrb[64].mxu1 %v16498_v11  ;;  %7967 = vmatprep.mubr.bf16.mxu0 %v16540_v35 }
 0x2b1   : > { %7999 = vmatpush1.bf16.msra.mxu0 %v13171_v58  ;;  %8551 = vmatprep.mubr.bf16.mxu1 %v16540_v35  ;;  %v13195_v58 = vcombine.low %v2153_v24, %v2157_v12  ;;  %v2177_v24 = vld [vmem:[#allocation7 + $0x1580] sm:$0xff] }
 0x2b2   : > { %8583 = vmatpush1.bf16.msra.mxu1 %v13173_v41  ;;  %8000 = vmatprep.subr.bf16.mxu0 %v13180_v51  ;;  %v13197_v41 = vcombine.low %v2154_v25, %v2158_v0  ;;  %v13204_v51 = vcombine.high %v2161_v39, %v2165_v9  ;;  %v2181_v12 = vld [vmem:[#allocation7 + $0x15a0] sm:$0xff]  ;;  %v2178_v25 = vld [vmem:[#allocation7 + $0x1588] sm:$0xff] }
 0x2b3   : > { %8584 = vmatprep.subr.bf16.mxu1 %v13182_v47  ;;  %v13206_v47 = vcombine.high %v2162_v16, %v2166_v2  ;;  %v2182_v0 = vld [vmem:[#allocation7 + $0x15a8] sm:$0xff] }
 0x2b5   : > { %8001 = vmatpush1.bf16.msra.mxu0 %v13179_v15  ;;  %v13203_v15 = vcombine.low %v2161_v39, %v2165_v9  ;;  %v2185_v39 = vld [vmem:[#allocation7 + $0x15c0] sm:$0xff] }
 0x2b6   : > { %8585 = vmatpush1.bf16.msra.mxu1 %v13181_v45  ;;  %8002 = vmatprep.subr.bf16.mxu0 %v13188_v21  ;;  %v13205_v45 = vcombine.low %v2162_v16, %v2166_v2  ;;  %v13212_v21 = vcombine.high %v2169_v4, %v2173_v18  ;;  %v2189_v9 = vld [vmem:[#allocation7 + $0x15e0] sm:$0xff]  ;;  %v2186_v16 = vld [vmem:[#allocation7 + $0x15c8] sm:$0xff] }
 0x2b7   : > { %7968 = vmatmul.mubr.bf16.gmra.mrb[68].mxu0 %v16534_v53  ;;  %8586 = vmatprep.subr.bf16.mxu1 %v13190_v34  ;;  %v13214_v34 = vcombine.high %v2170_v5, %v2174_v57  ;;  %v2190_v2 = vld [vmem:[#allocation7 + $0x15e8] sm:$0xff] }
 0x2b8   : > { %8552 = vmatmul.mubr.bf16.gmra.mrb[68].mxu1 %v16534_v53  ;;  %7977 = vmatprep.mubr.bf16.mxu0 %v16576_v8 }
 0x2b9   : > { %8003 = vmatpush1.bf16.msra.mxu0 %v13187_v6  ;;  %8561 = vmatprep.mubr.bf16.mxu1 %v16576_v8  ;;  %v13211_v6 = vcombine.low %v2169_v4, %v2173_v18  ;;  %v2193_v4 = vld [vmem:[#allocation7 + $0x1600] sm:$0xff] }
 0x2ba   : > { %8587 = vmatpush1.bf16.msra.mxu1 %v13189_v52  ;;  %8004 = vmatprep.subr.bf16.mxu0 %v13196_v7  ;;  %v13213_v52 = vcombine.low %v2170_v5, %v2174_v57  ;;  %v13220_v7 = vcombine.high %v2177_v24, %v2181_v12  ;;  %v2197_v18 = vld [vmem:[#allocation7 + $0x1620] sm:$0xff]  ;;  %v2194_v5 = vld [vmem:[#allocation7 + $0x1608] sm:$0xff] }
 0x2bb   : > { %8588 = vmatprep.subr.bf16.mxu1 %v13198_v42  ;;  %v13222_v42 = vcombine.high %v2178_v25, %v2182_v0  ;;  %v2198_v57 = vld [vmem:[#allocation7 + $0x1628] sm:$0xff] }
 0x2bd   : > { %8005 = vmatpush1.bf16.msra.mxu0 %v13195_v58  ;;  %v13219_v58 = vcombine.low %v2177_v24, %v2181_v12  ;;  %v2201_v24 = vld [vmem:[#allocation7 + $0x1640] sm:$0xff] }
 0x2be   : > { %8589 = vmatpush1.bf16.msra.mxu1 %v13197_v41  ;;  %8006 = vmatprep.subr.bf16.mxu0 %v13204_v51  ;;  %v13221_v41 = vcombine.low %v2178_v25, %v2182_v0  ;;  %v13228_v51 = vcombine.high %v2185_v39, %v2189_v9  ;;  %v2205_v12 = vld [vmem:[#allocation7 + $0x1660] sm:$0xff]  ;;  %v2202_v25 = vld [vmem:[#allocation7 + $0x1648] sm:$0xff] }
 0x2bf   : > { %7978 = vmatmul.mubr.bf16.gmra.mrb[72].mxu0 %v16570_v1  ;;  %8590 = vmatprep.subr.bf16.mxu1 %v13206_v47  ;;  %v13230_v47 = vcombine.high %v2186_v16, %v2190_v2  ;;  %v2206_v0 = vld [vmem:[#allocation7 + $0x1668] sm:$0xff] }
 0x2c0   : > { %8562 = vmatmul.mubr.bf16.gmra.mrb[72].mxu1 %v16570_v1  ;;  %7987 = vmatprep.mubr.bf16.mxu0 %v16612_v46 }
 0x2c1   : > { %8007 = vmatpush1.bf16.msra.mxu0 %v13203_v15  ;;  %8571 = vmatprep.mubr.bf16.mxu1 %v16612_v46  ;;  %v13227_v15 = vcombine.low %v2185_v39, %v2189_v9  ;;  %v2213_v39 = vld [vmem:[#allocation7 + $0x16a0] sm:$0xff]  ;;  %v2210_v9 = vld [vmem:[#allocation7 + $0x1688] sm:$0xff] }
 0x2c2   : > { %8591 = vmatpush1.bf16.msra.mxu1 %v13205_v45  ;;  %8008 = vmatprep.subr.bf16.mxu0 %v13212_v21  ;;  %v13229_v45 = vcombine.low %v2186_v16, %v2190_v2  ;;  %v13236_v21 = vcombine.high %v2193_v4, %v2197_v18  ;;  %v13243_v16 = vcombine.low %v2201_v24, %v2205_v12 }
 0x2c3   : > { %8592 = vmatprep.subr.bf16.mxu1 %v13214_v34  ;;  %v13238_v34 = vcombine.high %v2194_v5, %v2198_v57  ;;  %v13245_v2 = vcombine.low %v2202_v25, %v2206_v0 }
 0x2c5   : > { %8009 = vmatpush1.bf16.msra.mxu0 %v13211_v6  ;;  %v13235_v6 = vcombine.low %v2193_v4, %v2197_v18  ;;  %v2221_v4 = vld [vmem:[#allocation7 + $0x16e0] sm:$0xff]  ;;  %v2218_v18 = vld [vmem:[#allocation7 + $0x16c8] sm:$0xff] }
 0x2c6   : > { %8593 = vmatpush1.bf16.msra.mxu1 %v13213_v52  ;;  %8010 = vmatprep.subr.bf16.mxu0 %v13220_v7  ;;  %v13237_v52 = vcombine.low %v2194_v5, %v2198_v57  ;;  %v13244_v7 = vcombine.high %v2201_v24, %v2205_v12  ;;  %v2229_v24 = vld [vmem:[#allocation7 + $0x1720] sm:$0xff]  ;;  %v2226_v12 = vld [vmem:[#allocation7 + $0x1708] sm:$0xff] }
 0x2c7   : > { %7988 = vmatmul.mubr.bf16.gmra.mrb[76].mxu0 %v16606_v37  ;;  %8594 = vmatprep.subr.bf16.mxu1 %v13222_v42  ;;  %v13246_v42 = vcombine.high %v2202_v25, %v2206_v0 }
 0x2c8   : > { %8572 = vmatmul.mubr.bf16.gmra.mrb[76].mxu1 %v16606_v37  ;;  %8030 = vmatprep.mubr.bf16.mxu0 %v16526_v48 }
 0x2c9   : > { %8011 = vmatpush1.bf16.msra.mxu0 %v13219_v58  ;;  %8614 = vmatprep.mubr.bf16.mxu1 %v16526_v48  ;;  %v2209_v58 = vld [vmem:[#allocation7 + $0x1680] sm:$0xff] }
 0x2ca   : > { %8595 = vmatpush1.bf16.msra.mxu1 %v13221_v41  ;;  %8012 = vmatprep.subr.bf16.mxu0 %v13228_v51  ;;  %v2214_v41 = vld [vmem:[#allocation7 + $0x16a8] sm:$0xff]  ;;  %v13252_v51 = vcombine.high %v2209_v58, %v2213_v39  ;;  %v13251_v5 = vcombine.low %v2209_v58, %v2213_v39  ;;  %v2237_v58 = vld [vmem:[#allocation7 + $0x1760] sm:$0xff] }
 0x2cb   : > { %8596 = vmatprep.subr.bf16.mxu1 %v13230_v47  ;;  %v13254_v47 = vcombine.high %v2210_v9, %v2214_v41  ;;  %v13253_v57 = vcombine.low %v2210_v9, %v2214_v41  ;;  %v2234_v39 = vld [vmem:[#allocation7 + $0x1748] sm:$0xff] }
 0x2cd   : > { %8013 = vmatpush1.bf16.msra.mxu0 %v13227_v15  ;;  %v2217_v15 = vld [vmem:[#allocation7 + $0x16c0] sm:$0xff] }
 0x2ce   : > { %8597 = vmatpush1.bf16.msra.mxu1 %v13229_v45  ;;  %8014 = vmatprep.subr.bf16.mxu0 %v13236_v21  ;;  %v2222_v45 = vld [vmem:[#allocation7 + $0x16e8] sm:$0xff]  ;;  %v13260_v21 = vcombine.high %v2217_v15, %v2221_v4  ;;  %v13259_v25 = vcombine.low %v2217_v15, %v2221_v4  ;;  %v2245_v15 = vld [vmem:[#allocation7 + $0x17a0] sm:$0xff] }
 0x2cf   : > { %8598 = vmatprep.subr.bf16.mxu1 %v13238_v34  ;;  %v13262_v34 = vcombine.high %v2218_v18, %v2222_v45  ;;  %v13261_v0 = vcombine.low %v2218_v18, %v2222_v45  ;;  %v2242_v4 = vld [vmem:[#allocation7 + $0x1788] sm:$0xff] }
 0x2d1   : > { %8015 = vmatpush1.bf16.msra.mxu0 %v13235_v6  ;;  %v2225_v6 = vld [vmem:[#allocation7 + $0x1700] sm:$0xff] }
 0x2d2   : > { %8599 = vmatpush1.bf16.msra.mxu1 %v13237_v52  ;;  %8016 = vmatprep.subr.bf16.mxu0 %v13244_v7  ;;  %v2230_v52 = vld [vmem:[#allocation7 + $0x1728] sm:$0xff]  ;;  %v13268_v7 = vcombine.high %v2225_v6, %v2229_v24  ;;  %v13267_v9 = vcombine.low %v2225_v6, %v2229_v24  ;;  %v2253_v6 = vld [vmem:[#allocation7 + $0x17e0] sm:$0xff] }
 0x2d3   : > { %8600 = vmatprep.subr.bf16.mxu1 %v13246_v42  ;;  %v13270_v42 = vcombine.high %v2226_v12, %v2230_v52  ;;  %v13269_v41 = vcombine.low %v2226_v12, %v2230_v52  ;;  %v2250_v24 = vld [vmem:[#allocation7 + $0x17c8] sm:$0xff] }
 0x2d5   : > { %8017 = vmatpush1.bf16.msra.mxu0 %v13243_v16  ;;  %v2233_v16 = vld [vmem:[#allocation7 + $0x1740] sm:$0xff] }
 0x2d6   : > { %8601 = vmatpush1.bf16.msra.mxu1 %v13245_v2  ;;  %8018 = vmatprep.subr.bf16.mxu0 %v13252_v51  ;;  %v2238_v2 = vld [vmem:[#allocation7 + $0x1768] sm:$0xff]  ;;  %v13276_v51 = vcombine.high %v2233_v16, %v2237_v58  ;;  %v13275_v18 = vcombine.low %v2233_v16, %v2237_v58  ;;  %v2261_v16 = vld [vmem:[#allocation7 + $0x1820] sm:$0xff] }
 0x2d7   : > { %8602 = vmatprep.subr.bf16.mxu1 %v13254_v47  ;;  %v13278_v47 = vcombine.high %v2234_v39, %v2238_v2  ;;  %v13277_v45 = vcombine.low %v2234_v39, %v2238_v2  ;;  %v2258_v58 = vld [vmem:[#allocation7 + $0x1808] sm:$0xff] }
 0x2d9   : > { %8019 = vmatpush1.bf16.msra.mxu0 %v13251_v5  ;;  %v2241_v5 = vld [vmem:[#allocation7 + $0x1780] sm:$0xff] }
 0x2da   : > { %8603 = vmatpush1.bf16.msra.mxu1 %v13253_v57  ;;  %8020 = vmatprep.subr.bf16.mxu0 %v13260_v21  ;;  %v2246_v57 = vld [vmem:[#allocation7 + $0x17a8] sm:$0xff]  ;;  %v13284_v21 = vcombine.high %v2241_v5, %v2245_v15  ;;  %v13283_v12 = vcombine.low %v2241_v5, %v2245_v15  ;;  %v2269_v5 = vld [vmem:[#allocation7 + $0x1860] sm:$0xff] }
 0x2db   : > { %8604 = vmatprep.subr.bf16.mxu1 %v13262_v34  ;;  %v13286_v34 = vcombine.high %v2242_v4, %v2246_v57  ;;  %v13285_v52 = vcombine.low %v2242_v4, %v2246_v57  ;;  %v2266_v15 = vld [vmem:[#allocation7 + $0x1848] sm:$0xff] }
 0x2dc   : > { %v2270_v4 = vld [vmem:[#allocation7 + $0x1868] sm:$0xff] }
 0x2dd   : > { %8021 = vmatpush1.bf16.msra.mxu0 %v13259_v25  ;;  %v2249_v25 = vld [vmem:[#allocation7 + $0x17c0] sm:$0xff] }
 0x2de   : > { %8605 = vmatpush1.bf16.msra.mxu1 %v13261_v0  ;;  %8022 = vmatprep.subr.bf16.mxu0 %v13268_v7  ;;  %v2254_v0 = vld [vmem:[#allocation7 + $0x17e8] sm:$0xff]  ;;  %v13292_v7 = vcombine.high %v2249_v25, %v2253_v6  ;;  %v13291_v39 = vcombine.low %v2249_v25, %v2253_v6  ;;  %v2273_v25 = vld [vmem:[#allocation7 + $0x1880] sm:$0xff] }
 0x2df   : > { %8606 = vmatprep.subr.bf16.mxu1 %v13270_v42  ;;  %v13294_v42 = vcombine.high %v2250_v24, %v2254_v0  ;;  %v13293_v2 = vcombine.low %v2250_v24, %v2254_v0  ;;  %v2277_v6 = vld [vmem:[#allocation7 + $0x18a0] sm:$0xff]  ;;  %v2274_v24 = vld [vmem:[#allocation7 + $0x1888] sm:$0xff] }
 0x2e0   : > { %v2278_v0 = vld [vmem:[#allocation7 + $0x18a8] sm:$0xff] }
 0x2e1   : > { %8023 = vmatpush1.bf16.msra.mxu0 %v13267_v9  ;;  %v2257_v9 = vld [vmem:[#allocation7 + $0x1800] sm:$0xff] }
 0x2e2   : > { %8607 = vmatpush1.bf16.msra.mxu1 %v13269_v41  ;;  %8024 = vmatprep.subr.bf16.mxu0 %v13276_v51  ;;  %v2262_v41 = vld [vmem:[#allocation7 + $0x1828] sm:$0xff]  ;;  %v13300_v51 = vcombine.high %v2257_v9, %v2261_v16  ;;  %v13299_v57 = vcombine.low %v2257_v9, %v2261_v16  ;;  %v2281_v9 = vld [vmem:[#allocation7 + $0x18c0] sm:$0xff] }
 0x2e3   : > { %8608 = vmatprep.subr.bf16.mxu1 %v13278_v47  ;;  %v13302_v47 = vcombine.high %v2258_v58, %v2262_v41  ;;  %v2285_v16 = vld [vmem:[#allocation7 + $0x18e0] sm:$0xff] }
 0x2e5   : > { %8025 = vmatpush1.bf16.msra.mxu0 %v13275_v18  ;;  %v2265_v18 = vld [vmem:[#allocation7 + $0x1840] sm:$0xff] }
 0x2e6   : > { %8609 = vmatpush1.bf16.msra.mxu1 %v13277_v45  ;;  %8026 = vmatprep.subr.bf16.mxu0 %v13284_v21  ;;  %v13301_v45 = vcombine.low %v2258_v58, %v2262_v41  ;;  %v13308_v21 = vcombine.high %v2265_v18, %v2269_v5  ;;  %v2282_v58 = vld [vmem:[#allocation7 + $0x18c8] sm:$0xff] }
 0x2e7   : > { %8610 = vmatprep.subr.bf16.mxu1 %v13286_v34  ;;  %v13310_v34 = vcombine.high %v2266_v15, %v2270_v4  ;;  %v2286_v41 = vld [vmem:[#allocation7 + $0x18e8] sm:$0xff] }
 0x2e9   : > { %8027 = vmatpush1.bf16.msra.mxu0 %v13283_v12  ;;  %v13307_v12 = vcombine.low %v2265_v18, %v2269_v5  ;;  %v2289_v18 = vld [vmem:[#allocation7 + $0x1900] sm:$0xff] }
 0x2ea   : > { %8611 = vmatpush1.bf16.msra.mxu1 %v13285_v52  ;;  %8028 = vmatprep.subr.bf16.mxu0 %v13292_v7  ;;  %v13309_v52 = vcombine.low %v2266_v15, %v2270_v4  ;;  %v13316_v7 = vcombine.high %v2273_v25, %v2277_v6  ;;  %v2293_v5 = vld [vmem:[#allocation7 + $0x1920] sm:$0xff]  ;;  %v2290_v15 = vld [vmem:[#allocation7 + $0x1908] sm:$0xff] }
 0x2eb   : > { %8612 = vmatprep.subr.bf16.mxu1 %v13294_v42  ;;  %v13318_v42 = vcombine.high %v2274_v24, %v2278_v0  ;;  %v2294_v4 = vld [vmem:[#allocation7 + $0x1928] sm:$0xff] }
 0x2ed   : > { %8029 = vmatpush1.bf16.msra.mxu0 %v13291_v39  ;;  %v13315_v39 = vcombine.low %v2273_v25, %v2277_v6  ;;  %v2297_v25 = vld [vmem:[#allocation7 + $0x1940] sm:$0xff] }
 0x2ee   : > { %8613 = vmatpush1.bf16.msra.mxu1 %v13293_v2  ;;  %8071 = vmatprep.subr.bf16.mxu0 %v13300_v51  ;;  %v13317_v2 = vcombine.low %v2274_v24, %v2278_v0  ;;  %v13324_v51 = vcombine.high %v2281_v9, %v2285_v16  ;;  %v2301_v6 = vld [vmem:[#allocation7 + $0x1960] sm:$0xff]  ;;  %v2298_v24 = vld [vmem:[#allocation7 + $0x1948] sm:$0xff] }
 0x2ef   : > { %8655 = vmatprep.subr.bf16.mxu1 %v13302_v47  ;;  %v13326_v47 = vcombine.high %v2282_v58, %v2286_v41  ;;  %v2302_v0 = vld [vmem:[#allocation7 + $0x1968] sm:$0xff] }
 0x2f0   : > { %8031 = vmatmul.mubr.bf16.vlgmr.msra.gmra.mrb[64].mxu0 %v16517_v55 }
 0x2f1   : > { %8615 = vmatmul.mubr.bf16.vlgmr.msra.gmra.mrb[64].mxu1 %v16517_v55  ;;  %8040 = vmatprep.mubr.bf16.mxu0 %v16562_v49 }
 0x2f2   : > { %8072 = vmatpush1.bf16.msra.mxu0 %v13299_v57  ;;  %8624 = vmatprep.mubr.bf16.mxu1 %v16562_v49  ;;  %v13323_v57 = vcombine.low %v2281_v9, %v2285_v16  ;;  %v2305_v9 = vld [vmem:[#allocation7 + $0x1980] sm:$0xff] }
 0x2f3   : > { %8656 = vmatpush1.bf16.msra.mxu1 %v13301_v45  ;;  %8073 = vmatprep.subr.bf16.mxu0 %v13308_v21  ;;  %v13325_v45 = vcombine.low %v2282_v58, %v2286_v41  ;;  %v13332_v21 = vcombine.high %v2289_v18, %v2293_v5  ;;  %v2309_v16 = vld [vmem:[#allocation7 + $0x19a0] sm:$0xff]  ;;  %v2306_v58 = vld [vmem:[#allocation7 + $0x1988] sm:$0xff] }
 0x2f4   : > { %8657 = vmatprep.subr.bf16.mxu1 %v13310_v34  ;;  %v13334_v34 = vcombine.high %v2290_v15, %v2294_v4  ;;  %v2310_v41 = vld [vmem:[#allocation7 + $0x19a8] sm:$0xff] }
 0x2f6   : > { %8074 = vmatpush1.bf16.msra.mxu0 %v13307_v12  ;;  %v13331_v12 = vcombine.low %v2289_v18, %v2293_v5  ;;  %v2313_v18 = vld [vmem:[#allocation7 + $0x19c0] sm:$0xff] }
 0x2f7   : > { %8658 = vmatpush1.bf16.msra.mxu1 %v13309_v52  ;;  %8075 = vmatprep.subr.bf16.mxu0 %v13316_v7  ;;  %v13333_v52 = vcombine.low %v2290_v15, %v2294_v4  ;;  %v13340_v7 = vcombine.high %v2297_v25, %v2301_v6  ;;  %v2317_v5 = vld [vmem:[#allocation7 + $0x19e0] sm:$0xff]  ;;  %v2314_v15 = vld [vmem:[#allocation7 + $0x19c8] sm:$0xff] }
 0x2f8   : > { %8041 = vmatmul.mubr.bf16.gmra.mrb[68].mxu0 %v16553_v60  ;;  %8659 = vmatprep.subr.bf16.mxu1 %v13318_v42  ;;  %v13342_v42 = vcombine.high %v2298_v24, %v2302_v0  ;;  %v2318_v4 = vld [vmem:[#allocation7 + $0x19e8] sm:$0xff] }
 0x2f9   : > { %8625 = vmatmul.mubr.bf16.gmra.mrb[68].mxu1 %v16553_v60  ;;  %8050 = vmatprep.mubr.bf16.mxu0 %v16598_v50 }
 0x2fa   : > { %8076 = vmatpush1.bf16.msra.mxu0 %v13315_v39  ;;  %8634 = vmatprep.mubr.bf16.mxu1 %v16598_v50  ;;  %v13339_v39 = vcombine.low %v2297_v25, %v2301_v6  ;;  %v2321_v25 = vld [vmem:[#allocation7 + $0x1a00] sm:$0xff] }
 0x2fb   : > { %8660 = vmatpush1.bf16.msra.mxu1 %v13317_v2  ;;  %8077 = vmatprep.subr.bf16.mxu0 %v13324_v51  ;;  %v13341_v2 = vcombine.low %v2298_v24, %v2302_v0  ;;  %v13348_v51 = vcombine.high %v2305_v9, %v2309_v16  ;;  %v2325_v6 = vld [vmem:[#allocation7 + $0x1a20] sm:$0xff]  ;;  %v2322_v24 = vld [vmem:[#allocation7 + $0x1a08] sm:$0xff] }
 0x2fc   : > { %8661 = vmatprep.subr.bf16.mxu1 %v13326_v47  ;;  %v13350_v47 = vcombine.high %v2306_v58, %v2310_v41  ;;  %v2326_v0 = vld [vmem:[#allocation7 + $0x1a28] sm:$0xff] }
 0x2fe   : > { %8078 = vmatpush1.bf16.msra.mxu0 %v13323_v57  ;;  %v13347_v57 = vcombine.low %v2305_v9, %v2309_v16  ;;  %v2329_v9 = vld [vmem:[#allocation7 + $0x1a40] sm:$0xff] }
 0x2ff   : > { %8662 = vmatpush1.bf16.msra.mxu1 %v13325_v45  ;;  %8079 = vmatprep.subr.bf16.mxu0 %v13332_v21  ;;  %v13349_v45 = vcombine.low %v2306_v58, %v2310_v41  ;;  %v13356_v21 = vcombine.high %v2313_v18, %v2317_v5  ;;  %v2333_v16 = vld [vmem:[#allocation7 + $0x1a60] sm:$0xff]  ;;  %v2330_v58 = vld [vmem:[#allocation7 + $0x1a48] sm:$0xff] }
 0x300   : > { %8051 = vmatmul.mubr.bf16.gmra.mrb[72].mxu0 %v16589_v38  ;;  %8663 = vmatprep.subr.bf16.mxu1 %v13334_v34  ;;  %v13358_v34 = vcombine.high %v2314_v15, %v2318_v4  ;;  %v2334_v41 = vld [vmem:[#allocation7 + $0x1a68] sm:$0xff] }
 0x301   : > { %8635 = vmatmul.mubr.bf16.gmra.mrb[72].mxu1 %v16589_v38  ;;  %8060 = vmatprep.mubr.bf16.mxu0 %v16634_v56 }
 0x302   : > { %8080 = vmatpush1.bf16.msra.mxu0 %v13331_v12  ;;  %8644 = vmatprep.mubr.bf16.mxu1 %v16634_v56  ;;  %v13355_v12 = vcombine.low %v2313_v18, %v2317_v5  ;;  %v2341_v18 = vld [vmem:[#allocation7 + $0x1aa0] sm:$0xff]  ;;  %v2338_v5 = vld [vmem:[#allocation7 + $0x1a88] sm:$0xff] }
 0x303   : > { %8664 = vmatpush1.bf16.msra.mxu1 %v13333_v52  ;;  %8081 = vmatprep.subr.bf16.mxu0 %v13340_v7  ;;  %v13357_v52 = vcombine.low %v2314_v15, %v2318_v4  ;;  %v13364_v7 = vcombine.high %v2321_v25, %v2325_v6  ;;  %v13371_v15 = vcombine.low %v2329_v9, %v2333_v16 }
 0x304   : > { %8665 = vmatprep.subr.bf16.mxu1 %v13342_v42  ;;  %v13366_v42 = vcombine.high %v2322_v24, %v2326_v0  ;;  %v13373_v4 = vcombine.low %v2330_v58, %v2334_v41 }
 0x306   : > { %8082 = vmatpush1.bf16.msra.mxu0 %v13339_v39  ;;  %v13363_v39 = vcombine.low %v2321_v25, %v2325_v6  ;;  %v2349_v25 = vld [vmem:[#allocation7 + $0x1ae0] sm:$0xff]  ;;  %v2346_v6 = vld [vmem:[#allocation7 + $0x1ac8] sm:$0xff] }
 0x307   : > { %8666 = vmatpush1.bf16.msra.mxu1 %v13341_v2  ;;  %8083 = vmatprep.subr.bf16.mxu0 %v13348_v51  ;;  %v13365_v2 = vcombine.low %v2322_v24, %v2326_v0  ;;  %v13372_v51 = vcombine.high %v2329_v9, %v2333_v16  ;;  %v2357_v9 = vld [vmem:[#allocation7 + $0x1b20] sm:$0xff]  ;;  %v2354_v16 = vld [vmem:[#allocation7 + $0x1b08] sm:$0xff] }
 0x308   : > { %8061 = vmatmul.mubr.bf16.gmra.mrb[76].mxu0 %v16625_v26  ;;  %8667 = vmatprep.subr.bf16.mxu1 %v13350_v47  ;;  %v13374_v47 = vcombine.high %v2330_v58, %v2334_v41 }
 0x309   : > { %8645 = vmatmul.mubr.bf16.gmra.mrb[76].mxu1 %v16625_v26  ;;  %8103 = vmatprep.mubr.bf16.mxu0 %v16648_v32 }
 0x30a   : > { %8084 = vmatpush1.bf16.msra.mxu0 %v13347_v57  ;;  %8687 = vmatprep.mubr.bf16.mxu1 %v16648_v32  ;;  %v2337_v57 = vld [vmem:[#allocation7 + $0x1a80] sm:$0xff] }
 0x30b   : > { %8668 = vmatpush1.bf16.msra.mxu1 %v13349_v45  ;;  %8085 = vmatprep.subr.bf16.mxu0 %v13356_v21  ;;  %v2342_v45 = vld [vmem:[#allocation7 + $0x1aa8] sm:$0xff]  ;;  %v13380_v21 = vcombine.high %v2337_v57, %v2341_v18  ;;  %v13379_v24 = vcombine.low %v2337_v57, %v2341_v18  ;;  %v2365_v57 = vld [vmem:[#allocation7 + $0x1b60] sm:$0xff] }
 0x30c   : > { %8669 = vmatprep.subr.bf16.mxu1 %v13358_v34  ;;  %v13382_v34 = vcombine.high %v2338_v5, %v2342_v45  ;;  %v13381_v0 = vcombine.low %v2338_v5, %v2342_v45  ;;  %v2362_v18 = vld [vmem:[#allocation7 + $0x1b48] sm:$0xff] }
 0x30e   : > { %8086 = vmatpush1.bf16.msra.mxu0 %v13355_v12  ;;  %v2345_v12 = vld [vmem:[#allocation7 + $0x1ac0] sm:$0xff] }
 0x30f   : > { %8670 = vmatpush1.bf16.msra.mxu1 %v13357_v52  ;;  %8087 = vmatprep.subr.bf16.mxu0 %v13364_v7  ;;  %v2350_v52 = vld [vmem:[#allocation7 + $0x1ae8] sm:$0xff]  ;;  %v13388_v7 = vcombine.high %v2345_v12, %v2349_v25  ;;  %v13387_v58 = vcombine.low %v2345_v12, %v2349_v25  ;;  %v2373_v12 = vld [vmem:[#allocation7 + $0x1ba0] sm:$0xff] }
 0x310   : > { %8671 = vmatprep.subr.bf16.mxu1 %v13366_v42  ;;  %v13390_v42 = vcombine.high %v2346_v6, %v2350_v52  ;;  %v13389_v41 = vcombine.low %v2346_v6, %v2350_v52  ;;  %v2370_v25 = vld [vmem:[#allocation7 + $0x1b88] sm:$0xff] }
 0x312   : > { %8088 = vmatpush1.bf16.msra.mxu0 %v13363_v39  ;;  %v2353_v39 = vld [vmem:[#allocation7 + $0x1b00] sm:$0xff] }
 0x313   : > { %8672 = vmatpush1.bf16.msra.mxu1 %v13365_v2  ;;  %8089 = vmatprep.subr.bf16.mxu0 %v13372_v51  ;;  %v2358_v2 = vld [vmem:[#allocation7 + $0x1b28] sm:$0xff]  ;;  %v13396_v51 = vcombine.high %v2353_v39, %v2357_v9  ;;  %v13395_v5 = vcombine.low %v2353_v39, %v2357_v9  ;;  %v2381_v39 = vld [vmem:[#allocation7 + $0x1be0] sm:$0xff] }
 0x314   : > { %8673 = vmatprep.subr.bf16.mxu1 %v13374_v47  ;;  %v13398_v47 = vcombine.high %v2354_v16, %v2358_v2  ;;  %v13397_v45 = vcombine.low %v2354_v16, %v2358_v2  ;;  %v2378_v9 = vld [vmem:[#allocation7 + $0x1bc8] sm:$0xff] }
 0x316   : > { %8090 = vmatpush1.bf16.msra.mxu0 %v13371_v15  ;;  %v2361_v15 = vld [vmem:[#allocation7 + $0x1b40] sm:$0xff] }
 0x317   : > { %8674 = vmatpush1.bf16.msra.mxu1 %v13373_v4  ;;  %8091 = vmatprep.subr.bf16.mxu0 %v13380_v21  ;;  %v2366_v4 = vld [vmem:[#allocation7 + $0x1b68] sm:$0xff]  ;;  %v13404_v21 = vcombine.high %v2361_v15, %v2365_v57  ;;  %v13403_v6 = vcombine.low %v2361_v15, %v2365_v57  ;;  %v2389_v15 = vld [vmem:[#allocation7 + $0x1c20] sm:$0xff] }
 0x318   : > { %8675 = vmatprep.subr.bf16.mxu1 %v13382_v34  ;;  %v13406_v34 = vcombine.high %v2362_v18, %v2366_v4  ;;  %v13405_v52 = vcombine.low %v2362_v18, %v2366_v4  ;;  %v2386_v57 = vld [vmem:[#allocation7 + $0x1c08] sm:$0xff] }
 0x31a   : > { %8092 = vmatpush1.bf16.msra.mxu0 %v13379_v24  ;;  %v2369_v24 = vld [vmem:[#allocation7 + $0x1b80] sm:$0xff] }
 0x31b   : > { %8676 = vmatpush1.bf16.msra.mxu1 %v13381_v0  ;;  %8093 = vmatprep.subr.bf16.mxu0 %v13388_v7  ;;  %v2374_v0 = vld [vmem:[#allocation7 + $0x1ba8] sm:$0xff]  ;;  %v13412_v7 = vcombine.high %v2369_v24, %v2373_v12  ;;  %v13411_v16 = vcombine.low %v2369_v24, %v2373_v12  ;;  %v2397_v24 = vld [vmem:[#allocation7 + $0x1c60] sm:$0xff] }
 0x31c   : > { %8677 = vmatprep.subr.bf16.mxu1 %v13390_v42  ;;  %v13414_v42 = vcombine.high %v2370_v25, %v2374_v0  ;;  %v13413_v2 = vcombine.low %v2370_v25, %v2374_v0  ;;  %v2394_v12 = vld [vmem:[#allocation7 + $0x1c48] sm:$0xff] }
 0x31d   : > { %v2398_v25 = vld [vmem:[#allocation7 + $0x1c68] sm:$0xff] }
 0x31e   : > { %8094 = vmatpush1.bf16.msra.mxu0 %v13387_v58  ;;  %v2377_v58 = vld [vmem:[#allocation7 + $0x1bc0] sm:$0xff] }
 0x31f   : > { %8678 = vmatpush1.bf16.msra.mxu1 %v13389_v41  ;;  %8095 = vmatprep.subr.bf16.mxu0 %v13396_v51  ;;  %v2382_v41 = vld [vmem:[#allocation7 + $0x1be8] sm:$0xff]  ;;  %v13420_v51 = vcombine.high %v2377_v58, %v2381_v39  ;;  %v13419_v18 = vcombine.low %v2377_v58, %v2381_v39  ;;  %v2401_v58 = vld [vmem:[#allocation7 + $0x1c80] sm:$0xff] }
 0x320   : > { %8679 = vmatprep.subr.bf16.mxu1 %v13398_v47  ;;  %v13422_v47 = vcombine.high %v2378_v9, %v2382_v41  ;;  %v13421_v4 = vcombine.low %v2378_v9, %v2382_v41  ;;  %v2405_v39 = vld [vmem:[#allocation7 + $0x1ca0] sm:$0xff]  ;;  %v2402_v9 = vld [vmem:[#allocation7 + $0x1c88] sm:$0xff] }
 0x321   : > { %v2406_v41 = vld [vmem:[#allocation7 + $0x1ca8] sm:$0xff] }
 0x322   : > { %8096 = vmatpush1.bf16.msra.mxu0 %v13395_v5  ;;  %v2385_v5 = vld [vmem:[#allocation7 + $0x1c00] sm:$0xff] }
 0x323   : > { %8680 = vmatpush1.bf16.msra.mxu1 %v13397_v45  ;;  %8097 = vmatprep.subr.bf16.mxu0 %v13404_v21  ;;  %v2390_v45 = vld [vmem:[#allocation7 + $0x1c28] sm:$0xff]  ;;  %v13428_v21 = vcombine.high %v2385_v5, %v2389_v15  ;;  %v13427_v0 = vcombine.low %v2385_v5, %v2389_v15  ;;  %v2409_v5 = vld [vmem:[#allocation7 + $0x1cc0] sm:$0xff] }
 0x324   : > { %8681 = vmatprep.subr.bf16.mxu1 %v13406_v34  ;;  %v13430_v34 = vcombine.high %v2386_v57, %v2390_v45  ;;  %v2413_v15 = vld [vmem:[#allocation7 + $0x1ce0] sm:$0xff] }
 0x326   : > { %8098 = vmatpush1.bf16.msra.mxu0 %v13403_v6  ;;  %v2393_v6 = vld [vmem:[#allocation7 + $0x1c40] sm:$0xff] }
 0x327   : > { %8682 = vmatpush1.bf16.msra.mxu1 %v13405_v52  ;;  %8099 = vmatprep.subr.bf16.mxu0 %v13412_v7  ;;  %v13429_v52 = vcombine.low %v2386_v57, %v2390_v45  ;;  %v13436_v7 = vcombine.high %v2393_v6, %v2397_v24  ;;  %v2410_v57 = vld [vmem:[#allocation7 + $0x1cc8] sm:$0xff] }
 0x328   : > { %8683 = vmatprep.subr.bf16.mxu1 %v13414_v42  ;;  %v13438_v42 = vcombine.high %v2394_v12, %v2398_v25  ;;  %v2414_v45 = vld [vmem:[#allocation7 + $0x1ce8] sm:$0xff] }
 0x32a   : > { %8100 = vmatpush1.bf16.msra.mxu0 %v13411_v16  ;;  %v13435_v16 = vcombine.low %v2393_v6, %v2397_v24  ;;  %v2417_v6 = vld [vmem:[#allocation7 + $0x1d00] sm:$0xff] }
 0x32b   : > { %8684 = vmatpush1.bf16.msra.mxu1 %v13413_v2  ;;  %8101 = vmatprep.subr.bf16.mxu0 %v13420_v51  ;;  %v13437_v2 = vcombine.low %v2394_v12, %v2398_v25  ;;  %v13444_v51 = vcombine.high %v2401_v58, %v2405_v39  ;;  %v2421_v24 = vld [vmem:[#allocation7 + $0x1d20] sm:$0xff]  ;;  %v2418_v12 = vld [vmem:[#allocation7 + $0x1d08] sm:$0xff] }
 0x32c   : > { %8685 = vmatprep.subr.bf16.mxu1 %v13422_v47  ;;  %v13446_v47 = vcombine.high %v2402_v9, %v2406_v41  ;;  %v2422_v25 = vld [vmem:[#allocation7 + $0x1d28] sm:$0xff] }
 0x32e   : > { %8102 = vmatpush1.bf16.msra.mxu0 %v13419_v18  ;;  %v13443_v18 = vcombine.low %v2401_v58, %v2405_v39  ;;  %v2425_v58 = vld [vmem:[#allocation7 + $0x1d40] sm:$0xff] }
 0x32f   : > { %8686 = vmatpush1.bf16.msra.mxu1 %v13421_v4  ;;  %8144 = vmatprep.subr.bf16.mxu0 %v13428_v21  ;;  %v13445_v4 = vcombine.low %v2402_v9, %v2406_v41  ;;  %v13452_v21 = vcombine.high %v2409_v5, %v2413_v15  ;;  %v2429_v39 = vld [vmem:[#allocation7 + $0x1d60] sm:$0xff]  ;;  %v2426_v9 = vld [vmem:[#allocation7 + $0x1d48] sm:$0xff] }
 0x330   : > { %8728 = vmatprep.subr.bf16.mxu1 %v13430_v34  ;;  %v13454_v34 = vcombine.high %v2410_v57, %v2414_v45  ;;  %v2430_v41 = vld [vmem:[#allocation7 + $0x1d68] sm:$0xff] }
 0x331   : > { %8104 = vmatmul.mubr.bf16.vlgmr.msra.gmra.mrb[64].mxu0 %v16642_v36 }
 0x332   : > { %8688 = vmatmul.mubr.bf16.vlgmr.msra.gmra.mrb[64].mxu1 %v16642_v36  ;;  %8113 = vmatprep.mubr.bf16.mxu0 %v16680_v62 }
 0x333   : > { %8145 = vmatpush1.bf16.msra.mxu0 %v13427_v0  ;;  %8697 = vmatprep.mubr.bf16.mxu1 %v16680_v62  ;;  %v13451_v0 = vcombine.low %v2409_v5, %v2413_v15  ;;  %v2433_v5 = vld [vmem:[#allocation7 + $0x1d80] sm:$0xff] }
 0x334   : > { %8729 = vmatpush1.bf16.msra.mxu1 %v13429_v52  ;;  %8146 = vmatprep.subr.bf16.mxu0 %v13436_v7  ;;  %v13453_v52 = vcombine.low %v2410_v57, %v2414_v45  ;;  %v13460_v7 = vcombine.high %v2417_v6, %v2421_v24  ;;  %v2437_v15 = vld [vmem:[#allocation7 + $0x1da0] sm:$0xff]  ;;  %v2434_v57 = vld [vmem:[#allocation7 + $0x1d88] sm:$0xff] }
 0x335   : > { %8730 = vmatprep.subr.bf16.mxu1 %v13438_v42  ;;  %v13462_v42 = vcombine.high %v2418_v12, %v2422_v25  ;;  %v2438_v45 = vld [vmem:[#allocation7 + $0x1da8] sm:$0xff] }
 0x337   : > { %8147 = vmatpush1.bf16.msra.mxu0 %v13435_v16  ;;  %v13459_v16 = vcombine.low %v2417_v6, %v2421_v24  ;;  %v2441_v6 = vld [vmem:[#allocation7 + $0x1dc0] sm:$0xff] }
 0x338   : > { %8731 = vmatpush1.bf16.msra.mxu1 %v13437_v2  ;;  %8148 = vmatprep.subr.bf16.mxu0 %v13444_v51  ;;  %v13461_v2 = vcombine.low %v2418_v12, %v2422_v25  ;;  %v13468_v51 = vcombine.high %v2425_v58, %v2429_v39  ;;  %v2445_v24 = vld [vmem:[#allocation7 + $0x1de0] sm:$0xff]  ;;  %v2442_v12 = vld [vmem:[#allocation7 + $0x1dc8] sm:$0xff] }
 0x339   : > { %8114 = vmatmul.mubr.bf16.gmra.mrb[68].mxu0 %v16674_v3  ;;  %8732 = vmatprep.subr.bf16.mxu1 %v13446_v47  ;;  %v13470_v47 = vcombine.high %v2426_v9, %v2430_v41  ;;  %v2446_v25 = vld [vmem:[#allocation7 + $0x1de8] sm:$0xff] }
 0x33a   : > { %8698 = vmatmul.mubr.bf16.gmra.mrb[68].mxu1 %v16674_v3  ;;  %8123 = vmatprep.mubr.bf16.mxu0 %v16712_v19 }
 0x33b   : > { %8149 = vmatpush1.bf16.msra.mxu0 %v13443_v18  ;;  %8707 = vmatprep.mubr.bf16.mxu1 %v16712_v19  ;;  %v13467_v18 = vcombine.low %v2425_v58, %v2429_v39  ;;  %v2449_v58 = vld [vmem:[#allocation7 + $0x1e00] sm:$0xff] }
 0x33c   : > { %8733 = vmatpush1.bf16.msra.mxu1 %v13445_v4  ;;  %8150 = vmatprep.subr.bf16.mxu0 %v13452_v21  ;;  %v13469_v4 = vcombine.low %v2426_v9, %v2430_v41  ;;  %v13476_v21 = vcombine.high %v2433_v5, %v2437_v15  ;;  %v2453_v39 = vld [vmem:[#allocation7 + $0x1e20] sm:$0xff]  ;;  %v2450_v9 = vld [vmem:[#allocation7 + $0x1e08] sm:$0xff] }
 0x33d   : > { %8734 = vmatprep.subr.bf16.mxu1 %v13454_v34  ;;  %v13478_v34 = vcombine.high %v2434_v57, %v2438_v45  ;;  %v2454_v41 = vld [vmem:[#allocation7 + $0x1e28] sm:$0xff] }
 0x33f   : > { %8151 = vmatpush1.bf16.msra.mxu0 %v13451_v0  ;;  %v13475_v0 = vcombine.low %v2433_v5, %v2437_v15  ;;  %v2457_v5 = vld [vmem:[#allocation7 + $0x1e40] sm:$0xff] }
 0x340   : > { %8735 = vmatpush1.bf16.msra.mxu1 %v13453_v52  ;;  %8152 = vmatprep.subr.bf16.mxu0 %v13460_v7  ;;  %v13477_v52 = vcombine.low %v2434_v57, %v2438_v45  ;;  %v13484_v7 = vcombine.high %v2441_v6, %v2445_v24  ;;  %v2461_v15 = vld [vmem:[#allocation7 + $0x1e60] sm:$0xff]  ;;  %v2458_v57 = vld [vmem:[#allocation7 + $0x1e48] sm:$0xff] }
 0x341   : > { %8124 = vmatmul.mubr.bf16.gmra.mrb[72].mxu0 %v16706_v40  ;;  %8736 = vmatprep.subr.bf16.mxu1 %v13462_v42  ;;  %v13486_v42 = vcombine.high %v2442_v12, %v2446_v25  ;;  %v2462_v45 = vld [vmem:[#allocation7 + $0x1e68] sm:$0xff] }
 0x342   : > { %8708 = vmatmul.mubr.bf16.gmra.mrb[72].mxu1 %v16706_v40  ;;  %8133 = vmatprep.mubr.bf16.mxu0 %v16744_v63 }
 0x343   : > { %8153 = vmatpush1.bf16.msra.mxu0 %v13459_v16  ;;  %8717 = vmatprep.mubr.bf16.mxu1 %v16744_v63  ;;  %v13483_v16 = vcombine.low %v2441_v6, %v2445_v24  ;;  %v2469_v6 = vld [vmem:[#allocation7 + $0x1ea0] sm:$0xff]  ;;  %v2466_v24 = vld [vmem:[#allocation7 + $0x1e88] sm:$0xff] }
 0x344   : > { %8737 = vmatpush1.bf16.msra.mxu1 %v13461_v2  ;;  %8154 = vmatprep.subr.bf16.mxu0 %v13468_v51  ;;  %v13485_v2 = vcombine.low %v2442_v12, %v2446_v25  ;;  %v13492_v51 = vcombine.high %v2449_v58, %v2453_v39  ;;  %v13499_v12 = vcombine.low %v2457_v5, %v2461_v15 }
 0x345   : > { %8738 = vmatprep.subr.bf16.mxu1 %v13470_v47  ;;  %v13494_v47 = vcombine.high %v2450_v9, %v2454_v41  ;;  %v13501_v25 = vcombine.low %v2458_v57, %v2462_v45 }
 0x347   : > { %8155 = vmatpush1.bf16.msra.mxu0 %v13467_v18  ;;  %v13491_v18 = vcombine.low %v2449_v58, %v2453_v39  ;;  %v2477_v58 = vld [vmem:[#allocation7 + $0x1ee0] sm:$0xff]  ;;  %v2474_v39 = vld [vmem:[#allocation7 + $0x1ec8] sm:$0xff] }
 0x348   : > { %8739 = vmatpush1.bf16.msra.mxu1 %v13469_v4  ;;  %8156 = vmatprep.subr.bf16.mxu0 %v13476_v21  ;;  %v13493_v4 = vcombine.low %v2450_v9, %v2454_v41  ;;  %v13500_v21 = vcombine.high %v2457_v5, %v2461_v15  ;;  %v2485_v5 = vld [vmem:[#allocation7 + $0x1f20] sm:$0xff]  ;;  %v2482_v15 = vld [vmem:[#allocation7 + $0x1f08] sm:$0xff] }
 0x349   : > { %8134 = vmatmul.mubr.bf16.gmra.mrb[76].mxu0 %v16738_v10  ;;  %8740 = vmatprep.subr.bf16.mxu1 %v13478_v34  ;;  %v13502_v34 = vcombine.high %v2458_v57, %v2462_v45 }
 0x34a   : > { %8718 = vmatmul.mubr.bf16.gmra.mrb[76].mxu1 %v16738_v10  ;;  %8176 = vmatprep.mubr.bf16.mxu0 %v16666_v13 }
 0x34b   : > { %8157 = vmatpush1.bf16.msra.mxu0 %v13475_v0  ;;  %8760 = vmatprep.mubr.bf16.mxu1 %v16666_v13  ;;  %v2465_v0 = vld [vmem:[#allocation7 + $0x1e80] sm:$0xff] }
 0x34c   : > { %8741 = vmatpush1.bf16.msra.mxu1 %v13477_v52  ;;  %8158 = vmatprep.subr.bf16.mxu0 %v13484_v7  ;;  %v2470_v52 = vld [vmem:[#allocation7 + $0x1ea8] sm:$0xff]  ;;  %v13508_v7 = vcombine.high %v2465_v0, %v2469_v6  ;;  %v13507_v9 = vcombine.low %v2465_v0, %v2469_v6  ;;  %v2493_v0 = vld [vmem:[#allocation7 + $0x1f60] sm:$0xff] }
 0x34d   : > { %8742 = vmatprep.subr.bf16.mxu1 %v13486_v42  ;;  %v13510_v42 = vcombine.high %v2466_v24, %v2470_v52  ;;  %v13509_v41 = vcombine.low %v2466_v24, %v2470_v52  ;;  %v2490_v6 = vld [vmem:[#allocation7 + $0x1f48] sm:$0xff] }
 0x34e   : > { %v19254_v13 = vld [vmem:[#allocation151_spill] sm:$0xff] }
 0x34f   : > { %8159 = vmatpush1.bf16.msra.mxu0 %v13483_v16  ;;  %v2473_v16 = vld [vmem:[#allocation7 + $0x1ec0] sm:$0xff] }
 0x350   : > { %8743 = vmatpush1.bf16.msra.mxu1 %v13485_v2  ;;  %8160 = vmatprep.subr.bf16.mxu0 %v13492_v51  ;;  %v2478_v2 = vld [vmem:[#allocation7 + $0x1ee8] sm:$0xff]  ;;  %v13516_v51 = vcombine.high %v2473_v16, %v2477_v58  ;;  %v13515_v57 = vcombine.low %v2473_v16, %v2477_v58  ;;  %v2501_v16 = vld [vmem:[#allocation7 + $0x1fa0] sm:$0xff] }
 0x351   : > { %8744 = vmatprep.subr.bf16.mxu1 %v13494_v47  ;;  %v13518_v47 = vcombine.high %v2474_v39, %v2478_v2  ;;  %v13517_v45 = vcombine.low %v2474_v39, %v2478_v2  ;;  %v2498_v58 = vld [vmem:[#allocation7 + $0x1f88] sm:$0xff] }
 0x353   : > { %8161 = vmatpush1.bf16.msra.mxu0 %v13491_v18  ;;  %v2481_v18 = vld [vmem:[#allocation7 + $0x1f00] sm:$0xff] }
 0x354   : > { %8745 = vmatpush1.bf16.msra.mxu1 %v13493_v4  ;;  %8162 = vmatprep.subr.bf16.mxu0 %v13500_v21  ;;  %v2486_v4 = vld [vmem:[#allocation7 + $0x1f28] sm:$0xff]  ;;  %v13524_v21 = vcombine.high %v2481_v18, %v2485_v5  ;;  %v13523_v24 = vcombine.low %v2481_v18, %v2485_v5  ;;  %v2509_v18 = vld [vmem:[#allocation7 + $0x1fe0] sm:$0xff] }
 0x355   : > { %8746 = vmatprep.subr.bf16.mxu1 %v13502_v34  ;;  %v13526_v34 = vcombine.high %v2482_v15, %v2486_v4  ;;  %v13525_v52 = vcombine.low %v2482_v15, %v2486_v4  ;;  %v2506_v5 = vld [vmem:[#allocation7 + $0x1fc8] sm:$0xff] }
 0x357   : > { %8163 = vmatpush1.bf16.msra.mxu0 %v13499_v12  ;;  %v2489_v12 = vld [vmem:[#allocation7 + $0x1f40] sm:$0xff] }
 0x358   : > { %8747 = vmatpush1.bf16.msra.mxu1 %v13501_v25  ;;  %8164 = vmatprep.subr.bf16.mxu0 %v13508_v7  ;;  %v2494_v25 = vld [vmem:[#allocation7 + $0x1f68] sm:$0xff]  ;;  %v13532_v7 = vcombine.high %v2489_v12, %v2493_v0  ;;  %v13531_v39 = vcombine.low %v2489_v12, %v2493_v0  ;;  %v1495_v12 = vld [vmem:[#allocation7 + $0x30] sm:$0xff]  ;;  %v1492_v0 = vld [vmem:[#allocation7 + $0x18] sm:$0xff] }
 0x359   : > { %8748 = vmatprep.subr.bf16.mxu1 %v13510_v42  ;;  %v13534_v42 = vcombine.high %v2490_v6, %v2494_v25  ;;  %v13533_v2 = vcombine.low %v2490_v6, %v2494_v25 }
 0x35b   : > { %8165 = vmatpush1.bf16.msra.mxu0 %v13507_v9  ;;  %v2497_v9 = vld [vmem:[#allocation7 + $0x1f80] sm:$0xff] }
 0x35c   : > { %8749 = vmatpush1.bf16.msra.mxu1 %v13509_v41  ;;  %8166 = vmatprep.subr.bf16.mxu0 %v13516_v51  ;;  %v2502_v41 = vld [vmem:[#allocation7 + $0x1fa8] sm:$0xff]  ;;  %v13540_v51 = vcombine.high %v2497_v9, %v2501_v16  ;;  %v13539_v15 = vcombine.low %v2497_v9, %v2501_v16  ;;  %v1503_v9 = vld [vmem:[#allocation7 + $0x70] sm:$0xff]  ;;  %v1500_v16 = vld [vmem:[#allocation7 + $0x58] sm:$0xff] }
 0x35d   : > { %8750 = vmatprep.subr.bf16.mxu1 %v13518_v47  ;;  %v13542_v47 = vcombine.high %v2498_v58, %v2502_v41  ;;  %v13541_v4 = vcombine.low %v2498_v58, %v2502_v41  ;;  %v1504_v58 = vld [vmem:[#allocation7 + $0x78] sm:$0xff] }
 0x35f   : > { %8167 = vmatpush1.bf16.msra.mxu0 %v13515_v57  ;;  %v2505_v57 = vld [vmem:[#allocation7 + $0x1fc0] sm:$0xff] }
 0x360   : > { %8751 = vmatpush1.bf16.msra.mxu1 %v13517_v45  ;;  %8168 = vmatprep.subr.bf16.mxu0 %v13524_v21  ;;  %v2510_v45 = vld [vmem:[#allocation7 + $0x1fe8] sm:$0xff]  ;;  %v13548_v21 = vcombine.high %v2505_v57, %v2509_v18  ;;  %v13547_v6 = vcombine.low %v2505_v57, %v2509_v18  ;;  %v12546_v57 = vcombine.high %v1500_v16, %v1504_v58  ;;  %v1507_v18 = vld [vmem:[#allocation7 + $0x90] sm:$0xff] }
 0x361   : > { %8752 = vmatprep.subr.bf16.mxu1 %v13526_v34  ;;  %v13550_v34 = vcombine.high %v2506_v5, %v2510_v45  ;;  %v13549_v25 = vcombine.low %v2506_v5, %v2510_v45  ;;  %v19253_v5 = vld [vmem:[#allocation154_spill] sm:$0xff] }
 0x362   : > { %v1508_v45 = vld [vmem:[#allocation7 + $0x98] sm:$0xff] }
 0x363   : > { %8169 = vmatpush1.bf16.msra.mxu0 %v13523_v24  ;;  %v1491_v24 = vld [vmem:[#allocation7 + $0x10] sm:$0xff] }
 0x364   : > { %8753 = vmatpush1.bf16.msra.mxu1 %v13525_v52  ;;  %8170 = vmatprep.subr.bf16.mxu0 %v13532_v7  ;;  %v1496_v52 = vld [vmem:[#allocation7 + $0x38] sm:$0xff]  ;;  %v12536_v7 = vcombine.high %v1491_v24, %v1495_v12  ;;  %v12535_v41 = vcombine.low %v1491_v24, %v1495_v12 }
 0x365   : > { %8754 = vmatprep.subr.bf16.mxu1 %v13534_v42  ;;  %v12538_v42 = vcombine.high %v1492_v0, %v1496_v52 }
 0x367   : > { %8171 = vmatpush1.bf16.msra.mxu0 %v13531_v39  ;;  %v1499_v39 = vld [vmem:[#allocation7 + $0x50] sm:$0xff] }
 0x368   : > { %8755 = vmatpush1.bf16.msra.mxu1 %v13533_v2  ;;  %8172 = vmatprep.subr.bf16.mxu0 %v13540_v51  ;;  %v12537_v2 = vcombine.low %v1492_v0, %v1496_v52  ;;  %v12544_v51 = vcombine.high %v1499_v39, %v1503_v9  ;;  %v1515_v0 = vld [vmem:[#allocation7 + $0xd0] sm:$0xff] }
 0x369   : > { %8756 = vmatprep.subr.bf16.mxu1 %v13542_v47  ;;  %v19252_v47 = vld [vmem:[#allocation141_spill] sm:$0xff] }
 0x36a   : > { %v1519_v52 = vld [vmem:[#allocation7 + $0xf0] sm:$0xff] }
 0x36b   : > { %8173 = vmatpush1.bf16.msra.mxu0 %v13539_v15  ;;  %v1511_v15 = vld [vmem:[#allocation7 + $0xb0] sm:$0xff] }
 0x36c   : > { %8757 = vmatpush1.bf16.msra.mxu1 %v13541_v4  ;;  %8174 = vmatprep.subr.bf16.mxu0 %v13548_v21  ;;  %v1512_v4 = vld [vmem:[#allocation7 + $0xb8] sm:$0xff]  ;;  %v12543_v21 = vcombine.low %v1499_v39, %v1503_v9  ;;  %v12552_v24 = vcombine.high %v1507_v18, %v1511_v15  ;;  %v1523_v9 = vld [vmem:[#allocation7 + $0x110] sm:$0xff] }
 0x36d   : > { %8758 = vmatprep.subr.bf16.mxu1 %v13550_v34  ;;  %v12545_v34 = vcombine.low %v1500_v16, %v1504_v58  ;;  %v12554_v12 = vcombine.high %v1508_v45, %v1512_v4  ;;  %v19255_v16 = vld [vmem:[#allocation164_spill] sm:$0xff]  ;;  %v1524_v58 = vld [vmem:[#allocation7 + $0x118] sm:$0xff] }
 0x36f   : > { %8175 = vmatpush1.bf16.msra.mxu0 %v13547_v6  ;;  %v1516_v6 = vld [vmem:[#allocation7 + $0xd8] sm:$0xff] }
 0x370   : > { %8759 = vmatpush1.bf16.msra.mxu1 %v13549_v25  ;;  %8801 = vmatprep.subr.bf16.mxu0 %v12536_v7  ;;  %v1520_v25 = vld [vmem:[#allocation7 + $0xf8] sm:$0xff]  ;;  %v12551_v7 = vcombine.low %v1507_v18, %v1511_v15 }
 0x371   : > { %9385 = vmatprep.subr.bf16.mxu1 %v12538_v42  ;;  %v12553_v42 = vcombine.low %v1508_v45, %v1512_v4  ;;  %v12562_v39 = vcombine.high %v1516_v6, %v1520_v25  ;;  %v1531_v45 = vld [vmem:[#allocation7 + $0x150] sm:$0xff] }
 0x372   : > { %8177 = vmatmul.mubr.bf16.vlgmr.msra.gmra.mrb[64].mxu0 %v19252_v47  ;;  %v1535_v4 = vld [vmem:[#allocation7 + $0x170] sm:$0xff] }
 0x373   : > { %8761 = vmatmul.mubr.bf16.vlgmr.msra.gmra.mrb[64].mxu1 %v19252_v47  ;;  %8186 = vmatprep.mubr.bf16.mxu0 %v19253_v5  ;;  %v12560_v47 = vcombine.high %v1515_v0, %v1519_v52 }
 0x374   : > { %8770 = vmatprep.mubr.bf16.mxu1 %v19253_v5  ;;  %8802 = vmatpush1.bf16.msra.mxu0 %v12535_v41  ;;  %v1527_v41 = vld [vmem:[#allocation7 + $0x130] sm:$0xff] }
 0x375   : > { %9386 = vmatpush1.bf16.msra.mxu1 %v12537_v2  ;;  %8803 = vmatprep.subr.bf16.mxu0 %v12544_v51  ;;  %v1528_v2 = vld [vmem:[#allocation7 + $0x138] sm:$0xff]  ;;  %v12559_v51 = vcombine.low %v1515_v0, %v1519_v52  ;;  %v12568_v18 = vcombine.high %v1523_v9, %v1527_v41  ;;  %v1539_v52 = vld [vmem:[#allocation7 + $0x190] sm:$0xff] }
 0x376   : > { %9387 = vmatprep.subr.bf16.mxu1 %v12546_v57  ;;  %v12561_v57 = vcombine.low %v1516_v6, %v1520_v25  ;;  %v12570_v15 = vcombine.high %v1524_v58, %v1528_v2  ;;  %v19256_v5 = vld [vmem:[#allocation161_spill] sm:$0xff] }
 0x377   : > { %v1540_v6 = vld [vmem:[#allocation7 + $0x198] sm:$0xff] }
 0x378   : > { %8804 = vmatpush1.bf16.msra.mxu0 %v12543_v21  ;;  %v1532_v21 = vld [vmem:[#allocation7 + $0x158] sm:$0xff] }
 0x379   : > { %9388 = vmatpush1.bf16.msra.mxu1 %v12545_v34  ;;  %8805 = vmatprep.subr.bf16.mxu0 %v12552_v24  ;;  %v1536_v34 = vld [vmem:[#allocation7 + $0x178] sm:$0xff]  ;;  %v12567_v24 = vcombine.low %v1523_v9, %v1527_v41  ;;  %v1547_v41 = vld [vmem:[#allocation7 + $0x1d0] sm:$0xff] }
 0x37a   : > { %8187 = vmatmul.mubr.bf16.gmra.mrb[68].mxu0 %v19254_v13  ;;  %9389 = vmatprep.subr.bf16.mxu1 %v12554_v12  ;;  %v12569_v12 = vcombine.low %v1524_v58, %v1528_v2  ;;  %v12578_v0 = vcombine.high %v1532_v21, %v1536_v34  ;;  %v1544_v25 = vld [vmem:[#allocation7 + $0x1b8] sm:$0xff]  ;;  %v1551_v58 = vld [vmem:[#allocation7 + $0x1f0] sm:$0xff] }
 0x37b   : > { %8771 = vmatmul.mubr.bf16.gmra.mrb[68].mxu1 %v19254_v13  ;;  %8196 = vmatprep.mubr.bf16.mxu0 %v19255_v16  ;;  %v12576_v13 = vcombine.high %v1531_v45, %v1535_v4  ;;  %v12586_v9 = vcombine.high %v1540_v6, %v1544_v25  ;;  %v1548_v2 = vld [vmem:[#allocation7 + $0x1d8] sm:$0xff] }
 0x37c   : > { %8780 = vmatprep.mubr.bf16.mxu1 %v19255_v16  ;;  %8806 = vmatpush1.bf16.msra.mxu0 %v12551_v7  ;;  %v12575_v7 = vcombine.low %v1531_v45, %v1535_v4  ;;  %v1555_v4 = vld [vmem:[#allocation7 + $0x210] sm:$0xff] }
 0x37d   : > { %9390 = vmatpush1.bf16.msra.mxu1 %v12553_v42  ;;  %8807 = vmatprep.subr.bf16.mxu0 %v12560_v47  ;;  %v1543_v47 = vld [vmem:[#allocation7 + $0x1b0] sm:$0xff]  ;;  %v12577_v42 = vcombine.low %v1532_v21, %v1536_v34  ;;  %v1556_v34 = vld [vmem:[#allocation7 + $0x218] sm:$0xff] }
 0x37e   : > { %9391 = vmatprep.subr.bf16.mxu1 %v12562_v39  ;;  %v12584_v39 = vcombine.high %v1539_v52, %v1543_v47  ;;  %v19257_v21 = vld [vmem:[#allocation24_spill] sm:$0xff] }
 0x380   : > { %8808 = vmatpush1.bf16.msra.mxu0 %v12559_v51  ;;  %v1552_v51 = vld [vmem:[#allocation7 + $0x1f8] sm:$0xff] }
 0x381   : > { %9392 = vmatpush1.bf16.msra.mxu1 %v12561_v57  ;;  %8809 = vmatprep.subr.bf16.mxu0 %v12568_v18  ;;  %v12583_v57 = vcombine.low %v1539_v52, %v1543_v47  ;;  %v12585_v18 = vcombine.low %v1540_v6, %v1544_v25  ;;  %v12594_v45 = vcombine.high %v1548_v2, %v1552_v51  ;;  %v1563_v6 = vld [vmem:[#allocation7 + $0x250] sm:$0xff] }
 0x382   : > { %8197 = vmatmul.mubr.bf16.gmra.mrb[72].mxu0 %v19256_v5  ;;  %9393 = vmatprep.subr.bf16.mxu1 %v12570_v15  ;;  %v12592_v15 = vcombine.high %v1547_v41, %v1551_v58  ;;  %v1567_v25 = vld [vmem:[#allocation7 + $0x270] sm:$0xff] }
 0x383   : > { %8781 = vmatmul.mubr.bf16.gmra.mrb[72].mxu1 %v19256_v5  ;;  %8206 = vmatprep.mubr.bf16.mxu0 %v16760_v29 }
 0x384   : > { %8790 = vmatprep.mubr.bf16.mxu1 %v16760_v29  ;;  %8810 = vmatpush1.bf16.msra.mxu0 %v12567_v24  ;;  %v1560_v24 = vld [vmem:[#allocation7 + $0x238] sm:$0xff] }
 0x385   : > { %9394 = vmatpush1.bf16.msra.mxu1 %v12569_v12  ;;  %8811 = vmatprep.subr.bf16.mxu0 %v12576_v13  ;;  %v1559_v13 = vld [vmem:[#allocation7 + $0x230] sm:$0xff]  ;;  %v12591_v12 = vcombine.low %v1547_v41, %v1551_v58  ;;  %v12602_v47 = vcombine.high %v1556_v34, %v1560_v24  ;;  %v1572_v58 = vld [vmem:[#allocation7 + $0x298] sm:$0xff] }
 0x386   : > { %9395 = vmatprep.subr.bf16.mxu1 %v12578_v0  ;;  %v12593_v0 = vcombine.low %v1548_v2, %v1552_v51  ;;  %v12600_v52 = vcombine.high %v1555_v4, %v1559_v13  ;;  %v1575_v41 = vld [vmem:[#allocation7 + $0x2b0] sm:$0xff]  ;;  %v12607_v2 = vcombine.low %v1563_v6, %v1567_v25 }
 0x388   : > { %8812 = vmatpush1.bf16.msra.mxu0 %v12575_v7  ;;  %v1564_v7 = vld [vmem:[#allocation7 + $0x258] sm:$0xff] }
 0x389   : > { %9396 = vmatpush1.bf16.msra.mxu1 %v12577_v42  ;;  %8813 = vmatprep.subr.bf16.mxu0 %v12584_v39  ;;  %v1568_v42 = vld [vmem:[#allocation7 + $0x278] sm:$0xff]  ;;  %v12599_v39 = vcombine.low %v1555_v4, %v1559_v13  ;;  %v1583_v4 = vld [vmem:[#allocation7 + $0x2f0] sm:$0xff] }
 0x38a   : > { %8207 = vmatmul.mubr.bf16.gmra.mrb[76].mxu0 %v16754_v27  ;;  %9397 = vmatprep.subr.bf16.mxu1 %v12586_v9  ;;  %v12601_v9 = vcombine.low %v1556_v34, %v1560_v24  ;;  %v12609_v51 = vcombine.low %v1564_v7, %v1568_v42  ;;  %v1580_v13 = vld [vmem:[#allocation7 + $0x2d8] sm:$0xff] }
 0x38b   : > { %8791 = vmatmul.mubr.bf16.gmra.mrb[76].mxu1 %v16754_v27  ;;  %8833 = vmatprep.mubr.bf16.mxu0 %v19257_v21  ;;  %v12608_v27 = vcombine.high %v1563_v6, %v1567_v25  ;;  %v1591_v6 = vld [vmem:[#allocation7 + $0x330] sm:$0xff]  ;;  %v1588_v25 = vld [vmem:[#allocation7 + $0x318] sm:$0xff] }
 0x38c   : > { %8814 = vmatpush1.bf16.msra.mxu0 %v12583_v57  ;;  %9417 = vmatprep.mubr.bf16.mxu1 %v19257_v21  ;;  %v12610_v57 = vcombine.high %v1564_v7, %v1568_v42  ;;  %v1571_v21 = vld [vmem:[#allocation7 + $0x290] sm:$0xff] }
 0x38d   : > { %9398 = vmatpush1.bf16.msra.mxu1 %v12585_v18  ;;  %8815 = vmatprep.subr.bf16.mxu0 %v12592_v15  ;;  %v1576_v18 = vld [vmem:[#allocation7 + $0x2b8] sm:$0xff]  ;;  %v12616_v15 = vcombine.high %v1571_v21, %v1575_v41  ;;  %v12615_v34 = vcombine.low %v1571_v21, %v1575_v41  ;;  %v1599_v21 = vld [vmem:[#allocation7 + $0x370] sm:$0xff] }
 0x38e   : > { %9399 = vmatprep.subr.bf16.mxu1 %v12594_v45  ;;  %v12618_v45 = vcombine.high %v1572_v58, %v1576_v18  ;;  %v12617_v24 = vcombine.low %v1572_v58, %v1576_v18  ;;  %v1596_v41 = vld [vmem:[#allocation7 + $0x358] sm:$0xff] }
 0x390   : > { %8816 = vmatpush1.bf16.msra.mxu0 %v12591_v12  ;;  %v1579_v12 = vld [vmem:[#allocation7 + $0x2d0] sm:$0xff] }
 0x391   : > { %9400 = vmatpush1.bf16.msra.mxu1 %v12593_v0  ;;  %8817 = vmatprep.subr.bf16.mxu0 %v12600_v52  ;;  %v1584_v0 = vld [vmem:[#allocation7 + $0x2f8] sm:$0xff]  ;;  %v12624_v52 = vcombine.high %v1579_v12, %v1583_v4  ;;  %v12623_v7 = vcombine.low %v1579_v12, %v1583_v4  ;;  %v1607_v12 = vld [vmem:[#allocation7 + $0x3b0] sm:$0xff] }
 0x392   : > { %9401 = vmatprep.subr.bf16.mxu1 %v12602_v47  ;;  %v12626_v47 = vcombine.high %v1580_v13, %v1584_v0  ;;  %v12625_v42 = vcombine.low %v1580_v13, %v1584_v0  ;;  %v1604_v4 = vld [vmem:[#allocation7 + $0x398] sm:$0xff] }
 0x394   : > { %8818 = vmatpush1.bf16.msra.mxu0 %v12599_v39  ;;  %v1587_v39 = vld [vmem:[#allocation7 + $0x310] sm:$0xff] }
 0x395   : > { %9402 = vmatpush1.bf16.msra.mxu1 %v12601_v9  ;;  %8819 = vmatprep.subr.bf16.mxu0 %v12608_v27  ;;  %v1592_v27 = vld [vmem:[#allocation7 + $0x338] sm:$0xff]  ;;  %v12632_v9 = vcombine.high %v1587_v39, %v1591_v6  ;;  %v12631_v58 = vcombine.low %v1587_v39, %v1591_v6  ;;  %v1615_v39 = vld [vmem:[#allocation7 + $0x3f0] sm:$0xff] }
 0x396   : > { %9403 = vmatprep.subr.bf16.mxu1 %v12610_v57  ;;  %v12634_v57 = vcombine.high %v1588_v25, %v1592_v27  ;;  %v12633_v18 = vcombine.low %v1588_v25, %v1592_v27  ;;  %v1612_v6 = vld [vmem:[#allocation7 + $0x3d8] sm:$0xff] }
 0x398   : > { %8820 = vmatpush1.bf16.msra.mxu0 %v12607_v2  ;;  %v1595_v2 = vld [vmem:[#allocation7 + $0x350] sm:$0xff] }
 0x399   : > { %9404 = vmatpush1.bf16.msra.mxu1 %v12609_v51  ;;  %8821 = vmatprep.subr.bf16.mxu0 %v12616_v15  ;;  %v1600_v51 = vld [vmem:[#allocation7 + $0x378] sm:$0xff]  ;;  %v12640_v15 = vcombine.high %v1595_v2, %v1599_v21  ;;  %v12639_v13 = vcombine.low %v1595_v2, %v1599_v21  ;;  %v1623_v2 = vld [vmem:[#allocation7 + $0x430] sm:$0xff] }
 0x39a   : > { %9405 = vmatprep.subr.bf16.mxu1 %v12618_v45  ;;  %v12642_v45 = vcombine.high %v1596_v41, %v1600_v51  ;;  %v12641_v0 = vcombine.low %v1596_v41, %v1600_v51  ;;  %v1620_v21 = vld [vmem:[#allocation7 + $0x418] sm:$0xff] }
 0x39c   : > { %8822 = vmatpush1.bf16.msra.mxu0 %v12615_v34  ;;  %v1603_v34 = vld [vmem:[#allocation7 + $0x390] sm:$0xff] }
 0x39d   : > { %9406 = vmatpush1.bf16.msra.mxu1 %v12617_v24  ;;  %8823 = vmatprep.subr.bf16.mxu0 %v12624_v52  ;;  %v1608_v24 = vld [vmem:[#allocation7 + $0x3b8] sm:$0xff]  ;;  %v12648_v52 = vcombine.high %v1603_v34, %v1607_v12  ;;  %v12647_v25 = vcombine.low %v1603_v34, %v1607_v12  ;;  %v1631_v34 = vld [vmem:[#allocation7 + $0x470] sm:$0xff] }
 0x39e   : > { %9407 = vmatprep.subr.bf16.mxu1 %v12626_v47  ;;  %v12650_v47 = vcombine.high %v1604_v4, %v1608_v24  ;;  %v12649_v27 = vcombine.low %v1604_v4, %v1608_v24  ;;  %v1628_v12 = vld [vmem:[#allocation7 + $0x458] sm:$0xff] }
 0x39f   : > { %v1632_v4 = vld [vmem:[#allocation7 + $0x478] sm:$0xff] }
 0x3a0   : > { %8824 = vmatpush1.bf16.msra.mxu0 %v12623_v7  ;;  %v1611_v7 = vld [vmem:[#allocation7 + $0x3d0] sm:$0xff] }
 0x3a1   : > { %9408 = vmatpush1.bf16.msra.mxu1 %v12625_v42  ;;  %8825 = vmatprep.subr.bf16.mxu0 %v12632_v9  ;;  %v1616_v42 = vld [vmem:[#allocation7 + $0x3f8] sm:$0xff]  ;;  %v12656_v9 = vcombine.high %v1611_v7, %v1615_v39  ;;  %v12655_v41 = vcombine.low %v1611_v7, %v1615_v39  ;;  %v12674_v7 = vcombine.high %v1628_v12, %v1632_v4  ;;  %v1635_v39 = vld [vmem:[#allocation7 + $0x490] sm:$0xff] }
 0x3a2   : > { %9409 = vmatprep.subr.bf16.mxu1 %v12634_v57  ;;  %v12658_v57 = vcombine.high %v1612_v6, %v1616_v42  ;;  %v12657_v51 = vcombine.low %v1612_v6, %v1616_v42  ;;  %v19259_v6 = vld [vmem:[#allocation36_spill] sm:$0xff]  ;;  %v1636_v42 = vld [vmem:[#allocation7 + $0x498] sm:$0xff] }
 0x3a4   : > { %8826 = vmatpush1.bf16.msra.mxu0 %v12631_v58  ;;  %v1619_v58 = vld [vmem:[#allocation7 + $0x410] sm:$0xff] }
 0x3a5   : > { %9410 = vmatpush1.bf16.msra.mxu1 %v12633_v18  ;;  %8827 = vmatprep.subr.bf16.mxu0 %v12640_v15  ;;  %v1624_v18 = vld [vmem:[#allocation7 + $0x438] sm:$0xff]  ;;  %v12664_v15 = vcombine.high %v1619_v58, %v1623_v2  ;;  %v12663_v24 = vcombine.low %v1619_v58, %v1623_v2 }
 0x3a6   : > { %9411 = vmatprep.subr.bf16.mxu1 %v12642_v45  ;;  %v12666_v45 = vcombine.high %v1620_v21, %v1624_v18 }
 0x3a8   : > { %8828 = vmatpush1.bf16.msra.mxu0 %v12639_v13  ;;  %v1627_v13 = vld [vmem:[#allocation7 + $0x450] sm:$0xff] }
 0x3a9   : > { %9412 = vmatpush1.bf16.msra.mxu1 %v12641_v0  ;;  %8829 = vmatprep.subr.bf16.mxu0 %v12648_v52  ;;  %v12665_v0 = vcombine.low %v1620_v21, %v1624_v18  ;;  %v12672_v52 = vcombine.high %v1627_v13, %v1631_v34  ;;  %v1643_v21 = vld [vmem:[#allocation7 + $0x4d0] sm:$0xff] }
 0x3aa   : > { %9413 = vmatprep.subr.bf16.mxu1 %v12650_v47  ;;  %v19258_v47 = vld [vmem:[#allocation22_spill] sm:$0xff]  ;;  %v1647_v18 = vld [vmem:[#allocation7 + $0x4f0] sm:$0xff] }
 0x3ac   : > { %8830 = vmatpush1.bf16.msra.mxu0 %v12647_v25  ;;  %v1639_v25 = vld [vmem:[#allocation7 + $0x4b0] sm:$0xff] }
 0x3ad   : > { %9414 = vmatpush1.bf16.msra.mxu1 %v12649_v27  ;;  %8831 = vmatprep.subr.bf16.mxu0 %v12656_v9  ;;  %v1640_v27 = vld [vmem:[#allocation7 + $0x4b8] sm:$0xff]  ;;  %v12671_v9 = vcombine.low %v1627_v13, %v1631_v34  ;;  %v12680_v58 = vcombine.high %v1635_v39, %v1639_v25  ;;  %v1651_v34 = vld [vmem:[#allocation7 + $0x510] sm:$0xff] }
 0x3ae   : > { %9415 = vmatprep.subr.bf16.mxu1 %v12658_v57  ;;  %v12673_v57 = vcombine.low %v1628_v12, %v1632_v4  ;;  %v12682_v2 = vcombine.high %v1636_v42, %v1640_v27  ;;  %v19261_v12 = vld [vmem:[#allocation48_spill] sm:$0xff]  ;;  %v1652_v4 = vld [vmem:[#allocation7 + $0x518] sm:$0xff] }
 0x3b0   : > { %8832 = vmatpush1.bf16.msra.mxu0 %v12655_v41  ;;  %v1644_v41 = vld [vmem:[#allocation7 + $0x4d8] sm:$0xff] }
 0x3b1   : > { %9416 = vmatpush1.bf16.msra.mxu1 %v12657_v51  ;;  %8874 = vmatprep.subr.bf16.mxu0 %v12664_v15  ;;  %v1648_v51 = vld [vmem:[#allocation7 + $0x4f8] sm:$0xff]  ;;  %v12679_v15 = vcombine.low %v1635_v39, %v1639_v25 }
 0x3b2   : > { %9458 = vmatprep.subr.bf16.mxu1 %v12666_v45  ;;  %v12681_v45 = vcombine.low %v1636_v42, %v1640_v27  ;;  %v12690_v13 = vcombine.high %v1644_v41, %v1648_v51  ;;  %v12689_v39 = vcombine.low %v1644_v41, %v1648_v51  ;;  %v1659_v42 = vld [vmem:[#allocation7 + $0x550] sm:$0xff]  ;;  %v1668_v51 = vld [vmem:[#allocation7 + $0x598] sm:$0xff] }
 0x3b3   : > { %8834 = vmatmul.mubr.bf16.vlgmr.msra.gmra.mrb[80].mxu0 %v19258_v47  ;;  %v1663_v27 = vld [vmem:[#allocation7 + $0x570] sm:$0xff] }
 0x3b4   : > { %9418 = vmatmul.mubr.bf16.vlgmr.msra.gmra.mrb[80].mxu1 %v19258_v47  ;;  %8843 = vmatprep.mubr.bf16.mxu0 %v19259_v6  ;;  %v12688_v47 = vcombine.high %v1643_v21, %v1647_v18  ;;  %v19263_v41 = vld [vmem:[#allocation60_spill] sm:$0xff] }
 0x3b5   : > { %8875 = vmatpush1.bf16.msra.mxu0 %v12663_v24  ;;  %9427 = vmatprep.mubr.bf16.mxu1 %v19259_v6  ;;  %v19260_v24 = vld [vmem:[#allocation34_spill] sm:$0xff] }
 0x3b6   : > { %9459 = vmatpush1.bf16.msra.mxu1 %v12665_v0  ;;  %8876 = vmatprep.subr.bf16.mxu0 %v12672_v52  ;;  %v1655_v0 = vld [vmem:[#allocation7 + $0x530] sm:$0xff]  ;;  %v1656_v52 = vld [vmem:[#allocation7 + $0x538] sm:$0xff] }
 0x3b7   : > { %9460 = vmatprep.subr.bf16.mxu1 %v12674_v7  ;;  %v12687_v7 = vcombine.low %v1643_v21, %v1647_v18  ;;  %v12696_v25 = vcombine.high %v1651_v34, %v1655_v0  ;;  %v12698_v6 = vcombine.high %v1652_v4, %v1656_v52  ;;  %v1667_v18 = vld [vmem:[#allocation7 + $0x590] sm:$0xff] }
 0x3b9   : > { %8877 = vmatpush1.bf16.msra.mxu0 %v12671_v9  ;;  %v1660_v9 = vld [vmem:[#allocation7 + $0x558] sm:$0xff] }
 0x3ba   : > { %9461 = vmatpush1.bf16.msra.mxu1 %v12673_v57  ;;  %8878 = vmatprep.subr.bf16.mxu0 %v12680_v58  ;;  %v1664_v57 = vld [vmem:[#allocation7 + $0x578] sm:$0xff]  ;;  %v12695_v58 = vcombine.low %v1651_v34, %v1655_v0 }
 0x3bb   : > { %8844 = vmatmul.mubr.bf16.gmra.mrb[84].mxu0 %v19260_v24  ;;  %9462 = vmatprep.subr.bf16.mxu1 %v12682_v2  ;;  %v12697_v2 = vcombine.low %v1652_v4, %v1656_v52  ;;  %v12706_v21 = vcombine.high %v1660_v9, %v1664_v57  ;;  %v12705_v34 = vcombine.low %v1660_v9, %v1664_v57  ;;  %v1675_v4 = vld [vmem:[#allocation7 + $0x5d0] sm:$0xff]  ;;  %v1684_v57 = vld [vmem:[#allocation7 + $0x618] sm:$0xff] }
 0x3bc   : > { %9428 = vmatmul.mubr.bf16.gmra.mrb[84].mxu1 %v19260_v24  ;;  %8853 = vmatprep.mubr.bf16.mxu0 %v19261_v12  ;;  %v12704_v24 = vcombine.high %v1659_v42, %v1663_v27  ;;  %v1679_v52 = vld [vmem:[#allocation7 + $0x5f0] sm:$0xff] }
 0x3bd   : > { %8879 = vmatpush1.bf16.msra.mxu0 %v12679_v15  ;;  %9437 = vmatprep.mubr.bf16.mxu1 %v19261_v12  ;;  %v19262_v15 = vld [vmem:[#allocation46_spill] sm:$0xff]  ;;  %v19265_v9 = vld [vmem:[#allocation32_spill] sm:$0xff] }
 0x3be   : > { %9463 = vmatpush1.bf16.msra.mxu1 %v12681_v45  ;;  %8880 = vmatprep.subr.bf16.mxu0 %v12688_v47  ;;  %v1671_v45 = vld [vmem:[#allocation7 + $0x5b0] sm:$0xff]  ;;  %v1672_v47 = vld [vmem:[#allocation7 + $0x5b8] sm:$0xff] }
 0x3bf   : > { %9464 = vmatprep.subr.bf16.mxu1 %v12690_v13  ;;  %v12703_v13 = vcombine.low %v1659_v42, %v1663_v27  ;;  %v12712_v0 = vcombine.high %v1667_v18, %v1671_v45  ;;  %v12714_v12 = vcombine.high %v1668_v51, %v1672_v47  ;;  %v1683_v27 = vld [vmem:[#allocation7 + $0x610] sm:$0xff] }
 0x3c1   : > { %8881 = vmatpush1.bf16.msra.mxu0 %v12687_v7  ;;  %v1676_v7 = vld [vmem:[#allocation7 + $0x5d8] sm:$0xff] }
 0x3c2   : > { %9465 = vmatpush1.bf16.msra.mxu1 %v12689_v39  ;;  %8882 = vmatprep.subr.bf16.mxu0 %v12696_v25  ;;  %v1680_v39 = vld [vmem:[#allocation7 + $0x5f8] sm:$0xff]  ;;  %v12711_v25 = vcombine.low %v1667_v18, %v1671_v45 }
 0x3c3   : > { %8854 = vmatmul.mubr.bf16.gmra.mrb[88].mxu0 %v19262_v15  ;;  %9466 = vmatprep.subr.bf16.mxu1 %v12698_v6  ;;  %v12713_v6 = vcombine.low %v1668_v51, %v1672_v47  ;;  %v12722_v42 = vcombine.high %v1676_v7, %v1680_v39  ;;  %v12721_v18 = vcombine.low %v1676_v7, %v1680_v39  ;;  %v1691_v51 = vld [vmem:[#allocation7 + $0x650] sm:$0xff] }
 0x3c4   : > { %9438 = vmatmul.mubr.bf16.gmra.mrb[88].mxu1 %v19262_v15  ;;  %8863 = vmatprep.mubr.bf16.mxu0 %v19263_v41  ;;  %v12720_v15 = vcombine.high %v1675_v4, %v1679_v52  ;;  %v1695_v47 = vld [vmem:[#allocation7 + $0x670] sm:$0xff] }
 0x3c5   : > { %8883 = vmatpush1.bf16.msra.mxu0 %v12695_v58  ;;  %9447 = vmatprep.mubr.bf16.mxu1 %v19263_v41  ;;  %v19264_v58 = vld [vmem:[#allocation58_spill] sm:$0xff]  ;;  %v12735_v7 = vcombine.low %v1691_v51, %v1695_v47 }
 0x3c6   : > { %9467 = vmatpush1.bf16.msra.mxu1 %v12697_v2  ;;  %8884 = vmatprep.subr.bf16.mxu0 %v12704_v24  ;;  %v1687_v2 = vld [vmem:[#allocation7 + $0x630] sm:$0xff]  ;;  %v1688_v24 = vld [vmem:[#allocation7 + $0x638] sm:$0xff] }
 0x3c7   : > { %9468 = vmatprep.subr.bf16.mxu1 %v12706_v21  ;;  %v12719_v21 = vcombine.low %v1675_v4, %v1679_v52  ;;  %v12728_v45 = vcombine.high %v1683_v27, %v1687_v2  ;;  %v12730_v41 = vcombine.high %v1684_v57, %v1688_v24  ;;  %v1703_v4 = vld [vmem:[#allocation7 + $0x6b0] sm:$0xff]  ;;  %v1700_v52 = vld [vmem:[#allocation7 + $0x698] sm:$0xff] }
 0x3c9   : > { %8885 = vmatpush1.bf16.msra.mxu0 %v12703_v13  ;;  %v1692_v13 = vld [vmem:[#allocation7 + $0x658] sm:$0xff] }
 0x3ca   : > { %9469 = vmatpush1.bf16.msra.mxu1 %v12705_v34  ;;  %8886 = vmatprep.subr.bf16.mxu0 %v12712_v0  ;;  %v1696_v34 = vld [vmem:[#allocation7 + $0x678] sm:$0xff]  ;;  %v12727_v0 = vcombine.low %v1683_v27, %v1687_v2  ;;  %v1711_v27 = vld [vmem:[#allocation7 + $0x6f0] sm:$0xff] }
 0x3cb   : > { %8864 = vmatmul.mubr.bf16.gmra.mrb[92].mxu0 %v19264_v58  ;;  %9470 = vmatprep.subr.bf16.mxu1 %v12714_v12  ;;  %v12729_v12 = vcombine.low %v1684_v57, %v1688_v24  ;;  %v12737_v39 = vcombine.low %v1692_v13, %v1696_v34  ;;  %v1708_v2 = vld [vmem:[#allocation7 + $0x6d8] sm:$0xff] }
 0x3cc   : > { %9448 = vmatmul.mubr.bf16.gmra.mrb[92].mxu1 %v19264_v58  ;;  %8906 = vmatprep.mubr.bf16.mxu0 %v19265_v9  ;;  %v12736_v58 = vcombine.high %v1691_v51, %v1695_v47  ;;  %v1719_v51 = vld [vmem:[#allocation7 + $0x730] sm:$0xff]  ;;  %v1716_v47 = vld [vmem:[#allocation7 + $0x718] sm:$0xff] }
 0x3cd   : > { %8887 = vmatpush1.bf16.msra.mxu0 %v12711_v25  ;;  %9490 = vmatprep.mubr.bf16.mxu1 %v19265_v9  ;;  %v12738_v25 = vcombine.high %v1692_v13, %v1696_v34  ;;  %v1699_v9 = vld [vmem:[#allocation7 + $0x690] sm:$0xff] }
 0x3ce   : > { %9471 = vmatpush1.bf16.msra.mxu1 %v12713_v6  ;;  %8888 = vmatprep.subr.bf16.mxu0 %v12720_v15  ;;  %v1704_v6 = vld [vmem:[#allocation7 + $0x6b8] sm:$0xff]  ;;  %v12744_v15 = vcombine.high %v1699_v9, %v1703_v4  ;;  %v12743_v57 = vcombine.low %v1699_v9, %v1703_v4  ;;  %v1727_v9 = vld [vmem:[#allocation7 + $0x770] sm:$0xff] }
 0x3cf   : > { %9472 = vmatprep.subr.bf16.mxu1 %v12722_v42  ;;  %v12746_v42 = vcombine.high %v1700_v52, %v1704_v6  ;;  %v12745_v24 = vcombine.low %v1700_v52, %v1704_v6  ;;  %v1724_v4 = vld [vmem:[#allocation7 + $0x758] sm:$0xff] }
 0x3d1   : > { %8889 = vmatpush1.bf16.msra.mxu0 %v12719_v21  ;;  %v1707_v21 = vld [vmem:[#allocation7 + $0x6d0] sm:$0xff] }
 0x3d2   : > { %9473 = vmatpush1.bf16.msra.mxu1 %v12721_v18  ;;  %8890 = vmatprep.subr.bf16.mxu0 %v12728_v45  ;;  %v1712_v18 = vld [vmem:[#allocation7 + $0x6f8] sm:$0xff]  ;;  %v12752_v45 = vcombine.high %v1707_v21, %v1711_v27  ;;  %v12751_v13 = vcombine.low %v1707_v21, %v1711_v27  ;;  %v1735_v21 = vld [vmem:[#allocation7 + $0x7b0] sm:$0xff] }
 0x3d3   : > { %9474 = vmatprep.subr.bf16.mxu1 %v12730_v41  ;;  %v12754_v41 = vcombine.high %v1708_v2, %v1712_v18  ;;  %v12753_v34 = vcombine.low %v1708_v2, %v1712_v18  ;;  %v1732_v27 = vld [vmem:[#allocation7 + $0x798] sm:$0xff] }
 0x3d5   : > { %8891 = vmatpush1.bf16.msra.mxu0 %v12727_v0  ;;  %v1715_v0 = vld [vmem:[#allocation7 + $0x710] sm:$0xff] }
 0x3d6   : > { %9475 = vmatpush1.bf16.msra.mxu1 %v12729_v12  ;;  %8892 = vmatprep.subr.bf16.mxu0 %v12736_v58  ;;  %v1720_v12 = vld [vmem:[#allocation7 + $0x738] sm:$0xff]  ;;  %v12760_v58 = vcombine.high %v1715_v0, %v1719_v51  ;;  %v12759_v52 = vcombine.low %v1715_v0, %v1719_v51  ;;  %v1743_v0 = vld [vmem:[#allocation7 + $0x7f0] sm:$0xff] }
 0x3d7   : > { %9476 = vmatprep.subr.bf16.mxu1 %v12738_v25  ;;  %v12762_v25 = vcombine.high %v1716_v47, %v1720_v12  ;;  %v12761_v6 = vcombine.low %v1716_v47, %v1720_v12  ;;  %v1740_v51 = vld [vmem:[#allocation7 + $0x7d8] sm:$0xff] }
 0x3d9   : > { %8893 = vmatpush1.bf16.msra.mxu0 %v12735_v7  ;;  %v1723_v7 = vld [vmem:[#allocation7 + $0x750] sm:$0xff] }
 0x3da   : > { %9477 = vmatpush1.bf16.msra.mxu1 %v12737_v39  ;;  %8894 = vmatprep.subr.bf16.mxu0 %v12744_v15  ;;  %v1728_v39 = vld [vmem:[#allocation7 + $0x778] sm:$0xff]  ;;  %v12768_v15 = vcombine.high %v1723_v7, %v1727_v9  ;;  %v12767_v2 = vcombine.low %v1723_v7, %v1727_v9  ;;  %v1751_v7 = vld [vmem:[#allocation7 + $0x830] sm:$0xff] }
 0x3db   : > { %9478 = vmatprep.subr.bf16.mxu1 %v12746_v42  ;;  %v12770_v42 = vcombine.high %v1724_v4, %v1728_v39  ;;  %v12769_v18 = vcombine.low %v1724_v4, %v1728_v39  ;;  %v1748_v9 = vld [vmem:[#allocation7 + $0x818] sm:$0xff] }
 0x3dd   : > { %8895 = vmatpush1.bf16.msra.mxu0 %v12743_v57  ;;  %v1731_v57 = vld [vmem:[#allocation7 + $0x790] sm:$0xff] }
 0x3de   : > { %9479 = vmatpush1.bf16.msra.mxu1 %v12745_v24  ;;  %8896 = vmatprep.subr.bf16.mxu0 %v12752_v45  ;;  %v1736_v24 = vld [vmem:[#allocation7 + $0x7b8] sm:$0xff]  ;;  %v12776_v45 = vcombine.high %v1731_v57, %v1735_v21  ;;  %v12775_v47 = vcombine.low %v1731_v57, %v1735_v21  ;;  %v1759_v57 = vld [vmem:[#allocation7 + $0x870] sm:$0xff] }
 0x3df   : > { %9480 = vmatprep.subr.bf16.mxu1 %v12754_v41  ;;  %v12778_v41 = vcombine.high %v1732_v27, %v1736_v24  ;;  %v12777_v12 = vcombine.low %v1732_v27, %v1736_v24  ;;  %v1756_v21 = vld [vmem:[#allocation7 + $0x858] sm:$0xff] }
 0x3e0   : > { %v1760_v27 = vld [vmem:[#allocation7 + $0x878] sm:$0xff] }
 0x3e1   : > { %8897 = vmatpush1.bf16.msra.mxu0 %v12751_v13  ;;  %v1739_v13 = vld [vmem:[#allocation7 + $0x7d0] sm:$0xff] }
 0x3e2   : > { %9481 = vmatpush1.bf16.msra.mxu1 %v12753_v34  ;;  %8898 = vmatprep.subr.bf16.mxu0 %v12760_v58  ;;  %v1744_v34 = vld [vmem:[#allocation7 + $0x7f8] sm:$0xff]  ;;  %v12784_v58 = vcombine.high %v1739_v13, %v1743_v0  ;;  %v12783_v4 = vcombine.low %v1739_v13, %v1743_v0  ;;  %v12802_v13 = vcombine.high %v1756_v21, %v1760_v27  ;;  %v1763_v0 = vld [vmem:[#allocation7 + $0x890] sm:$0xff] }
 0x3e3   : > { %9482 = vmatprep.subr.bf16.mxu1 %v12762_v25  ;;  %v12786_v25 = vcombine.high %v1740_v51, %v1744_v34  ;;  %v12785_v39 = vcombine.low %v1740_v51, %v1744_v34  ;;  %v19267_v51 = vld [vmem:[#allocation44_spill] sm:$0xff]  ;;  %v1764_v34 = vld [vmem:[#allocation7 + $0x898] sm:$0xff] }
 0x3e5   : > { %8899 = vmatpush1.bf16.msra.mxu0 %v12759_v52  ;;  %v1747_v52 = vld [vmem:[#allocation7 + $0x810] sm:$0xff] }
 0x3e6   : > { %9483 = vmatpush1.bf16.msra.mxu1 %v12761_v6  ;;  %8900 = vmatprep.subr.bf16.mxu0 %v12768_v15  ;;  %v1752_v6 = vld [vmem:[#allocation7 + $0x838] sm:$0xff]  ;;  %v12792_v15 = vcombine.high %v1747_v52, %v1751_v7  ;;  %v12791_v24 = vcombine.low %v1747_v52, %v1751_v7 }
 0x3e7   : > { %9484 = vmatprep.subr.bf16.mxu1 %v12770_v42  ;;  %v12794_v42 = vcombine.high %v1748_v9, %v1752_v6 }
 0x3e9   : > { %8901 = vmatpush1.bf16.msra.mxu0 %v12767_v2  ;;  %v1755_v2 = vld [vmem:[#allocation7 + $0x850] sm:$0xff] }
 0x3ea   : > { %9485 = vmatpush1.bf16.msra.mxu1 %v12769_v18  ;;  %8902 = vmatprep.subr.bf16.mxu0 %v12776_v45  ;;  %v12793_v18 = vcombine.low %v1748_v9, %v1752_v6  ;;  %v12800_v45 = vcombine.high %v1755_v2, %v1759_v57  ;;  %v1771_v9 = vld [vmem:[#allocation7 + $0x8d0] sm:$0xff] }
 0x3eb   : > { %9486 = vmatprep.subr.bf16.mxu1 %v12778_v41  ;;  %v19266_v41 = vld [vmem:[#allocation29_spill] sm:$0xff] }
 0x3ec   : > { %v1775_v6 = vld [vmem:[#allocation7 + $0x8f0] sm:$0xff] }
 0x3ed   : > { %8903 = vmatpush1.bf16.msra.mxu0 %v12775_v47  ;;  %v1767_v47 = vld [vmem:[#allocation7 + $0x8b0] sm:$0xff] }
 0x3ee   : > { %9487 = vmatpush1.bf16.msra.mxu1 %v12777_v12  ;;  %8904 = vmatprep.subr.bf16.mxu0 %v12784_v58  ;;  %v1768_v12 = vld [vmem:[#allocation7 + $0x8b8] sm:$0xff]  ;;  %v12799_v58 = vcombine.low %v1755_v2, %v1759_v57  ;;  %v12808_v52 = vcombine.high %v1763_v0, %v1767_v47  ;;  %v1779_v57 = vld [vmem:[#allocation7 + $0x910] sm:$0xff] }
 0x3ef   : > { %9488 = vmatprep.subr.bf16.mxu1 %v12786_v25  ;;  %v12801_v25 = vcombine.low %v1756_v21, %v1760_v27  ;;  %v12810_v7 = vcombine.high %v1764_v34, %v1768_v12  ;;  %v19269_v21 = vld [vmem:[#allocation56_spill] sm:$0xff]  ;;  %v1780_v27 = vld [vmem:[#allocation7 + $0x918] sm:$0xff] }
 0x3f1   : > { %8905 = vmatpush1.bf16.msra.mxu0 %v12783_v4  ;;  %v1772_v4 = vld [vmem:[#allocation7 + $0x8d8] sm:$0xff] }
 0x3f2   : > { %9489 = vmatpush1.bf16.msra.mxu1 %v12785_v39  ;;  %8947 = vmatprep.subr.bf16.mxu0 %v12792_v15  ;;  %v1776_v39 = vld [vmem:[#allocation7 + $0x8f8] sm:$0xff]  ;;  %v12807_v15 = vcombine.low %v1763_v0, %v1767_v47 }
 0x3f3   : > { %9531 = vmatprep.subr.bf16.mxu1 %v12794_v42  ;;  %v12809_v42 = vcombine.low %v1764_v34, %v1768_v12  ;;  %v12818_v2 = vcombine.high %v1772_v4, %v1776_v39  ;;  %v12817_v0 = vcombine.low %v1772_v4, %v1776_v39  ;;  %v1787_v34 = vld [vmem:[#allocation7 + $0x950] sm:$0xff]  ;;  %v19271_v4 = vld [vmem:[#allocation67_spill] sm:$0xff]  ;;  %v1796_v39 = vld [vmem:[#allocation7 + $0x998] sm:$0xff] }
 0x3f4   : > { %8907 = vmatmul.mubr.bf16.vlgmr.msra.gmra.mrb[80].mxu0 %v19266_v41  ;;  %v1791_v12 = vld [vmem:[#allocation7 + $0x970] sm:$0xff] }
 0x3f5   : > { %9491 = vmatmul.mubr.bf16.vlgmr.msra.gmra.mrb[80].mxu1 %v19266_v41  ;;  %8916 = vmatprep.mubr.bf16.mxu0 %v19267_v51  ;;  %v12816_v41 = vcombine.high %v1771_v9, %v1775_v6 }
 0x3f6   : > { %8948 = vmatpush1.bf16.msra.mxu0 %v12791_v24  ;;  %9500 = vmatprep.mubr.bf16.mxu1 %v19267_v51  ;;  %v19268_v24 = vld [vmem:[#allocation41_spill] sm:$0xff] }
 0x3f7   : > { %9532 = vmatpush1.bf16.msra.mxu1 %v12793_v18  ;;  %8949 = vmatprep.subr.bf16.mxu0 %v12800_v45  ;;  %v1783_v18 = vld [vmem:[#allocation7 + $0x930] sm:$0xff]  ;;  %v1784_v45 = vld [vmem:[#allocation7 + $0x938] sm:$0xff] }
 0x3f8   : > { %9533 = vmatprep.subr.bf16.mxu1 %v12802_v13  ;;  %v12815_v13 = vcombine.low %v1771_v9, %v1775_v6  ;;  %v12824_v47 = vcombine.high %v1779_v57, %v1783_v18  ;;  %v12826_v51 = vcombine.high %v1780_v27, %v1784_v45  ;;  %v1795_v6 = vld [vmem:[#allocation7 + $0x990] sm:$0xff] }
 0x3fa   : > { %8950 = vmatpush1.bf16.msra.mxu0 %v12799_v58  ;;  %v1788_v58 = vld [vmem:[#allocation7 + $0x958] sm:$0xff] }
 0x3fb   : > { %9534 = vmatpush1.bf16.msra.mxu1 %v12801_v25  ;;  %8951 = vmatprep.subr.bf16.mxu0 %v12808_v52  ;;  %v1792_v25 = vld [vmem:[#allocation7 + $0x978] sm:$0xff]  ;;  %v12823_v52 = vcombine.low %v1779_v57, %v1783_v18 }
 0x3fc   : > { %8917 = vmatmul.mubr.bf16.gmra.mrb[84].mxu0 %v19268_v24  ;;  %9535 = vmatprep.subr.bf16.mxu1 %v12810_v7  ;;  %v12825_v7 = vcombine.low %v1780_v27, %v1784_v45  ;;  %v12834_v9 = vcombine.high %v1788_v58, %v1792_v25  ;;  %v12833_v57 = vcombine.low %v1788_v58, %v1792_v25  ;;  %v1803_v27 = vld [vmem:[#allocation7 + $0x9d0] sm:$0xff]  ;;  %v1812_v25 = vld [vmem:[#allocation7 + $0xa18] sm:$0xff] }
 0x3fd   : > { %9501 = vmatmul.mubr.bf16.gmra.mrb[84].mxu1 %v19268_v24  ;;  %8926 = vmatprep.mubr.bf16.mxu0 %v19269_v21  ;;  %v12832_v24 = vcombine.high %v1787_v34, %v1791_v12  ;;  %v1807_v45 = vld [vmem:[#allocation7 + $0x9f0] sm:$0xff] }
 0x3fe   : > { %8952 = vmatpush1.bf16.msra.mxu0 %v12807_v15  ;;  %9510 = vmatprep.mubr.bf16.mxu1 %v19269_v21  ;;  %v19270_v15 = vld [vmem:[#allocation53_spill] sm:$0xff]  ;;  %v19273_v58 = vld [vmem:[#allocation72_spill] sm:$0xff] }
 0x3ff   : > { %9536 = vmatpush1.bf16.msra.mxu1 %v12809_v42  ;;  %8953 = vmatprep.subr.bf16.mxu0 %v12816_v41  ;;  %v1799_v42 = vld [vmem:[#allocation7 + $0x9b0] sm:$0xff]  ;;  %v1800_v41 = vld [vmem:[#allocation7 + $0x9b8] sm:$0xff] }
 0x400   : > { %9537 = vmatprep.subr.bf16.mxu1 %v12818_v2  ;;  %v12831_v2 = vcombine.low %v1787_v34, %v1791_v12  ;;  %v12840_v18 = vcombine.high %v1795_v6, %v1799_v42  ;;  %v12842_v21 = vcombine.high %v1796_v39, %v1800_v41  ;;  %v1811_v12 = vld [vmem:[#allocation7 + $0xa10] sm:$0xff] }
 0x402   : > { %8954 = vmatpush1.bf16.msra.mxu0 %v12815_v13  ;;  %v1804_v13 = vld [vmem:[#allocation7 + $0x9d8] sm:$0xff] }
 0x403   : > { %9538 = vmatpush1.bf16.msra.mxu1 %v12817_v0  ;;  %8955 = vmatprep.subr.bf16.mxu0 %v12824_v47  ;;  %v1808_v0 = vld [vmem:[#allocation7 + $0x9f8] sm:$0xff]  ;;  %v12839_v47 = vcombine.low %v1795_v6, %v1799_v42 }
 0x404   : > { %8927 = vmatmul.mubr.bf16.gmra.mrb[88].mxu0 %v19270_v15  ;;  %9539 = vmatprep.subr.bf16.mxu1 %v12826_v51  ;;  %v12841_v51 = vcombine.low %v1796_v39, %v1800_v41  ;;  %v12850_v34 = vcombine.high %v1804_v13, %v1808_v0  ;;  %v12849_v6 = vcombine.low %v1804_v13, %v1808_v0  ;;  %v1819_v39 = vld [vmem:[#allocation7 + $0xa50] sm:$0xff] }
 0x405   : > { %9511 = vmatmul.mubr.bf16.gmra.mrb[88].mxu1 %v19270_v15  ;;  %8936 = vmatprep.mubr.bf16.mxu0 %v19271_v4  ;;  %v12848_v15 = vcombine.high %v1803_v27, %v1807_v45  ;;  %v1823_v41 = vld [vmem:[#allocation7 + $0xa70] sm:$0xff] }
 0x406   : > { %8956 = vmatpush1.bf16.msra.mxu0 %v12823_v52  ;;  %9520 = vmatprep.mubr.bf16.mxu1 %v19271_v4  ;;  %v19272_v52 = vld [vmem:[#allocation64_spill] sm:$0xff]  ;;  %v12863_v13 = vcombine.low %v1819_v39, %v1823_v41 }
 0x407   : > { %9540 = vmatpush1.bf16.msra.mxu1 %v12825_v7  ;;  %8957 = vmatprep.subr.bf16.mxu0 %v12832_v24  ;;  %v1815_v7 = vld [vmem:[#allocation7 + $0xa30] sm:$0xff]  ;;  %v1816_v24 = vld [vmem:[#allocation7 + $0xa38] sm:$0xff] }
 0x408   : > { %9541 = vmatprep.subr.bf16.mxu1 %v12834_v9  ;;  %v12847_v9 = vcombine.low %v1803_v27, %v1807_v45  ;;  %v12856_v42 = vcombine.high %v1811_v12, %v1815_v7  ;;  %v12858_v4 = vcombine.high %v1812_v25, %v1816_v24  ;;  %v1831_v27 = vld [vmem:[#allocation7 + $0xab0] sm:$0xff]  ;;  %v1828_v45 = vld [vmem:[#allocation7 + $0xa98] sm:$0xff] }
 0x40a   : > { %8958 = vmatpush1.bf16.msra.mxu0 %v12831_v2  ;;  %v1820_v2 = vld [vmem:[#allocation7 + $0xa58] sm:$0xff] }
 0x40b   : > { %9542 = vmatpush1.bf16.msra.mxu1 %v12833_v57  ;;  %8959 = vmatprep.subr.bf16.mxu0 %v12840_v18  ;;  %v1824_v57 = vld [vmem:[#allocation7 + $0xa78] sm:$0xff]  ;;  %v12855_v18 = vcombine.low %v1811_v12, %v1815_v7  ;;  %v1839_v12 = vld [vmem:[#allocation7 + $0xaf0] sm:$0xff] }
 0x40c   : > { %8937 = vmatmul.mubr.bf16.gmra.mrb[92].mxu0 %v19272_v52  ;;  %9543 = vmatprep.subr.bf16.mxu1 %v12842_v21  ;;  %v12857_v21 = vcombine.low %v1812_v25, %v1816_v24  ;;  %v12865_v0 = vcombine.low %v1820_v2, %v1824_v57  ;;  %v1836_v7 = vld [vmem:[#allocation7 + $0xad8] sm:$0xff] }
 0x40d   : > { %9521 = vmatmul.mubr.bf16.gmra.mrb[92].mxu1 %v19272_v52  ;;  %8979 = vmatprep.mubr.bf16.mxu0 %v19273_v58  ;;  %v12864_v52 = vcombine.high %v1819_v39, %v1823_v41  ;;  %v1847_v39 = vld [vmem:[#allocation7 + $0xb30] sm:$0xff]  ;;  %v1844_v41 = vld [vmem:[#allocation7 + $0xb18] sm:$0xff] }
 0x40e   : > { %8960 = vmatpush1.bf16.msra.mxu0 %v12839_v47  ;;  %9563 = vmatprep.mubr.bf16.mxu1 %v19273_v58  ;;  %v12866_v47 = vcombine.high %v1820_v2, %v1824_v57  ;;  %v1827_v58 = vld [vmem:[#allocation7 + $0xa90] sm:$0xff] }
 0x40f   : > { %9544 = vmatpush1.bf16.msra.mxu1 %v12841_v51  ;;  %8961 = vmatprep.subr.bf16.mxu0 %v12848_v15  ;;  %v1832_v51 = vld [vmem:[#allocation7 + $0xab8] sm:$0xff]  ;;  %v12872_v15 = vcombine.high %v1827_v58, %v1831_v27  ;;  %v12871_v25 = vcombine.low %v1827_v58, %v1831_v27  ;;  %v1855_v58 = vld [vmem:[#allocation7 + $0xb70] sm:$0xff] }
 0x410   : > { %9545 = vmatprep.subr.bf16.mxu1 %v12850_v34  ;;  %v12874_v34 = vcombine.high %v1828_v45, %v1832_v51  ;;  %v12873_v24 = vcombine.low %v1828_v45, %v1832_v51  ;;  %v1852_v27 = vld [vmem:[#allocation7 + $0xb58] sm:$0xff] }
 0x412   : > { %8962 = vmatpush1.bf16.msra.mxu0 %v12847_v9  ;;  %v1835_v9 = vld [vmem:[#allocation7 + $0xad0] sm:$0xff] }
 0x413   : > { %9546 = vmatpush1.bf16.msra.mxu1 %v12849_v6  ;;  %8963 = vmatprep.subr.bf16.mxu0 %v12856_v42  ;;  %v1840_v6 = vld [vmem:[#allocation7 + $0xaf8] sm:$0xff]  ;;  %v12880_v42 = vcombine.high %v1835_v9, %v1839_v12  ;;  %v12879_v2 = vcombine.low %v1835_v9, %v1839_v12  ;;  %v1863_v9 = vld [vmem:[#allocation7 + $0xbb0] sm:$0xff] }
 0x414   : > { %9547 = vmatprep.subr.bf16.mxu1 %v12858_v4  ;;  %v12882_v4 = vcombine.high %v1836_v7, %v1840_v6  ;;  %v12881_v57 = vcombine.low %v1836_v7, %v1840_v6  ;;  %v1860_v12 = vld [vmem:[#allocation7 + $0xb98] sm:$0xff] }
 0x416   : > { %8964 = vmatpush1.bf16.msra.mxu0 %v12855_v18  ;;  %v1843_v18 = vld [vmem:[#allocation7 + $0xb10] sm:$0xff] }
 0x417   : > { %9548 = vmatpush1.bf16.msra.mxu1 %v12857_v21  ;;  %8965 = vmatprep.subr.bf16.mxu0 %v12864_v52  ;;  %v1848_v21 = vld [vmem:[#allocation7 + $0xb38] sm:$0xff]  ;;  %v12888_v52 = vcombine.high %v1843_v18, %v1847_v39  ;;  %v12887_v45 = vcombine.low %v1843_v18, %v1847_v39  ;;  %v1871_v18 = vld [vmem:[#allocation7 + $0xbf0] sm:$0xff] }
 0x418   : > { %9549 = vmatprep.subr.bf16.mxu1 %v12866_v47  ;;  %v12890_v47 = vcombine.high %v1844_v41, %v1848_v21  ;;  %v12889_v51 = vcombine.low %v1844_v41, %v1848_v21  ;;  %v1868_v39 = vld [vmem:[#allocation7 + $0xbd8] sm:$0xff] }
 0x41a   : > { %8966 = vmatpush1.bf16.msra.mxu0 %v12863_v13  ;;  %v1851_v13 = vld [vmem:[#allocation7 + $0xb50] sm:$0xff] }
 0x41b   : > { %9550 = vmatpush1.bf16.msra.mxu1 %v12865_v0  ;;  %8967 = vmatprep.subr.bf16.mxu0 %v12872_v15  ;;  %v1856_v0 = vld [vmem:[#allocation7 + $0xb78] sm:$0xff]  ;;  %v12896_v15 = vcombine.high %v1851_v13, %v1855_v58  ;;  %v12895_v7 = vcombine.low %v1851_v13, %v1855_v58  ;;  %v1879_v13 = vld [vmem:[#allocation7 + $0xc30] sm:$0xff] }
 0x41c   : > { %9551 = vmatprep.subr.bf16.mxu1 %v12874_v34  ;;  %v12898_v34 = vcombine.high %v1852_v27, %v1856_v0  ;;  %v12897_v6 = vcombine.low %v1852_v27, %v1856_v0  ;;  %v1876_v58 = vld [vmem:[#allocation7 + $0xc18] sm:$0xff] }
 0x41e   : > { %8968 = vmatpush1.bf16.msra.mxu0 %v12871_v25  ;;  %v1859_v25 = vld [vmem:[#allocation7 + $0xb90] sm:$0xff] }
 0x41f   : > { %9552 = vmatpush1.bf16.msra.mxu1 %v12873_v24  ;;  %8969 = vmatprep.subr.bf16.mxu0 %v12880_v42  ;;  %v1864_v24 = vld [vmem:[#allocation7 + $0xbb8] sm:$0xff]  ;;  %v12904_v42 = vcombine.high %v1859_v25, %v1863_v9  ;;  %v12903_v41 = vcombine.low %v1859_v25, %v1863_v9  ;;  %v1887_v25 = vld [vmem:[#allocation7 + $0xc70] sm:$0xff] }
 0x420   : > { %9553 = vmatprep.subr.bf16.mxu1 %v12882_v4  ;;  %v12906_v4 = vcombine.high %v1860_v12, %v1864_v24  ;;  %v12905_v21 = vcombine.low %v1860_v12, %v1864_v24  ;;  %v1884_v9 = vld [vmem:[#allocation7 + $0xc58] sm:$0xff] }
 0x421   : > { %v1888_v12 = vld [vmem:[#allocation7 + $0xc78] sm:$0xff] }
 0x422   : > { %8970 = vmatpush1.bf16.msra.mxu0 %v12879_v2  ;;  %v1867_v2 = vld [vmem:[#allocation7 + $0xbd0] sm:$0xff] }
 0x423   : > { %9554 = vmatpush1.bf16.msra.mxu1 %v12881_v57  ;;  %8971 = vmatprep.subr.bf16.mxu0 %v12888_v52  ;;  %v1872_v57 = vld [vmem:[#allocation7 + $0xbf8] sm:$0xff]  ;;  %v12912_v52 = vcombine.high %v1867_v2, %v1871_v18  ;;  %v12911_v27 = vcombine.low %v1867_v2, %v1871_v18  ;;  %v12930_v2 = vcombine.high %v1884_v9, %v1888_v12  ;;  %v1891_v18 = vld [vmem:[#allocation7 + $0xc90] sm:$0xff] }
 0x424   : > { %9555 = vmatprep.subr.bf16.mxu1 %v12890_v47  ;;  %v12914_v47 = vcombine.high %v1868_v39, %v1872_v57  ;;  %v12913_v0 = vcombine.low %v1868_v39, %v1872_v57  ;;  %v1892_v39 = vld [vmem:[#allocation7 + $0xc98] sm:$0xff] }
 0x425   : > { %v1896_v57 = vld [vmem:[#allocation7 + $0xcb8] sm:$0xff] }
 0x426   : > { %8972 = vmatpush1.bf16.msra.mxu0 %v12887_v45  ;;  %v1875_v45 = vld [vmem:[#allocation7 + $0xc10] sm:$0xff] }
 0x427   : > { %9556 = vmatpush1.bf16.msra.mxu1 %v12889_v51  ;;  %8973 = vmatprep.subr.bf16.mxu0 %v12896_v15  ;;  %v1880_v51 = vld [vmem:[#allocation7 + $0xc38] sm:$0xff]  ;;  %v12920_v15 = vcombine.high %v1875_v45, %v1879_v13  ;;  %v12919_v24 = vcombine.low %v1875_v45, %v1879_v13  ;;  %v12938_v45 = vcombine.high %v1892_v39, %v1896_v57  ;;  %v1899_v13 = vld [vmem:[#allocation7 + $0xcd0] sm:$0xff] }
 0x428   : > { %9557 = vmatprep.subr.bf16.mxu1 %v12898_v34  ;;  %v12922_v34 = vcombine.high %v1876_v58, %v1880_v51 }
 0x42a   : > { %8974 = vmatpush1.bf16.msra.mxu0 %v12895_v7  ;;  %v1883_v7 = vld [vmem:[#allocation7 + $0xc50] sm:$0xff] }
 0x42b   : > { %9558 = vmatpush1.bf16.msra.mxu1 %v12897_v6  ;;  %8975 = vmatprep.subr.bf16.mxu0 %v12904_v42  ;;  %v12921_v6 = vcombine.low %v1876_v58, %v1880_v51  ;;  %v12928_v42 = vcombine.high %v1883_v7, %v1887_v25  ;;  %v1903_v58 = vld [vmem:[#allocation7 + $0xcf0] sm:$0xff]  ;;  %v1900_v51 = vld [vmem:[#allocation7 + $0xcd8] sm:$0xff] }
 0x42c   : > { %9559 = vmatprep.subr.bf16.mxu1 %v12906_v4  ;;  %v19274_v4 = vld [vmem:[#allocation70_spill] sm:$0xff] }
 0x42e   : > { %8976 = vmatpush1.bf16.msra.mxu0 %v12903_v41  ;;  %v1895_v41 = vld [vmem:[#allocation7 + $0xcb0] sm:$0xff] }
 0x42f   : > { %9560 = vmatpush1.bf16.msra.mxu1 %v12905_v21  ;;  %8977 = vmatprep.subr.bf16.mxu0 %v12912_v52  ;;  %v12927_v21 = vcombine.low %v1883_v7, %v1887_v25  ;;  %v12929_v52 = vcombine.low %v1884_v9, %v1888_v12  ;;  %v1907_v7 = vld [vmem:[#allocation7 + $0xd10] sm:$0xff]  ;;  %v1908_v9 = vld [vmem:[#allocation7 + $0xd18] sm:$0xff] }
 0x430   : > { %9561 = vmatprep.subr.bf16.mxu1 %v12914_v47  ;;  %v12936_v47 = vcombine.high %v1891_v18, %v1895_v41  ;;  %v1911_v25 = vld [vmem:[#allocation7 + $0xd30] sm:$0xff]  ;;  %v1912_v12 = vld [vmem:[#allocation7 + $0xd38] sm:$0xff] }
 0x432   : > { %8978 = vmatpush1.bf16.msra.mxu0 %v12911_v27  ;;  %v1904_v27 = vld [vmem:[#allocation7 + $0xcf8] sm:$0xff] }
 0x433   : > { %9562 = vmatpush1.bf16.msra.mxu1 %v12913_v0  ;;  %9020 = vmatprep.subr.bf16.mxu0 %v12920_v15  ;;  %v12935_v0 = vcombine.low %v1891_v18, %v1895_v41  ;;  %v12937_v15 = vcombine.low %v1892_v39, %v1896_v57  ;;  %v1919_v18 = vld [vmem:[#allocation7 + $0xd70] sm:$0xff]  ;;  %v1916_v41 = vld [vmem:[#allocation7 + $0xd58] sm:$0xff]  ;;  %v12953_v57 = vcombine.low %v1908_v9, %v1912_v12 }
 0x434   : > { %9604 = vmatprep.subr.bf16.mxu1 %v12922_v34  ;;  %v12944_v34 = vcombine.high %v1899_v13, %v1903_v58  ;;  %v1920_v39 = vld [vmem:[#allocation7 + $0xd78] sm:$0xff] }
 0x435   : > { %8980 = vmatmul.mubr.bf16.vlgmr.msra.gmra.mrb[80].mxu0 %v19274_v4 }
 0x436   : > { %9564 = vmatmul.mubr.bf16.vlgmr.msra.gmra.mrb[80].mxu1 %v19274_v4  ;;  %8989 = vmatprep.mubr.bf16.mxu0 %v16408_v28  ;;  %v12954_v4 = vcombine.high %v1908_v9, %v1912_v12  ;;  %v1931_v12 = vld [vmem:[#allocation7 + $0xdd0] sm:$0xff] }
 0x437   : > { %9021 = vmatpush1.bf16.msra.mxu0 %v12919_v24  ;;  %9573 = vmatprep.mubr.bf16.mxu1 %v16408_v28  ;;  %v12946_v28 = vcombine.high %v1900_v51, %v1904_v27  ;;  %v12943_v24 = vcombine.low %v1899_v13, %v1903_v58 }
 0x438   : > { %9605 = vmatpush1.bf16.msra.mxu1 %v12921_v6  ;;  %9022 = vmatprep.subr.bf16.mxu0 %v12928_v42  ;;  %v12945_v6 = vcombine.low %v1900_v51, %v1904_v27  ;;  %v12952_v42 = vcombine.high %v1907_v7, %v1911_v25  ;;  %v1924_v51 = vld [vmem:[#allocation7 + $0xd98] sm:$0xff] }
 0x439   : > { %9606 = vmatprep.subr.bf16.mxu1 %v12930_v2  ;;  %v1915_v2 = vld [vmem:[#allocation7 + $0xd50] sm:$0xff]  ;;  %v1928_v27 = vld [vmem:[#allocation7 + $0xdb8] sm:$0xff] }
 0x43a   : > { %v12970_v9 = vcombine.high %v1924_v51, %v1928_v27 }
 0x43b   : > { %9023 = vmatpush1.bf16.msra.mxu0 %v12927_v21  ;;  %v12960_v21 = vcombine.high %v1915_v2, %v1919_v18 }
 0x43c   : > { %9607 = vmatpush1.bf16.msra.mxu1 %v12929_v52  ;;  %9024 = vmatprep.subr.bf16.mxu0 %v12936_v47  ;;  %v12962_v52 = vcombine.high %v1916_v41, %v1920_v39  ;;  %v1923_v47 = vld [vmem:[#allocation7 + $0xd90] sm:$0xff] }
 0x43d   : > { %8990 = vmatmul.mubr.bf16.gmra.mrb[84].mxu0 %v16402_v14  ;;  %9608 = vmatprep.subr.bf16.mxu1 %v12938_v45  ;;  %v1927_v45 = vld [vmem:[#allocation7 + $0xdb0] sm:$0xff] }
 0x43e   : > { %9574 = vmatmul.mubr.bf16.gmra.mrb[84].mxu1 %v16402_v14  ;;  %8999 = vmatprep.mubr.bf16.mxu0 %v16440_v61  ;;  %v12951_v14 = vcombine.low %v1907_v7, %v1911_v25  ;;  %v12968_v25 = vcombine.high %v1923_v47, %v1927_v45 }
 0x43f   : > { %9025 = vmatpush1.bf16.msra.mxu0 %v12935_v0  ;;  %9583 = vmatprep.mubr.bf16.mxu1 %v16440_v61 }
 0x440   : > { %9609 = vmatpush1.bf16.msra.mxu1 %v12937_v15  ;;  %9026 = vmatprep.subr.bf16.mxu0 %v12944_v34  ;;  %v12959_v15 = vcombine.low %v1915_v2, %v1919_v18  ;;  %v12969_v2 = vcombine.low %v1924_v51, %v1928_v27 }
 0x441   : > { %9610 = vmatprep.subr.bf16.mxu1 %v12946_v28  ;;  %v12961_v28 = vcombine.low %v1916_v41, %v1920_v39 }
 0x443   : > { %9027 = vmatpush1.bf16.msra.mxu0 %v12943_v24  ;;  %v1935_v24 = vld [vmem:[#allocation7 + $0xdf0] sm:$0xff] }
 0x444   : > { %9611 = vmatpush1.bf16.msra.mxu1 %v12945_v6  ;;  %9028 = vmatprep.subr.bf16.mxu0 %v12952_v42  ;;  %v1936_v42 = vld [vmem:[#allocation7 + $0xdf8] sm:$0xff]  ;;  %v12976_v18 = vcombine.high %v1931_v12, %v1935_v24  ;;  %v12975_v27 = vcombine.low %v1931_v12, %v1935_v24 }
 0x445   : > { %9000 = vmatmul.mubr.bf16.gmra.mrb[88].mxu0 %v16434_v44  ;;  %9612 = vmatprep.subr.bf16.mxu1 %v12954_v4  ;;  %v16899_v61 = vpop.f32.mrb[64].mxu0  ;;  %v12967_v4 = vcombine.low %v1923_v47, %v1927_v45  ;;  %v1940_v47 = vld [vmem:[#allocation7 + $0xe18] sm:$0xff] }
 0x446   : > { %9584 = vmatmul.mubr.bf16.gmra.mrb[88].mxu1 %v16434_v44  ;;  %9009 = vmatprep.mubr.bf16.mxu0 %v16472_v59  ;;  %v16903_v13 = vpop.f32.mrb[64].mxu1  ;;  %v16905_v58 = vpop.f32.mrb[65].mxu0  ;;  %v1944_v45 = vld [vmem:[#allocation7 + $0xe38] sm:$0xff] }
 0x447   : > { %9029 = vmatpush1.bf16.msra.mxu0 %v12951_v14  ;;  %9593 = vmatprep.mubr.bf16.mxu1 %v16472_v59  ;;  %v16908_v0 = vpop.f32.mrb[65].mxu1  ;;  %v16910_v34 = vpop.f32.mrb[66].mxu0  ;;  %v1932_v59 = vld [vmem:[#allocation7 + $0xdd8] sm:$0xff]  ;;  %v1939_v14 = vld [vmem:[#allocation7 + $0xe10] sm:$0xff]  ;;  %v12986_v16 = vcombine.high %v1940_v47, %v1944_v45  ;;  %v12985_v24 = vcombine.low %v1940_v47, %v1944_v45 }
 0x448   : > { %9613 = vmatpush1.bf16.msra.mxu1 %v12953_v57  ;;  %9030 = vmatprep.subr.bf16.mxu0 %v12960_v21  ;;  %v16912_v44 = vpop.f32.mrb[66].mxu1  ;;  %v16914_v7 = vpop.f32.mrb[67].mxu0  ;;  %v12978_v39 = vcombine.high %v1932_v59, %v1936_v42  ;;  %v1943_v57 = vld [vmem:[#allocation7 + $0xe30] sm:$0xff]  ;;  %v19275_v21 = vld [vmem:[#allocation78_spill] sm:$0xff] }
 0x449   : > { %9614 = vmatprep.subr.bf16.mxu1 %v12962_v52  ;;  %v16916_v6 = vpop.f32.mrb[67].mxu1  ;;  %v12984_v29 = vcombine.high %v1939_v14, %v1943_v57  ;;  %v12983_v12 = vcombine.low %v1939_v14, %v1943_v57 }
 0x44b   : > { %9031 = vmatpush1.bf16.msra.mxu0 %v12959_v15 }
 0x44c   : > { %9615 = vmatpush1.bf16.msra.mxu1 %v12961_v28  ;;  %9032 = vmatprep.subr.bf16.mxu0 %v12968_v25  ;;  %v12977_v25 = vcombine.low %v1932_v59, %v1936_v42 }
 0x44d   : > { %9010 = vmatmul.mubr.bf16.gmra.mrb[92].mxu0 %v16466_v17  ;;  %9616 = vmatprep.subr.bf16.mxu1 %v12970_v9  ;;  %v16919_v41 = vpop.f32.mrb[68].mxu0 }
 0x44e   : > { %9594 = vmatmul.mubr.bf16.gmra.mrb[92].mxu1 %v16466_v17  ;;  %9052 = vmatprep.mubr.bf16.mxu0 %v19275_v21  ;;  %v16923_v52 = vpop.f32.mrb[68].mxu1  ;;  %v16925_v15 = vpop.f32.mrb[69].mxu0 }
 0x44f   : > { %19276 = vst [vmem:[#allocation24_spill] sm:$0xff] %v16923_v52  ;;  %19277 = vst [vmem:[#allocation22_spill] sm:$0xff] %v16925_v15  ;;  %9033 = vmatpush1.bf16.msra.mxu0 %v12967_v4  ;;  %9636 = vmatprep.mubr.bf16.mxu1 %v19275_v21  ;;  %v16928_v51 = vpop.f32.mrb[69].mxu1  ;;  %v16930_v28 = vpop.f32.mrb[70].mxu0  ;;  %v1947_v4 = vld [vmem:[#allocation7 + $0xe50] sm:$0xff]  ;;  %v1948_v21 = vld [vmem:[#allocation7 + $0xe58] sm:$0xff] }
 0x450   : > { %19278 = vst [vmem:[#allocation36_spill] sm:$0xff] %v16928_v51  ;;  %19279 = vst [vmem:[#allocation34_spill] sm:$0xff] %v16930_v28  ;;  %9617 = vmatpush1.bf16.msra.mxu1 %v12969_v2  ;;  %9034 = vmatprep.subr.bf16.mxu0 %v12976_v18  ;;  %v16932_v17 = vpop.f32.mrb[70].mxu1  ;;  %v16934_v9 = vpop.f32.mrb[71].mxu0  ;;  %v1951_v15 = vld [vmem:[#allocation7 + $0xe70] sm:$0xff]  ;;  %v1952_v52 = vld [vmem:[#allocation7 + $0xe78] sm:$0xff] }
 0x451   : > { %19280 = vst [vmem:[#allocation48_spill] sm:$0xff] %v16932_v17  ;;  %19281 = vst [vmem:[#allocation46_spill] sm:$0xff] %v16934_v9  ;;  %9618 = vmatprep.subr.bf16.mxu1 %v12978_v39  ;;  %v16936_v5 = vpop.f32.mrb[71].mxu1  ;;  %v12992_v2 = vcombine.high %v1947_v4, %v1951_v15  ;;  %v12994_v42 = vcombine.high %v1948_v21, %v1952_v52  ;;  %v1955_v18 = vld [vmem:[#allocation7 + $0xe90] sm:$0xff]  ;;  %v1956_v17 = vld [vmem:[#allocation7 + $0xe98] sm:$0xff]  ;;  %v12991_v14 = vcombine.low %v1947_v4, %v1951_v15 }
 0x452   : > { %19282 = vst [vmem:[#allocation60_spill] sm:$0xff] %v16936_v5  ;;  %v1959_v9 = vld [vmem:[#allocation7 + $0xeb0] sm:$0xff]  ;;  %v1960_v28 = vld [vmem:[#allocation7 + $0xeb8] sm:$0xff] }
 0x453   : > { %9035 = vmatpush1.bf16.msra.mxu0 %v12975_v27  ;;  %v13000_v45 = vcombine.high %v1955_v18, %v1959_v9  ;;  %v12999_v15 = vcombine.low %v1955_v18, %v1959_v9  ;;  %v13001_v4 = vcombine.low %v1956_v17, %v1960_v28 }
 0x454   : > { %9619 = vmatpush1.bf16.msra.mxu1 %v12977_v25  ;;  %9036 = vmatprep.subr.bf16.mxu0 %v12984_v29  ;;  %v12993_v29 = vcombine.low %v1948_v21, %v1952_v52  ;;  %v13002_v25 = vcombine.high %v1956_v17, %v1960_v28 }
 0x455   : > { %9620 = vmatprep.subr.bf16.mxu1 %v12986_v16  ;;  %v16938_v59 = vpop.f32.mrb[72].mxu0 }
 0x456   : > { %19283 = vst [vmem:[#allocation58_spill] sm:$0xff] %v16938_v59  ;;  %v16940_v39 = vpop.f32.mrb[72].mxu1  ;;  %v16942_v5 = vpop.f32.mrb[73].mxu0  ;;  %v1968_v59 = vld [vmem:[#allocation7 + $0xef8] sm:$0xff] }
 0x457   : > { %19284 = vst [vmem:[#allocation32_spill] sm:$0xff] %v16940_v39  ;;  %19285 = vst [vmem:[#allocation29_spill] sm:$0xff] %v16942_v5  ;;  %9037 = vmatpush1.bf16.msra.mxu0 %v12983_v12  ;;  %v16944_v51 = vpop.f32.mrb[73].mxu1  ;;  %v16946_v57 = vpop.f32.mrb[74].mxu0  ;;  %v1963_v5 = vld [vmem:[#allocation7 + $0xed0] sm:$0xff]  ;;  %v1964_v12 = vld [vmem:[#allocation7 + $0xed8] sm:$0xff] }
 0x458   : > { %19286 = vst [vmem:[#allocation44_spill] sm:$0xff] %v16944_v51  ;;  %19287 = vst [vmem:[#allocation41_spill] sm:$0xff] %v16946_v57  ;;  %9621 = vmatpush1.bf16.msra.mxu1 %v12985_v24  ;;  %9038 = vmatprep.subr.bf16.mxu0 %v12992_v2  ;;  %v16948_v16 = vpop.f32.mrb[74].mxu1  ;;  %v16950_v47 = vpop.f32.mrb[75].mxu0  ;;  %v1967_v39 = vld [vmem:[#allocation7 + $0xef0] sm:$0xff]  ;;  %v13010_v21 = vcombine.high %v1964_v12, %v1968_v59  ;;  %v1976_v57 = vld [vmem:[#allocation7 + $0xf38] sm:$0xff]  ;;  %v13009_v28 = vcombine.low %v1964_v12, %v1968_v59 }
 0x459   : > { %19288 = vst [vmem:[#allocation56_spill] sm:$0xff] %v16948_v16  ;;  %19289 = vst [vmem:[#allocation53_spill] sm:$0xff] %v16950_v47  ;;  %9622 = vmatprep.subr.bf16.mxu1 %v12994_v42  ;;  %v16952_v27 = vpop.f32.mrb[75].mxu1  ;;  %v13008_v24 = vcombine.high %v1963_v5, %v1967_v39  ;;  %v1971_v2 = vld [vmem:[#allocation7 + $0xf10] sm:$0xff]  ;;  %v1972_v16 = vld [vmem:[#allocation7 + $0xf18] sm:$0xff]  ;;  %v13007_v9 = vcombine.low %v1963_v5, %v1967_v39 }
 0x45a   : > { %19290 = vst [vmem:[#allocation67_spill] sm:$0xff] %v16952_v27  ;;  %v1975_v47 = vld [vmem:[#allocation7 + $0xf30] sm:$0xff]  ;;  %v13017_v39 = vcombine.low %v1972_v16, %v1976_v57 }
 0x45b   : > { %9039 = vmatpush1.bf16.msra.mxu0 %v12991_v14  ;;  %v13015_v5 = vcombine.low %v1971_v2, %v1975_v47  ;;  %v1987_v12 = vld [vmem:[#allocation7 + $0xf90] sm:$0xff] }
 0x45c   : > { %9623 = vmatpush1.bf16.msra.mxu1 %v12993_v29  ;;  %9040 = vmatprep.subr.bf16.mxu0 %v13000_v45  ;;  %v13016_v29 = vcombine.high %v1971_v2, %v1975_v47  ;;  %v1999_v47 = vld [vmem:[#allocation7 + $0xff0] sm:$0xff]  ;;  %v1996_v2 = vld [vmem:[#allocation7 + $0xfd8] sm:$0xff] }
 0x45d   : > { %9624 = vmatprep.subr.bf16.mxu1 %v13002_v25  ;;  %v16954_v52 = vpop.f32.mrb[76].mxu0  ;;  %v13018_v25 = vcombine.high %v1972_v16, %v1976_v57 }
 0x45e   : > { %19291 = vst [vmem:[#allocation64_spill] sm:$0xff] %v16954_v52  ;;  %v16956_v42 = vpop.f32.mrb[76].mxu1  ;;  %v16958_v27 = vpop.f32.mrb[77].mxu0  ;;  %v1984_v52 = vld [vmem:[#allocation7 + $0xf78] sm:$0xff] }
 0x45f   : > { %19292 = vst [vmem:[#allocation72_spill] sm:$0xff] %v16956_v42  ;;  %19293 = vst [vmem:[#allocation70_spill] sm:$0xff] %v16958_v27  ;;  %9041 = vmatpush1.bf16.msra.mxu0 %v12999_v15  ;;  %v16960_v51 = vpop.f32.mrb[77].mxu1  ;;  %v16962_v18 = vpop.f32.mrb[78].mxu0  ;;  %v1979_v27 = vld [vmem:[#allocation7 + $0xf50] sm:$0xff]  ;;  %v1980_v15 = vld [vmem:[#allocation7 + $0xf58] sm:$0xff] }
 0x460   : > { %19294 = vst [vmem:[#allocation78_spill] sm:$0xff] %v16960_v51  ;;  %19295 = vst [vmem:[#allocation174_spill] sm:$0xff] %v16962_v18  ;;  %9625 = vmatpush1.bf16.msra.mxu1 %v13001_v4  ;;  %9042 = vmatprep.subr.bf16.mxu0 %v13008_v24  ;;  %v16964_v17 = vpop.f32.mrb[78].mxu1  ;;  %v16966_v14 = vpop.f32.mrb[79].mxu0  ;;  %v1983_v42 = vld [vmem:[#allocation7 + $0xf70] sm:$0xff]  ;;  %v13026_v59 = vcombine.high %v1980_v15, %v1984_v52  ;;  %v1992_v18 = vld [vmem:[#allocation7 + $0xfb8] sm:$0xff] }
 0x461   : > { %19296 = vst [vmem:[#allocation175_spill] sm:$0xff] %v16964_v17  ;;  %19297 = vst [vmem:[#allocation176_spill] sm:$0xff] %v16966_v14  ;;  %9626 = vmatprep.subr.bf16.mxu1 %v13010_v21  ;;  %v16968_v45 = vpop.f32.mrb[79].mxu1  ;;  %v13024_v4 = vcombine.high %v1979_v27, %v1983_v42  ;;  %v1991_v24 = vld [vmem:[#allocation7 + $0xfb0] sm:$0xff]  ;;  %v1988_v17 = vld [vmem:[#allocation7 + $0xf98] sm:$0xff]  ;;  %v13023_v21 = vcombine.low %v1979_v27, %v1983_v42 }
 0x462   : > { %19298 = vst [vmem:[#allocation177_spill] sm:$0xff] %v16968_v45  ;;  %v13025_v45 = vcombine.low %v1980_v15, %v1984_v52  ;;  %v13032_v14 = vcombine.high %v1987_v12, %v1991_v24  ;;  %v13034_v51 = vcombine.high %v1988_v17, %v1992_v18  ;;  %v13031_v57 = vcombine.low %v1987_v12, %v1991_v24  ;;  %v2007_v27 = vld [vmem:[#allocation7 + $0x1030] sm:$0xff]  ;;  %v2004_v42 = vld [vmem:[#allocation7 + $0x1018] sm:$0xff] }
 0x463   : > { %9043 = vmatpush1.bf16.msra.mxu0 %v13007_v9  ;;  %v1995_v9 = vld [vmem:[#allocation7 + $0xfd0] sm:$0xff]  ;;  %v13033_v16 = vcombine.low %v1988_v17, %v1992_v18  ;;  %v2016_v18 = vld [vmem:[#allocation7 + $0x1078] sm:$0xff] }
 0x464   : > { %9627 = vmatpush1.bf16.msra.mxu1 %v13009_v28  ;;  %9044 = vmatprep.subr.bf16.mxu0 %v13016_v29  ;;  %v2000_v28 = vld [vmem:[#allocation7 + $0xff8] sm:$0xff]  ;;  %v13040_v29 = vcombine.high %v1995_v9, %v1999_v47  ;;  %v13039_v52 = vcombine.low %v1995_v9, %v1999_v47  ;;  %v2015_v12 = vld [vmem:[#allocation7 + $0x1070] sm:$0xff] }
 0x465   : > { %9628 = vmatprep.subr.bf16.mxu1 %v13018_v25  ;;  %v13042_v25 = vcombine.high %v1996_v2, %v2000_v28  ;;  %v13041_v15 = vcombine.low %v1996_v2, %v2000_v28  ;;  %v2019_v9 = vld [vmem:[#allocation7 + $0x1090] sm:$0xff]  ;;  %v2020_v2 = vld [vmem:[#allocation7 + $0x1098] sm:$0xff] }
 0x466   : > { %v2023_v47 = vld [vmem:[#allocation7 + $0x10b0] sm:$0xff]  ;;  %v2024_v28 = vld [vmem:[#allocation7 + $0x10b8] sm:$0xff] }
 0x467   : > { %9045 = vmatpush1.bf16.msra.mxu0 %v13015_v5  ;;  %v2003_v5 = vld [vmem:[#allocation7 + $0x1010] sm:$0xff] }
 0x468   : > { %9629 = vmatpush1.bf16.msra.mxu1 %v13017_v39  ;;  %9046 = vmatprep.subr.bf16.mxu0 %v13024_v4  ;;  %v2008_v39 = vld [vmem:[#allocation7 + $0x1038] sm:$0xff]  ;;  %v13048_v4 = vcombine.high %v2003_v5, %v2007_v27 }
 0x469   : > { %9630 = vmatprep.subr.bf16.mxu1 %v13026_v59  ;;  %v13050_v59 = vcombine.high %v2004_v42, %v2008_v39  ;;  %v13049_v17 = vcombine.low %v2004_v42, %v2008_v39  ;;  %v2028_v42 = vld [vmem:[#allocation7 + $0x10d8] sm:$0xff] }
 0x46a   : > { %v2032_v39 = vld [vmem:[#allocation7 + $0x10f8] sm:$0xff] }
 0x46b   : > { %9047 = vmatpush1.bf16.msra.mxu0 %v13023_v21  ;;  %v2011_v21 = vld [vmem:[#allocation7 + $0x1050] sm:$0xff] }
 0x46c   : > { %9631 = vmatpush1.bf16.msra.mxu1 %v13025_v45  ;;  %9048 = vmatprep.subr.bf16.mxu0 %v13032_v14  ;;  %v2012_v14 = vld [vmem:[#allocation7 + $0x1058] sm:$0xff]  ;;  %v13056_v45 = vcombine.high %v2011_v21, %v2015_v12 }
 0x46d   : > { %9632 = vmatprep.subr.bf16.mxu1 %v13034_v51  ;;  %v13047_v51 = vcombine.low %v2003_v5, %v2007_v27  ;;  %v13058_v24 = vcombine.high %v2012_v14, %v2016_v18  ;;  %v2027_v5 = vld [vmem:[#allocation7 + $0x10d0] sm:$0xff] }
 0x46e   : > { %v2031_v27 = vld [vmem:[#allocation7 + $0x10f0] sm:$0xff] }
 0x46f   : > { %9049 = vmatpush1.bf16.msra.mxu0 %v13031_v57  ;;  %v13055_v57 = vcombine.low %v2011_v21, %v2015_v12  ;;  %v2036_v21 = vld [vmem:[#allocation7 + $0x1118] sm:$0xff] }
 0x470   : > { %9633 = vmatpush1.bf16.msra.mxu1 %v13033_v16  ;;  %9050 = vmatprep.subr.bf16.mxu0 %v13040_v29  ;;  %v13057_v16 = vcombine.low %v2012_v14, %v2016_v18  ;;  %v13064_v29 = vcombine.high %v2019_v9, %v2023_v47  ;;  %v2040_v12 = vld [vmem:[#allocation7 + $0x1138] sm:$0xff]  ;;  %v13071_v14 = vcombine.low %v2027_v5, %v2031_v27 }
 0x471   : > { %9634 = vmatprep.subr.bf16.mxu1 %v13042_v25  ;;  %v13066_v25 = vcombine.high %v2020_v2, %v2024_v28  ;;  %v13073_v18 = vcombine.low %v2028_v42, %v2032_v39 }
 0x473   : > { %9051 = vmatpush1.bf16.msra.mxu0 %v13039_v52  ;;  %v13065_v52 = vcombine.low %v2020_v2, %v2024_v28  ;;  %v13081_v2 = vcombine.low %v2036_v21, %v2040_v12 }
 0x474   : > { %9635 = vmatpush1.bf16.msra.mxu1 %v13041_v15  ;;  %9093 = vmatprep.subr.bf16.mxu0 %v13048_v4  ;;  %v13072_v15 = vcombine.high %v2027_v5, %v2031_v27  ;;  %v2035_v4 = vld [vmem:[#allocation7 + $0x1110] sm:$0xff] }
 0x475   : > { %9677 = vmatprep.subr.bf16.mxu1 %v13050_v59  ;;  %v2039_v59 = vld [vmem:[#allocation7 + $0x1130] sm:$0xff] }
 0x476   : > { %9053 = vmatmul.mubr.bf16.vlgmr.msra.gmra.mrb[80].mxu0 %v16386_v23 }
 0x477   : > { %9637 = vmatmul.mubr.bf16.vlgmr.msra.gmra.mrb[80].mxu1 %v16386_v23  ;;  %9062 = vmatprep.mubr.bf16.mxu0 %v16426_v30  ;;  %v13063_v23 = vcombine.low %v2019_v9, %v2023_v47  ;;  %v2044_v9 = vld [vmem:[#allocation7 + $0x1158] sm:$0xff] }
 0x478   : > { %9094 = vmatpush1.bf16.msra.mxu0 %v13047_v51  ;;  %9646 = vmatprep.mubr.bf16.mxu1 %v16426_v30  ;;  %v13074_v30 = vcombine.high %v2028_v42, %v2032_v39  ;;  %v13080_v51 = vcombine.high %v2035_v4, %v2039_v59  ;;  %v2048_v47 = vld [vmem:[#allocation7 + $0x1178] sm:$0xff] }
 0x479   : > { %9678 = vmatpush1.bf16.msra.mxu1 %v13049_v17  ;;  %9095 = vmatprep.subr.bf16.mxu0 %v13056_v45  ;;  %v13082_v17 = vcombine.high %v2036_v21, %v2040_v12  ;;  %v2043_v45 = vld [vmem:[#allocation7 + $0x1150] sm:$0xff]  ;;  %v13089_v27 = vcombine.low %v2044_v9, %v2048_v47 }
 0x47a   : > { %9679 = vmatprep.subr.bf16.mxu1 %v13058_v24  ;;  %v2047_v24 = vld [vmem:[#allocation7 + $0x1170] sm:$0xff] }
 0x47b   : > { %v13088_v28 = vcombine.high %v2043_v45, %v2047_v24  ;;  %v13087_v5 = vcombine.low %v2043_v45, %v2047_v24  ;;  %v2067_v21 = vld [vmem:[#allocation7 + $0x1210] sm:$0xff] }
 0x47c   : > { %9096 = vmatpush1.bf16.msra.mxu0 %v13055_v57  ;;  %v2051_v57 = vld [vmem:[#allocation7 + $0x1190] sm:$0xff] }
 0x47d   : > { %9680 = vmatpush1.bf16.msra.mxu1 %v13057_v16  ;;  %9097 = vmatprep.subr.bf16.mxu0 %v13064_v29  ;;  %v2055_v16 = vld [vmem:[#allocation7 + $0x11b0] sm:$0xff]  ;;  %v2052_v29 = vld [vmem:[#allocation7 + $0x1198] sm:$0xff] }
 0x47e   : > { %9063 = vmatmul.mubr.bf16.gmra.mrb[84].mxu0 %v16418_v43  ;;  %9681 = vmatprep.subr.bf16.mxu1 %v13066_v25  ;;  %v2056_v25 = vld [vmem:[#allocation7 + $0x11b8] sm:$0xff]  ;;  %v13096_v42 = vcombine.high %v2051_v57, %v2055_v16  ;;  %v2071_v12 = vld [vmem:[#allocation7 + $0x1230] sm:$0xff] }
 0x47f   : > { %9647 = vmatmul.mubr.bf16.gmra.mrb[84].mxu1 %v16418_v43  ;;  %9072 = vmatprep.mubr.bf16.mxu0 %v16458_v31  ;;  %v13079_v43 = vcombine.low %v2035_v4, %v2039_v59  ;;  %v13098_v39 = vcombine.high %v2052_v29, %v2056_v25  ;;  %v13097_v4 = vcombine.low %v2052_v29, %v2056_v25  ;;  %v2084_v29 = vld [vmem:[#allocation7 + $0x1298] sm:$0xff] }
 0x480   : > { %9098 = vmatpush1.bf16.msra.mxu0 %v13063_v23  ;;  %9656 = vmatprep.mubr.bf16.mxu1 %v16458_v31  ;;  %v13090_v31 = vcombine.high %v2044_v9, %v2048_v47  ;;  %v2059_v23 = vld [vmem:[#allocation7 + $0x11d0] sm:$0xff]  ;;  %v13112_v45 = vcombine.high %v2067_v21, %v2071_v12  ;;  %v2088_v25 = vld [vmem:[#allocation7 + $0x12b8] sm:$0xff] }
 0x481   : > { %9682 = vmatpush1.bf16.msra.mxu1 %v13065_v52  ;;  %9099 = vmatprep.subr.bf16.mxu0 %v13072_v15  ;;  %v2063_v52 = vld [vmem:[#allocation7 + $0x11f0] sm:$0xff]  ;;  %v2060_v15 = vld [vmem:[#allocation7 + $0x11d8] sm:$0xff] }
 0x482   : > { %9683 = vmatprep.subr.bf16.mxu1 %v13074_v30  ;;  %v2064_v30 = vld [vmem:[#allocation7 + $0x11f8] sm:$0xff]  ;;  %v13104_v59 = vcombine.high %v2059_v23, %v2063_v52  ;;  %v2075_v9 = vld [vmem:[#allocation7 + $0x1250] sm:$0xff] }
 0x483   : > { %v2079_v47 = vld [vmem:[#allocation7 + $0x1270] sm:$0xff] }
 0x484   : > { %9100 = vmatpush1.bf16.msra.mxu0 %v13071_v14  ;;  %v2068_v14 = vld [vmem:[#allocation7 + $0x1218] sm:$0xff] }
 0x485   : > { %9684 = vmatpush1.bf16.msra.mxu1 %v13073_v18  ;;  %9101 = vmatprep.subr.bf16.mxu0 %v13080_v51  ;;  %v2072_v18 = vld [vmem:[#allocation7 + $0x1238] sm:$0xff]  ;;  %v13103_v51 = vcombine.low %v2059_v23, %v2063_v52  ;;  %v2091_v23 = vld [vmem:[#allocation7 + $0x12d0] sm:$0xff] }
 0x486   : > { %9073 = vmatmul.mubr.bf16.gmra.mrb[88].mxu0 %v16450_v33  ;;  %9685 = vmatprep.subr.bf16.mxu1 %v13082_v17  ;;  %v13105_v17 = vcombine.low %v2060_v15, %v2064_v30  ;;  %v13114_v24 = vcombine.high %v2068_v14, %v2072_v18  ;;  %v2095_v52 = vld [vmem:[#allocation7 + $0x12f0] sm:$0xff] }
 0x487   : > { %9657 = vmatmul.mubr.bf16.gmra.mrb[88].mxu1 %v16450_v33  ;;  %9082 = vmatprep.mubr.bf16.mxu0 %v16490_v20  ;;  %v13095_v33 = vcombine.low %v2051_v57, %v2055_v16  ;;  %v2087_v16 = vld [vmem:[#allocation7 + $0x12b0] sm:$0xff] }
 0x488   : > { %9102 = vmatpush1.bf16.msra.mxu0 %v13079_v43  ;;  %9666 = vmatprep.mubr.bf16.mxu1 %v16490_v20  ;;  %v13106_v20 = vcombine.high %v2060_v15, %v2064_v30  ;;  %v2076_v43 = vld [vmem:[#allocation7 + $0x1258] sm:$0xff] }
 0x489   : > { %9686 = vmatpush1.bf16.msra.mxu1 %v13081_v2  ;;  %9103 = vmatprep.subr.bf16.mxu0 %v13088_v28  ;;  %v2080_v2 = vld [vmem:[#allocation7 + $0x1278] sm:$0xff]  ;;  %v13113_v28 = vcombine.low %v2068_v14, %v2072_v18 }
 0x48a   : > { %9687 = vmatprep.subr.bf16.mxu1 %v13090_v31  ;;  %v13120_v31 = vcombine.high %v2075_v9, %v2079_v47  ;;  %v13122_v57 = vcombine.high %v2076_v43, %v2080_v2  ;;  %v2092_v15 = vld [vmem:[#allocation7 + $0x12d8] sm:$0xff] }
 0x48b   : > { %v2096_v30 = vld [vmem:[#allocation7 + $0x12f8] sm:$0xff] }
 0x48c   : > { %9104 = vmatpush1.bf16.msra.mxu0 %v13087_v5  ;;  %v13119_v5 = vcombine.low %v2075_v9, %v2079_v47  ;;  %v2100_v14 = vld [vmem:[#allocation7 + $0x1318] sm:$0xff]  ;;  %v2107_v9 = vld [vmem:[#allocation7 + $0x1350] sm:$0xff] }
 0x48d   : > { %9688 = vmatpush1.bf16.msra.mxu1 %v13089_v27  ;;  %9105 = vmatprep.subr.bf16.mxu0 %v13096_v42  ;;  %v13121_v27 = vcombine.low %v2076_v43, %v2080_v2  ;;  %v2104_v18 = vld [vmem:[#allocation7 + $0x1338] sm:$0xff]  ;;  %v2111_v47 = vld [vmem:[#allocation7 + $0x1370] sm:$0xff] }
 0x48e   : > { %9083 = vmatmul.mubr.bf16.gmra.mrb[92].mxu0 %v16482_v22  ;;  %9689 = vmatprep.subr.bf16.mxu1 %v13098_v39  ;;  %v13130_v39 = vcombine.high %v2084_v29, %v2088_v25  ;;  %v2108_v43 = vld [vmem:[#allocation7 + $0x1358] sm:$0xff] }
 0x48f   : > { %9667 = vmatmul.mubr.bf16.gmra.mrb[92].mxu1 %v16482_v22  ;;  %9125 = vmatprep.mubr.bf16.mxu0 %v16504_v54  ;;  %v13111_v22 = vcombine.low %v2067_v21, %v2071_v12  ;;  %v2099_v21 = vld [vmem:[#allocation7 + $0x1310] sm:$0xff]  ;;  %v2112_v2 = vld [vmem:[#allocation7 + $0x1378] sm:$0xff] }
 0x490   : > { %9106 = vmatpush1.bf16.msra.mxu0 %v13095_v33  ;;  %9709 = vmatprep.mubr.bf16.mxu1 %v16504_v54  ;;  %v2083_v54 = vld [vmem:[#allocation7 + $0x1290] sm:$0xff] }
 0x491   : > { %9690 = vmatpush1.bf16.msra.mxu1 %v13097_v4  ;;  %9107 = vmatprep.subr.bf16.mxu0 %v13104_v59  ;;  %v13128_v42 = vcombine.high %v2083_v54, %v2087_v16  ;;  %v13127_v33 = vcombine.low %v2083_v54, %v2087_v16  ;;  %v13129_v4 = vcombine.low %v2084_v29, %v2088_v25  ;;  %v2103_v12 = vld [vmem:[#allocation7 + $0x1330] sm:$0xff]  ;;  %v2116_v29 = vld [vmem:[#allocation7 + $0x1398] sm:$0xff] }
 0x492   : > { %9691 = vmatprep.subr.bf16.mxu1 %v13106_v20  ;;  %v13136_v59 = vcombine.high %v2091_v23, %v2095_v52  ;;  %v13138_v20 = vcombine.high %v2092_v15, %v2096_v30  ;;  %v2115_v54 = vld [vmem:[#allocation7 + $0x1390] sm:$0xff]  ;;  %v2120_v25 = vld [vmem:[#allocation7 + $0x13b8] sm:$0xff] }
 0x493   : > { %v2119_v16 = vld [vmem:[#allocation7 + $0x13b0] sm:$0xff] }
 0x494   : > { %9108 = vmatpush1.bf16.msra.mxu0 %v13103_v51  ;;  %v13135_v51 = vcombine.low %v2091_v23, %v2095_v52  ;;  %v2123_v23 = vld [vmem:[#allocation7 + $0x13d0] sm:$0xff] }
 0x495   : > { %9692 = vmatpush1.bf16.msra.mxu1 %v13105_v17  ;;  %9109 = vmatprep.subr.bf16.mxu0 %v13112_v45  ;;  %v13137_v17 = vcombine.low %v2092_v15, %v2096_v30  ;;  %v13144_v45 = vcombine.high %v2099_v21, %v2103_v12  ;;  %v2127_v52 = vld [vmem:[#allocation7 + $0x13f0] sm:$0xff]  ;;  %v2124_v15 = vld [vmem:[#allocation7 + $0x13d8] sm:$0xff] }
 0x496   : > { %9693 = vmatprep.subr.bf16.mxu1 %v13114_v24  ;;  %v13146_v24 = vcombine.high %v2100_v14, %v2104_v18  ;;  %v2128_v30 = vld [vmem:[#allocation7 + $0x13f8] sm:$0xff] }
 0x498   : > { %9110 = vmatpush1.bf16.msra.mxu0 %v13111_v22  ;;  %v13143_v22 = vcombine.low %v2099_v21, %v2103_v12  ;;  %v2131_v21 = vld [vmem:[#allocation7 + $0x1410] sm:$0xff] }
 0x499   : > { %9694 = vmatpush1.bf16.msra.mxu1 %v13113_v28  ;;  %9111 = vmatprep.subr.bf16.mxu0 %v13120_v31  ;;  %v13145_v28 = vcombine.low %v2100_v14, %v2104_v18  ;;  %v13152_v31 = vcombine.high %v2107_v9, %v2111_v47  ;;  %v2135_v12 = vld [vmem:[#allocation7 + $0x1430] sm:$0xff]  ;;  %v2132_v14 = vld [vmem:[#allocation7 + $0x1418] sm:$0xff] }
 0x49a   : > { %9695 = vmatprep.subr.bf16.mxu1 %v13122_v57  ;;  %v13154_v57 = vcombine.high %v2108_v43, %v2112_v2  ;;  %v2136_v18 = vld [vmem:[#allocation7 + $0x1438] sm:$0xff] }
 0x49c   : > { %9112 = vmatpush1.bf16.msra.mxu0 %v13119_v5  ;;  %v13151_v5 = vcombine.low %v2107_v9, %v2111_v47  ;;  %v2139_v9 = vld [vmem:[#allocation7 + $0x1450] sm:$0xff] }
 0x49d   : > { %9696 = vmatpush1.bf16.msra.mxu1 %v13121_v27  ;;  %9113 = vmatprep.subr.bf16.mxu0 %v13128_v42  ;;  %v13153_v27 = vcombine.low %v2108_v43, %v2112_v2  ;;  %v13160_v42 = vcombine.high %v2115_v54, %v2119_v16  ;;  %v2143_v47 = vld [vmem:[#allocation7 + $0x1470] sm:$0xff]  ;;  %v2140_v43 = vld [vmem:[#allocation7 + $0x1458] sm:$0xff] }
 0x49e   : > { %9697 = vmatprep.subr.bf16.mxu1 %v13130_v39  ;;  %v13162_v39 = vcombine.high %v2116_v29, %v2120_v25  ;;  %v2144_v2 = vld [vmem:[#allocation7 + $0x1478] sm:$0xff] }
 0x4a0   : > { %9114 = vmatpush1.bf16.msra.mxu0 %v13127_v33  ;;  %v13159_v33 = vcombine.low %v2115_v54, %v2119_v16  ;;  %v2147_v54 = vld [vmem:[#allocation7 + $0x1490] sm:$0xff] }
 0x4a1   : > { %9698 = vmatpush1.bf16.msra.mxu1 %v13129_v4  ;;  %9115 = vmatprep.subr.bf16.mxu0 %v13136_v59  ;;  %v13161_v4 = vcombine.low %v2116_v29, %v2120_v25  ;;  %v13168_v59 = vcombine.high %v2123_v23, %v2127_v52  ;;  %v2151_v16 = vld [vmem:[#allocation7 + $0x14b0] sm:$0xff]  ;;  %v2148_v29 = vld [vmem:[#allocation7 + $0x1498] sm:$0xff] }
 0x4a2   : > { %9699 = vmatprep.subr.bf16.mxu1 %v13138_v20  ;;  %v13170_v20 = vcombine.high %v2124_v15, %v2128_v30  ;;  %v2152_v25 = vld [vmem:[#allocation7 + $0x14b8] sm:$0xff] }
 0x4a4   : > { %9116 = vmatpush1.bf16.msra.mxu0 %v13135_v51  ;;  %v13167_v51 = vcombine.low %v2123_v23, %v2127_v52  ;;  %v2155_v23 = vld [vmem:[#allocation7 + $0x14d0] sm:$0xff] }
 0x4a5   : > { %9700 = vmatpush1.bf16.msra.mxu1 %v13137_v17  ;;  %9117 = vmatprep.subr.bf16.mxu0 %v13144_v45  ;;  %v13169_v17 = vcombine.low %v2124_v15, %v2128_v30  ;;  %v13176_v45 = vcombine.high %v2131_v21, %v2135_v12  ;;  %v2159_v52 = vld [vmem:[#allocation7 + $0x14f0] sm:$0xff]  ;;  %v2156_v15 = vld [vmem:[#allocation7 + $0x14d8] sm:$0xff] }
 0x4a6   : > { %9701 = vmatprep.subr.bf16.mxu1 %v13146_v24  ;;  %v13178_v24 = vcombine.high %v2132_v14, %v2136_v18  ;;  %v2160_v30 = vld [vmem:[#allocation7 + $0x14f8] sm:$0xff] }
 0x4a8   : > { %9118 = vmatpush1.bf16.msra.mxu0 %v13143_v22  ;;  %v13175_v22 = vcombine.low %v2131_v21, %v2135_v12  ;;  %v2164_v21 = vld [vmem:[#allocation7 + $0x1518] sm:$0xff] }
 0x4a9   : > { %9702 = vmatpush1.bf16.msra.mxu1 %v13145_v28  ;;  %9119 = vmatprep.subr.bf16.mxu0 %v13152_v31  ;;  %v13177_v28 = vcombine.low %v2132_v14, %v2136_v18  ;;  %v13184_v31 = vcombine.high %v2139_v9, %v2143_v47  ;;  %v2168_v12 = vld [vmem:[#allocation7 + $0x1538] sm:$0xff]  ;;  %v13199_v14 = vcombine.low %v2155_v23, %v2159_v52 }
 0x4aa   : > { %9703 = vmatprep.subr.bf16.mxu1 %v13154_v57  ;;  %v13186_v57 = vcombine.high %v2140_v43, %v2144_v2  ;;  %v13201_v18 = vcombine.low %v2156_v15, %v2160_v30 }
 0x4ac   : > { %9120 = vmatpush1.bf16.msra.mxu0 %v13151_v5  ;;  %v13183_v5 = vcombine.low %v2139_v9, %v2143_v47  ;;  %v2172_v9 = vld [vmem:[#allocation7 + $0x1558] sm:$0xff] }
 0x4ad   : > { %9704 = vmatpush1.bf16.msra.mxu1 %v13153_v27  ;;  %9121 = vmatprep.subr.bf16.mxu0 %v13160_v42  ;;  %v13185_v27 = vcombine.low %v2140_v43, %v2144_v2  ;;  %v13192_v42 = vcombine.high %v2147_v54, %v2151_v16  ;;  %v2176_v47 = vld [vmem:[#allocation7 + $0x1578] sm:$0xff]  ;;  %v13209_v43 = vcombine.low %v2164_v21, %v2168_v12 }
 0x4ae   : > { %9705 = vmatprep.subr.bf16.mxu1 %v13162_v39  ;;  %v13194_v39 = vcombine.high %v2148_v29, %v2152_v25 }
 0x4b0   : > { %9122 = vmatpush1.bf16.msra.mxu0 %v13159_v33  ;;  %v13193_v33 = vcombine.low %v2148_v29, %v2152_v25 }
 0x4b1   : > { %9706 = vmatpush1.bf16.msra.mxu1 %v13161_v4  ;;  %9123 = vmatprep.subr.bf16.mxu0 %v13168_v59  ;;  %v13200_v4 = vcombine.high %v2155_v23, %v2159_v52  ;;  %v2163_v59 = vld [vmem:[#allocation7 + $0x1510] sm:$0xff] }
 0x4b2   : > { %9707 = vmatprep.subr.bf16.mxu1 %v13170_v20  ;;  %v2167_v20 = vld [vmem:[#allocation7 + $0x1530] sm:$0xff] }
 0x4b4   : > { %9124 = vmatpush1.bf16.msra.mxu0 %v13167_v51  ;;  %v13208_v51 = vcombine.high %v2163_v59, %v2167_v20 }
 0x4b5   : > { %9708 = vmatpush1.bf16.msra.mxu1 %v13169_v17  ;;  %9166 = vmatprep.subr.bf16.mxu0 %v13176_v45  ;;  %v13210_v17 = vcombine.high %v2164_v21, %v2168_v12  ;;  %v2171_v45 = vld [vmem:[#allocation7 + $0x1550] sm:$0xff] }
 0x4b6   : > { %9750 = vmatprep.subr.bf16.mxu1 %v13178_v24  ;;  %v2175_v24 = vld [vmem:[#allocation7 + $0x1570] sm:$0xff] }
 0x4b7   : > { %9126 = vmatmul.mubr.bf16.vlgmr.msra.gmra.mrb[80].mxu0 %v16498_v11  ;;  %v13216_v2 = vcombine.high %v2171_v45, %v2175_v24  ;;  %v2203_v21 = vld [vmem:[#allocation7 + $0x1650] sm:$0xff] }
 0x4b8   : > { %9710 = vmatmul.mubr.bf16.vlgmr.msra.gmra.mrb[80].mxu1 %v16498_v11  ;;  %9135 = vmatprep.mubr.bf16.mxu0 %v16540_v35  ;;  %v13191_v11 = vcombine.low %v2147_v54, %v2151_v16  ;;  %v13215_v54 = vcombine.low %v2171_v45, %v2175_v24  ;;  %v13217_v16 = vcombine.low %v2172_v9, %v2176_v47  ;;  %v2207_v12 = vld [vmem:[#allocation7 + $0x1670] sm:$0xff] }
 0x4b9   : > { %9167 = vmatpush1.bf16.msra.mxu0 %v13175_v22  ;;  %9719 = vmatprep.mubr.bf16.mxu1 %v16540_v35  ;;  %v13202_v35 = vcombine.high %v2156_v15, %v2160_v30  ;;  %v2179_v22 = vld [vmem:[#allocation7 + $0x1590] sm:$0xff] }
 0x4ba   : > { %9751 = vmatpush1.bf16.msra.mxu1 %v13177_v28  ;;  %9168 = vmatprep.subr.bf16.mxu0 %v13184_v31  ;;  %v2183_v28 = vld [vmem:[#allocation7 + $0x15b0] sm:$0xff]  ;;  %v2180_v31 = vld [vmem:[#allocation7 + $0x1598] sm:$0xff] }
 0x4bb   : > { %9752 = vmatprep.subr.bf16.mxu1 %v13186_v57  ;;  %v2184_v57 = vld [vmem:[#allocation7 + $0x15b8] sm:$0xff]  ;;  %v13224_v29 = vcombine.high %v2179_v22, %v2183_v28  ;;  %v2195_v15 = vld [vmem:[#allocation7 + $0x1610] sm:$0xff] }
 0x4bc   : > { %v13226_v25 = vcombine.high %v2180_v31, %v2184_v57  ;;  %v13225_v23 = vcombine.low %v2180_v31, %v2184_v57  ;;  %v2199_v30 = vld [vmem:[#allocation7 + $0x1630] sm:$0xff]  ;;  %v2220_v31 = vld [vmem:[#allocation7 + $0x16d8] sm:$0xff] }
 0x4bd   : > { %9169 = vmatpush1.bf16.msra.mxu0 %v13183_v5  ;;  %v2187_v5 = vld [vmem:[#allocation7 + $0x15d0] sm:$0xff]  ;;  %v2224_v57 = vld [vmem:[#allocation7 + $0x16f8] sm:$0xff] }
 0x4be   : > { %9753 = vmatpush1.bf16.msra.mxu1 %v13185_v27  ;;  %9170 = vmatprep.subr.bf16.mxu0 %v13192_v42  ;;  %v2191_v27 = vld [vmem:[#allocation7 + $0x15f0] sm:$0xff]  ;;  %v2188_v42 = vld [vmem:[#allocation7 + $0x15d8] sm:$0xff] }
 0x4bf   : > { %9136 = vmatmul.mubr.bf16.gmra.mrb[84].mxu0 %v16534_v53  ;;  %9754 = vmatprep.subr.bf16.mxu1 %v13194_v39  ;;  %v2192_v39 = vld [vmem:[#allocation7 + $0x15f8] sm:$0xff]  ;;  %v13232_v52 = vcombine.high %v2187_v5, %v2191_v27  ;;  %v2215_v24 = vld [vmem:[#allocation7 + $0x16b0] sm:$0xff] }
 0x4c0   : > { %9720 = vmatmul.mubr.bf16.gmra.mrb[84].mxu1 %v16534_v53  ;;  %9145 = vmatprep.mubr.bf16.mxu0 %v16576_v8  ;;  %v13207_v53 = vcombine.low %v2163_v59, %v2167_v20  ;;  %v13240_v59 = vcombine.high %v2195_v15, %v2199_v30 }
 0x4c1   : > { %9171 = vmatpush1.bf16.msra.mxu0 %v13191_v11  ;;  %9729 = vmatprep.mubr.bf16.mxu1 %v16576_v8  ;;  %v13218_v8 = vcombine.high %v2172_v9, %v2176_v47  ;;  %v2196_v11 = vld [vmem:[#allocation7 + $0x1618] sm:$0xff] }
 0x4c2   : > { %9755 = vmatpush1.bf16.msra.mxu1 %v13193_v33  ;;  %9172 = vmatprep.subr.bf16.mxu0 %v13200_v4  ;;  %v2200_v33 = vld [vmem:[#allocation7 + $0x1638] sm:$0xff]  ;;  %v13231_v4 = vcombine.low %v2187_v5, %v2191_v27  ;;  %v2227_v5 = vld [vmem:[#allocation7 + $0x1710] sm:$0xff] }
 0x4c3   : > { %9756 = vmatprep.subr.bf16.mxu1 %v13202_v35  ;;  %v13233_v35 = vcombine.low %v2188_v42, %v2192_v39  ;;  %v13242_v20 = vcombine.high %v2196_v11, %v2200_v33  ;;  %v2212_v9 = vld [vmem:[#allocation7 + $0x1698] sm:$0xff]  ;;  %v2231_v27 = vld [vmem:[#allocation7 + $0x1730] sm:$0xff] }
 0x4c4   : > { %v2216_v47 = vld [vmem:[#allocation7 + $0x16b8] sm:$0xff] }
 0x4c5   : > { %9173 = vmatpush1.bf16.msra.mxu0 %v13199_v14  ;;  %v2204_v14 = vld [vmem:[#allocation7 + $0x1658] sm:$0xff] }
 0x4c6   : > { %9757 = vmatpush1.bf16.msra.mxu1 %v13201_v18  ;;  %9174 = vmatprep.subr.bf16.mxu0 %v13208_v51  ;;  %v2208_v18 = vld [vmem:[#allocation7 + $0x1678] sm:$0xff]  ;;  %v13241_v51 = vcombine.low %v2196_v11, %v2200_v33 }
 0x4c7   : > { %9146 = vmatmul.mubr.bf16.gmra.mrb[88].mxu0 %v16570_v1  ;;  %9758 = vmatprep.subr.bf16.mxu1 %v13210_v17  ;;  %v13248_v17 = vcombine.high %v2203_v21, %v2207_v12  ;;  %v13250_v45 = vcombine.high %v2204_v14, %v2208_v18  ;;  %v2236_v11 = vld [vmem:[#allocation7 + $0x1758] sm:$0xff] }
 0x4c8   : > { %9730 = vmatmul.mubr.bf16.gmra.mrb[88].mxu1 %v16570_v1  ;;  %9155 = vmatprep.mubr.bf16.mxu0 %v16612_v46  ;;  %v13223_v1 = vcombine.low %v2179_v22, %v2183_v28  ;;  %v2219_v22 = vld [vmem:[#allocation7 + $0x16d0] sm:$0xff]  ;;  %v2240_v33 = vld [vmem:[#allocation7 + $0x1778] sm:$0xff] }
 0x4c9   : > { %9175 = vmatpush1.bf16.msra.mxu0 %v13207_v53  ;;  %9739 = vmatprep.mubr.bf16.mxu1 %v16612_v46  ;;  %v13234_v46 = vcombine.high %v2188_v42, %v2192_v39  ;;  %v13247_v53 = vcombine.low %v2203_v21, %v2207_v12  ;;  %v2223_v28 = vld [vmem:[#allocation7 + $0x16f0] sm:$0xff]  ;;  %v2228_v42 = vld [vmem:[#allocation7 + $0x1718] sm:$0xff] }
 0x4ca   : > { %9759 = vmatpush1.bf16.msra.mxu1 %v13209_v43  ;;  %9176 = vmatprep.subr.bf16.mxu0 %v13216_v2  ;;  %v13249_v43 = vcombine.low %v2204_v14, %v2208_v18  ;;  %v2232_v39 = vld [vmem:[#allocation7 + $0x1738] sm:$0xff]  ;;  %v2243_v21 = vld [vmem:[#allocation7 + $0x1790] sm:$0xff] }
 0x4cb   : > { %9760 = vmatprep.subr.bf16.mxu1 %v13218_v8  ;;  %v13258_v8 = vcombine.high %v2212_v9, %v2216_v47  ;;  %v2247_v12 = vld [vmem:[#allocation7 + $0x17b0] sm:$0xff]  ;;  %v2244_v14 = vld [vmem:[#allocation7 + $0x1798] sm:$0xff] }
 0x4cc   : > { %v2248_v18 = vld [vmem:[#allocation7 + $0x17b8] sm:$0xff] }
 0x4cd   : > { %9177 = vmatpush1.bf16.msra.mxu0 %v13215_v54 }
 0x4ce   : > { %9761 = vmatpush1.bf16.msra.mxu1 %v13217_v16  ;;  %9178 = vmatprep.subr.bf16.mxu0 %v13224_v29  ;;  %v13257_v16 = vcombine.low %v2212_v9, %v2216_v47  ;;  %v13264_v29 = vcombine.high %v2219_v22, %v2223_v28  ;;  %v2252_v9 = vld [vmem:[#allocation7 + $0x17d8] sm:$0xff] }
 0x4cf   : > { %9156 = vmatmul.mubr.bf16.gmra.mrb[92].mxu0 %v16606_v37  ;;  %9762 = vmatprep.subr.bf16.mxu1 %v13226_v25  ;;  %v13266_v25 = vcombine.high %v2220_v31, %v2224_v57  ;;  %v2256_v47 = vld [vmem:[#allocation7 + $0x17f8] sm:$0xff] }
 0x4d0   : > { %9740 = vmatmul.mubr.bf16.gmra.mrb[92].mxu1 %v16606_v37  ;;  %9198 = vmatprep.mubr.bf16.mxu0 %v16526_v48  ;;  %v13239_v37 = vcombine.low %v2195_v15, %v2199_v30  ;;  %v2235_v15 = vld [vmem:[#allocation7 + $0x1750] sm:$0xff] }
 0x4d1   : > { %9179 = vmatpush1.bf16.msra.mxu0 %v13223_v1  ;;  %9782 = vmatprep.mubr.bf16.mxu1 %v16526_v48  ;;  %v2211_v48 = vld [vmem:[#allocation7 + $0x1690] sm:$0xff]  ;;  %v13263_v1 = vcombine.low %v2219_v22, %v2223_v28 }
 0x4d2   : > { %9763 = vmatpush1.bf16.msra.mxu1 %v13225_v23  ;;  %9180 = vmatprep.subr.bf16.mxu0 %v13232_v52  ;;  %v13256_v2 = vcombine.high %v2211_v48, %v2215_v24  ;;  %v13255_v54 = vcombine.low %v2211_v48, %v2215_v24  ;;  %v13265_v23 = vcombine.low %v2220_v31, %v2224_v57  ;;  %v2239_v30 = vld [vmem:[#allocation7 + $0x1770] sm:$0xff]  ;;  %v2260_v31 = vld [vmem:[#allocation7 + $0x1818] sm:$0xff] }
 0x4d3   : > { %9764 = vmatprep.subr.bf16.mxu1 %v13234_v46  ;;  %v13272_v52 = vcombine.high %v2227_v5, %v2231_v27  ;;  %v13274_v46 = vcombine.high %v2228_v42, %v2232_v39  ;;  %v2251_v48 = vld [vmem:[#allocation7 + $0x17d0] sm:$0xff]  ;;  %v2264_v57 = vld [vmem:[#allocation7 + $0x1838] sm:$0xff] }
 0x4d4   : > { %v2255_v24 = vld [vmem:[#allocation7 + $0x17f0] sm:$0xff] }
 0x4d5   : > { %9181 = vmatpush1.bf16.msra.mxu0 %v13231_v4  ;;  %v13271_v4 = vcombine.low %v2227_v5, %v2231_v27  ;;  %v2259_v22 = vld [vmem:[#allocation7 + $0x1810] sm:$0xff] }
 0x4d6   : > { %9765 = vmatpush1.bf16.msra.mxu1 %v13233_v35  ;;  %9182 = vmatprep.subr.bf16.mxu0 %v13240_v59  ;;  %v13273_v35 = vcombine.low %v2228_v42, %v2232_v39  ;;  %v13280_v59 = vcombine.high %v2235_v15, %v2239_v30  ;;  %v2263_v28 = vld [vmem:[#allocation7 + $0x1830] sm:$0xff]  ;;  %v2268_v42 = vld [vmem:[#allocation7 + $0x1858] sm:$0xff] }
 0x4d7   : > { %9766 = vmatprep.subr.bf16.mxu1 %v13242_v20  ;;  %v13282_v20 = vcombine.high %v2236_v11, %v2240_v33  ;;  %v2267_v5 = vld [vmem:[#allocation7 + $0x1850] sm:$0xff]  ;;  %v2272_v39 = vld [vmem:[#allocation7 + $0x1878] sm:$0xff] }
 0x4d8   : > { %v2271_v27 = vld [vmem:[#allocation7 + $0x1870] sm:$0xff] }
 0x4d9   : > { %9183 = vmatpush1.bf16.msra.mxu0 %v13239_v37  ;;  %v13279_v37 = vcombine.low %v2235_v15, %v2239_v30  ;;  %v2275_v15 = vld [vmem:[#allocation7 + $0x1890] sm:$0xff] }
 0x4da   : > { %9767 = vmatpush1.bf16.msra.mxu1 %v13241_v51  ;;  %9184 = vmatprep.subr.bf16.mxu0 %v13248_v17  ;;  %v13281_v51 = vcombine.low %v2236_v11, %v2240_v33  ;;  %v13288_v17 = vcombine.high %v2243_v21, %v2247_v12  ;;  %v2279_v30 = vld [vmem:[#allocation7 + $0x18b0] sm:$0xff]  ;;  %v2276_v11 = vld [vmem:[#allocation7 + $0x1898] sm:$0xff] }
 0x4db   : > { %9768 = vmatprep.subr.bf16.mxu1 %v13250_v45  ;;  %v13290_v45 = vcombine.high %v2244_v14, %v2248_v18  ;;  %v2280_v33 = vld [vmem:[#allocation7 + $0x18b8] sm:$0xff] }
 0x4dd   : > { %9185 = vmatpush1.bf16.msra.mxu0 %v13247_v53  ;;  %v13287_v53 = vcombine.low %v2243_v21, %v2247_v12  ;;  %v2283_v21 = vld [vmem:[#allocation7 + $0x18d0] sm:$0xff] }
 0x4de   : > { %9769 = vmatpush1.bf16.msra.mxu1 %v13249_v43  ;;  %9186 = vmatprep.subr.bf16.mxu0 %v13256_v2  ;;  %v13289_v43 = vcombine.low %v2244_v14, %v2248_v18  ;;  %v13296_v2 = vcombine.high %v2251_v48, %v2255_v24  ;;  %v2287_v12 = vld [vmem:[#allocation7 + $0x18f0] sm:$0xff]  ;;  %v2284_v14 = vld [vmem:[#allocation7 + $0x18d8] sm:$0xff] }
 0x4df   : > { %9770 = vmatprep.subr.bf16.mxu1 %v13258_v8  ;;  %v13298_v8 = vcombine.high %v2252_v9, %v2256_v47  ;;  %v2288_v18 = vld [vmem:[#allocation7 + $0x18f8] sm:$0xff] }
 0x4e1   : > { %9187 = vmatpush1.bf16.msra.mxu0 %v13255_v54  ;;  %v13295_v54 = vcombine.low %v2251_v48, %v2255_v24  ;;  %v2292_v48 = vld [vmem:[#allocation7 + $0x1918] sm:$0xff] }
 0x4e2   : > { %9771 = vmatpush1.bf16.msra.mxu1 %v13257_v16  ;;  %9188 = vmatprep.subr.bf16.mxu0 %v13264_v29  ;;  %v13297_v16 = vcombine.low %v2252_v9, %v2256_v47  ;;  %v13304_v29 = vcombine.high %v2259_v22, %v2263_v28  ;;  %v2296_v24 = vld [vmem:[#allocation7 + $0x1938] sm:$0xff]  ;;  %v13327_v9 = vcombine.low %v2283_v21, %v2287_v12 }
 0x4e3   : > { %9772 = vmatprep.subr.bf16.mxu1 %v13266_v25  ;;  %v13306_v25 = vcombine.high %v2260_v31, %v2264_v57  ;;  %v13329_v47 = vcombine.low %v2284_v14, %v2288_v18 }
 0x4e5   : > { %9189 = vmatpush1.bf16.msra.mxu0 %v13263_v1  ;;  %v13303_v1 = vcombine.low %v2259_v22, %v2263_v28  ;;  %v2300_v22 = vld [vmem:[#allocation7 + $0x1958] sm:$0xff] }
 0x4e6   : > { %9773 = vmatpush1.bf16.msra.mxu1 %v13265_v23  ;;  %9190 = vmatprep.subr.bf16.mxu0 %v13272_v52  ;;  %v13305_v23 = vcombine.low %v2260_v31, %v2264_v57  ;;  %v13312_v52 = vcombine.high %v2267_v5, %v2271_v27  ;;  %v2304_v28 = vld [vmem:[#allocation7 + $0x1978] sm:$0xff]  ;;  %v13337_v31 = vcombine.low %v2292_v48, %v2296_v24 }
 0x4e7   : > { %9774 = vmatprep.subr.bf16.mxu1 %v13274_v46  ;;  %v13314_v46 = vcombine.high %v2268_v42, %v2272_v39 }
 0x4e9   : > { %9191 = vmatpush1.bf16.msra.mxu0 %v13271_v4  ;;  %v13311_v4 = vcombine.low %v2267_v5, %v2271_v27  ;;  %v13345_v27 = vcombine.low %v2300_v22, %v2304_v28 }
 0x4ea   : > { %9775 = vmatpush1.bf16.msra.mxu1 %v13273_v35  ;;  %9192 = vmatprep.subr.bf16.mxu0 %v13280_v59  ;;  %v13313_v35 = vcombine.low %v2268_v42, %v2272_v39  ;;  %v13320_v59 = vcombine.high %v2275_v15, %v2279_v30 }
 0x4eb   : > { %9776 = vmatprep.subr.bf16.mxu1 %v13282_v20  ;;  %v13322_v20 = vcombine.high %v2276_v11, %v2280_v33 }
 0x4ed   : > { %9193 = vmatpush1.bf16.msra.mxu0 %v13279_v37  ;;  %v13321_v37 = vcombine.low %v2276_v11, %v2280_v33  ;;  %v2323_v11 = vld [vmem:[#allocation7 + $0x1a10] sm:$0xff] }
 0x4ee   : > { %9777 = vmatpush1.bf16.msra.mxu1 %v13281_v51  ;;  %9194 = vmatprep.subr.bf16.mxu0 %v13288_v17  ;;  %v13328_v51 = vcombine.high %v2283_v21, %v2287_v12  ;;  %v2291_v17 = vld [vmem:[#allocation7 + $0x1910] sm:$0xff] }
 0x4ef   : > { %9778 = vmatprep.subr.bf16.mxu1 %v13290_v45  ;;  %v2295_v45 = vld [vmem:[#allocation7 + $0x1930] sm:$0xff] }
 0x4f0   : > { %v2327_v33 = vld [vmem:[#allocation7 + $0x1a30] sm:$0xff] }
 0x4f1   : > { %9195 = vmatpush1.bf16.msra.mxu0 %v13287_v53  ;;  %v13336_v53 = vcombine.high %v2291_v17, %v2295_v45  ;;  %v13368_v21 = vcombine.high %v2323_v11, %v2327_v33 }
 0x4f2   : > { %9779 = vmatpush1.bf16.msra.mxu1 %v13289_v43  ;;  %9196 = vmatprep.subr.bf16.mxu0 %v13296_v2  ;;  %v13338_v43 = vcombine.high %v2292_v48, %v2296_v24  ;;  %v2299_v2 = vld [vmem:[#allocation7 + $0x1950] sm:$0xff]  ;;  %v2340_v48 = vld [vmem:[#allocation7 + $0x1a98] sm:$0xff] }
 0x4f3   : > { %9780 = vmatprep.subr.bf16.mxu1 %v13298_v8  ;;  %v2303_v8 = vld [vmem:[#allocation7 + $0x1970] sm:$0xff]  ;;  %v2344_v24 = vld [vmem:[#allocation7 + $0x1ab8] sm:$0xff] }
 0x4f4   : > { %v13344_v57 = vcombine.high %v2299_v2, %v2303_v8  ;;  %v13343_v5 = vcombine.low %v2299_v2, %v2303_v8  ;;  %v2347_v2 = vld [vmem:[#allocation7 + $0x1ad0] sm:$0xff] }
 0x4f5   : > { %9197 = vmatpush1.bf16.msra.mxu0 %v13295_v54  ;;  %v2307_v54 = vld [vmem:[#allocation7 + $0x1990] sm:$0xff] }
 0x4f6   : > { %9781 = vmatpush1.bf16.msra.mxu1 %v13297_v16  ;;  %9239 = vmatprep.subr.bf16.mxu0 %v13304_v29  ;;  %v2311_v16 = vld [vmem:[#allocation7 + $0x19b0] sm:$0xff]  ;;  %v2308_v29 = vld [vmem:[#allocation7 + $0x1998] sm:$0xff] }
 0x4f7   : > { %9823 = vmatprep.subr.bf16.mxu1 %v13306_v25  ;;  %v2312_v25 = vld [vmem:[#allocation7 + $0x19b8] sm:$0xff]  ;;  %v13352_v42 = vcombine.high %v2307_v54, %v2311_v16  ;;  %v2351_v8 = vld [vmem:[#allocation7 + $0x1af0] sm:$0xff] }
 0x4f8   : > { %9199 = vmatmul.mubr.bf16.vlgmr.msra.gmra.mrb[80].mxu0 %v16517_v55  ;;  %v13354_v39 = vcombine.high %v2308_v29, %v2312_v25 }
 0x4f9   : > { %9783 = vmatmul.mubr.bf16.vlgmr.msra.gmra.mrb[80].mxu1 %v16517_v55  ;;  %9208 = vmatprep.mubr.bf16.mxu0 %v16562_v49  ;;  %v13319_v55 = vcombine.low %v2275_v15, %v2279_v30  ;;  %v13353_v15 = vcombine.low %v2308_v29, %v2312_v25  ;;  %v2356_v29 = vld [vmem:[#allocation7 + $0x1b18] sm:$0xff] }
 0x4fa   : > { %9240 = vmatpush1.bf16.msra.mxu0 %v13303_v1  ;;  %9792 = vmatprep.mubr.bf16.mxu1 %v16562_v49  ;;  %v13330_v49 = vcombine.high %v2284_v14, %v2288_v18  ;;  %v2315_v1 = vld [vmem:[#allocation7 + $0x19d0] sm:$0xff]  ;;  %v2360_v25 = vld [vmem:[#allocation7 + $0x1b38] sm:$0xff] }
 0x4fb   : > { %9824 = vmatpush1.bf16.msra.mxu1 %v13305_v23  ;;  %9241 = vmatprep.subr.bf16.mxu0 %v13312_v52  ;;  %v2319_v23 = vld [vmem:[#allocation7 + $0x19f0] sm:$0xff]  ;;  %v2316_v52 = vld [vmem:[#allocation7 + $0x19d8] sm:$0xff] }
 0x4fc   : > { %9825 = vmatprep.subr.bf16.mxu1 %v13314_v46  ;;  %v2320_v46 = vld [vmem:[#allocation7 + $0x19f8] sm:$0xff]  ;;  %v13360_v30 = vcombine.high %v2315_v1, %v2319_v23  ;;  %v2331_v14 = vld [vmem:[#allocation7 + $0x1a50] sm:$0xff] }
 0x4fd   : > { %v2335_v18 = vld [vmem:[#allocation7 + $0x1a70] sm:$0xff] }
 0x4fe   : > { %9242 = vmatpush1.bf16.msra.mxu0 %v13311_v4  ;;  %v2324_v4 = vld [vmem:[#allocation7 + $0x1a18] sm:$0xff] }
 0x4ff   : > { %9826 = vmatpush1.bf16.msra.mxu1 %v13313_v35  ;;  %9243 = vmatprep.subr.bf16.mxu0 %v13320_v59  ;;  %v2328_v35 = vld [vmem:[#allocation7 + $0x1a38] sm:$0xff]  ;;  %v13359_v59 = vcombine.low %v2315_v1, %v2319_v23  ;;  %v2363_v1 = vld [vmem:[#allocation7 + $0x1b50] sm:$0xff] }
 0x500   : > { %9209 = vmatmul.mubr.bf16.gmra.mrb[84].mxu0 %v16553_v60  ;;  %9827 = vmatprep.subr.bf16.mxu1 %v13322_v20  ;;  %v13361_v20 = vcombine.low %v2316_v52, %v2320_v46  ;;  %v13370_v12 = vcombine.high %v2324_v4, %v2328_v35  ;;  %v2367_v23 = vld [vmem:[#allocation7 + $0x1b70] sm:$0xff] }
 0x501   : > { %9793 = vmatmul.mubr.bf16.gmra.mrb[84].mxu1 %v16553_v60  ;;  %9218 = vmatprep.mubr.bf16.mxu0 %v16598_v50  ;;  %v13335_v60 = vcombine.low %v2291_v17, %v2295_v45  ;;  %v2343_v45 = vld [vmem:[#allocation7 + $0x1ab0] sm:$0xff] }
 0x502   : > { %9244 = vmatpush1.bf16.msra.mxu0 %v13319_v55  ;;  %9802 = vmatprep.mubr.bf16.mxu1 %v16598_v50  ;;  %v13346_v50 = vcombine.high %v2300_v22, %v2304_v28  ;;  %v2332_v55 = vld [vmem:[#allocation7 + $0x1a58] sm:$0xff] }
 0x503   : > { %9828 = vmatpush1.bf16.msra.mxu1 %v13321_v37  ;;  %9245 = vmatprep.subr.bf16.mxu0 %v13328_v51  ;;  %v2336_v37 = vld [vmem:[#allocation7 + $0x1a78] sm:$0xff]  ;;  %v13369_v51 = vcombine.low %v2324_v4, %v2328_v35 }
 0x504   : > { %9829 = vmatprep.subr.bf16.mxu1 %v13330_v49  ;;  %v13376_v49 = vcombine.high %v2331_v14, %v2335_v18  ;;  %v13378_v17 = vcombine.high %v2332_v55, %v2336_v37  ;;  %v2348_v22 = vld [vmem:[#allocation7 + $0x1ad8] sm:$0xff] }
 0x505   : > { %v2352_v28 = vld [vmem:[#allocation7 + $0x1af8] sm:$0xff] }
 0x506   : > { %9246 = vmatpush1.bf16.msra.mxu0 %v13327_v9  ;;  %v13375_v9 = vcombine.low %v2331_v14, %v2335_v18  ;;  %v2372_v4 = vld [vmem:[#allocation7 + $0x1b98] sm:$0xff]  ;;  %v2379_v14 = vld [vmem:[#allocation7 + $0x1bd0] sm:$0xff] }
 0x507   : > { %9830 = vmatpush1.bf16.msra.mxu1 %v13329_v47  ;;  %9247 = vmatprep.subr.bf16.mxu0 %v13336_v53  ;;  %v13377_v47 = vcombine.low %v2332_v55, %v2336_v37  ;;  %v2376_v35 = vld [vmem:[#allocation7 + $0x1bb8] sm:$0xff]  ;;  %v2383_v18 = vld [vmem:[#allocation7 + $0x1bf0] sm:$0xff] }
 0x508   : > { %9219 = vmatmul.mubr.bf16.gmra.mrb[88].mxu0 %v16589_v38  ;;  %9831 = vmatprep.subr.bf16.mxu1 %v13338_v43  ;;  %v13386_v43 = vcombine.high %v2340_v48, %v2344_v24  ;;  %v2380_v55 = vld [vmem:[#allocation7 + $0x1bd8] sm:$0xff] }
 0x509   : > { %9803 = vmatmul.mubr.bf16.gmra.mrb[88].mxu1 %v16589_v38  ;;  %9228 = vmatprep.mubr.bf16.mxu0 %v16634_v56  ;;  %v13351_v38 = vcombine.low %v2307_v54, %v2311_v16  ;;  %v2355_v54 = vld [vmem:[#allocation7 + $0x1b10] sm:$0xff]  ;;  %v2384_v37 = vld [vmem:[#allocation7 + $0x1bf8] sm:$0xff] }
 0x50a   : > { %9248 = vmatpush1.bf16.msra.mxu0 %v13335_v60  ;;  %9812 = vmatprep.mubr.bf16.mxu1 %v16634_v56  ;;  %v13362_v56 = vcombine.high %v2316_v52, %v2320_v46  ;;  %v2359_v16 = vld [vmem:[#allocation7 + $0x1b30] sm:$0xff]  ;;  %v2364_v52 = vld [vmem:[#allocation7 + $0x1b58] sm:$0xff] }
 0x50b   : > { %9832 = vmatpush1.bf16.msra.mxu1 %v13337_v31  ;;  %9249 = vmatprep.subr.bf16.mxu0 %v13344_v57  ;;  %v13385_v31 = vcombine.low %v2340_v48, %v2344_v24  ;;  %v13392_v57 = vcombine.high %v2347_v2, %v2351_v8  ;;  %v2368_v46 = vld [vmem:[#allocation7 + $0x1b78] sm:$0xff] }
 0x50c   : > { %9833 = vmatprep.subr.bf16.mxu1 %v13346_v50  ;;  %v13394_v50 = vcombine.high %v2348_v22, %v2352_v28  ;;  %v2388_v48 = vld [vmem:[#allocation7 + $0x1c18] sm:$0xff] }
 0x50d   : > { %v2392_v24 = vld [vmem:[#allocation7 + $0x1c38] sm:$0xff] }
 0x50e   : > { %9250 = vmatpush1.bf16.msra.mxu0 %v13343_v5  ;;  %v13391_v5 = vcombine.low %v2347_v2, %v2351_v8  ;;  %v2395_v2 = vld [vmem:[#allocation7 + $0x1c50] sm:$0xff] }
 0x50f   : > { %9834 = vmatpush1.bf16.msra.mxu1 %v13345_v27  ;;  %9251 = vmatprep.subr.bf16.mxu0 %v13352_v42  ;;  %v13393_v27 = vcombine.low %v2348_v22, %v2352_v28  ;;  %v13400_v42 = vcombine.high %v2355_v54, %v2359_v16  ;;  %v2399_v8 = vld [vmem:[#allocation7 + $0x1c70] sm:$0xff]  ;;  %v2396_v22 = vld [vmem:[#allocation7 + $0x1c58] sm:$0xff] }
 0x510   : > { %9229 = vmatmul.mubr.bf16.gmra.mrb[92].mxu0 %v16625_v26  ;;  %9835 = vmatprep.subr.bf16.mxu1 %v13354_v39  ;;  %v13402_v39 = vcombine.high %v2356_v29, %v2360_v25  ;;  %v2400_v28 = vld [vmem:[#allocation7 + $0x1c78] sm:$0xff] }
 0x511   : > { %9813 = vmatmul.mubr.bf16.gmra.mrb[92].mxu1 %v16625_v26  ;;  %9271 = vmatprep.mubr.bf16.mxu0 %v16648_v32  ;;  %v13367_v26 = vcombine.low %v2323_v11, %v2327_v33  ;;  %v2371_v11 = vld [vmem:[#allocation7 + $0x1b90] sm:$0xff] }
 0x512   : > { %9252 = vmatpush1.bf16.msra.mxu0 %v13351_v38  ;;  %9855 = vmatprep.mubr.bf16.mxu1 %v16648_v32  ;;  %v2339_v32 = vld [vmem:[#allocation7 + $0x1a90] sm:$0xff]  ;;  %v13399_v38 = vcombine.low %v2355_v54, %v2359_v16 }
 0x513   : > { %9836 = vmatpush1.bf16.msra.mxu1 %v13353_v15  ;;  %9253 = vmatprep.subr.bf16.mxu0 %v13360_v30  ;;  %v13384_v53 = vcombine.high %v2339_v32, %v2343_v45  ;;  %v13383_v60 = vcombine.low %v2339_v32, %v2343_v45  ;;  %v13401_v15 = vcombine.low %v2356_v29, %v2360_v25  ;;  %v2375_v33 = vld [vmem:[#allocation7 + $0x1bb0] sm:$0xff]  ;;  %v2404_v29 = vld [vmem:[#allocation7 + $0x1c98] sm:$0xff] }
 0x514   : > { %9837 = vmatprep.subr.bf16.mxu1 %v13362_v56  ;;  %v13408_v30 = vcombine.high %v2363_v1, %v2367_v23  ;;  %v13410_v56 = vcombine.high %v2364_v52, %v2368_v46  ;;  %v2387_v32 = vld [vmem:[#allocation7 + $0x1c10] sm:$0xff]  ;;  %v2408_v25 = vld [vmem:[#allocation7 + $0x1cb8] sm:$0xff] }
 0x515   : > { %v2391_v45 = vld [vmem:[#allocation7 + $0x1c30] sm:$0xff] }
 0x516   : > { %9254 = vmatpush1.bf16.msra.mxu0 %v13359_v59  ;;  %v13407_v59 = vcombine.low %v2363_v1, %v2367_v23  ;;  %v2403_v54 = vld [vmem:[#allocation7 + $0x1c90] sm:$0xff] }
 0x517   : > { %9838 = vmatpush1.bf16.msra.mxu1 %v13361_v20  ;;  %9255 = vmatprep.subr.bf16.mxu0 %v13368_v21  ;;  %v13409_v20 = vcombine.low %v2364_v52, %v2368_v46  ;;  %v13416_v21 = vcombine.high %v2371_v11, %v2375_v33  ;;  %v2407_v16 = vld [vmem:[#allocation7 + $0x1cb0] sm:$0xff]  ;;  %v2412_v52 = vld [vmem:[#allocation7 + $0x1cd8] sm:$0xff] }
 0x518   : > { %9839 = vmatprep.subr.bf16.mxu1 %v13370_v12  ;;  %v13418_v12 = vcombine.high %v2372_v4, %v2376_v35  ;;  %v2411_v1 = vld [vmem:[#allocation7 + $0x1cd0] sm:$0xff]  ;;  %v2416_v46 = vld [vmem:[#allocation7 + $0x1cf8] sm:$0xff] }
 0x519   : > { %v2415_v23 = vld [vmem:[#allocation7 + $0x1cf0] sm:$0xff] }
 0x51a   : > { %9256 = vmatpush1.bf16.msra.mxu0 %v13367_v26  ;;  %v13415_v26 = vcombine.low %v2371_v11, %v2375_v33  ;;  %v2420_v11 = vld [vmem:[#allocation7 + $0x1d18] sm:$0xff] }
 0x51b   : > { %9840 = vmatpush1.bf16.msra.mxu1 %v13369_v51  ;;  %9257 = vmatprep.subr.bf16.mxu0 %v13376_v49  ;;  %v13417_v51 = vcombine.low %v2372_v4, %v2376_v35  ;;  %v13424_v49 = vcombine.high %v2379_v14, %v2383_v18  ;;  %v2424_v33 = vld [vmem:[#allocation7 + $0x1d38] sm:$0xff]  ;;  %v13455_v4 = vcombine.low %v2411_v1, %v2415_v23 }
 0x51c   : > { %9841 = vmatprep.subr.bf16.mxu1 %v13378_v17  ;;  %v13426_v17 = vcombine.high %v2380_v55, %v2384_v37  ;;  %v13457_v35 = vcombine.low %v2412_v52, %v2416_v46 }
 0x51e   : > { %9258 = vmatpush1.bf16.msra.mxu0 %v13375_v9  ;;  %v13423_v9 = vcombine.low %v2379_v14, %v2383_v18  ;;  %v2428_v14 = vld [vmem:[#allocation7 + $0x1d58] sm:$0xff] }
 0x51f   : > { %9842 = vmatpush1.bf16.msra.mxu1 %v13377_v47  ;;  %9259 = vmatprep.subr.bf16.mxu0 %v13384_v53  ;;  %v13425_v47 = vcombine.low %v2380_v55, %v2384_v37  ;;  %v13432_v53 = vcombine.high %v2387_v32, %v2391_v45  ;;  %v2432_v18 = vld [vmem:[#allocation7 + $0x1d78] sm:$0xff]  ;;  %v13465_v55 = vcombine.low %v2420_v11, %v2424_v33 }
 0x520   : > { %9843 = vmatprep.subr.bf16.mxu1 %v13386_v43  ;;  %v13434_v43 = vcombine.high %v2388_v48, %v2392_v24 }
 0x522   : > { %9260 = vmatpush1.bf16.msra.mxu0 %v13383_v60  ;;  %v13431_v60 = vcombine.low %v2387_v32, %v2391_v45  ;;  %v13473_v45 = vcombine.low %v2428_v14, %v2432_v18 }
 0x523   : > { %9844 = vmatpush1.bf16.msra.mxu1 %v13385_v31  ;;  %9261 = vmatprep.subr.bf16.mxu0 %v13392_v57  ;;  %v13433_v31 = vcombine.low %v2388_v48, %v2392_v24  ;;  %v13440_v57 = vcombine.high %v2395_v2, %v2399_v8 }
 0x524   : > { %9845 = vmatprep.subr.bf16.mxu1 %v13394_v50  ;;  %v13442_v50 = vcombine.high %v2396_v22, %v2400_v28 }
 0x526   : > { %9262 = vmatpush1.bf16.msra.mxu0 %v13391_v5  ;;  %v13439_v5 = vcombine.low %v2395_v2, %v2399_v8 }
 0x527   : > { %9846 = vmatpush1.bf16.msra.mxu1 %v13393_v27  ;;  %9263 = vmatprep.subr.bf16.mxu0 %v13400_v42  ;;  %v13441_v27 = vcombine.low %v2396_v22, %v2400_v28  ;;  %v13448_v42 = vcombine.high %v2403_v54, %v2407_v16  ;;  %v2451_v22 = vld [vmem:[#allocation7 + $0x1e10] sm:$0xff] }
 0x528   : > { %9847 = vmatprep.subr.bf16.mxu1 %v13402_v39  ;;  %v13450_v39 = vcombine.high %v2404_v29, %v2408_v25  ;;  %v2455_v28 = vld [vmem:[#allocation7 + $0x1e30] sm:$0xff] }
 0x52a   : > { %9264 = vmatpush1.bf16.msra.mxu0 %v13399_v38  ;;  %v13449_v38 = vcombine.low %v2404_v29, %v2408_v25  ;;  %v2459_v25 = vld [vmem:[#allocation7 + $0x1e50] sm:$0xff] }
 0x52b   : > { %9848 = vmatpush1.bf16.msra.mxu1 %v13401_v15  ;;  %9265 = vmatprep.subr.bf16.mxu0 %v13408_v30  ;;  %v13456_v15 = vcombine.high %v2411_v1, %v2415_v23  ;;  %v2419_v30 = vld [vmem:[#allocation7 + $0x1d10] sm:$0xff] }
 0x52c   : > { %9849 = vmatprep.subr.bf16.mxu1 %v13410_v56  ;;  %v2423_v56 = vld [vmem:[#allocation7 + $0x1d30] sm:$0xff] }
 0x52e   : > { %9266 = vmatpush1.bf16.msra.mxu0 %v13407_v59  ;;  %v13464_v59 = vcombine.high %v2419_v30, %v2423_v56 }
 0x52f   : > { %9850 = vmatpush1.bf16.msra.mxu1 %v13409_v20  ;;  %9267 = vmatprep.subr.bf16.mxu0 %v13416_v21  ;;  %v13466_v20 = vcombine.high %v2420_v11, %v2424_v33  ;;  %v2427_v21 = vld [vmem:[#allocation7 + $0x1d50] sm:$0xff] }
 0x530   : > { %9851 = vmatprep.subr.bf16.mxu1 %v13418_v12  ;;  %v2431_v12 = vld [vmem:[#allocation7 + $0x1d70] sm:$0xff] }
 0x531   : > { %v13472_v37 = vcombine.high %v2427_v21, %v2431_v12  ;;  %v13471_v32 = vcombine.low %v2427_v21, %v2431_v12  ;;  %v2475_v11 = vld [vmem:[#allocation7 + $0x1ed0] sm:$0xff]  ;;  %v9969_v12 = vsub.f32 0.0, %v16899_v61  ;;  %v9977_v61 = vsub.f32 0.0, %v16910_v34 }
 0x532   : > { %9268 = vmatpush1.bf16.msra.mxu0 %v13415_v26  ;;  %v2435_v26 = vld [vmem:[#allocation7 + $0x1d90] sm:$0xff] }
 0x533   : > { %9852 = vmatpush1.bf16.msra.mxu1 %v13417_v51  ;;  %9269 = vmatprep.subr.bf16.mxu0 %v13424_v49  ;;  %v2439_v51 = vld [vmem:[#allocation7 + $0x1db0] sm:$0xff]  ;;  %v2436_v49 = vld [vmem:[#allocation7 + $0x1d98] sm:$0xff] }
 0x534   : > { %9853 = vmatprep.subr.bf16.mxu1 %v13426_v17  ;;  %v2440_v17 = vld [vmem:[#allocation7 + $0x1db8] sm:$0xff]  ;;  %v13480_v48 = vcombine.high %v2435_v26, %v2439_v51  ;;  %v2479_v33 = vld [vmem:[#allocation7 + $0x1ef0] sm:$0xff] }
 0x535   : > { %v13482_v24 = vcombine.high %v2436_v49, %v2440_v17  ;;  %v13481_v2 = vcombine.low %v2436_v49, %v2440_v17  ;;  %v13520_v21 = vcombine.high %v2475_v11, %v2479_v33  ;;  %v9972_v49 = vsub.f32 0.0, %v16908_v0 }
 0x536   : > { %9270 = vmatpush1.bf16.msra.mxu0 %v13423_v9  ;;  %v2443_v9 = vld [vmem:[#allocation7 + $0x1dd0] sm:$0xff] }
 0x537   : > { %9854 = vmatpush1.bf16.msra.mxu1 %v13425_v47  ;;  %9312 = vmatprep.subr.bf16.mxu0 %v13432_v53  ;;  %v2447_v47 = vld [vmem:[#allocation7 + $0x1df0] sm:$0xff]  ;;  %v2444_v53 = vld [vmem:[#allocation7 + $0x1dd8] sm:$0xff] }
 0x538   : > { %9896 = vmatprep.subr.bf16.mxu1 %v13434_v43  ;;  %v2448_v43 = vld [vmem:[#allocation7 + $0x1df8] sm:$0xff]  ;;  %v13488_v8 = vcombine.high %v2443_v9, %v2447_v47 }
 0x539   : > { %9272 = vmatmul.mubr.bf16.vlgmr.msra.gmra.mrb[80].mxu0 %v16642_v36 }
 0x53a   : > { %9856 = vmatmul.mubr.bf16.vlgmr.msra.gmra.mrb[80].mxu1 %v16642_v36  ;;  %9281 = vmatprep.mubr.bf16.mxu0 %v16680_v62  ;;  %v13447_v36 = vcombine.low %v2403_v54, %v2407_v16  ;;  %v13489_v54 = vcombine.low %v2444_v53, %v2448_v43  ;;  %v13496_v16 = vcombine.high %v2451_v22, %v2455_v28 }
 0x53b   : > { %9313 = vmatpush1.bf16.msra.mxu0 %v13431_v60  ;;  %9865 = vmatprep.mubr.bf16.mxu1 %v16680_v62  ;;  %v13458_v62 = vcombine.high %v2412_v52, %v2416_v46  ;;  %v19299_v60 = vld [vmem:[#allocation144_spill] sm:$0xff] }
 0x53c   : > { %9897 = vmatpush1.bf16.msra.mxu1 %v13433_v31  ;;  %9314 = vmatprep.subr.bf16.mxu0 %v13440_v57  ;;  %v2452_v31 = vld [vmem:[#allocation7 + $0x1e18] sm:$0xff]  ;;  %v2467_v52 = vld [vmem:[#allocation7 + $0x1e90] sm:$0xff] }
 0x53d   : > { %9898 = vmatprep.subr.bf16.mxu1 %v13442_v50  ;;  %v2456_v57 = vld [vmem:[#allocation7 + $0x1e38] sm:$0xff]  ;;  %v13487_v50 = vcombine.low %v2443_v9, %v2447_v47  ;;  %v2471_v46 = vld [vmem:[#allocation7 + $0x1eb0] sm:$0xff]  ;;  %v9979_v47 = vsub.f32 0.0, %v16912_v44 }
 0x53e   : > { %v13498_v29 = vcombine.high %v2452_v31, %v2456_v57  ;;  %v2495_v9 = vld [vmem:[#allocation7 + $0x1f70] sm:$0xff] }
 0x53f   : > { %9315 = vmatpush1.bf16.msra.mxu0 %v13439_v5  ;;  %v2463_v5 = vld [vmem:[#allocation7 + $0x1e70] sm:$0xff] }
 0x540   : > { %9899 = vmatpush1.bf16.msra.mxu1 %v13441_v27  ;;  %9316 = vmatprep.subr.bf16.mxu0 %v13448_v42  ;;  %v2460_v27 = vld [vmem:[#allocation7 + $0x1e58] sm:$0xff]  ;;  %v13504_v1 = vcombine.high %v2459_v25, %v2463_v5 }
 0x541   : > { %9282 = vmatmul.mubr.bf16.gmra.mrb[84].mxu0 %v16674_v3  ;;  %9900 = vmatprep.subr.bf16.mxu1 %v13450_v39  ;;  %v2464_v42 = vld [vmem:[#allocation7 + $0x1e78] sm:$0xff]  ;;  %v13497_v39 = vcombine.low %v2452_v31, %v2456_v57  ;;  %v2503_v31 = vld [vmem:[#allocation7 + $0x1fb0] sm:$0xff]  ;;  %v10053_v57 = vmul.f32 1.442695, %v9979_v47 }
 0x542   : > { %9866 = vmatmul.mubr.bf16.gmra.mrb[84].mxu1 %v16674_v3  ;;  %9291 = vmatprep.mubr.bf16.mxu0 %v16712_v19  ;;  %v13463_v3 = vcombine.low %v2419_v30, %v2423_v56  ;;  %v13506_v23 = vcombine.high %v2460_v27, %v2464_v42  ;;  %v13512_v30 = vcombine.high %v2467_v52, %v2471_v46 }
 0x543   : > { %9317 = vmatpush1.bf16.msra.mxu0 %v13447_v36  ;;  %9875 = vmatprep.mubr.bf16.mxu1 %v16712_v19  ;;  %v13474_v19 = vcombine.high %v2428_v14, %v2432_v18  ;;  %v2468_v36 = vld [vmem:[#allocation7 + $0x1e98] sm:$0xff]  ;;  %v2483_v18 = vld [vmem:[#allocation7 + $0x1f10] sm:$0xff] }
 0x544   : > { %9901 = vmatpush1.bf16.msra.mxu1 %v13449_v38  ;;  %9318 = vmatprep.subr.bf16.mxu0 %v13456_v15  ;;  %v2472_v38 = vld [vmem:[#allocation7 + $0x1eb8] sm:$0xff]  ;;  %v13503_v15 = vcombine.low %v2459_v25, %v2463_v5 }
 0x545   : > { %9902 = vmatprep.subr.bf16.mxu1 %v13458_v62  ;;  %v13505_v62 = vcombine.low %v2460_v27, %v2464_v42  ;;  %v13514_v56 = vcombine.high %v2468_v36, %v2472_v38 }
 0x547   : > { %9319 = vmatpush1.bf16.msra.mxu0 %v13455_v4  ;;  %v2476_v4 = vld [vmem:[#allocation7 + $0x1ed8] sm:$0xff] }
 0x548   : > { %9903 = vmatpush1.bf16.msra.mxu1 %v13457_v35  ;;  %9320 = vmatprep.subr.bf16.mxu0 %v13464_v59  ;;  %v2480_v35 = vld [vmem:[#allocation7 + $0x1ef8] sm:$0xff]  ;;  %v13511_v59 = vcombine.low %v2467_v52, %v2471_v46  ;;  %v19302_v46 = vld [vmem:[#allocation36_spill] sm:$0xff] }
 0x549   : > { %9292 = vmatmul.mubr.bf16.gmra.mrb[88].mxu0 %v16706_v40  ;;  %9904 = vmatprep.subr.bf16.mxu1 %v13466_v20  ;;  %v13513_v20 = vcombine.low %v2468_v36, %v2472_v38  ;;  %v13522_v14 = vcombine.high %v2476_v4, %v2480_v35  ;;  %v13521_v17 = vcombine.low %v2476_v4, %v2480_v35  ;;  %v9988_v36 = vsub.f32 0.0, %v19302_v46  ;;  %v2508_v38 = vld [vmem:[#allocation7 + $0x1fd8] sm:$0xff] }
 0x54a   : > { %9876 = vmatmul.mubr.bf16.gmra.mrb[88].mxu1 %v16706_v40  ;;  %9301 = vmatprep.mubr.bf16.mxu0 %v16744_v63  ;;  %v13479_v40 = vcombine.low %v2435_v26, %v2439_v51  ;;  %v9970_v26 = vsub.f32 0.0, %v16905_v58  ;;  %v13519_v51 = vcombine.low %v2475_v11, %v2479_v33  ;;  %v2496_v58 = vld [vmem:[#allocation7 + $0x1f78] sm:$0xff] }
 0x54b   : > { %9321 = vmatpush1.bf16.msra.mxu0 %v13463_v3  ;;  %9885 = vmatprep.mubr.bf16.mxu1 %v16744_v63  ;;  %v13490_v63 = vcombine.high %v2444_v53, %v2448_v43  ;;  %v2487_v3 = vld [vmem:[#allocation7 + $0x1f30] sm:$0xff]  ;;  %v2492_v53 = vld [vmem:[#allocation7 + $0x1f58] sm:$0xff] }
 0x54c   : > { %9905 = vmatpush1.bf16.msra.mxu1 %v13465_v55  ;;  %9322 = vmatprep.subr.bf16.mxu0 %v13472_v37  ;;  %v9971_v55 = vsub.f32 0.0, %v16903_v13  ;;  %v2484_v37 = vld [vmem:[#allocation7 + $0x1f18] sm:$0xff]  ;;  %v10035_v43 = vmul.f32 1.442695, %v9970_v26  ;;  %v13527_v0 = vcombine.low %v2483_v18, %v2487_v3  ;;  %v13538_v44 = vcombine.high %v2492_v53, %v2496_v58 }
 0x54d   : > { %9906 = vmatprep.subr.bf16.mxu1 %v13474_v19  ;;  %v2488_v19 = vld [vmem:[#allocation7 + $0x1f38] sm:$0xff] }
 0x54e   : > { %v10037_v13 = vmul.f32 1.442695, %v9971_v55  ;;  %v13529_v34 = vcombine.low %v2484_v37, %v2488_v19 }
 0x54f   : > { %9323 = vmatpush1.bf16.msra.mxu0 %v13471_v32  ;;  %v13528_v32 = vcombine.high %v2483_v18, %v2487_v3 }
 0x550   : > { %9907 = vmatpush1.bf16.msra.mxu1 %v13473_v45  ;;  %9324 = vmatprep.subr.bf16.mxu0 %v13480_v48  ;;  %v10033_v45 = vmul.f32 1.442695, %v9969_v12  ;;  %v13530_v48 = vcombine.high %v2484_v37, %v2488_v19  ;;  %v10337_v12 = vld [vmem:[%s18880_s3 + $0x180] sm:$0xff] }
 0x551   : > { %9302 = vmatmul.mubr.bf16.gmra.mrb[92].mxu0 %v16738_v10  ;;  %9908 = vmatprep.subr.bf16.mxu1 %v13482_v24  ;;  %v2491_v24 = vld [vmem:[#allocation7 + $0x1f50] sm:$0xff] }
 0x552   : > { %9886 = vmatmul.mubr.bf16.gmra.mrb[92].mxu1 %v16738_v10  ;;  %9344 = vmatprep.mubr.bf16.mxu0 %v19299_v60  ;;  %v13495_v10 = vcombine.low %v2451_v22, %v2455_v28  ;;  %15157 = vpow2.f32 %v10033_v45  ;;  %v10049_v22 = vmul.f32 1.442695, %v9977_v61  ;;  %v9985_v28 = vsub.f32 0.0, %v16919_v41  ;;  %v10321_v45 = vld [vmem:[%s18880_s3 + $0x100] sm:$0xff] }
 0x553   : > { %9325 = vmatpush1.bf16.msra.mxu0 %v13479_v40  ;;  %9928 = vmatprep.mubr.bf16.mxu1 %v19299_v60  ;;  %v9978_v40 = vsub.f32 0.0, %v16914_v7  ;;  %v2499_v60 = vld [vmem:[#allocation7 + $0x1f90] sm:$0xff]  ;;  %15159 = vpow2.f32 %v10037_v13  ;;  %v13535_v5 = vcombine.low %v2491_v24, %v2495_v9  ;;  %v13537_v41 = vcombine.low %v2492_v53, %v2496_v58  ;;  %v10308_v13 = vld [vmem:[%s18880_s3 + $0x98] sm:$0xff] }
 0x554   : > { %9909 = vmatpush1.bf16.msra.mxu1 %v13481_v2  ;;  %9326 = vmatprep.subr.bf16.mxu0 %v13488_v8  ;;  %v10039_v2 = vmul.f32 1.442695, %v9972_v49  ;;  %v9980_v8 = vsub.f32 0.0, %v16916_v6  ;;  %v19300_v7 = vld [vmem:[#allocation24_spill] sm:$0xff]  ;;  %15161 = vpow2.f32 %v10035_v43  ;;  %v13544_v42 = vcombine.high %v2499_v60, %v2503_v31  ;;  %v10340_v43 = vld [vmem:[%s18880_s3 + $0x198] sm:$0xff] }
 0x555   : > { %9910 = vmatprep.subr.bf16.mxu1 %v13490_v63  ;;  %v13536_v63 = vcombine.high %v2491_v24, %v2495_v9  ;;  %v10051_v6 = vmul.f32 1.442695, %v9978_v40  ;;  %v13543_v11 = vcombine.low %v2499_v60, %v2503_v31  ;;  %v10322_v24 = vld [vmem:[%s18880_s3 + $0x108] sm:$0xff]  ;;  %v10307_v9 = vld [vmem:[%s18880_s3 + $0x90] sm:$0xff] }
 0x556   : > { %15163 = vpow2.f32 %v10039_v2  ;;  %v10055_v27 = vmul.f32 1.442695, %v9980_v8  ;;  %v10339_v58 = vld [vmem:[%s18880_s3 + $0x190] sm:$0xff] }
 0x557   : > { %9327 = vmatpush1.bf16.msra.mxu0 %v13487_v50  ;;  %v9987_v50 = vsub.f32 0.0, %v19300_v7  ;;  %15165 = vpow2.f32 %v10049_v22  ;;  %v14237_v22 = vpack.c.bf16 %v10308_v13, %v10307_v9  ;;  %v10323_v60 = vld [vmem:[%s18880_s3 + $0x110] sm:$0xff] }
 0x558   : > { %9911 = vmatpush1.bf16.msra.mxu1 %v13489_v54  ;;  %9328 = vmatprep.subr.bf16.mxu0 %v13496_v16  ;;  %v2500_v54 = vld [vmem:[#allocation7 + $0x1f98] sm:$0xff]  ;;  %15167 = vpow2.f32 %v10053_v57  ;;  %v19310_v13 = vld [vmem:[#allocation32_spill] sm:$0xff] }
 0x559   : > { %9912 = vmatprep.subr.bf16.mxu1 %v13498_v29  ;;  %v2504_v16 = vld [vmem:[#allocation7 + $0x1fb8] sm:$0xff]  ;;  %v10069_v52 = vmul.f32 1.442695, %v9987_v50  ;;  %15169 = vpow2.f32 %v10051_v6  ;;  %v14269_v50 = vpack.c.bf16 %v10340_v43, %v10339_v58  ;;  %v10310_v6 = vld [vmem:[%s18880_s3 + $0xa8] sm:$0xff] }
 0x55a   : > { %v19301_v29 = vld [vmem:[#allocation22_spill] sm:$0xff]  ;;  %15171 = vpow2.f32 %v10055_v27  ;;  %v13545_v33 = vcombine.low %v2500_v54, %v2504_v16  ;;  %v19304_v7 = vld [vmem:[#allocation141_spill] sm:$0xff] }
 0x55b   : > { %9329 = vmatpush1.bf16.msra.mxu0 %v13495_v10  ;;  %v9986_v25 = vsub.f32 0.0, %v19301_v29  ;;  %v10065_v10 = vmul.f32 1.442695, %v9985_v28  ;;  %v10291_v28 = vld [vmem:[%s18880_s3 + $0x10] sm:$0xff]  ;;  %v10341_v27 = vld [vmem:[%s18880_s3 + $0x1a0] sm:$0xff]  ;;  %v10328_v43 = vld [vmem:[%s18880_s3 + $0x138] sm:$0xff] }
 0x55c   : > { %9913 = vmatpush1.bf16.msra.mxu1 %v13497_v39  ;;  %9330 = vmatprep.subr.bf16.mxu0 %v13504_v1  ;;  %v13546_v39 = vcombine.high %v2500_v54, %v2504_v16  ;;  %v2507_v1 = vld [vmem:[#allocation7 + $0x1fd0] sm:$0xff]  ;;  %v15158_v18 = vpop.eup %15157  ;;  %v10324_v54 = vld [vmem:[%s18880_s3 + $0x118] sm:$0xff]  ;;  %v10309_v16 = vld [vmem:[%s18880_s3 + $0xa0] sm:$0xff] }
 0x55d   : > { %9914 = vmatprep.subr.bf16.mxu1 %v13506_v23  ;;  %v2511_v23 = vld [vmem:[#allocation7 + $0x1ff0] sm:$0xff]  ;;  %15173 = vpow2.f32 %v10065_v10  ;;  %v15160_v37 = vpop.eup %15159 }
 0x55e   : > { %v13552_v4 = vcombine.high %v2507_v1, %v2511_v23  ;;  %15175 = vpow2.f32 %v10069_v52  ;;  %v13551_v55 = vcombine.low %v2507_v1, %v2511_v23  ;;  %v10163_v53 = vadd.f32 1.0, %v15160_v37 }
 0x55f   : > { %9331 = vmatpush1.bf16.msra.mxu0 %v13503_v15  ;;  %v2512_v15 = vld [vmem:[#allocation7 + $0x1ff8] sm:$0xff] }
 0x560   : > { %9915 = vmatpush1.bf16.msra.mxu1 %v13505_v62  ;;  %9332 = vmatprep.subr.bf16.mxu0 %v13512_v30  ;;  %v10067_v62 = vmul.f32 1.442695, %v9986_v25  ;;  %v19303_v30 = vld [vmem:[#allocation34_spill] sm:$0xff]  ;;  %v13554_v35 = vcombine.high %v2508_v38, %v2512_v15  ;;  %v13553_v19 = vcombine.low %v2508_v38, %v2512_v15  ;;  %v14241_v38 = vpack.c.bf16 %v10310_v6, %v10309_v16 }
 0x561   : > { %9916 = vmatprep.subr.bf16.mxu1 %v13514_v56  ;;  %v9993_v56 = vsub.f32 0.0, %v19303_v30  ;;  %v10293_v15 = vld [vmem:[%s18880_s3 + $0x20] sm:$0xff] }
 0x562   : > { %15177 = vpow2.f32 %v10067_v62  ;;  %v10294_v62 = vld [vmem:[%s18880_s3 + $0x28] sm:$0xff]  ;;  %v10325_v30 = vld [vmem:[%s18880_s3 + $0x120] sm:$0xff] }
 0x563   : > { %9333 = vmatpush1.bf16.msra.mxu0 %v13511_v59  ;;  %v10305_v59 = vld [vmem:[%s18880_s3 + $0x80] sm:$0xff]  ;;  %v10081_v3 = vmul.f32 1.442695, %v9993_v56 }
 0x564   : > { %9917 = vmatpush1.bf16.msra.mxu1 %v13513_v20  ;;  %9334 = vmatprep.subr.bf16.mxu0 %v13520_v21  ;;  %v10306_v20 = vld [vmem:[%s18880_s3 + $0x88] sm:$0xff]  ;;  %v10071_v21 = vmul.f32 1.442695, %v9988_v36  ;;  %v14271_v36 = vpack.c.bf16 %v10324_v54, %v10323_v60 }
 0x565   : > { %9918 = vmatprep.subr.bf16.mxu1 %v13522_v14  ;;  %v10338_v14 = vld [vmem:[%s18880_s3 + $0x188] sm:$0xff]  ;;  %v14233_v26 = vpack.c.bf16 %v10306_v20, %v10305_v59  ;;  %v10311_v59 = vld [vmem:[%s18880_s3 + $0xb0] sm:$0xff]  ;;  %v10312_v20 = vld [vmem:[%s18880_s3 + $0xb8] sm:$0xff] }
 0x566   : > { %v14265_v49 = vpack.c.bf16 %v10338_v14, %v10337_v12  ;;  %15179 = vpow2.f32 %v10071_v21  ;;  %v19308_v12 = vld [vmem:[#allocation60_spill] sm:$0xff] }
 0x567   : > { %9335 = vmatpush1.bf16.msra.mxu0 %v13519_v51  ;;  %v15162_v51 = vpop.eup %15161  ;;  %15181 = vpow2.f32 %v10081_v3  ;;  %v9996_v14 = vsub.f32 0.0, %v19308_v12  ;;  %v10344_v3 = vld [vmem:[%s18880_s3 + $0x1b8] sm:$0xff] }
 0x568   : > { %9919 = vmatpush1.bf16.msra.mxu1 %v13521_v17  ;;  %9336 = vmatprep.subr.bf16.mxu0 %v13528_v32  ;;  %v10289_v17 = vld [vmem:[%s18880_s3] sm:$0xff]  ;;  %v10290_v32 = vld [vmem:[%s18880_s3 + $0x8] sm:$0xff]  ;;  %v15164_v61 = vpop.eup %15163 }
 0x569   : > { %9920 = vmatprep.subr.bf16.mxu1 %v13530_v48  ;;  %v10161_v48 = vadd.f32 1.0, %v15158_v18  ;;  %v15166_v47 = vpop.eup %15165  ;;  %v14235_v2 = vpack.c.bf16 %v10290_v32, %v10289_v17  ;;  %v10343_v18 = vld [vmem:[%s18880_s3 + $0x1b0] sm:$0xff] }
 0x56a   : > { %v15168_v40 = vpop.eup %15167  ;;  %v10169_v57 = vadd.f32 1.0, %v15166_v47  ;;  %v10003_v47 = vsub.f32 0.0, %v19310_v13  ;;  %v14277_v58 = vpack.c.bf16 %v10344_v3, %v10343_v18  ;;  %v10299_v3 = vld [vmem:[%s18880_s3 + $0x50] sm:$0xff] }
 0x56b   : > { %9337 = vmatpush1.bf16.msra.mxu0 %v13527_v0  ;;  %v10162_v0 = vadd.f32 1.0, %v15162_v51  ;;  %v15170_v8 = vpop.eup %15169  ;;  %15183 = vrcp.f32 %v10161_v48  ;;  %v10171_v25 = vadd.f32 1.0, %v15168_v40  ;;  %v10296_v48 = vld [vmem:[%s18880_s3 + $0x38] sm:$0xff]  ;;  %v10313_v40 = vld [vmem:[%s18880_s3 + $0xc0] sm:$0xff]  ;;  %v19321_v13 = vld [vmem:[#allocation72_spill] sm:$0xff] }
 0x56c   : > { %9921 = vmatpush1.bf16.msra.mxu1 %v13529_v34  ;;  %9338 = vmatprep.subr.bf16.mxu0 %v13536_v63  ;;  %v10164_v34 = vadd.f32 1.0, %v15164_v61  ;;  %v14267_v63 = vpack.c.bf16 %v10322_v24, %v10321_v45  ;;  %v15172_v31 = vpop.eup %15171  ;;  %15185 = vrcp.f32 %v10163_v53  ;;  %v10170_v10 = vadd.f32 1.0, %v15170_v8  ;;  %v10295_v61 = vld [vmem:[%s18880_s3 + $0x30] sm:$0xff]  ;;  %v19311_v53 = vld [vmem:[#allocation151_spill] sm:$0xff] }
 0x56d   : > { %9922 = vmatprep.subr.bf16.mxu1 %v13538_v44  ;;  %v10292_v44 = vld [vmem:[%s18880_s3 + $0x18] sm:$0xff]  ;;  %v15174_v29 = vpop.eup %15173  ;;  %15187 = vrcp.f32 %v10162_v0  ;;  %v10172_v46 = vadd.f32 1.0, %v15172_v31  ;;  %v14245_v45 = vpack.c.bf16 %v10312_v20, %v10311_v59  ;;  %v10327_v24 = vld [vmem:[%s18880_s3 + $0x130] sm:$0xff]  ;;  %v10314_v0 = vld [vmem:[%s18880_s3 + $0xc8] sm:$0xff]  ;;  %v10087_v8 = vmul.f32 1.442695, %v9996_v14 }
 0x56e   : > { %v14239_v23 = vpack.c.bf16 %v10292_v44, %v10291_v28  ;;  %15189 = vrcp.f32 %v10164_v34  ;;  %v10177_v56 = vadd.f32 1.0, %v15174_v29  ;;  %v19312_v34 = vld [vmem:[#allocation29_spill] sm:$0xff]  ;;  %v10345_v28 = vld [vmem:[%s18880_s3 + $0x1c0] sm:$0xff]  ;;  %v10346_v44 = vld [vmem:[%s18880_s3 + $0x1c8] sm:$0xff]  ;;  %v14279_v6 = vpack.c.bf16 %v10328_v43, %v10327_v24 }
 0x56f   : > { %9339 = vmatpush1.bf16.msra.mxu0 %v13535_v5  ;;  %v19305_v5 = vld [vmem:[#allocation154_spill] sm:$0xff]  ;;  %15191 = vrcp.f32 %v10169_v57  ;;  %v19314_v57 = vld [vmem:[#allocation44_spill] sm:$0xff]  ;;  %v14249_v29 = vpack.c.bf16 %v10314_v0, %v10313_v40  ;;  %v19323_v43 = vld [vmem:[#allocation173_spill] sm:$0xff] }
 0x570   : > { %9923 = vmatpush1.bf16.msra.mxu1 %v13537_v41  ;;  %9340 = vmatprep.subr.bf16.mxu0 %v13544_v42  ;;  %v10342_v41 = vld [vmem:[%s18880_s3 + $0x1a8] sm:$0xff]  ;;  %v15176_v42 = vpop.eup %15175  ;;  %15193 = vrcp.f32 %v10171_v25  ;;  %v10297_v25 = vld [vmem:[%s18880_s3 + $0x40] sm:$0xff] }
 0x571   : > { %9924 = vmatprep.subr.bf16.mxu1 %v13546_v39  ;;  %v19306_v39 = vld [vmem:[#allocation48_spill] sm:$0xff]  ;;  %v15178_v52 = vpop.eup %15177  ;;  %v10179_v21 = vadd.f32 1.0, %v15176_v42  ;;  %15195 = vrcp.f32 %v10170_v10  ;;  %v10101_v42 = vmul.f32 1.442695, %v10003_v47  ;;  %v19315_v10 = vld [vmem:[#allocation41_spill] sm:$0xff]  ;;  %v10019_v47 = vsub.f32 0.0, %v19321_v13 }
 0x572   : > { %v9995_v1 = vsub.f32 0.0, %v19306_v39  ;;  %v10178_v37 = vadd.f32 1.0, %v15178_v52  ;;  %15197 = vrcp.f32 %v10172_v46  ;;  %v10009_v39 = vsub.f32 0.0, %v19315_v10  ;;  %v10315_v52 = vld [vmem:[%s18880_s3 + $0xd0] sm:$0xff]  ;;  %v10316_v46 = vld [vmem:[%s18880_s3 + $0xd8] sm:$0xff]  ;;  %v10349_v40 = vld [vmem:[%s18880_s3 + $0x1e0] sm:$0xff] }
 0x573   : > { %9341 = vmatpush1.bf16.msra.mxu0 %v13543_v11  ;;  %v19307_v11 = vld [vmem:[#allocation46_spill] sm:$0xff]  ;;  %15199 = vrcp.f32 %v10177_v56  ;;  %v14253_v18 = vpack.c.bf16 %v10316_v46, %v10315_v52  ;;  %v10350_v0 = vld [vmem:[%s18880_s3 + $0x1e8] sm:$0xff] }
 0x574   : > { %9925 = vmatpush1.bf16.msra.mxu1 %v13545_v33  ;;  %9342 = vmatprep.subr.bf16.mxu0 %v13552_v4  ;;  %v9994_v33 = vsub.f32 0.0, %v19307_v11  ;;  %v14273_v4 = vpack.c.bf16 %v10342_v41, %v10341_v27  ;;  %15201 = vrcp.f32 %v10179_v21  ;;  %v10329_v27 = vld [vmem:[%s18880_s3 + $0x140] sm:$0xff]  ;;  %v10348_v56 = vld [vmem:[%s18880_s3 + $0x1d8] sm:$0xff] }
 0x575   : > { %9926 = vmatprep.subr.bf16.mxu1 %v13554_v35  ;;  %v10326_v35 = vld [vmem:[%s18880_s3 + $0x128] sm:$0xff]  ;;  %15203 = vrcp.f32 %v10178_v37  ;;  %v10331_v37 = vld [vmem:[%s18880_s3 + $0x150] sm:$0xff]  ;;  %v10352_v52 = vld [vmem:[%s18880_s3 + $0x1f8] sm:$0xff] }
 0x576   : > { %v14275_v32 = vpack.c.bf16 %v10326_v35, %v10325_v30  ;;  %v10083_v9 = vmul.f32 1.442695, %v9994_v33  ;;  %v10347_v30 = vld [vmem:[%s18880_s3 + $0x1d0] sm:$0xff]  ;;  %v19318_v21 = vld [vmem:[#allocation67_spill] sm:$0xff] }
 0x577   : > { %9343 = vmatpush1.bf16.msra.mxu0 %v13551_v55  ;;  %v15180_v55 = vpop.eup %15179  ;;  %v10012_v12 = vsub.f32 0.0, %v19318_v21  ;;  %v10303_v21 = vld [vmem:[%s18880_s3 + $0x70] sm:$0xff] }
 0x578   : > { %9927 = vmatpush1.bf16.msra.mxu1 %v13553_v19  ;;  %14234 = vmatprep.subr.bf16.mxu0 %v14233_v26  ;;  %v10085_v19 = vmul.f32 1.442695, %v9995_v1  ;;  %v14243_v26 = vpack.c.bf16 %v10294_v62, %v10293_v15  ;;  %v15182_v51 = vpop.eup %15181  ;;  %v14281_v1 = vpack.c.bf16 %v10346_v44, %v10345_v28  ;;  %v19316_v15 = vld [vmem:[#allocation56_spill] sm:$0xff] }
 0x579   : > { %14266 = vmatprep.subr.bf16.mxu1 %v14265_v49  ;;  %v19309_v49 = vld [vmem:[#allocation58_spill] sm:$0xff]  ;;  %v17168_v60 = vpop.eup %15183  ;;  %v10185_v31 = vadd.f32 1.0, %v15182_v51  ;;  %v10011_v62 = vsub.f32 0.0, %v19316_v15  ;;  %v19319_v51 = vld [vmem:[#allocation64_spill] sm:$0xff]  ;;  %v10119_v44 = vmul.f32 1.442695, %v10012_v12 }
 0x57a   : > { %9345 = vmatmul.mubr.bf16.vlgmr.msra.gmra.mrb[80].mxu0 %v19304_v7  ;;  %v10001_v17 = vsub.f32 0.0, %v19309_v49  ;;  %v17172_v54 = vpop.eup %15185  ;;  %15205 = vpow2.f32 %v10085_v19  ;;  %v10017_v49 = vsub.f32 0.0, %v19319_v51  ;;  %v19325_v15 = vld [vmem:[#allocation176_spill] sm:$0xff]  ;;  %v10304_v12 = vld [vmem:[%s18880_s3 + $0x78] sm:$0xff]  ;;  %v10369_v51 = vld [vmem:[%s18880_s3 + $0x280] sm:$0xff] }
 0x57b   : > { %9929 = vmatmul.mubr.bf16.vlgmr.msra.gmra.mrb[80].mxu1 %v19304_v7  ;;  %9354 = vmatprep.mubr.bf16.mxu0 %v19305_v5  ;;  %v10004_v7 = vsub.f32 0.0, %v19314_v57  ;;  %v17183_v41 = vpop.eup %15187  ;;  %15207 = vpow2.f32 %v10083_v9  ;;  %v10117_v9 = vmul.f32 1.442695, %v10011_v62  ;;  %v10026_v62 = vsub.f32 0.0, %v19325_v15 }
 0x57c   : > { %9938 = vmatprep.mubr.bf16.mxu1 %v19305_v5  ;;  %14236 = vmatpush3.bf16.msra.mxu0 %v14235_v2  ;;  %v10180_v2 = vadd.f32 1.0, %v15180_v55  ;;  %v10097_v16 = vmul.f32 1.442695, %v10001_v17  ;;  %v10298_v5 = vld [vmem:[%s18880_s3 + $0x48] sm:$0xff]  ;;  %v10300_v55 = vld [vmem:[%s18880_s3 + $0x58] sm:$0xff] }
 0x57d   : > { %14268 = vmatpush3.bf16.msra.mxu1 %v14267_v63  ;;  %14238 = vmatprep.subr.bf16.mxu0 %v14237_v22  ;;  %v10002_v63 = vsub.f32 0.0, %v19312_v34  ;;  %v19313_v22 = vld [vmem:[#allocation164_spill] sm:$0xff]  ;;  %v10103_v33 = vmul.f32 1.442695, %v10004_v7  ;;  %v14251_v59 = vpack.c.bf16 %v10298_v5, %v10297_v25  ;;  %v19320_v17 = vld [vmem:[#allocation161_spill] sm:$0xff]  ;;  %v19324_v34 = vld [vmem:[#allocation78_spill] sm:$0xff]  ;;  %v14289_v25 = vpack.c.bf16 %v10350_v0, %v10349_v40 }
 0x57e   : > { %14270 = vmatprep.subr.bf16.mxu1 %v14269_v50  ;;  %v14247_v50 = vpack.c.bf16 %v10296_v48, %v10295_v61  ;;  %15209 = vrcp.f32 %v10180_v2  ;;  %v10317_v61 = vld [vmem:[%s18880_s3 + $0xe0] sm:$0xff]  ;;  %v10318_v48 = vld [vmem:[%s18880_s3 + $0xe8] sm:$0xff] }
 0x57f   : > { %15211 = vrcp.f32 %v10185_v31  ;;  %v14257_v57 = vpack.c.bf16 %v10318_v48, %v10317_v61  ;;  %v10301_v7 = vld [vmem:[%s18880_s3 + $0x60] sm:$0xff]  ;;  %v10334_v5 = vld [vmem:[%s18880_s3 + $0x168] sm:$0xff] }
 0x580   : > { %14240 = vmatpush3.bf16.msra.mxu0 %v14239_v23  ;;  %v10330_v23 = vld [vmem:[%s18880_s3 + $0x148] sm:$0xff]  ;;  %15213 = vpow2.f32 %v10087_v8  ;;  %v10401_v48 = vld [vmem:[%s18880_s3 + $0x380] sm:$0xff] }
 0x581   : > { %14272 = vmatpush3.bf16.msra.mxu1 %v14271_v36  ;;  %14242 = vmatprep.subr.bf16.mxu0 %v14241_v38  ;;  %v17195_v36 = vpop.eup %15189  ;;  %v10099_v38 = vmul.f32 1.442695, %v10002_v63  ;;  %v14283_v14 = vpack.c.bf16 %v10330_v23, %v10329_v27  ;;  %15215 = vpow2.f32 %v10097_v16  ;;  %v10020_v63 = vsub.f32 0.0, %v19324_v34  ;;  %v10333_v16 = vld [vmem:[%s18880_s3 + $0x160] sm:$0xff]  ;;  %v10319_v27 = vld [vmem:[%s18880_s3 + $0xf0] sm:$0xff] }
 0x582   : > { %9355 = vmatmul.mubr.bf16.gmra.mrb[84].mxu0 %v19311_v53  ;;  %14274 = vmatprep.subr.bf16.mxu1 %v14273_v4  ;;  %v17204_v11 = vpop.eup %15191  ;;  %v19317_v4 = vld [vmem:[#allocation53_spill] sm:$0xff]  ;;  %15217 = vpow2.f32 %v10101_v42 }
 0x583   : > { %9939 = vmatmul.mubr.bf16.gmra.mrb[84].mxu1 %v19311_v53  ;;  %9364 = vmatprep.mubr.bf16.mxu0 %v19313_v22  ;;  %v10010_v35 = vsub.f32 0.0, %v19317_v4  ;;  %v17207_v20 = vpop.eup %15193  ;;  %v19322_v53 = vld [vmem:[#allocation70_spill] sm:$0xff]  ;;  %15219 = vpow2.f32 %v10099_v38  ;;  %v10351_v23 = vld [vmem:[%s18880_s3 + $0x1f0] sm:$0xff]  ;;  %v10135_v38 = vmul.f32 1.442695, %v10020_v63 }
 0x584   : > { %9948 = vmatprep.mubr.bf16.mxu1 %v19313_v22  ;;  %14244 = vmatpush3.bf16.msra.mxu0 %v14243_v26  ;;  %v17219_v19 = vpop.eup %15195  ;;  %v10113_v26 = vmul.f32 1.442695, %v10009_v39  ;;  %v14255_v22 = vpack.c.bf16 %v10300_v55, %v10299_v3  ;;  %15221 = vpow2.f32 %v10103_v33  ;;  %v10320_v42 = vld [vmem:[%s18880_s3 + $0xf8] sm:$0xff]  ;;  %v10133_v39 = vmul.f32 1.442695, %v10019_v47  ;;  %v19327_v55 = vld [vmem:[#allocation171_spill] sm:$0xff] }
 0x585   : > { %14276 = vmatpush3.bf16.msra.mxu1 %v14275_v32  ;;  %14246 = vmatprep.subr.bf16.mxu0 %v14245_v45  ;;  %v14285_v32 = vpack.c.bf16 %v10348_v56, %v10347_v30  ;;  %v10332_v45 = vld [vmem:[%s18880_s3 + $0x158] sm:$0xff]  ;;  %v17232_v24 = vpop.eup %15197  ;;  %v10115_v8 = vmul.f32 1.442695, %v10010_v35  ;;  %v14291_v35 = vpack.c.bf16 %v10334_v5, %v10333_v16  ;;  %v19329_v47 = vld [vmem:[#allocation175_spill] sm:$0xff] }
 0x586   : > { %14278 = vmatprep.subr.bf16.mxu1 %v14277_v58  ;;  %v10018_v58 = vsub.f32 0.0, %v19322_v53  ;;  %v17244_v2 = vpop.eup %15199  ;;  %v14287_v31 = vpack.c.bf16 %v10332_v45, %v10331_v37  ;;  %15223 = vpow2.f32 %v10113_v26  ;;  %v19326_v33 = vld [vmem:[#allocation177_spill] sm:$0xff]  ;;  %v14293_v37 = vpack.c.bf16 %v10352_v52, %v10351_v23  ;;  %v19328_v45 = vld [vmem:[#allocation174_spill] sm:$0xff] }
 0x587   : > { %v17248_v28 = vpop.eup %15201  ;;  %15225 = vpow2.f32 %v10117_v9  ;;  %v10028_v4 = vsub.f32 0.0, %v19326_v33  ;;  %v10336_v26 = vld [vmem:[%s18880_s3 + $0x178] sm:$0xff]  ;;  %v10025_v61 = vsub.f32 0.0, %v19328_v45  ;;  %v10402_v9 = vld [vmem:[%s18880_s3 + $0x388] sm:$0xff]  ;;  %v10027_v53 = vsub.f32 0.0, %v19329_v47  ;;  %v10385_v47 = vld [vmem:[%s18880_s3 + $0x300] sm:$0xff] }
 0x588   : > { %14248 = vmatpush3.bf16.msra.mxu0 %v14247_v50  ;;  %v10302_v50 = vld [vmem:[%s18880_s3 + $0x68] sm:$0xff]  ;;  %15227 = vpow2.f32 %v10115_v8 }
 0x589   : > { %14280 = vmatpush3.bf16.msra.mxu1 %v14279_v6  ;;  %14250 = vmatprep.subr.bf16.mxu0 %v14249_v29  ;;  %v17259_v6 = vpop.eup %15203  ;;  %v10129_v29 = vmul.f32 1.442695, %v10017_v49  ;;  %v14259_v30 = vpack.c.bf16 %v10302_v50, %v10301_v7  ;;  %15229 = vpow2.f32 %v10119_v44  ;;  %v10370_v49 = vld [vmem:[%s18880_s3 + $0x288] sm:$0xff]  ;;  %v14329_v44 = vpack.c.bf16 %v10402_v9, %v10401_v48 }
 0x58a   : > { %9365 = vmatmul.mubr.bf16.gmra.mrb[88].mxu0 %v19320_v17  ;;  %14282 = vmatprep.subr.bf16.mxu1 %v14281_v1  ;;  %v15206_v10 = vpop.eup %15205  ;;  %v10131_v1 = vmul.f32 1.442695, %v10018_v58  ;;  %v10147_v58 = vmul.f32 1.442695, %v10026_v62  ;;  %v14297_v8 = vpack.c.bf16 %v10370_v49, %v10369_v51  ;;  %v10149_v50 = vmul.f32 1.442695, %v10027_v53 }
 0x58b   : > { %9949 = vmatmul.mubr.bf16.gmra.mrb[88].mxu1 %v19320_v17  ;;  %9374 = vmatprep.mubr.bf16.mxu0 %v19323_v43  ;;  %v15208_v46 = vpop.eup %15207  ;;  %v10187_v3 = vadd.f32 1.0, %v15206_v10  ;;  %15231 = vpow2.f32 %v10129_v29  ;;  %v10386_v53 = vld [vmem:[%s18880_s3 + $0x308] sm:$0xff] }
 0x58c   : > { %9958 = vmatprep.mubr.bf16.mxu1 %v19323_v43  ;;  %14252 = vmatpush3.bf16.msra.mxu0 %v14251_v59  ;;  %v17277_v56 = vpop.eup %15209  ;;  %v14261_v59 = vpack.c.bf16 %v10320_v42, %v10319_v27  ;;  %15233 = vpow2.f32 %v10133_v39  ;;  %v14263_v43 = vpack.c.bf16 %v10304_v12, %v10303_v21 }
 0x58d   : > { %14284 = vmatpush3.bf16.msra.mxu1 %v14283_v14  ;;  %14254 = vmatprep.subr.bf16.mxu0 %v14253_v18  ;;  %v10335_v14 = vld [vmem:[%s18880_s3 + $0x170] sm:$0xff]  ;;  %v17289_v18 = vpop.eup %15211  ;;  %15235 = vpow2.f32 %v10131_v1 }
 0x58e   : > { %14286 = vmatprep.subr.bf16.mxu1 %v14285_v32  ;;  %v15214_v17 = vpop.eup %15213  ;;  %v10186_v32 = vadd.f32 1.0, %v15208_v46  ;;  %15237 = vpow2.f32 %v10135_v38  ;;  %v14295_v0 = vpack.c.bf16 %v10336_v26, %v10335_v14 }
 0x58f   : > { %v15216_v13 = vpop.eup %15215  ;;  %15239 = vrcp.f32 %v10187_v3  ;;  %v10188_v63 = vadd.f32 1.0, %v15214_v17 }
 0x590   : > { %14256 = vmatpush3.bf16.msra.mxu0 %v14255_v22  ;;  %v15218_v40 = vpop.eup %15217  ;;  %v10353_v22 = vld [vmem:[%s18880_s3 + $0x200] sm:$0xff]  ;;  %15241 = vrcp.f32 %v10186_v32  ;;  %v10193_v10 = vadd.f32 1.0, %v15216_v13 }
 0x591   : > { %14288 = vmatpush3.bf16.msra.mxu1 %v14287_v31  ;;  %14258 = vmatprep.subr.bf16.mxu0 %v14257_v57  ;;  %v15220_v34 = vpop.eup %15219  ;;  %v10145_v57 = vmul.f32 1.442695, %v10025_v61  ;;  %15243 = vpow2.f32 %v10147_v58  ;;  %v10195_v1 = vadd.f32 1.0, %v15218_v40  ;;  %v14331_v58 = vpack.c.bf16 %v10386_v53, %v10385_v47  ;;  %v10372_v40 = vld [vmem:[%s18880_s3 + $0x298] sm:$0xff]  ;;  %v10382_v47 = vld [vmem:[%s18880_s3 + $0x2e8] sm:$0xff]  ;;  %v10413_v53 = vld [vmem:[%s18880_s3 + $0x3e0] sm:$0xff] }
 0x592   : > { %9375 = vmatmul.mubr.bf16.gmra.mrb[92].mxu0 %v19327_v55  ;;  %14290 = vmatprep.subr.bf16.mxu1 %v14289_v25  ;;  %v15222_v31 = vpop.eup %15221  ;;  %v10194_v29 = vadd.f32 1.0, %v15220_v34  ;;  %v10356_v34 = vld [vmem:[%s18880_s3 + $0x218] sm:$0xff] }
 0x593   : > { %9959 = vmatmul.mubr.bf16.gmra.mrb[92].mxu1 %v19327_v55  ;;  %10481 = vmatprep.mubr.f32.mxu0 %v17183_v41  ;;  %v10151_v41 = vmul.f32 1.442695, %v10028_v4  ;;  %v15224_v7 = vpop.eup %15223  ;;  %v10196_v27 = vadd.f32 1.0, %v15222_v31  ;;  %v10388_v31 = vld [vmem:[%s18880_s3 + $0x318] sm:$0xff] }
 0x594   : > { %14260 = vmatpush3.bf16.msra.mxu0 %v14259_v30  ;;  %10586 = vmatprep.mubr.f32.mxu1 %v17195_v36  ;;  %v10354_v36 = vld [vmem:[%s18880_s3 + $0x208] sm:$0xff]  ;;  %v15226_v16 = vpop.eup %15225  ;;  %v10201_v62 = vadd.f32 1.0, %v15224_v7  ;;  %v10373_v7 = vld [vmem:[%s18880_s3 + $0x2a0] sm:$0xff] }
 0x595   : > { %14292 = vmatpush3.bf16.msra.mxu1 %v14291_v35  ;;  %14262 = vmatprep.subr.bf16.mxu0 %v14261_v59  ;;  %15245 = vpow2.f32 %v10151_v41  ;;  %v14299_v25 = vpack.c.bf16 %v10354_v36, %v10353_v22  ;;  %v15228_v5 = vpop.eup %15227  ;;  %v10203_v30 = vadd.f32 1.0, %v15226_v16  ;;  %v10403_v41 = vld [vmem:[%s18880_s3 + $0x390] sm:$0xff]  ;;  %v10357_v16 = vld [vmem:[%s18880_s3 + $0x220] sm:$0xff] }
 0x596   : > { %14294 = vmatprep.subr.bf16.mxu1 %v14293_v37  ;;  %15247 = vrcp.f32 %v10188_v63  ;;  %v15230_v42 = vpop.eup %15229  ;;  %v10202_v52 = vadd.f32 1.0, %v15228_v5  ;;  %v10404_v63 = vld [vmem:[%s18880_s3 + $0x398] sm:$0xff]  ;;  %v10405_v5 = vld [vmem:[%s18880_s3 + $0x3a0] sm:$0xff] }
 0x597   : > { %15249 = vpow2.f32 %v10145_v57  ;;  %v15232_v39 = vpop.eup %15231  ;;  %v10204_v38 = vadd.f32 1.0, %v15230_v42  ;;  %v14333_v36 = vpack.c.bf16 %v10404_v63, %v10403_v41  ;;  %v10414_v41 = vld [vmem:[%s18880_s3 + $0x3e8] sm:$0xff] }
 0x598   : > { %14264 = vmatpush3.bf16.msra.mxu0 %v14263_v43  ;;  %15251 = vpow2.f32 %v10149_v50  ;;  %v15234_v23 = vpop.eup %15233  ;;  %v10209_v35 = vadd.f32 1.0, %v15232_v39  ;;  %v10371_v43 = vld [vmem:[%s18880_s3 + $0x290] sm:$0xff]  ;;  %v10374_v50 = vld [vmem:[%s18880_s3 + $0x2a8] sm:$0xff]  ;;  %v10389_v39 = vld [vmem:[%s18880_s3 + $0x320] sm:$0xff] }
 0x599   : > { %14296 = vmatpush3.bf16.msra.mxu1 %v14295_v0  ;;  %14298 = vmatprep.subr.bf16.mxu0 %v14297_v8  ;;  %15253 = vrcp.f32 %v10194_v29  ;;  %v15236_v46 = vpop.eup %15235  ;;  %v10211_v59 = vadd.f32 1.0, %v15234_v23  ;;  %v14301_v0 = vpack.c.bf16 %v10372_v40, %v10371_v43  ;;  %v10355_v8 = vld [vmem:[%s18880_s3 + $0x210] sm:$0xff]  ;;  %v14305_v29 = vpack.c.bf16 %v10374_v50, %v10373_v7  ;;  %v10365_v43 = vld [vmem:[%s18880_s3 + $0x260] sm:$0xff]  ;;  %v10366_v40 = vld [vmem:[%s18880_s3 + $0x268] sm:$0xff] }
 0x59a   : > { %14330 = vmatprep.subr.bf16.mxu1 %v14329_v44  ;;  %15255 = vrcp.f32 %v10196_v27  ;;  %v15238_v15 = vpop.eup %15237  ;;  %v14303_v22 = vpack.c.bf16 %v10356_v34, %v10355_v8  ;;  %v10387_v44 = vld [vmem:[%s18880_s3 + $0x310] sm:$0xff]  ;;  %v10406_v27 = vld [vmem:[%s18880_s3 + $0x3a8] sm:$0xff]  ;;  %v14353_v8 = vpack.c.bf16 %v10414_v41, %v10413_v53  ;;  %v10397_v34 = vld [vmem:[%s18880_s3 + $0x360] sm:$0xff] }
 0x59b   : > { %10482 = vmatmul.mubr.f32.vlgmr.msra.gmra.mrb[96].mxu0 %v17168_v60  ;;  %15257 = vrcp.f32 %v10193_v10  ;;  %v15240_v60 = vpop.eup %15239  ;;  %v10212_v33 = vadd.f32 1.0, %v15238_v15  ;;  %v14335_v57 = vpack.c.bf16 %v10388_v31, %v10387_v44  ;;  %v14337_v10 = vpack.c.bf16 %v10406_v27, %v10405_v5  ;;  %v10398_v63 = vld [vmem:[%s18880_s3 + $0x368] sm:$0xff]  ;;  %v10384_v44 = vld [vmem:[%s18880_s3 + $0x2f8] sm:$0xff]  ;;  %v10367_v50 = vld [vmem:[%s18880_s3 + $0x270] sm:$0xff] }
 0x59c   : > { %10587 = vmatmul.mubr.f32.vlgmr.msra.gmra.mrb[96].mxu1 %v17172_v54  ;;  %10486 = vmatprep.mubr.f32.mxu0 %v17219_v19  ;;  %15259 = vrcp.f32 %v10195_v1  ;;  %v15242_v54 = vpop.eup %15241  ;;  %v10210_v19 = vadd.f32 1.0, %v15236_v46  ;;  %v10390_v1 = vld [vmem:[%s18880_s3 + $0x328] sm:$0xff]  ;;  %v10376_v46 = vld [vmem:[%s18880_s3 + $0x2b8] sm:$0xff] }
 0x59d   : > { %10591 = vmatprep.mubr.f32.mxu1 %v17232_v24  ;;  %14300 = vmatpush3.bf16.msra.mxu0 %v14299_v25  ;;  %15261 = vrcp.f32 %v10202_v52  ;;  %v15244_v24 = vpop.eup %15243  ;;  %v10358_v25 = vld [vmem:[%s18880_s3 + $0x228] sm:$0xff]  ;;  %v14339_v23 = vpack.c.bf16 %v10390_v1, %v10389_v39  ;;  %v10375_v52 = vld [vmem:[%s18880_s3 + $0x2b0] sm:$0xff]  ;;  %v10416_v7 = vld [vmem:[%s18880_s3 + $0x3f8] sm:$0xff] }
 0x59e   : > { %15263 = vrcp.f32 %v10204_v38  ;;  %14332 = vmatpush3.bf16.msra.mxu1 %v14331_v58  ;;  %14302 = vmatprep.subr.bf16.mxu0 %v14301_v0  ;;  %v14307_v42 = vpack.c.bf16 %v10358_v25, %v10357_v16  ;;  %v10407_v38 = vld [vmem:[%s18880_s3 + $0x3b0] sm:$0xff]  ;;  %v14309_v15 = vpack.c.bf16 %v10376_v46, %v10375_v52  ;;  %v14323_v0 = vpack.c.bf16 %v10366_v40, %v10365_v43  ;;  %v10368_v16 = vld [vmem:[%s18880_s3 + $0x278] sm:$0xff]  ;;  %v11131_v39 = vld [vmem:[%s18882_s5 + $0x88] sm:$0xff] }
 0x59f   : > { %10487 = vmatmul.mubr.f32.gmra.mrb[98].mxu0 %v17204_v11  ;;  %v15246_v4 = vpop.eup %15245  ;;  %15265 = vrcp.f32 %v10201_v62  ;;  %14334 = vmatprep.subr.bf16.mxu1 %v14333_v36  ;;  %v10359_v62 = vld [vmem:[%s18880_s3 + $0x230] sm:$0xff]  ;;  %v14327_v5 = vpack.c.bf16 %v10368_v16, %v10367_v50  ;;  %v10400_v27 = vld [vmem:[%s18880_s3 + $0x378] sm:$0xff]  ;;  %v11162_v1 = vld [vmem:[%s18882_s5 + $0x180] sm:$0xff] }
 0x5a0   : > { %10592 = vmatmul.mubr.f32.gmra.mrb[98].mxu1 %v17207_v20  ;;  %10491 = vmatprep.mubr.f32.mxu0 %v17259_v6  ;;  %v15248_v11 = vpop.eup %15247  ;;  %15267 = vrcp.f32 %v10203_v30  ;;  %v10218_v6 = vadd.f32 1.0, %v15244_v24  ;;  %v10408_v30 = vld [vmem:[%s18880_s3 + $0x3b8] sm:$0xff]  ;;  %v10391_v24 = vld [vmem:[%s18880_s3 + $0x330] sm:$0xff]  ;;  %v11163_v52 = vld [vmem:[%s18882_s5 + $0x188] sm:$0xff] }
 0x5a1   : > { %10596 = vmatprep.mubr.f32.mxu1 %v17277_v56  ;;  %v15250_v20 = vpop.eup %15249  ;;  %15269 = vrcp.f32 %v10210_v19  ;;  %v10220_v56 = vadd.f32 1.0, %v15246_v4  ;;  %14304 = vmatpush3.bf16.msra.mxu0 %v14303_v22  ;;  %v14341_v19 = vpack.c.bf16 %v10408_v30, %v10407_v38  ;;  %v14355_v22 = vpack.c.bf16 %v10398_v63, %v10397_v34  ;;  %v10383_v36 = vld [vmem:[%s18880_s3 + $0x2f0] sm:$0xff] }
 0x5a2   : > { %v15252_v21 = vpop.eup %15251  ;;  %15271 = vrcp.f32 %v10212_v33  ;;  %14336 = vmatpush3.bf16.msra.mxu1 %v14335_v57  ;;  %14306 = vmatprep.subr.bf16.mxu0 %v14305_v29  ;;  %v10392_v33 = vld [vmem:[%s18880_s3 + $0x338] sm:$0xff]  ;;  %v14325_v31 = vpack.c.bf16 %v10384_v44, %v10383_v36  ;;  %v10415_v57 = vld [vmem:[%s18880_s3 + $0x3f0] sm:$0xff]  ;;  %v14393_v46 = vpack.c.bf16 %v11163_v52, %v11162_v1 }
 0x5a3   : > { %10492 = vmatmul.mubr.f32.gmra.mrb[100].mxu0 %v17244_v2  ;;  %v15254_v12 = vpop.eup %15253  ;;  %15273 = vrcp.f32 %v10209_v35  ;;  %v10217_v2 = vadd.f32 1.0, %v15250_v20  ;;  %v10219_v55 = vadd.f32 1.0, %v15252_v21  ;;  %14338 = vmatprep.subr.bf16.mxu1 %v14337_v10  ;;  %v14343_v4 = vpack.c.bf16 %v10392_v33, %v10391_v24  ;;  %v10377_v35 = vld [vmem:[%s18880_s3 + $0x2c0] sm:$0xff]  ;;  %v10362_v21 = vld [vmem:[%s18880_s3 + $0x248] sm:$0xff]  ;;  %v10399_v25 = vld [vmem:[%s18880_s3 + $0x370] sm:$0xff] }
 0x5a4   : > { %10597 = vmatmul.mubr.f32.gmra.mrb[100].mxu1 %v17248_v28  ;;  %10496 = vmatprep.mubr.f32.mxu0 %v15242_v54  ;;  %v15256_v14 = vpop.eup %15255  ;;  %15275 = vrcp.f32 %v10211_v59  ;;  %v10409_v59 = vld [vmem:[%s18880_s3 + $0x3c0] sm:$0xff]  ;;  %v14357_v29 = vpack.c.bf16 %v10416_v7, %v10415_v57 }
 0x5a5   : > { %10601 = vmatprep.mubr.f32.mxu1 %v15248_v11  ;;  %v15258_v3 = vpop.eup %15257  ;;  %15277 = vrcp.f32 %v10218_v6  ;;  %14308 = vmatpush3.bf16.msra.mxu0 %v14307_v42  ;;  %v10378_v11 = vld [vmem:[%s18880_s3 + $0x2c8] sm:$0xff]  ;;  %v10361_v6 = vld [vmem:[%s18880_s3 + $0x240] sm:$0xff]  ;;  %v14359_v42 = vpack.c.bf16 %v10400_v27, %v10399_v25 }
 0x5a6   : > { %v15260_v28 = vpop.eup %15259  ;;  %15279 = vrcp.f32 %v10220_v56  ;;  %14340 = vmatpush3.bf16.msra.mxu1 %v14339_v23  ;;  %14310 = vmatprep.subr.bf16.mxu0 %v14309_v15  ;;  %v14313_v20 = vpack.c.bf16 %v10378_v11, %v10377_v35  ;;  %v10410_v56 = vld [vmem:[%s18880_s3 + $0x3c8] sm:$0xff]  ;;  %v11130_v10 = vld [vmem:[%s18882_s5 + $0x80] sm:$0xff] }
 0x5a7   : > { %10497 = vmatmul.mubr.f32.gmra.mrb[102].mxu0 %v17289_v18  ;;  %v15262_v37 = vpop.eup %15261  ;;  %15281 = vrcp.f32 %v10217_v2  ;;  %14342 = vmatprep.subr.bf16.mxu1 %v14341_v19  ;;  %v10393_v2 = vld [vmem:[%s18880_s3 + $0x340] sm:$0xff]  ;;  %v14361_v23 = vpack.c.bf16 %v11131_v39, %v11130_v10 }
 0x5a8   : > { %10602 = vmatmul.mubr.f32.gmra.mrb[102].mxu1 %v15240_v60  ;;  %10501 = vmatprep.mubr.f32.mxu0 %v15254_v12  ;;  %v15264_v26 = vpop.eup %15263  ;;  %15283 = vrcp.f32 %v10219_v55  ;;  %v10360_v60 = vld [vmem:[%s18880_s3 + $0x238] sm:$0xff]  ;;  %v14315_v12 = vpack.c.bf16 %v10362_v21, %v10361_v6 }
 0x5a9   : > { %10606 = vmatprep.mubr.f32.mxu1 %v15256_v14  ;;  %v15266_v51 = vpop.eup %15265  ;;  %v14311_v54 = vpack.c.bf16 %v10360_v60, %v10359_v62  ;;  %v14345_v14 = vpack.c.bf16 %v10410_v56, %v10409_v59 }
 0x5aa   : > { %v15268_v18 = vpop.eup %15267  ;;  %14344 = vmatpush3.bf16.msra.mxu1 %v14343_v4 }
 0x5ab   : > { %10502 = vmatmul.mubr.f32.gmra.mrb[104].mxu0 %v15258_v3  ;;  %v15270_v49 = vpop.eup %15269  ;;  %v10394_v3 = vld [vmem:[%s18880_s3 + $0x348] sm:$0xff]  ;;  %14346 = vmatprep.subr.bf16.mxu1 %v14345_v14 }
 0x5ac   : > { %10607 = vmatmul.mubr.f32.gmra.mrb[104].mxu1 %v15260_v28  ;;  %10506 = vmatprep.mubr.f32.mxu0 %v15262_v37  ;;  %v15272_v17 = vpop.eup %15271  ;;  %v14347_v55 = vpack.c.bf16 %v10394_v3, %v10393_v2  ;;  %v10379_v28 = vld [vmem:[%s18880_s3 + $0x2d0] sm:$0xff]  ;;  %v10380_v37 = vld [vmem:[%s18880_s3 + $0x2d8] sm:$0xff] }
 0x5ad   : > { %10611 = vmatprep.mubr.f32.mxu1 %v15264_v26  ;;  %v15274_v32 = vpop.eup %15273  ;;  %14312 = vmatpush3.bf16.msra.mxu0 %v14311_v54  ;;  %v10411_v26 = vld [vmem:[%s18880_s3 + $0x3d0] sm:$0xff] }
 0x5ae   : > { %v15276_v45 = vpop.eup %15275  ;;  %14314 = vmatprep.subr.bf16.mxu0 %v14313_v20  ;;  %14348 = vmatpush3.bf16.msra.mxu1 %v14347_v55 }
 0x5af   : > { %10507 = vmatmul.mubr.f32.gmra.mrb[106].mxu0 %v15266_v51  ;;  %v15278_v61 = vpop.eup %15277  ;;  %v14317_v51 = vpack.c.bf16 %v10380_v37, %v10379_v28 }
 0x5b0   : > { %10612 = vmatmul.mubr.f32.gmra.mrb[106].mxu1 %v15268_v18  ;;  %10511 = vmatprep.mubr.f32.mxu0 %v15270_v49  ;;  %v15280_v48 = vpop.eup %15279  ;;  %v10363_v18 = vld [vmem:[%s18880_s3 + $0x250] sm:$0xff]  ;;  %v10364_v49 = vld [vmem:[%s18880_s3 + $0x258] sm:$0xff] }
 0x5b1   : > { %10616 = vmatprep.mubr.f32.mxu1 %v15272_v17  ;;  %v15282_v9 = vpop.eup %15281  ;;  %14316 = vmatpush3.bf16.msra.mxu0 %v14315_v12  ;;  %v10412_v17 = vld [vmem:[%s18880_s3 + $0x3d8] sm:$0xff] }
 0x5b2   : > { %v15284_v13 = vpop.eup %15283  ;;  %14318 = vmatprep.subr.bf16.mxu0 %v14317_v51 }
 0x5b3   : > { %10512 = vmatmul.mubr.f32.gmra.mrb[108].mxu0 %v15274_v32  ;;  %v14319_v32 = vpack.c.bf16 %v10364_v49, %v10363_v18 }
 0x5b4   : > { %10617 = vmatmul.mubr.f32.gmra.mrb[108].mxu1 %v15276_v45  ;;  %10516 = vmatprep.mubr.f32.mxu0 %v15278_v61  ;;  %v14349_v45 = vpack.c.bf16 %v10412_v17, %v10411_v26  ;;  %v10395_v61 = vld [vmem:[%s18880_s3 + $0x350] sm:$0xff] }
 0x5b5   : > { %10621 = vmatprep.mubr.f32.mxu1 %v15280_v48  ;;  %v10396_v48 = vld [vmem:[%s18880_s3 + $0x358] sm:$0xff]  ;;  %14320 = vmatpush3.bf16.msra.mxu0 %v14319_v32 }
 0x5b6   : > { %14350 = vmatprep.subr.bf16.mxu1 %v14349_v45 }
 0x5b7   : > { %10517 = vmatmul.mubr.f32.gmra.mrb[110].mxu0 %v15282_v9  ;;  %v14351_v9 = vpack.c.bf16 %v10396_v48, %v10395_v61 }
 0x5b8   : > { %10622 = vmatmul.mubr.f32.gmra.mrb[110].mxu1 %v15284_v13  ;;  %v10381_v13 = vld [vmem:[%s18880_s3 + $0x2e0] sm:$0xff] }
 0x5b9   : > { %14352 = vmatpush3.bf16.msra.mxu1 %v14351_v9  ;;  %v14321_v58 = vpack.c.bf16 %v10382_v47, %v10381_v13 }
 0x5ba   : > { %14354 = vmatprep.subr.bf16.mxu1 %v14353_v8 }
 0x5bb   : > { %14322 = vmatprep.subr.bf16.mxu0 %v14321_v58 }
 0x5bc   : > { %14324 = vmatpush3.bf16.msra.mxu0 %v14323_v0 }
 0x5bd   : > { %14356 = vmatpush3.bf16.msra.mxu1 %v14355_v22  ;;  %14326 = vmatprep.subr.bf16.mxu0 %v14325_v31 }
 0x5be   : > { %14358 = vmatprep.subr.bf16.mxu1 %v14357_v29 }
 0x5c0   : > { %14328 = vmatpush3.bf16.msra.mxu0 %v14327_v5 }
 0x5c1   : > { %14360 = vmatpush3.bf16.msra.mxu1 %v14359_v42  ;;  %14362 = vmatprep.subr.bf16.mxu0 %v14361_v23 }
 0x5c2   : > { %14394 = vmatprep.subr.bf16.mxu1 %v14393_v46 }
 0x64d   : > { %v9346_v38 = vpop.f32.mrb[80].mxu0 }
 0x64e   : > { %v9973_v15 = vsub.f32 0.0, %v9346_v38  ;;  %v9930_v62 = vpop.f32.mrb[80].mxu1  ;;  %v9348_v60 = vpop.f32.mrb[81].mxu0 }
 0x64f   : > { %v9975_v30 = vsub.f32 0.0, %v9930_v62  ;;  %v9974_v54 = vsub.f32 0.0, %v9348_v60  ;;  %v9932_v19 = vpop.f32.mrb[81].mxu1  ;;  %v9350_v24 = vpop.f32.mrb[82].mxu0 }
 0x650   : > { %v10041_v33 = vmul.f32 1.442695, %v9973_v15  ;;  %v9976_v4 = vsub.f32 0.0, %v9932_v19  ;;  %v9981_v35 = vsub.f32 0.0, %v9350_v24  ;;  %v9934_v11 = vpop.f32.mrb[82].mxu1  ;;  %v9352_v59 = vpop.f32.mrb[83].mxu0 }
 0x651   : > { %v10045_v20 = vmul.f32 1.442695, %v9975_v30  ;;  %v10043_v6 = vmul.f32 1.442695, %v9974_v54  ;;  %v9983_v21 = vsub.f32 0.0, %v9934_v11  ;;  %v9982_v56 = vsub.f32 0.0, %v9352_v59 }
 0x652   : > { %15285 = vpow2.f32 %v10041_v33  ;;  %v10047_v12 = vmul.f32 1.442695, %v9976_v4  ;;  %v10057_v14 = vmul.f32 1.442695, %v9981_v35  ;;  %v9936_v2 = vpop.f32.mrb[83].mxu1  ;;  %v17544_v33 = vld [vmem:[%s18882_s5] sm:$0xff] }
 0x653   : > { %15287 = vpow2.f32 %v10045_v20  ;;  %v10061_v3 = vmul.f32 1.442695, %v9983_v21  ;;  %v9984_v55 = vsub.f32 0.0, %v9936_v2  ;;  %v10059_v28 = vmul.f32 1.442695, %v9982_v56  ;;  %v17549_v4 = vld [vmem:[%s18882_s5 + $0x8] sm:$0xff] }
 0x654   : > { %15289 = vpow2.f32 %v10043_v6  ;;  %v17559_v6 = vld [vmem:[%s18882_s5 + $0x100] sm:$0xff]  ;;  %v17564_v21 = vld [vmem:[%s18882_s5 + $0x108] sm:$0xff]  ;;  %v17569_v56 = vld [vmem:[%s18882_s5 + $0x90] sm:$0xff] }
 0x655   : > { %15291 = vpow2.f32 %v10047_v12  ;;  %v10063_v37 = vmul.f32 1.442695, %v9984_v55  ;;  %v9356_v26 = vpop.f32.mrb[84].mxu0 }
 0x656   : > { %15293 = vpow2.f32 %v10057_v14  ;;  %v9989_v51 = vsub.f32 0.0, %v9356_v26  ;;  %v9940_v18 = vpop.f32.mrb[84].mxu1  ;;  %v9358_v49 = vpop.f32.mrb[85].mxu0 }
 0x657   : > { %15295 = vpow2.f32 %v10061_v3  ;;  %v9991_v17 = vsub.f32 0.0, %v9940_v18  ;;  %v9990_v32 = vsub.f32 0.0, %v9358_v49  ;;  %v9942_v45 = vpop.f32.mrb[85].mxu1  ;;  %v9360_v61 = vpop.f32.mrb[86].mxu0 }
 0x658   : > { %15297 = vpow2.f32 %v10059_v28  ;;  %v10073_v48 = vmul.f32 1.442695, %v9989_v51  ;;  %v9992_v9 = vsub.f32 0.0, %v9942_v45  ;;  %v9997_v13 = vsub.f32 0.0, %v9360_v61  ;;  %v17515_v47 = vpop.f32.mrb[86].mxu1  ;;  %v17517_v53 = vpop.f32.mrb[87].mxu0 }
 0x659   : > { %15299 = vpow2.f32 %v10063_v37  ;;  %v10077_v58 = vmul.f32 1.442695, %v9991_v17  ;;  %v10075_v43 = vmul.f32 1.442695, %v9990_v32  ;;  %v17519_v40 = vpop.f32.mrb[87].mxu1  ;;  %v9999_v60 = vsub.f32 0.0, %v17515_v47 }
 0x65a   : > { %15301 = vpow2.f32 %v10073_v48  ;;  %v10079_v41 = vmul.f32 1.442695, %v9992_v9  ;;  %v10089_v0 = vmul.f32 1.442695, %v9997_v13  ;;  %v9998_v19 = vsub.f32 0.0, %v17517_v53  ;;  %v17579_v37 = vld [vmem:[%s18882_s5 + $0x98] sm:$0xff] }
 0x65b   : > { %15303 = vpow2.f32 %v10077_v58  ;;  %v10000_v11 = vsub.f32 0.0, %v17519_v40  ;;  %v10093_v51 = vmul.f32 1.442695, %v9999_v60  ;;  %v14363_v9 = vpack.c.bf16 %v17549_v4, %v17544_v33  ;;  %v17596_v13 = vld [vmem:[%s18882_s5 + $0x190] sm:$0xff]  ;;  %v11165_v47 = vld [vmem:[%s18882_s5 + $0x198] sm:$0xff] }
 0x65c   : > { %v15286_v8 = vpop.eup %15285  ;;  %15305 = vpow2.f32 %v10075_v43  ;;  %v10091_v45 = vmul.f32 1.442695, %v9998_v19  ;;  %v14395_v40 = vpack.c.bf16 %v17564_v21, %v17559_v6  ;;  %v17682_v6 = vld [vmem:[%s18882_s5 + $0xb0] sm:$0xff]  ;;  %v17687_v21 = vld [vmem:[%s18882_s5 + $0xb8] sm:$0xff] }
 0x65d   : > { %v15288_v34 = vpop.eup %15287  ;;  %v10165_v63 = vadd.f32 1.0, %v15286_v8  ;;  %15307 = vpow2.f32 %v10079_v41  ;;  %v17521_v22 = vpop.f32.mrb[88].mxu0  ;;  %v10095_v58 = vmul.f32 1.442695, %v10000_v11  ;;  %v17607_v41 = vld [vmem:[%s18882_s5 + $0x10] sm:$0xff] }
 0x65e   : > { %v15290_v36 = vpop.eup %15289  ;;  %v17523_v44 = vpop.f32.mrb[88].mxu1  ;;  %v10167_v7 = vadd.f32 1.0, %v15288_v34  ;;  %15309 = vpow2.f32 %v10089_v0  ;;  %v10005_v3 = vsub.f32 0.0, %v17521_v22  ;;  %v17612_v0 = vld [vmem:[%s18882_s5 + $0x18] sm:$0xff]  ;;  %v14365_v22 = vpack.c.bf16 %v17579_v37, %v17569_v56  ;;  %v17693_v37 = vld [vmem:[%s18882_s5 + $0x1b0] sm:$0xff] }
 0x65f   : > { %v17525_v31 = vpop.f32.mrb[89].mxu0  ;;  %v15292_v57 = vpop.eup %15291  ;;  %v10166_v50 = vadd.f32 1.0, %v15290_v36  ;;  %15311 = vrcp.f32 %v10165_v63  ;;  %v10007_v18 = vsub.f32 0.0, %v17523_v44  ;;  %v17620_v36 = vld [vmem:[%s18882_s5 + $0x110] sm:$0xff]  ;;  %v17625_v44 = vld [vmem:[%s18882_s5 + $0x118] sm:$0xff] }
 0x660   : > { %v17527_v16 = vpop.f32.mrb[89].mxu1  ;;  %v17529_v29 = vpop.f32.mrb[90].mxu0  ;;  %v10168_v5 = vadd.f32 1.0, %v15292_v57  ;;  %v10006_v61 = vsub.f32 0.0, %v17525_v31  ;;  %v10105_v34 = vmul.f32 1.442695, %v10005_v3  ;;  %v14399_v60 = vpack.c.bf16 %v17625_v44, %v17620_v36 }
 0x661   : > { %v15294_v25 = vpop.eup %15293  ;;  %v17531_v27 = vpop.f32.mrb[90].mxu1  ;;  %15313 = vrcp.f32 %v10166_v50  ;;  %v10008_v43 = vsub.f32 0.0, %v17527_v16  ;;  %v10013_v63 = vsub.f32 0.0, %v17529_v29  ;;  %v17630_v31 = vld [vmem:[%s18882_s5 + $0xa0] sm:$0xff]  ;;  %v14397_v16 = vpack.c.bf16 %v11165_v47, %v17596_v13  ;;  %v17637_v29 = vld [vmem:[%s18882_s5 + $0xa8] sm:$0xff]  ;;  %v17714_v13 = vld [vmem:[%s18882_s5 + $0x130] sm:$0xff] }
 0x662   : > { %v17533_v42 = vpop.f32.mrb[91].mxu0  ;;  %v15296_v10 = vpop.eup %15295  ;;  %v10173_v39 = vadd.f32 1.0, %v15294_v25  ;;  %15315 = vrcp.f32 %v10168_v5  ;;  %v10015_v50 = vsub.f32 0.0, %v17531_v27  ;;  %v17642_v25 = vld [vmem:[%s18882_s5 + $0x1a0] sm:$0xff]  ;;  %v17647_v5 = vld [vmem:[%s18882_s5 + $0x1a8] sm:$0xff]  ;;  %v14373_v44 = vpack.c.bf16 %v17687_v21, %v17682_v6 }
 0x663   : > { %v17535_v1 = vpop.f32.mrb[91].mxu1  ;;  %v15298_v23 = vpop.eup %15297  ;;  %15317 = vrcp.f32 %v10167_v7  ;;  %v10175_v46 = vadd.f32 1.0, %v15296_v10  ;;  %v10109_v7 = vmul.f32 1.442695, %v10007_v18  ;;  %v10107_v27 = vmul.f32 1.442695, %v10006_v61 }
 0x664   : > { %v15300_v52 = vpop.eup %15299  ;;  %v10174_v38 = vadd.f32 1.0, %v15298_v23  ;;  %15319 = vrcp.f32 %v10173_v39  ;;  %v10014_v39 = vsub.f32 0.0, %v17533_v42  ;;  %v14367_v23 = vpack.c.bf16 %v17612_v0, %v17607_v41  ;;  %v17704_v61 = vld [vmem:[%s18882_s5 + $0x30] sm:$0xff]  ;;  %v17728_v41 = vld [vmem:[%s18882_s5 + $0xc0] sm:$0xff]  ;;  %v17733_v0 = vld [vmem:[%s18882_s5 + $0xc8] sm:$0xff] }
 0x665   : > { %v15302_v15 = vpop.eup %15301  ;;  %v10176_v62 = vadd.f32 1.0, %v15300_v52  ;;  %v17539_v24 = vpop.f32.mrb[92].mxu0  ;;  %v17655_v52 = vld [vmem:[%s18882_s5 + $0x20] sm:$0xff]  ;;  %v10016_v42 = vsub.f32 0.0, %v17535_v1  ;;  %v10121_v33 = vmul.f32 1.442695, %v10013_v63  ;;  %v14401_v11 = vpack.c.bf16 %v17647_v5, %v17642_v25 }
 0x666   : > { %v15304_v30 = vpop.eup %15303  ;;  %15321 = vrcp.f32 %v10174_v38  ;;  %v10181_v54 = vadd.f32 1.0, %v15302_v15  ;;  %v17552_v59 = vpop.f32.mrb[92].mxu1  ;;  %v10111_v15 = vmul.f32 1.442695, %v10008_v43  ;;  %v10123_v18 = vmul.f32 1.442695, %v10014_v39 }
 0x667   : > { %v15306_v35 = vpop.eup %15305  ;;  %15323 = vrcp.f32 %v10176_v62  ;;  %v17554_v20 = vpop.f32.mrb[93].mxu0  ;;  %v10183_v14 = vadd.f32 1.0, %v15304_v30  ;;  %v17668_v30 = vld [vmem:[%s18882_s5 + $0x120] sm:$0xff]  ;;  %v17760_v5 = vld [vmem:[%s18882_s5 + $0x48] sm:$0xff] }
 0x668   : > { %v15308_v12 = vpop.eup %15307  ;;  %15325 = vrcp.f32 %v10175_v46  ;;  %v10182_v2 = vadd.f32 1.0, %v15306_v35  ;;  %v17572_v55 = vpop.f32.mrb[93].mxu1  ;;  %v17660_v46 = vld [vmem:[%s18882_s5 + $0x28] sm:$0xff]  ;;  %v14369_v35 = vpack.c.bf16 %v17637_v29, %v17630_v31  ;;  %v17743_v31 = vld [vmem:[%s18882_s5 + $0x1c0] sm:$0xff] }
 0x669   : > { %v17574_v28 = vpop.f32.mrb[94].mxu0  ;;  %15327 = vrcp.f32 %v10181_v54  ;;  %v10184_v26 = vadd.f32 1.0, %v15308_v12  ;;  %v17582_v49 = vpop.f32.mrb[94].mxu1  ;;  %v17673_v54 = vld [vmem:[%s18882_s5 + $0x128] sm:$0xff]  ;;  %v10125_v12 = vmul.f32 1.442695, %v10015_v50 }
 0x66a   : > { %v17584_v17 = vpop.f32.mrb[95].mxu0  ;;  %v17586_v32 = vpop.eup %15309  ;;  %15329 = vrcp.f32 %v10182_v2  ;;  %v14403_v43 = vpack.c.bf16 %v17673_v54, %v17668_v30  ;;  %v17788_v54 = vld [vmem:[%s18882_s5 + $0xd8] sm:$0xff] }
 0x66b   : > { %v17589_v48 = vpop.f32.mrb[95].mxu1  ;;  %v15312_v53 = vpop.eup %15311  ;;  %15331 = vrcp.f32 %v10184_v26  ;;  %v17698_v26 = vld [vmem:[%s18882_s5 + $0x1b8] sm:$0xff] }
 0x66c   : > { %v15314_v8 = vpop.eup %15313  ;;  %15333 = vrcp.f32 %v10183_v14  ;;  %v10021_v14 = vsub.f32 0.0, %v17539_v24  ;;  %v14405_v25 = vpack.c.bf16 %v17698_v26, %v17693_v37 }
 0x66d   : > { %v15316_v57 = vpop.eup %15315  ;;  %15335 = vpow2.f32 %v10093_v51  ;;  %10691 = vmatprep.mubr.f32.mxu0 %v15314_v8 }
 0x66e   : > { %v15318_v10 = vpop.eup %15317  ;;  %15337 = vpow2.f32 %v10091_v45  ;;  %10796 = vmatprep.mubr.f32.mxu1 %v15316_v57  ;;  %10692 = vmatmul.mubr.f32.vlgmr.msra.gmra.mrb[112].mxu0 %v15312_v53  ;;  %v13593_v62 = vpop.f32.mrb[96].mxu0  ;;  %v10023_v45 = vsub.f32 0.0, %v17552_v59  ;;  %v10127_v59 = vmul.f32 1.442695, %v10016_v42  ;;  %v17748_v57 = vld [vmem:[%s18882_s5 + $0x1c8] sm:$0xff] }
 0x66f   : > { %v15320_v38 = vpop.eup %15319  ;;  %15339 = vpow2.f32 %v10095_v58  ;;  %10797 = vmatmul.mubr.f32.vlgmr.msra.gmra.mrb[112].mxu1 %v15318_v10  ;;  %14364 = vmatpush3.bf16.msra.mxu0 %v14363_v9  ;;  %v13649_v1 = vpop.f32.mrb[96].mxu1  ;;  %v17709_v9 = vld [vmem:[%s18882_s5 + $0x38] sm:$0xff]  ;;  %v14371_v58 = vpack.c.bf16 %v17660_v46, %v17655_v52  ;;  %v10137_v50 = vmul.f32 1.442695, %v10021_v14  ;;  %v17765_v10 = vld [vmem:[%s18882_s5 + $0x140] sm:$0xff]  ;;  %v14409_v30 = vpack.c.bf16 %v17748_v57, %v17743_v31  ;;  %v17819_v14 = vld [vmem:[%s18882_s5 + $0x150] sm:$0xff] }
 0x670   : > { %v15322_v19 = vpop.eup %15321  ;;  %15341 = vpow2.f32 %v10105_v34  ;;  %14396 = vmatpush3.bf16.msra.mxu1 %v14395_v40  ;;  %v13594_v4 = vpop.f32.mrb[97].mxu0  ;;  %14366 = vmatprep.subr.bf16.mxu0 %v14365_v22  ;;  %v17723_v40 = vld [vmem:[%s18882_s5 + $0x138] sm:$0xff]  ;;  %v10189_v34 = vadd.f32 1.0, %v17586_v32  ;;  %v17753_v32 = vld [vmem:[%s18882_s5 + $0x40] sm:$0xff]  ;;  %v14375_v46 = vpack.c.bf16 %v17709_v9, %v17704_v61 }
 0x671   : > { %v15324_v56 = vpop.eup %15323  ;;  %15343 = vpow2.f32 %v10109_v7  ;;  %10696 = vmatprep.mubr.f32.mxu0 %v15322_v19  ;;  %v13595_v2 = vadd.f32 %v13594_v4, %v13593_v62  ;;  %v13650_v3 = vpop.f32.mrb[97].mxu1  ;;  %14398 = vmatprep.subr.bf16.mxu1 %v14397_v16  ;;  %v14407_v62 = vpack.c.bf16 %v17723_v40, %v17714_v13  ;;  %v17793_v19 = vld [vmem:[%s18882_s5 + $0x1d0] sm:$0xff]  ;;  %v14379_v6 = vpack.c.bf16 %v17760_v5, %v17753_v32  ;;  %v17861_v57 = vld [vmem:[%s18882_s5 + $0x60] sm:$0xff]  ;;  %v17866_v32 = vld [vmem:[%s18882_s5 + $0x68] sm:$0xff] }
 0x672   : > { %v15326_v51 = vpop.eup %15325  ;;  %15345 = vpow2.f32 %v10107_v27  ;;  %10801 = vmatprep.mubr.f32.mxu1 %v15324_v56  ;;  %v13651_v24 = vadd.f32 %v13650_v3, %v13649_v1  ;;  %10697 = vmatmul.mubr.f32.gmra.mrb[114].mxu0 %v15320_v38  ;;  %v13596_v53 = vpop.f32.mrb[98].mxu0  ;;  %v17770_v27 = vld [vmem:[%s18882_s5 + $0x148] sm:$0xff]  ;;  %v17777_v38 = vld [vmem:[%s18882_s5 + $0xd0] sm:$0xff] }
 0x673   : > { %v15328_v47 = vpop.eup %15327  ;;  %15347 = vpow2.f32 %v10111_v15  ;;  %10802 = vmatmul.mubr.f32.gmra.mrb[114].mxu1 %v15326_v51  ;;  %14368 = vmatpush3.bf16.msra.mxu0 %v14367_v23  ;;  %v13652_v22 = vpop.f32.mrb[98].mxu1  ;;  %v10141_v23 = vmul.f32 1.442695, %v10023_v45  ;;  %v14411_v21 = vpack.c.bf16 %v17770_v27, %v17765_v10  ;;  %v17809_v56 = vld [vmem:[%s18882_s5 + $0x50] sm:$0xff]  ;;  %v17829_v45 = vld [vmem:[%s18882_s5 + $0xe0] sm:$0xff] }
 0x674   : > { %v15330_v8 = vpop.eup %15329  ;;  %15349 = vpow2.f32 %v10121_v33  ;;  %v17736_v63 = vadd.f32 %v13651_v24, %v13595_v2  ;;  %14400 = vmatpush3.bf16.msra.mxu1 %v14399_v60  ;;  %v13597_v36 = vpop.f32.mrb[99].mxu0  ;;  %14370 = vmatprep.subr.bf16.mxu0 %v14369_v35  ;;  %v14377_v60 = vpack.c.bf16 %v17733_v0, %v17728_v41  ;;  %v17798_v33 = vld [vmem:[%s18882_s5 + $0x1d8] sm:$0xff]  ;;  %v17834_v24 = vld [vmem:[%s18882_s5 + $0xe8] sm:$0xff]  ;;  %v17845_v41 = vld [vmem:[%s18882_s5 + $0x1e0] sm:$0xff] }
 0x675   : > { %v15332_v7 = vpop.eup %15331  ;;  %15351 = vpow2.f32 %v10125_v12  ;;  %v13598_v16 = vadd.f32 %v13597_v36, %v13596_v53  ;;  %v13653_v29 = vpop.f32.mrb[99].mxu1  ;;  %10701 = vmatprep.mubr.f32.mxu0 %v15330_v8  ;;  %14402 = vmatprep.subr.bf16.mxu1 %v14401_v11  ;;  %v17814_v12 = vld [vmem:[%s18882_s5 + $0x58] sm:$0xff]  ;;  %v17850_v0 = vld [vmem:[%s18882_s5 + $0x1e8] sm:$0xff]  ;;  %v14385_v31 = vpack.c.bf16 %v17834_v24, %v17829_v45  ;;  %v11160_v45 = vld [vmem:[%s18882_s5 + $0x170] sm:$0xff] }
 0x676   : > { %v15334_v39 = vpop.eup %15333  ;;  %15353 = vpow2.f32 %v10123_v18  ;;  %v13654_v52 = vadd.f32 %v13653_v29, %v13652_v22  ;;  %10806 = vmatprep.mubr.f32.mxu1 %v15332_v7  ;;  %10702 = vmatmul.mubr.f32.gmra.mrb[116].mxu0 %v15328_v47  ;;  %v13599_v42 = vpop.f32.mrb[100].mxu0  ;;  %v17824_v18 = vld [vmem:[%s18882_s5 + $0x158] sm:$0xff]  ;;  %v14381_v47 = vpack.c.bf16 %v17788_v54, %v17777_v38  ;;  %v14383_v40 = vpack.c.bf16 %v17814_v12, %v17809_v56 }
 0x677   : > { %v15336_v15 = vpop.eup %15335  ;;  %15355 = vpow2.f32 %v10127_v59  ;;  %10807 = vmatmul.mubr.f32.gmra.mrb[116].mxu1 %v15334_v39  ;;  %14372 = vmatpush3.bf16.msra.mxu0 %v14371_v58  ;;  %v13655_v35 = vpop.f32.mrb[100].mxu1  ;;  %v10029_v54 = vsub.f32 0.0, %v17574_v28 }
 0x678   : > { %v15338_v1 = vpop.eup %15337  ;;  %15357 = vrcp.f32 %v10189_v34  ;;  %v17800_v4 = vadd.f32 %v13654_v52, %v13598_v16  ;;  %14404 = vmatpush3.bf16.msra.mxu1 %v14403_v43  ;;  %v13600_v11 = vpop.f32.mrb[101].mxu0  ;;  %14374 = vmatprep.subr.bf16.mxu0 %v14373_v44  ;;  %v10191_v3 = vadd.f32 1.0, %v15336_v15  ;;  %v14413_v43 = vpack.c.bf16 %v17798_v33, %v17793_v19 }
 0x679   : > { %v15340_v2 = vpop.eup %15339  ;;  %v10190_v37 = vadd.f32 1.0, %v15338_v1  ;;  %15359 = vpow2.f32 %v10137_v50  ;;  %v13601_v26 = vadd.f32 %v13600_v11, %v13599_v42  ;;  %v13656_v51 = vpop.f32.mrb[101].mxu1  ;;  %14406 = vmatprep.subr.bf16.mxu1 %v14405_v25  ;;  %v14415_v44 = vpack.c.bf16 %v17824_v18, %v17819_v14  ;;  %v11144_v14 = vld [vmem:[%s18882_s5 + $0xf0] sm:$0xff] }
 0x67a   : > { %v15342_v61 = vpop.eup %15341  ;;  %v10192_v9 = vadd.f32 1.0, %v15340_v2  ;;  %15361 = vpow2.f32 %v10141_v23  ;;  %v13657_v13 = vadd.f32 %v13656_v51, %v13655_v35  ;;  %v13602_v58 = vpop.f32.mrb[102].mxu0  ;;  %v14417_v52 = vpack.c.bf16 %v17850_v0, %v17845_v41  ;;  %v11145_v2 = vld [vmem:[%s18882_s5 + $0xf8] sm:$0xff]  ;;  %v11176_v18 = vld [vmem:[%s18882_s5 + $0x1f0] sm:$0xff] }
 0x67b   : > { %v15344_v59 = vpop.eup %15343  ;;  %15363 = vrcp.f32 %v10190_v37  ;;  %v10197_v53 = vadd.f32 1.0, %v15342_v61  ;;  %14376 = vmatpush3.bf16.msra.mxu0 %v14375_v46  ;;  %v13658_v22 = vpop.f32.mrb[102].mxu1  ;;  %v10022_v15 = vsub.f32 0.0, %v17554_v20  ;;  %v17883_v20 = vld [vmem:[%s18882_s5 + $0x160] sm:$0xff]  ;;  %v11177_v61 = vld [vmem:[%s18882_s5 + $0x1f8] sm:$0xff]  ;;  %v14389_v0 = vpack.c.bf16 %v11145_v2, %v11144_v14 }
 0x67c   : > { %v15346_v8 = vpop.eup %15345  ;;  %15365 = vrcp.f32 %v10192_v9  ;;  %v17852_v34 = vadd.f32 %v13657_v13, %v13601_v26  ;;  %14408 = vmatpush3.bf16.msra.mxu1 %v14407_v62  ;;  %v13603_v36 = vpop.f32.mrb[103].mxu0  ;;  %14378 = vmatprep.subr.bf16.mxu0 %v14377_v60  ;;  %v10199_v50 = vadd.f32 1.0, %v15344_v59  ;;  %v14387_v62 = vpack.c.bf16 %v17866_v32, %v17861_v57 }
 0x67d   : > { %v15348_v7 = vpop.eup %15347  ;;  %15367 = vrcp.f32 %v10191_v3  ;;  %v10198_v16 = vadd.f32 1.0, %v15346_v8  ;;  %v13604_v29 = vadd.f32 %v13603_v36, %v13602_v58  ;;  %v13659_v25 = vpop.f32.mrb[103].mxu1  ;;  %14410 = vmatprep.subr.bf16.mxu1 %v14409_v30  ;;  %v10024_v30 = vsub.f32 0.0, %v17572_v55  ;;  %v17888_v55 = vld [vmem:[%s18882_s5 + $0x168] sm:$0xff]  ;;  %v11129_v8 = vld [vmem:[%s18882_s5 + $0x78] sm:$0xff] }
 0x67e   : > { %v15350_v5 = vpop.eup %15349  ;;  %15369 = vrcp.f32 %v10197_v53  ;;  %v10200_v39 = vadd.f32 1.0, %v15348_v7  ;;  %v13660_v23 = vadd.f32 %v13659_v25, %v13658_v22  ;;  %v13605_v42 = vpop.f32.mrb[104].mxu0  ;;  %v10139_v37 = vmul.f32 1.442695, %v10022_v15  ;;  %v11194_v7 = vld [vmem:[%s18882_s5 + $0x280] sm:$0xff] }
 0x67f   : > { %v15352_v46 = vpop.eup %15351  ;;  %15371 = vrcp.f32 %v10198_v16  ;;  %v10205_v38 = vadd.f32 1.0, %v15350_v5  ;;  %14380 = vmatpush3.bf16.msra.mxu0 %v14379_v6  ;;  %v13661_v33 = vpop.f32.mrb[104].mxu1  ;;  %v10030_v26 = vsub.f32 0.0, %v17584_v17  ;;  %v10143_v13 = vmul.f32 1.442695, %v10024_v30  ;;  %v11226_v5 = vld [vmem:[%s18882_s5 + $0x380] sm:$0xff] }
 0x680   : > { %v15354_v60 = vpop.eup %15353  ;;  %15373 = vrcp.f32 %v10200_v39  ;;  %v17875_v19 = vadd.f32 %v13660_v23, %v13604_v29  ;;  %14412 = vmatpush3.bf16.msra.mxu1 %v14411_v21  ;;  %v13606_v1 = vpop.f32.mrb[105].mxu0  ;;  %14382 = vmatprep.subr.bf16.mxu0 %v14381_v47  ;;  %v10207_v35 = vadd.f32 1.0, %v15352_v46  ;;  %v10031_v21 = vsub.f32 0.0, %v17582_v49  ;;  %v11227_v39 = vld [vmem:[%s18882_s5 + $0x388] sm:$0xff] }
 0x681   : > { %v15356_v28 = vpop.eup %15355  ;;  %15375 = vrcp.f32 %v10199_v50  ;;  %v10206_v11 = vadd.f32 1.0, %v15354_v60  ;;  %v13607_v6 = vadd.f32 %v13606_v1, %v13605_v42  ;;  %v13662_v56 = vpop.f32.mrb[105].mxu1  ;;  %14414 = vmatprep.subr.bf16.mxu1 %v14413_v43  ;;  %v14419_v49 = vpack.c.bf16 %v17888_v55, %v17883_v20  ;;  %v11195_v50 = vld [vmem:[%s18882_s5 + $0x288] sm:$0xff] }
 0x682   : > { %v15358_v10 = vpop.eup %15357  ;;  %15377 = vrcp.f32 %v10205_v38  ;;  %v10208_v27 = vadd.f32 1.0, %v15356_v28  ;;  %v13663_v12 = vadd.f32 %v13662_v56, %v13661_v33  ;;  %v13608_v51 = vpop.f32.mrb[106].mxu0  ;;  %v10032_v47 = vsub.f32 0.0, %v17589_v48  ;;  %v11128_v48 = vld [vmem:[%s18882_s5 + $0x70] sm:$0xff] }
 0x683   : > { %v17897_v3 = vpop.eup %15359  ;;  %15379 = vrcp.f32 %v10206_v11  ;;  %14384 = vmatpush3.bf16.msra.mxu0 %v14383_v40  ;;  %v13664_v59 = vpop.f32.mrb[106].mxu1  ;;  %v10153_v43 = vmul.f32 1.442695, %v10029_v54  ;;  %v10157_v22 = vmul.f32 1.442695, %v10031_v21  ;;  %v14391_v42 = vpack.c.bf16 %v11129_v8, %v11128_v48 }
 0x684   : > { %v17908_v9 = vpop.eup %15361  ;;  %15381 = vrcp.f32 %v10208_v27  ;;  %v17911_v17 = vadd.f32 %v13663_v12, %v13607_v6  ;;  %14416 = vmatpush3.bf16.msra.mxu1 %v14415_v44  ;;  %v13609_v53 = vpop.f32.mrb[107].mxu0  ;;  %14386 = vmatprep.subr.bf16.mxu0 %v14385_v31  ;;  %v14421_v44 = vpack.c.bf16 %v11177_v61, %v11176_v18  ;;  %v11161_v31 = vld [vmem:[%s18882_s5 + $0x178] sm:$0xff]  ;;  %v10155_v29 = vmul.f32 1.442695, %v10030_v26 }
 0x685   : > { %v15364_v58 = vpop.eup %15363  ;;  %15383 = vrcp.f32 %v10207_v35  ;;  %v13610_v40 = vadd.f32 %v13609_v53, %v13608_v51  ;;  %v13665_v41 = vpop.f32.mrb[107].mxu1  ;;  %14418 = vmatprep.subr.bf16.mxu1 %v14417_v52  ;;  %v10159_v52 = vmul.f32 1.442695, %v10032_v47  ;;  %v14423_v33 = vpack.c.bf16 %v11161_v31, %v11160_v45 }
 0x686   : > { %v15366_v24 = vpop.eup %15365  ;;  %10706 = vmatprep.mubr.f32.mxu0 %v15364_v58  ;;  %v13666_v36 = vadd.f32 %v13665_v41, %v13664_v59  ;;  %15385 = vpow2.f32 %v10139_v37  ;;  %v13611_v25 = vpop.f32.mrb[108].mxu0  ;;  %v14425_v1 = vpack.c.bf16 %v11195_v50, %v11194_v7  ;;  %v14457_v28 = vpack.c.bf16 %v11227_v39, %v11226_v5  ;;  %v11211_v7 = vld [vmem:[%s18882_s5 + $0x308] sm:$0xff]  ;;  %v11196_v50 = vld [vmem:[%s18882_s5 + $0x290] sm:$0xff]  ;;  %v11229_v5 = vld [vmem:[%s18882_s5 + $0x398] sm:$0xff] }
 0x687   : > { %v15368_v16 = vpop.eup %15367  ;;  %10811 = vmatprep.mubr.f32.mxu1 %v15366_v24  ;;  %10707 = vmatmul.mubr.f32.gmra.mrb[118].mxu0 %v15358_v10  ;;  %15387 = vpow2.f32 %v10143_v13  ;;  %v13667_v38 = vpop.f32.mrb[108].mxu1  ;;  %v10213_v2 = vadd.f32 1.0, %v17897_v3  ;;  %v19331_v39 = vld [vmem:[#allocation26_spill] sm:$0xff] }
 0x688   : > { %v15370_v23 = vpop.eup %15369  ;;  %10812 = vmatmul.mubr.f32.gmra.mrb[118].mxu1 %v15368_v16  ;;  %v17940_v46 = vadd.f32 %v13666_v36, %v13610_v40  ;;  %14388 = vmatpush3.bf16.msra.mxu0 %v14387_v62  ;;  %v13612_v15 = vpop.f32.mrb[109].mxu0  ;;  %15389 = vpow2.f32 %v10153_v43  ;;  %v11179_v36 = vld [vmem:[%s18882_s5 + $0x208] sm:$0xff]  ;;  %v11197_v16 = vld [vmem:[%s18882_s5 + $0x298] sm:$0xff] }
 0x689   : > { %v15372_v60 = vpop.eup %15371  ;;  %14420 = vmatpush3.bf16.msra.mxu1 %v14419_v49  ;;  %v13613_v30 = vadd.f32 %v13612_v15, %v13611_v25  ;;  %v13668_v54 = vpop.f32.mrb[109].mxu1  ;;  %14390 = vmatprep.subr.bf16.mxu0 %v14389_v0  ;;  %15391 = vpow2.f32 %v10157_v22  ;;  %v10215_v49 = vadd.f32 1.0, %v17908_v9  ;;  %v11178_v22 = vld [vmem:[%s18882_s5 + $0x200] sm:$0xff]  ;;  %v11228_v25 = vld [vmem:[%s18882_s5 + $0x390] sm:$0xff] }
 0x68a   : > { %v15374_v20 = vpop.eup %15373  ;;  %10711 = vmatprep.mubr.f32.mxu0 %v15372_v60  ;;  %v13669_v55 = vadd.f32 %v13668_v54, %v13667_v38  ;;  %14422 = vmatprep.subr.bf16.mxu1 %v14421_v44  ;;  %15393 = vpow2.f32 %v10155_v29  ;;  %v13614_v57 = vpop.f32.mrb[110].mxu0  ;;  %v11210_v44 = vld [vmem:[%s18882_s5 + $0x300] sm:$0xff]  ;;  %v19330_v29 = vld [vmem:[#allocation20_spill] sm:$0xff]  ;;  %v14429_v38 = vpack.c.bf16 %v11197_v16, %v11196_v50  ;;  %v14461_v54 = vpack.c.bf16 %v11229_v5, %v11228_v25  ;;  %v19344_v5 = vld [vmem:[#allocation33_spill] sm:$0xff] }
 0x68b   : > { %v15376_v35 = vpop.eup %15375  ;;  %10816 = vmatprep.mubr.f32.mxu1 %v15374_v20  ;;  %10712 = vmatmul.mubr.f32.gmra.mrb[120].mxu0 %v15370_v23  ;;  %15395 = vpow2.f32 %v10159_v52  ;;  %v13670_v11 = vpop.f32.mrb[110].mxu1  ;;  %v14427_v23 = vpack.c.bf16 %v11179_v36, %v11178_v22  ;;  %v14459_v52 = vpack.c.bf16 %v11211_v7, %v11210_v44  ;;  %v11180_v15 = vld [vmem:[%s18882_s5 + $0x210] sm:$0xff]  ;;  %v11199_v20 = vld [vmem:[%s18882_s5 + $0x2a8] sm:$0xff]  ;;  %v11234_v22 = vld [vmem:[%s18882_s5 + $0x3c0] sm:$0xff] }
 0x68c   : > { %v15378_v32 = vpop.eup %15377  ;;  %10817 = vmatmul.mubr.f32.gmra.mrb[120].mxu1 %v15376_v35  ;;  %v17945_v62 = vadd.f32 %v13669_v55, %v13613_v30  ;;  %14392 = vmatpush3.bf16.msra.mxu0 %v14391_v42  ;;  %v13615_v6 = vpop.f32.mrb[111].mxu0  ;;  %15397 = vrcp.f32 %v10213_v2  ;;  %v11181_v42 = vld [vmem:[%s18882_s5 + $0x218] sm:$0xff]  ;;  %v11212_v60 = vld [vmem:[%s18882_s5 + $0x310] sm:$0xff]  ;;  %v19332_v30 = vld [vmem:[#allocation19_spill] sm:$0xff] }
 0x68d   : > { %v15380_v56 = vpop.eup %15379  ;;  %14424 = vmatpush3.bf16.msra.mxu1 %v14423_v33  ;;  %v13616_v10 = vadd.f32 %v13615_v6, %v13614_v57  ;;  %v13671_v27 = vpop.f32.mrb[111].mxu1  ;;  %14426 = vmatprep.subr.bf16.mxu0 %v14425_v1  ;;  %v11213_v33 = vld [vmem:[%s18882_s5 + $0x318] sm:$0xff]  ;;  %v11198_v1 = vld [vmem:[%s18882_s5 + $0x2a0] sm:$0xff]  ;;  %v11231_v57 = vld [vmem:[%s18882_s5 + $0x3a8] sm:$0xff] }
 0x68e   : > { %v15382_v21 = vpop.eup %15381  ;;  %10716 = vmatprep.mubr.f32.mxu0 %v15380_v56  ;;  %v13672_v12 = vadd.f32 %v13671_v27, %v13670_v11  ;;  %14458 = vmatprep.subr.bf16.mxu1 %v14457_v28  ;;  %v19333_v55 = vld [vmem:[#allocation25_spill] sm:$0xff]  ;;  %v19334_v28 = vld [vmem:[#allocation23_spill] sm:$0xff]  ;;  %v14431_v11 = vpack.c.bf16 %v11181_v42, %v11180_v15  ;;  %v14463_v6 = vpack.c.bf16 %v11213_v33, %v11212_v60  ;;  %v19343_v44 = vld [vmem:[#allocation42_spill] sm:$0xff] }
 0x68f   : > { %v15384_v14 = vpop.eup %15383  ;;  %10821 = vmatprep.mubr.f32.mxu1 %v15382_v21  ;;  %10717 = vmatmul.mubr.f32.gmra.mrb[122].mxu0 %v15378_v32  ;;  %v11230_v35 = vld [vmem:[%s18882_s5 + $0x3a0] sm:$0xff]  ;;  %v14433_v56 = vpack.c.bf16 %v11199_v20, %v11198_v1  ;;  %v11183_v27 = vld [vmem:[%s18882_s5 + $0x228] sm:$0xff]  ;;  %v11236_v60 = vld [vmem:[%s18882_s5 + $0x3d0] sm:$0xff] }
 0x690   : > { %10822 = vmatmul.mubr.f32.gmra.mrb[122].mxu1 %v15384_v14  ;;  %v17948_v37 = vadd.f32 %v13672_v12, %v13616_v10  ;;  %v15386_v26 = vpop.eup %15385  ;;  %v19335_v32 = vld [vmem:[#allocation30_spill] sm:$0xff]  ;;  %v19336_v12 = vld [vmem:[#allocation21_spill] sm:$0xff]  ;;  %v14465_v14 = vpack.c.bf16 %v11231_v57, %v11230_v35  ;;  %v11215_v2 = vld [vmem:[%s18882_s5 + $0x328] sm:$0xff] }
 0x691   : > { %v15388_v51 = vpop.eup %15387  ;;  %v10214_v18 = vadd.f32 1.0, %v15386_v26  ;;  %v11182_v10 = vld [vmem:[%s18882_s5 + $0x220] sm:$0xff]  ;;  %v11200_v26 = vld [vmem:[%s18882_s5 + $0x2b0] sm:$0xff]  ;;  %v11235_v36 = vld [vmem:[%s18882_s5 + $0x3c8] sm:$0xff] }
 0x692   : > { %v15390_v61 = vpop.eup %15389  ;;  %v10216_v13 = vadd.f32 1.0, %v15388_v51  ;;  %v11214_v21 = vld [vmem:[%s18882_s5 + $0x320] sm:$0xff]  ;;  %v11201_v51 = vld [vmem:[%s18882_s5 + $0x2b8] sm:$0xff]  ;;  %v11220_v35 = vld [vmem:[%s18882_s5 + $0x350] sm:$0xff] }
 0x693   : > { %v15392_v47 = vpop.eup %15391  ;;  %15399 = vrcp.f32 %v10214_v18  ;;  %v10221_v59 = vadd.f32 1.0, %v15390_v61  ;;  %v19338_v18 = vld [vmem:[#allocation31_spill] sm:$0xff]  ;;  %v11232_v61 = vld [vmem:[%s18882_s5 + $0x3b0] sm:$0xff] }
 0x694   : > { %v15394_v53 = vpop.eup %15393  ;;  %15401 = vrcp.f32 %v10216_v13  ;;  %v10223_v3 = vadd.f32 1.0, %v15392_v47  ;;  %v11233_v13 = vld [vmem:[%s18882_s5 + $0x3b8] sm:$0xff]  ;;  %v11186_v16 = vld [vmem:[%s18882_s5 + $0x240] sm:$0xff]  ;;  %v19348_v57 = vld [vmem:[#allocation40_spill] sm:$0xff] }
 0x695   : > { %v15396_v58 = vpop.eup %15395  ;;  %15403 = vrcp.f32 %v10215_v49  ;;  %v10222_v43 = vadd.f32 1.0, %v15394_v53  ;;  %v19337_v49 = vld [vmem:[#allocation27_spill] sm:$0xff]  ;;  %v19339_v47 = vld [vmem:[#allocation38_spill] sm:$0xff]  ;;  %v14467_v53 = vpack.c.bf16 %v11215_v2, %v11214_v21 }
 0x696   : > { %15405 = vrcp.f32 %v10221_v59  ;;  %v10224_v40 = vadd.f32 1.0, %v15396_v58  ;;  %v15398_v41 = vpop.eup %15397  ;;  %v14435_v59 = vpack.c.bf16 %v11183_v27, %v11182_v10  ;;  %v14437_v58 = vpack.c.bf16 %v11201_v51, %v11200_v26  ;;  %v11218_v25 = vld [vmem:[%s18882_s5 + $0x340] sm:$0xff]  ;;  %v19349_v10 = vld [vmem:[#allocation49_spill] sm:$0xff] }
 0x697   : > { %15407 = vrcp.f32 %v10222_v43  ;;  %v11185_v43 = vld [vmem:[%s18882_s5 + $0x238] sm:$0xff]  ;;  %v19345_v15 = vld [vmem:[#allocation39_spill] sm:$0xff] }
 0x698   : > { %15409 = vrcp.f32 %v10224_v40  ;;  %v11216_v40 = vld [vmem:[%s18882_s5 + $0x330] sm:$0xff]  ;;  %v19346_v42 = vld [vmem:[#allocation43_spill] sm:$0xff] }
 0x699   : > { %15411 = vrcp.f32 %v10223_v3  ;;  %v11184_v3 = vld [vmem:[%s18882_s5 + $0x230] sm:$0xff]  ;;  %v19350_v27 = vld [vmem:[#allocation47_spill] sm:$0xff] }
 0x69a   : > { %v11238_v21 = vld [vmem:[%s18882_s5 + $0x3e0] sm:$0xff] }
 0x69d   : > { %v15400_v9 = vpop.eup %15399 }
 0x69e   : > { %v15402_v0 = vpop.eup %15401  ;;  %10721 = vmatprep.mubr.f32.mxu0 %v15400_v9  ;;  %v14469_v9 = vpack.c.bf16 %v11233_v13, %v11232_v61  ;;  %v11222_v61 = vld [vmem:[%s18882_s5 + $0x360] sm:$0xff]  ;;  %v19352_v13 = vld [vmem:[#allocation45_spill] sm:$0xff] }
 0x69f   : > { %v15404_v48 = vpop.eup %15403  ;;  %10826 = vmatprep.mubr.f32.mxu1 %v15402_v0  ;;  %10722 = vmatmul.mubr.f32.gmra.mrb[124].mxu0 %v15398_v41  ;;  %v19340_v41 = vld [vmem:[#allocation28_spill] sm:$0xff]  ;;  %v11217_v0 = vld [vmem:[%s18882_s5 + $0x338] sm:$0xff] }
 0x6a0   : > { %v15406_v8 = vpop.eup %15405  ;;  %10827 = vmatmul.mubr.f32.gmra.mrb[124].mxu1 %v15404_v48  ;;  %v11202_v48 = vld [vmem:[%s18882_s5 + $0x2c0] sm:$0xff]  ;;  %v14471_v7 = vpack.c.bf16 %v11217_v0, %v11216_v40  ;;  %v11240_v40 = vld [vmem:[%s18882_s5 + $0x3f0] sm:$0xff] }
 0x6a1   : > { %v15408_v45 = vpop.eup %15407 }
 0x6a2   : > { %v15410_v24 = vpop.eup %15409  ;;  %10726 = vmatprep.mubr.f32.mxu0 %v15408_v45  ;;  %v19341_v45 = vld [vmem:[#allocation37_spill] sm:$0xff] }
 0x6a3   : > { %v15412_v31 = vpop.eup %15411  ;;  %10831 = vmatprep.mubr.f32.mxu1 %v15410_v24  ;;  %10727 = vmatmul.mubr.f32.gmra.mrb[126].mxu0 %v15406_v8  ;;  %v11203_v8 = vld [vmem:[%s18882_s5 + $0x2c8] sm:$0xff] }
 0x6a4   : > { %10832 = vmatmul.mubr.f32.gmra.mrb[126].mxu1 %v15412_v31  ;;  %11434 = vmatprep.mubr.f32.mxu0 %v19330_v29  ;;  %v19342_v24 = vld [vmem:[#allocation35_spill] sm:$0xff]  ;;  %v14439_v31 = vpack.c.bf16 %v11185_v43, %v11184_v3  ;;  %v14441_v50 = vpack.c.bf16 %v11203_v8, %v11202_v48 }
 0x6a5   : > { %11539 = vmatprep.mubr.f32.mxu1 %v19331_v39  ;;  %v11187_v29 = vld [vmem:[%s18882_s5 + $0x248] sm:$0xff]  ;;  %v14473_v39 = vpack.c.bf16 %v11235_v36, %v11234_v22  ;;  %v11224_v22 = vld [vmem:[%s18882_s5 + $0x370] sm:$0xff] }
 0x6a6   : > { %v14443_v33 = vpack.c.bf16 %v11187_v29, %v11186_v16  ;;  %v19353_v3 = vld [vmem:[#allocation51_spill] sm:$0xff]  ;;  %v19356_v36 = vld [vmem:[#allocation52_spill] sm:$0xff]  ;;  %v19357_v16 = vld [vmem:[#allocation61_spill] sm:$0xff] }
 0x6a7   : > { %11435 = vmatmul.mubr.f32.vlgmr.msra.gmra.mrb[128].mxu0 %v19332_v30  ;;  %v11237_v30 = vld [vmem:[%s18882_s5 + $0x3d8] sm:$0xff]  ;;  %v19354_v43 = vld [vmem:[#allocation55_spill] sm:$0xff] }
 0x6a8   : > { %11540 = vmatmul.mubr.f32.vlgmr.msra.gmra.mrb[128].mxu1 %v19333_v55  ;;  %11439 = vmatprep.mubr.f32.mxu0 %v19334_v28  ;;  %v11188_v55 = vld [vmem:[%s18882_s5 + $0x250] sm:$0xff]  ;;  %v11189_v28 = vld [vmem:[%s18882_s5 + $0x258] sm:$0xff]  ;;  %v19358_v29 = vld [vmem:[#allocation59_spill] sm:$0xff] }
 0x6a9   : > { %11544 = vmatprep.mubr.f32.mxu1 %v19335_v32  ;;  %14428 = vmatpush3.bf16.msra.mxu0 %v14427_v23  ;;  %v11219_v23 = vld [vmem:[%s18882_s5 + $0x348] sm:$0xff]  ;;  %v14477_v32 = vpack.c.bf16 %v11237_v30, %v11236_v60  ;;  %v14447_v2 = vpack.c.bf16 %v11189_v28, %v11188_v55  ;;  %v11242_v60 = vld [vmem:[%s18882_s5 + $0x400] sm:$0xff]  ;;  %v11260_v55 = vld [vmem:[%s18882_s5 + $0x490] sm:$0xff] }
 0x6aa   : > { %14460 = vmatpush3.bf16.msra.mxu1 %v14459_v52  ;;  %14430 = vmatprep.subr.bf16.mxu0 %v14429_v38  ;;  %v11204_v52 = vld [vmem:[%s18882_s5 + $0x2d0] sm:$0xff]  ;;  %v11205_v38 = vld [vmem:[%s18882_s5 + $0x2d8] sm:$0xff]  ;;  %v14475_v1 = vpack.c.bf16 %v11219_v23, %v11218_v25  ;;  %v11290_v25 = vld [vmem:[%s18882_s5 + $0x580] sm:$0xff] }
 0x6ab   : > { %11440 = vmatmul.mubr.f32.gmra.mrb[130].mxu0 %v19336_v12  ;;  %14462 = vmatprep.subr.bf16.mxu1 %v14461_v54  ;;  %v19347_v54 = vld [vmem:[#allocation50_spill] sm:$0xff]  ;;  %v14445_v20 = vpack.c.bf16 %v11205_v38, %v11204_v52  ;;  %v11239_v12 = vld [vmem:[%s18882_s5 + $0x3e8] sm:$0xff] }
 0x6ac   : > { %11545 = vmatmul.mubr.f32.gmra.mrb[130].mxu1 %v19337_v49  ;;  %11444 = vmatprep.mubr.f32.mxu0 %v19338_v18  ;;  %v11190_v49 = vld [vmem:[%s18882_s5 + $0x260] sm:$0xff]  ;;  %v11191_v18 = vld [vmem:[%s18882_s5 + $0x268] sm:$0xff]  ;;  %v11261_v28 = vld [vmem:[%s18882_s5 + $0x498] sm:$0xff] }
 0x6ad   : > { %11549 = vmatprep.mubr.f32.mxu1 %v19339_v47  ;;  %14432 = vmatpush3.bf16.msra.mxu0 %v14431_v11  ;;  %v11221_v11 = vld [vmem:[%s18882_s5 + $0x358] sm:$0xff]  ;;  %v14481_v47 = vpack.c.bf16 %v11239_v12, %v11238_v21  ;;  %v14451_v0 = vpack.c.bf16 %v11191_v18, %v11190_v49  ;;  %v11243_v30 = vld [vmem:[%s18882_s5 + $0x408] sm:$0xff]  ;;  %v11276_v21 = vld [vmem:[%s18882_s5 + $0x510] sm:$0xff] }
 0x6ae   : > { %14464 = vmatpush3.bf16.msra.mxu1 %v14463_v6  ;;  %14434 = vmatprep.subr.bf16.mxu0 %v14433_v56  ;;  %v11206_v6 = vld [vmem:[%s18882_s5 + $0x2e0] sm:$0xff]  ;;  %v11207_v56 = vld [vmem:[%s18882_s5 + $0x2e8] sm:$0xff]  ;;  %v14479_v26 = vpack.c.bf16 %v11221_v11, %v11220_v35  ;;  %v14491_v11 = vpack.c.bf16 %v11243_v30, %v11242_v60  ;;  %v19365_v49 = vld [vmem:[#allocation73_spill] sm:$0xff] }
 0x6af   : > { %11445 = vmatmul.mubr.f32.gmra.mrb[132].mxu0 %v19340_v41  ;;  %14466 = vmatprep.subr.bf16.mxu1 %v14465_v14  ;;  %v19351_v14 = vld [vmem:[#allocation54_spill] sm:$0xff]  ;;  %v14449_v51 = vpack.c.bf16 %v11207_v56, %v11206_v6  ;;  %v14493_v56 = vpack.c.bf16 %v11261_v28, %v11260_v55  ;;  %v19366_v18 = vld [vmem:[#allocation71_spill] sm:$0xff] }
 0x6b0   : > { %11550 = vmatmul.mubr.f32.gmra.mrb[132].mxu1 %v19341_v45  ;;  %11449 = vmatprep.mubr.f32.mxu0 %v19342_v24  ;;  %v11241_v41 = vld [vmem:[%s18882_s5 + $0x3f8] sm:$0xff]  ;;  %v11192_v45 = vld [vmem:[%s18882_s5 + $0x270] sm:$0xff]  ;;  %v11298_v60 = vld [vmem:[%s18882_s5 + $0x5c0] sm:$0xff] }
 0x6b1   : > { %11554 = vmatprep.mubr.f32.mxu1 %v19343_v44  ;;  %14436 = vmatpush3.bf16.msra.mxu0 %v14435_v59  ;;  %v11223_v59 = vld [vmem:[%s18882_s5 + $0x368] sm:$0xff]  ;;  %v11193_v24 = vld [vmem:[%s18882_s5 + $0x278] sm:$0xff]  ;;  %v14485_v44 = vpack.c.bf16 %v11241_v41, %v11240_v40  ;;  %v11278_v40 = vld [vmem:[%s18882_s5 + $0x520] sm:$0xff] }
 0x6b2   : > { %14468 = vmatpush3.bf16.msra.mxu1 %v14467_v53  ;;  %14438 = vmatprep.subr.bf16.mxu0 %v14437_v58  ;;  %v11208_v53 = vld [vmem:[%s18882_s5 + $0x2f0] sm:$0xff]  ;;  %v11209_v58 = vld [vmem:[%s18882_s5 + $0x2f8] sm:$0xff]  ;;  %v14483_v48 = vpack.c.bf16 %v11223_v59, %v11222_v61  ;;  %v14455_v23 = vpack.c.bf16 %v11193_v24, %v11192_v45  ;;  %v11294_v61 = vld [vmem:[%s18882_s5 + $0x5a0] sm:$0xff] }
 0x6b3   : > { %11450 = vmatmul.mubr.f32.gmra.mrb[134].mxu0 %v19344_v5  ;;  %14470 = vmatprep.subr.bf16.mxu1 %v14469_v9  ;;  %v19355_v9 = vld [vmem:[#allocation62_spill] sm:$0xff]  ;;  %v14453_v8 = vpack.c.bf16 %v11209_v58, %v11208_v53  ;;  %v11291_v5 = vld [vmem:[%s18882_s5 + $0x588] sm:$0xff]  ;;  %v19368_v41 = vld [vmem:[#allocation69_spill] sm:$0xff] }
 0x6b4   : > { %11555 = vmatmul.mubr.f32.gmra.mrb[134].mxu1 %v19345_v15  ;;  %11454 = vmatprep.mubr.f32.mxu0 %v19346_v42  ;;  %v19360_v15 = vld [vmem:[#allocation57_spill] sm:$0xff]  ;;  %v14521_v42 = vpack.c.bf16 %v11291_v5, %v11290_v25  ;;  %v19363_v35 = vld [vmem:[#allocation74_spill] sm:$0xff]  ;;  %v19369_v45 = vld [vmem:[#allocation75_spill] sm:$0xff] }
 0x6b5   : > { %11559 = vmatprep.mubr.f32.mxu1 %v19347_v54  ;;  %14440 = vmatpush3.bf16.msra.mxu0 %v14439_v31  ;;  %v11225_v31 = vld [vmem:[%s18882_s5 + $0x378] sm:$0xff]  ;;  %v11274_v54 = vld [vmem:[%s18882_s5 + $0x500] sm:$0xff]  ;;  %v11280_v25 = vld [vmem:[%s18882_s5 + $0x530] sm:$0xff] }
 0x6b6   : > { %14472 = vmatpush3.bf16.msra.mxu1 %v14471_v7  ;;  %14442 = vmatprep.subr.bf16.mxu0 %v14441_v50  ;;  %v11258_v7 = vld [vmem:[%s18882_s5 + $0x480] sm:$0xff]  ;;  %v11259_v50 = vld [vmem:[%s18882_s5 + $0x488] sm:$0xff]  ;;  %v14487_v52 = vpack.c.bf16 %v11225_v31, %v11224_v22  ;;  %v11296_v22 = vld [vmem:[%s18882_s5 + $0x5b0] sm:$0xff] }
 0x6b7   : > { %11455 = vmatmul.mubr.f32.gmra.mrb[136].mxu0 %v19348_v57  ;;  %14474 = vmatprep.subr.bf16.mxu1 %v14473_v39  ;;  %v19359_v39 = vld [vmem:[#allocation65_spill] sm:$0xff]  ;;  %v14489_v38 = vpack.c.bf16 %v11259_v50, %v11258_v7  ;;  %v19364_v12 = vld [vmem:[#allocation66_spill] sm:$0xff]  ;;  %v19370_v24 = vld [vmem:[#allocation79_spill] sm:$0xff] }
 0x6b8   : > { %11560 = vmatmul.mubr.f32.gmra.mrb[136].mxu1 %v19349_v10  ;;  %11459 = vmatprep.mubr.f32.mxu0 %v19350_v27  ;;  %v11292_v57 = vld [vmem:[%s18882_s5 + $0x590] sm:$0xff]  ;;  %v11245_v27 = vld [vmem:[%s18882_s5 + $0x418] sm:$0xff]  ;;  %v11299_v30 = vld [vmem:[%s18882_s5 + $0x5c8] sm:$0xff] }
 0x6b9   : > { %11564 = vmatprep.mubr.f32.mxu1 %v19351_v14  ;;  %14444 = vmatpush3.bf16.msra.mxu0 %v14443_v33  ;;  %v19361_v33 = vld [vmem:[#allocation63_spill] sm:$0xff]  ;;  %v11244_v10 = vld [vmem:[%s18882_s5 + $0x410] sm:$0xff] }
 0x6ba   : > { %14476 = vmatpush3.bf16.msra.mxu1 %v14475_v1  ;;  %14446 = vmatprep.subr.bf16.mxu0 %v14445_v20  ;;  %v19362_v1 = vld [vmem:[#allocation68_spill] sm:$0xff]  ;;  %v14495_v59 = vpack.c.bf16 %v11245_v27, %v11244_v10  ;;  %v19372_v5 = vld [vmem:[#allocation77_spill] sm:$0xff]  ;;  %v11250_v55 = vld [vmem:[%s18882_s5 + $0x440] sm:$0xff] }
 0x6bb   : > { %11460 = vmatmul.mubr.f32.gmra.mrb[138].mxu0 %v19352_v13  ;;  %14478 = vmatprep.subr.bf16.mxu1 %v14477_v32  ;;  %v11275_v20 = vld [vmem:[%s18882_s5 + $0x508] sm:$0xff]  ;;  %v11293_v32 = vld [vmem:[%s18882_s5 + $0x598] sm:$0xff] }
 0x6bc   : > { %11565 = vmatmul.mubr.f32.gmra.mrb[138].mxu1 %v19353_v3  ;;  %11464 = vmatprep.mubr.f32.mxu0 %v19354_v43  ;;  %v14523_v6 = vpack.c.bf16 %v11275_v20, %v11274_v54  ;;  %v14525_v14 = vpack.c.bf16 %v11293_v32, %v11292_v57  ;;  %v11295_v13 = vld [vmem:[%s18882_s5 + $0x5a8] sm:$0xff]  ;;  %v11246_v3 = vld [vmem:[%s18882_s5 + $0x420] sm:$0xff]  ;;  %v19375_v54 = vld [vmem:[#allocation85_spill] sm:$0xff]  ;;  %v14537_v32 = vpack.c.bf16 %v11299_v30, %v11298_v60 }
 0x6bd   : > { %11569 = vmatprep.mubr.f32.mxu1 %v19355_v9  ;;  %14448 = vmatpush3.bf16.msra.mxu0 %v14447_v2  ;;  %v11277_v2 = vld [vmem:[%s18882_s5 + $0x518] sm:$0xff]  ;;  %v11247_v43 = vld [vmem:[%s18882_s5 + $0x428] sm:$0xff]  ;;  %v14529_v9 = vpack.c.bf16 %v11295_v13, %v11294_v61  ;;  %v11284_v61 = vld [vmem:[%s18882_s5 + $0x550] sm:$0xff] }
 0x6be   : > { %14480 = vmatpush3.bf16.msra.mxu1 %v14479_v26  ;;  %14450 = vmatprep.subr.bf16.mxu0 %v14449_v51  ;;  %v11262_v26 = vld [vmem:[%s18882_s5 + $0x4a0] sm:$0xff]  ;;  %v11263_v51 = vld [vmem:[%s18882_s5 + $0x4a8] sm:$0xff]  ;;  %v14527_v53 = vpack.c.bf16 %v11277_v2, %v11276_v21  ;;  %v14499_v31 = vpack.c.bf16 %v11247_v43, %v11246_v3  ;;  %v11300_v21 = vld [vmem:[%s18882_s5 + $0x5d0] sm:$0xff] }
 0x6bf   : > { %11465 = vmatmul.mubr.f32.gmra.mrb[140].mxu0 %v19356_v36  ;;  %14482 = vmatprep.subr.bf16.mxu1 %v14481_v47  ;;  %v19367_v47 = vld [vmem:[#allocation76_spill] sm:$0xff]  ;;  %v14497_v58 = vpack.c.bf16 %v11263_v51, %v11262_v26  ;;  %v11297_v36 = vld [vmem:[%s18882_s5 + $0x5b8] sm:$0xff]  ;;  %v19378_v27 = vld [vmem:[#allocation87_spill] sm:$0xff] }
 0x6c0   : > { %11570 = vmatmul.mubr.f32.gmra.mrb[140].mxu1 %v19357_v16  ;;  %11469 = vmatprep.mubr.f32.mxu0 %v19358_v29  ;;  %v11248_v16 = vld [vmem:[%s18882_s5 + $0x430] sm:$0xff]  ;;  %v11249_v29 = vld [vmem:[%s18882_s5 + $0x438] sm:$0xff]  ;;  %v11251_v28 = vld [vmem:[%s18882_s5 + $0x448] sm:$0xff] }
 0x6c1   : > { %11574 = vmatprep.mubr.f32.mxu1 %v19359_v39  ;;  %14452 = vmatpush3.bf16.msra.mxu0 %v14451_v0  ;;  %v11279_v0 = vld [vmem:[%s18882_s5 + $0x528] sm:$0xff]  ;;  %v14533_v39 = vpack.c.bf16 %v11297_v36, %v11296_v22  ;;  %v14507_v2 = vpack.c.bf16 %v11251_v28, %v11250_v55  ;;  %v19380_v13 = vld [vmem:[#allocation86_spill] sm:$0xff]  ;;  %v19382_v43 = vld [vmem:[#allocation89_spill] sm:$0xff] }
 0x6c2   : > { %14484 = vmatpush3.bf16.msra.mxu1 %v14483_v48  ;;  %14454 = vmatprep.subr.bf16.mxu0 %v14453_v8  ;;  %v11264_v48 = vld [vmem:[%s18882_s5 + $0x4b0] sm:$0xff]  ;;  %v11265_v8 = vld [vmem:[%s18882_s5 + $0x4b8] sm:$0xff]  ;;  %v14531_v7 = vpack.c.bf16 %v11279_v0, %v11278_v40  ;;  %v11302_v40 = vld [vmem:[%s18882_s5 + $0x5e0] sm:$0xff] }
 0x6c3   : > { %11470 = vmatmul.mubr.f32.gmra.mrb[142].mxu0 %v19360_v15  ;;  %14486 = vmatprep.subr.bf16.mxu1 %v14485_v44  ;;  %v19371_v44 = vld [vmem:[#allocation83_spill] sm:$0xff]  ;;  %v14501_v50 = vpack.c.bf16 %v11265_v8, %v11264_v48  ;;  %v19373_v15 = vld [vmem:[#allocation82_spill] sm:$0xff]  ;;  %v19376_v57 = vld [vmem:[#allocation80_spill] sm:$0xff] }
 0x6c4   : > { %11575 = vmatmul.mubr.f32.gmra.mrb[142].mxu1 %v19361_v33  ;;  %11644 = vmatprep.mubr.f32.mxu0 %v19362_v1  ;;  %v14503_v33 = vpack.c.bf16 %v11249_v29, %v11248_v16  ;;  %v19377_v10 = vld [vmem:[#allocation84_spill] sm:$0xff]  ;;  %v19381_v3 = vld [vmem:[#allocation90_spill] sm:$0xff]  ;;  %v19386_v29 = vld [vmem:[#allocation95_spill] sm:$0xff] }
 0x6c5   : > { %14456 = vmatpush3.bf16.msra.mxu0 %v14455_v23  ;;  %11749 = vmatprep.mubr.f32.mxu1 %v19363_v35  ;;  %v11281_v23 = vld [vmem:[%s18882_s5 + $0x538] sm:$0xff]  ;;  %v11282_v35 = vld [vmem:[%s18882_s5 + $0x540] sm:$0xff]  ;;  %v19384_v36 = vld [vmem:[#allocation88_spill] sm:$0xff] }
 0x6c6   : > { %14488 = vmatpush3.bf16.msra.mxu1 %v14487_v52  ;;  %14490 = vmatprep.subr.bf16.mxu0 %v14489_v38  ;;  %v11266_v52 = vld [vmem:[%s18882_s5 + $0x4c0] sm:$0xff]  ;;  %v11267_v38 = vld [vmem:[%s18882_s5 + $0x4c8] sm:$0xff]  ;;  %v14535_v1 = vpack.c.bf16 %v11281_v23, %v11280_v25  ;;  %v11304_v25 = vld [vmem:[%s18882_s5 + $0x5f0] sm:$0xff] }
 0x6c7   : > { %14522 = vmatprep.subr.bf16.mxu1 %v14521_v42  ;;  %v19374_v42 = vld [vmem:[#allocation81_spill] sm:$0xff]  ;;  %v14505_v20 = vpack.c.bf16 %v11267_v38, %v11266_v52  ;;  %v11286_v22 = vld [vmem:[%s18882_s5 + $0x560] sm:$0xff]  ;;  %v19385_v16 = vld [vmem:[#allocation92_spill] sm:$0xff] }
 0x6c8   : > { %11645 = vmatmul.mubr.f32.vlgmr.msra.gmra.mrb[144].mxu0 %v19364_v12  ;;  %v11301_v12 = vld [vmem:[%s18882_s5 + $0x5d8] sm:$0xff]  ;;  %v11288_v60 = vld [vmem:[%s18882_s5 + $0x570] sm:$0xff] }
 0x6c9   : > { %11750 = vmatmul.mubr.f32.vlgmr.msra.gmra.mrb[144].mxu1 %v19365_v49  ;;  %11649 = vmatprep.mubr.f32.mxu0 %v19366_v18  ;;  %v11252_v49 = vld [vmem:[%s18882_s5 + $0x450] sm:$0xff]  ;;  %v11253_v18 = vld [vmem:[%s18882_s5 + $0x458] sm:$0xff] }
 0x6ca   : > { %11754 = vmatprep.mubr.f32.mxu1 %v19367_v47  ;;  %14492 = vmatpush3.bf16.msra.mxu0 %v14491_v11  ;;  %v11283_v11 = vld [vmem:[%s18882_s5 + $0x548] sm:$0xff]  ;;  %v14541_v47 = vpack.c.bf16 %v11301_v12, %v11300_v21  ;;  %v14511_v0 = vpack.c.bf16 %v11253_v18, %v11252_v49  ;;  %v19388_v30 = vld [vmem:[#allocation94_spill] sm:$0xff]  ;;  %v19390_v28 = vld [vmem:[#allocation97_spill] sm:$0xff] }
 0x6cb   : > { %14524 = vmatpush3.bf16.msra.mxu1 %v14523_v6  ;;  %14494 = vmatprep.subr.bf16.mxu0 %v14493_v56  ;;  %v11268_v6 = vld [vmem:[%s18882_s5 + $0x4d0] sm:$0xff]  ;;  %v11269_v56 = vld [vmem:[%s18882_s5 + $0x4d8] sm:$0xff]  ;;  %v14539_v26 = vpack.c.bf16 %v11283_v11, %v11282_v35  ;;  %v11354_v35 = vld [vmem:[%s18882_s5 + $0x780] sm:$0xff] }
 0x6cc   : > { %11650 = vmatmul.mubr.f32.gmra.mrb[146].mxu0 %v19368_v41  ;;  %14526 = vmatprep.subr.bf16.mxu1 %v14525_v14  ;;  %v19379_v14 = vld [vmem:[#allocation91_spill] sm:$0xff]  ;;  %v14509_v51 = vpack.c.bf16 %v11269_v56, %v11268_v6  ;;  %v19389_v55 = vld [vmem:[#allocation98_spill] sm:$0xff]  ;;  %v11324_v49 = vld [vmem:[%s18882_s5 + $0x690] sm:$0xff] }
 0x6cd   : > { %11755 = vmatmul.mubr.f32.gmra.mrb[146].mxu1 %v19369_v45  ;;  %11654 = vmatprep.mubr.f32.mxu0 %v19370_v24  ;;  %v11303_v41 = vld [vmem:[%s18882_s5 + $0x5e8] sm:$0xff]  ;;  %v11254_v45 = vld [vmem:[%s18882_s5 + $0x460] sm:$0xff]  ;;  %v11325_v18 = vld [vmem:[%s18882_s5 + $0x698] sm:$0xff] }
 0x6ce   : > { %11759 = vmatprep.mubr.f32.mxu1 %v19371_v44  ;;  %14496 = vmatpush3.bf16.msra.mxu0 %v14495_v59  ;;  %v11285_v59 = vld [vmem:[%s18882_s5 + $0x558] sm:$0xff]  ;;  %v11255_v24 = vld [vmem:[%s18882_s5 + $0x468] sm:$0xff]  ;;  %v14545_v44 = vpack.c.bf16 %v11303_v41, %v11302_v40  ;;  %v11306_v21 = vld [vmem:[%s18882_s5 + $0x600] sm:$0xff] }
 0x6cf   : > { %14528 = vmatpush3.bf16.msra.mxu1 %v14527_v53  ;;  %14498 = vmatprep.subr.bf16.mxu0 %v14497_v58  ;;  %v11270_v53 = vld [vmem:[%s18882_s5 + $0x4e0] sm:$0xff]  ;;  %v11271_v58 = vld [vmem:[%s18882_s5 + $0x4e8] sm:$0xff]  ;;  %v14543_v48 = vpack.c.bf16 %v11285_v59, %v11284_v61  ;;  %v14515_v23 = vpack.c.bf16 %v11255_v24, %v11254_v45  ;;  %v11340_v40 = vld [vmem:[%s18882_s5 + $0x710] sm:$0xff] }
 0x6d0   : > { %11655 = vmatmul.mubr.f32.gmra.mrb[148].mxu0 %v19372_v5  ;;  %14530 = vmatprep.subr.bf16.mxu1 %v14529_v9  ;;  %v19383_v9 = vld [vmem:[#allocation93_spill] sm:$0xff]  ;;  %v14513_v8 = vpack.c.bf16 %v11271_v58, %v11270_v53  ;;  %v11307_v12 = vld [vmem:[%s18882_s5 + $0x608] sm:$0xff]  ;;  %v14557_v58 = vpack.c.bf16 %v11325_v18, %v11324_v49  ;;  %v19396_v41 = vld [vmem:[#allocation102_spill] sm:$0xff] }
 0x6d1   : > { %11760 = vmatmul.mubr.f32.gmra.mrb[148].mxu1 %v19373_v15  ;;  %11659 = vmatprep.mubr.f32.mxu0 %v19374_v42  ;;  %v11305_v5 = vld [vmem:[%s18882_s5 + $0x5f8] sm:$0xff]  ;;  %v11256_v15 = vld [vmem:[%s18882_s5 + $0x470] sm:$0xff]  ;;  %v19395_v61 = vld [vmem:[#allocation107_spill] sm:$0xff]  ;;  %v14555_v59 = vpack.c.bf16 %v11307_v12, %v11306_v21 }
 0x6d2   : > { %11764 = vmatprep.mubr.f32.mxu1 %v19375_v54  ;;  %14500 = vmatpush3.bf16.msra.mxu0 %v14499_v31  ;;  %v11287_v31 = vld [vmem:[%s18882_s5 + $0x568] sm:$0xff]  ;;  %v11257_v42 = vld [vmem:[%s18882_s5 + $0x478] sm:$0xff]  ;;  %v14549_v54 = vpack.c.bf16 %v11305_v5, %v11304_v25  ;;  %v11342_v25 = vld [vmem:[%s18882_s5 + $0x720] sm:$0xff] }
 0x6d3   : > { %14532 = vmatpush3.bf16.msra.mxu1 %v14531_v7  ;;  %14502 = vmatprep.subr.bf16.mxu0 %v14501_v50  ;;  %v11272_v7 = vld [vmem:[%s18882_s5 + $0x4f0] sm:$0xff]  ;;  %v11273_v50 = vld [vmem:[%s18882_s5 + $0x4f8] sm:$0xff]  ;;  %v14547_v52 = vpack.c.bf16 %v11287_v31, %v11286_v22  ;;  %v14519_v11 = vpack.c.bf16 %v11257_v42, %v11256_v15  ;;  %v11358_v22 = vld [vmem:[%s18882_s5 + $0x7a0] sm:$0xff] }
 0x6d4   : > { %11660 = vmatmul.mubr.f32.gmra.mrb[150].mxu0 %v19376_v57  ;;  %14534 = vmatprep.subr.bf16.mxu1 %v14533_v39  ;;  %v19387_v39 = vld [vmem:[#allocation99_spill] sm:$0xff]  ;;  %v14517_v38 = vpack.c.bf16 %v11273_v50, %v11272_v7  ;;  %v19397_v45 = vld [vmem:[#allocation106_spill] sm:$0xff]  ;;  %v19398_v24 = vld [vmem:[#allocation105_spill] sm:$0xff] }
 0x6d5   : > { %11765 = vmatmul.mubr.f32.gmra.mrb[150].mxu1 %v19377_v10  ;;  %11664 = vmatprep.mubr.f32.mxu0 %v19378_v27  ;;  %v11355_v57 = vld [vmem:[%s18882_s5 + $0x788] sm:$0xff]  ;;  %v11362_v21 = vld [vmem:[%s18882_s5 + $0x7c0] sm:$0xff] }
 0x6d6   : > { %11769 = vmatprep.mubr.f32.mxu1 %v19379_v14  ;;  %14504 = vmatpush3.bf16.msra.mxu0 %v14503_v33  ;;  %v11289_v33 = vld [vmem:[%s18882_s5 + $0x578] sm:$0xff]  ;;  %v19392_v10 = vld [vmem:[#allocation96_spill] sm:$0xff]  ;;  %v14585_v27 = vpack.c.bf16 %v11355_v57, %v11354_v35  ;;  %v11338_v14 = vld [vmem:[%s18882_s5 + $0x700] sm:$0xff] }
 0x6d7   : > { %14536 = vmatpush3.bf16.msra.mxu1 %v14535_v1  ;;  %14506 = vmatprep.subr.bf16.mxu0 %v14505_v20  ;;  %v11322_v1 = vld [vmem:[%s18882_s5 + $0x680] sm:$0xff]  ;;  %v11323_v20 = vld [vmem:[%s18882_s5 + $0x688] sm:$0xff]  ;;  %v14551_v6 = vpack.c.bf16 %v11289_v33, %v11288_v60  ;;  %v11360_v60 = vld [vmem:[%s18882_s5 + $0x7b0] sm:$0xff] }
 0x6d8   : > { %11665 = vmatmul.mubr.f32.gmra.mrb[152].mxu0 %v19380_v13  ;;  %14538 = vmatprep.subr.bf16.mxu1 %v14537_v32  ;;  %v19391_v32 = vld [vmem:[#allocation101_spill] sm:$0xff]  ;;  %v14553_v56 = vpack.c.bf16 %v11323_v20, %v11322_v1  ;;  %v19400_v5 = vld [vmem:[#allocation104_spill] sm:$0xff]  ;;  %v19402_v42 = vld [vmem:[#allocation111_spill] sm:$0xff] }
 0x6d9   : > { %11770 = vmatmul.mubr.f32.gmra.mrb[152].mxu1 %v19381_v3  ;;  %11669 = vmatprep.mubr.f32.mxu0 %v19382_v43  ;;  %v11356_v13 = vld [vmem:[%s18882_s5 + $0x790] sm:$0xff]  ;;  %v11309_v43 = vld [vmem:[%s18882_s5 + $0x618] sm:$0xff]  ;;  %v11363_v12 = vld [vmem:[%s18882_s5 + $0x7c8] sm:$0xff] }
 0x6da   : > { %11774 = vmatprep.mubr.f32.mxu1 %v19383_v9  ;;  %14508 = vmatpush3.bf16.msra.mxu0 %v14507_v2  ;;  %v19393_v2 = vld [vmem:[#allocation100_spill] sm:$0xff]  ;;  %v19404_v57 = vld [vmem:[#allocation110_spill] sm:$0xff] }
 0x6db   : > { %14540 = vmatpush3.bf16.msra.mxu1 %v14539_v26  ;;  %14510 = vmatprep.subr.bf16.mxu0 %v14509_v51  ;;  %v19394_v26 = vld [vmem:[#allocation103_spill] sm:$0xff]  ;;  %v11308_v3 = vld [vmem:[%s18882_s5 + $0x610] sm:$0xff] }
 0x6dc   : > { %11670 = vmatmul.mubr.f32.gmra.mrb[154].mxu0 %v19384_v36  ;;  %14542 = vmatprep.subr.bf16.mxu1 %v14541_v47  ;;  %v11339_v51 = vld [vmem:[%s18882_s5 + $0x708] sm:$0xff]  ;;  %v11357_v47 = vld [vmem:[%s18882_s5 + $0x798] sm:$0xff]  ;;  %v14559_v31 = vpack.c.bf16 %v11309_v43, %v11308_v3  ;;  %v11344_v35 = vld [vmem:[%s18882_s5 + $0x730] sm:$0xff] }
 0x6dd   : > { %11775 = vmatmul.mubr.f32.gmra.mrb[154].mxu1 %v19385_v16  ;;  %11674 = vmatprep.mubr.f32.mxu0 %v19386_v29  ;;  %v14587_v53 = vpack.c.bf16 %v11339_v51, %v11338_v14  ;;  %v14589_v9 = vpack.c.bf16 %v11357_v47, %v11356_v13  ;;  %v11359_v36 = vld [vmem:[%s18882_s5 + $0x7a8] sm:$0xff]  ;;  %v11310_v16 = vld [vmem:[%s18882_s5 + $0x620] sm:$0xff]  ;;  %v19407_v14 = vld [vmem:[#allocation117_spill] sm:$0xff]  ;;  %v14601_v47 = vpack.c.bf16 %v11363_v12, %v11362_v21 }
 0x6de   : > { %11779 = vmatprep.mubr.f32.mxu1 %v19387_v39  ;;  %14512 = vmatpush3.bf16.msra.mxu0 %v14511_v0  ;;  %v11341_v0 = vld [vmem:[%s18882_s5 + $0x718] sm:$0xff]  ;;  %v11311_v29 = vld [vmem:[%s18882_s5 + $0x628] sm:$0xff]  ;;  %v14593_v39 = vpack.c.bf16 %v11359_v36, %v11358_v22  ;;  %v11314_v49 = vld [vmem:[%s18882_s5 + $0x640] sm:$0xff] }
 0x6df   : > { %14544 = vmatpush3.bf16.msra.mxu1 %v14543_v48  ;;  %14514 = vmatprep.subr.bf16.mxu0 %v14513_v8  ;;  %v11326_v48 = vld [vmem:[%s18882_s5 + $0x6a0] sm:$0xff]  ;;  %v11327_v8 = vld [vmem:[%s18882_s5 + $0x6a8] sm:$0xff]  ;;  %v14591_v7 = vpack.c.bf16 %v11341_v0, %v11340_v40  ;;  %v14563_v33 = vpack.c.bf16 %v11311_v29, %v11310_v16  ;;  %v11364_v40 = vld [vmem:[%s18882_s5 + $0x7d0] sm:$0xff] }
 0x6e0   : > { %11675 = vmatmul.mubr.f32.gmra.mrb[156].mxu0 %v19388_v30  ;;  %14546 = vmatprep.subr.bf16.mxu1 %v14545_v44  ;;  %v19399_v44 = vld [vmem:[#allocation109_spill] sm:$0xff]  ;;  %v14561_v50 = vpack.c.bf16 %v11327_v8, %v11326_v48  ;;  %v19401_v15 = vld [vmem:[#allocation108_spill] sm:$0xff]  ;;  %v19410_v43 = vld [vmem:[#allocation119_spill] sm:$0xff] }
 0x6e1   : > { %11780 = vmatmul.mubr.f32.gmra.mrb[156].mxu1 %v19389_v55  ;;  %11679 = vmatprep.mubr.f32.mxu0 %v19390_v28  ;;  %v11361_v30 = vld [vmem:[%s18882_s5 + $0x7b8] sm:$0xff]  ;;  %v11312_v55 = vld [vmem:[%s18882_s5 + $0x630] sm:$0xff]  ;;  %v11315_v18 = vld [vmem:[%s18882_s5 + $0x648] sm:$0xff] }
 0x6e2   : > { %11784 = vmatprep.mubr.f32.mxu1 %v19391_v32  ;;  %14516 = vmatpush3.bf16.msra.mxu0 %v14515_v23  ;;  %v11343_v23 = vld [vmem:[%s18882_s5 + $0x728] sm:$0xff]  ;;  %v11313_v28 = vld [vmem:[%s18882_s5 + $0x638] sm:$0xff]  ;;  %v14597_v32 = vpack.c.bf16 %v11361_v30, %v11360_v60  ;;  %v14571_v0 = vpack.c.bf16 %v11315_v18, %v11314_v49  ;;  %v11348_v22 = vld [vmem:[%s18882_s5 + $0x750] sm:$0xff] }
 0x6e3   : > { %14548 = vmatpush3.bf16.msra.mxu1 %v14547_v52  ;;  %14518 = vmatprep.subr.bf16.mxu0 %v14517_v38  ;;  %v11328_v52 = vld [vmem:[%s18882_s5 + $0x6b0] sm:$0xff]  ;;  %v11329_v38 = vld [vmem:[%s18882_s5 + $0x6b8] sm:$0xff]  ;;  %v14595_v1 = vpack.c.bf16 %v11343_v23, %v11342_v25  ;;  %v11366_v25 = vld [vmem:[%s18882_s5 + $0x7e0] sm:$0xff] }
 0x6e4   : > { %11680 = vmatmul.mubr.f32.gmra.mrb[158].mxu0 %v19392_v10  ;;  %14550 = vmatprep.subr.bf16.mxu1 %v14549_v54  ;;  %v19403_v54 = vld [vmem:[#allocation115_spill] sm:$0xff]  ;;  %v14565_v20 = vpack.c.bf16 %v11329_v38, %v11328_v52  ;;  %v19405_v10 = vld [vmem:[#allocation114_spill] sm:$0xff]  ;;  %v19408_v13 = vld [vmem:[#allocation112_spill] sm:$0xff] }
 0x6e5   : > { %11785 = vmatmul.mubr.f32.gmra.mrb[158].mxu1 %v19393_v2  ;;  %11854 = vmatprep.mubr.f32.mxu0 %v19394_v26  ;;  %v14567_v2 = vpack.c.bf16 %v11313_v28, %v11312_v55  ;;  %v19409_v3 = vld [vmem:[#allocation116_spill] sm:$0xff]  ;;  %v19412_v36 = vld [vmem:[#allocation118_spill] sm:$0xff]  ;;  %v19414_v29 = vld [vmem:[#allocation121_spill] sm:$0xff] }
 0x6e6   : > { %14520 = vmatpush3.bf16.msra.mxu0 %v14519_v11  ;;  %11959 = vmatprep.mubr.f32.mxu1 %v19395_v61  ;;  %v11345_v11 = vld [vmem:[%s18882_s5 + $0x738] sm:$0xff]  ;;  %v11346_v61 = vld [vmem:[%s18882_s5 + $0x740] sm:$0xff]  ;;  %v19416_v30 = vld [vmem:[#allocation120_spill] sm:$0xff] }
 0x6e7   : > { %14552 = vmatpush3.bf16.msra.mxu1 %v14551_v6  ;;  %14554 = vmatprep.subr.bf16.mxu0 %v14553_v56  ;;  %v11330_v6 = vld [vmem:[%s18882_s5 + $0x6c0] sm:$0xff]  ;;  %v11331_v56 = vld [vmem:[%s18882_s5 + $0x6c8] sm:$0xff]  ;;  %v14599_v26 = vpack.c.bf16 %v11345_v11, %v11344_v35  ;;  %v11368_v35 = vld [vmem:[%s18882_s5 + $0x7f0] sm:$0xff] }
 0x6e8   : > { %14586 = vmatprep.subr.bf16.mxu1 %v14585_v27  ;;  %v19406_v27 = vld [vmem:[#allocation113_spill] sm:$0xff]  ;;  %v14569_v51 = vpack.c.bf16 %v11331_v56, %v11330_v6  ;;  %v19413_v16 = vld [vmem:[#allocation122_spill] sm:$0xff]  ;;  %v19417_v55 = vld [vmem:[#allocation124_spill] sm:$0xff] }
 0x6e9   : > { %11855 = vmatmul.mubr.f32.vlgmr.msra.gmra.mrb[160].mxu0 %v19396_v41  ;;  %v11365_v41 = vld [vmem:[%s18882_s5 + $0x7d8] sm:$0xff]  ;;  %v11350_v60 = vld [vmem:[%s18882_s5 + $0x760] sm:$0xff] }
 0x6ea   : > { %11960 = vmatmul.mubr.f32.vlgmr.msra.gmra.mrb[160].mxu1 %v19397_v45  ;;  %11859 = vmatprep.mubr.f32.mxu0 %v19398_v24  ;;  %v11316_v45 = vld [vmem:[%s18882_s5 + $0x650] sm:$0xff]  ;;  %v11317_v24 = vld [vmem:[%s18882_s5 + $0x658] sm:$0xff]  ;;  %v19418_v28 = vld [vmem:[#allocation127_spill] sm:$0xff] }
 0x6eb   : > { %11964 = vmatprep.mubr.f32.mxu1 %v19399_v44  ;;  %14556 = vmatpush3.bf16.msra.mxu0 %v14555_v59  ;;  %v11347_v59 = vld [vmem:[%s18882_s5 + $0x748] sm:$0xff]  ;;  %v14605_v44 = vpack.c.bf16 %v11365_v41, %v11364_v40  ;;  %v14575_v23 = vpack.c.bf16 %v11317_v24, %v11316_v45  ;;  %v19420_v21 = vld [vmem:[#allocation126_spill] sm:$0xff]  ;;  %v19423_v49 = vld [vmem:[#allocation133_spill] sm:$0xff] }
 0x6ec   : > { %14588 = vmatpush3.bf16.msra.mxu1 %v14587_v53  ;;  %14558 = vmatprep.subr.bf16.mxu0 %v14557_v58  ;;  %v11332_v53 = vld [vmem:[%s18882_s5 + $0x6d0] sm:$0xff]  ;;  %v11333_v58 = vld [vmem:[%s18882_s5 + $0x6d8] sm:$0xff]  ;;  %v14603_v48 = vpack.c.bf16 %v11347_v59, %v11346_v61  ;;  %v19426_v59 = vld [vmem:[#allocation135_spill] sm:$0xff] }
 0x6ed   : > { %11860 = vmatmul.mubr.f32.gmra.mrb[162].mxu0 %v19400_v5  ;;  %14590 = vmatprep.subr.bf16.mxu1 %v14589_v9  ;;  %v19411_v9 = vld [vmem:[#allocation123_spill] sm:$0xff]  ;;  %v14573_v8 = vpack.c.bf16 %v11333_v58, %v11332_v53  ;;  %v19428_v58 = vld [vmem:[#allocation134_spill] sm:$0xff]  ;;  %v19432_v41 = vld [vmem:[#allocation136_spill] sm:$0xff] }
 0x6ee   : > { %11965 = vmatmul.mubr.f32.gmra.mrb[162].mxu1 %v19401_v15  ;;  %11864 = vmatprep.mubr.f32.mxu0 %v19402_v42  ;;  %v11367_v5 = vld [vmem:[%s18882_s5 + $0x7e8] sm:$0xff]  ;;  %v11318_v15 = vld [vmem:[%s18882_s5 + $0x660] sm:$0xff] }
 0x6ef   : > { %11969 = vmatprep.mubr.f32.mxu1 %v19403_v54  ;;  %14560 = vmatpush3.bf16.msra.mxu0 %v14559_v31  ;;  %v11349_v31 = vld [vmem:[%s18882_s5 + $0x758] sm:$0xff]  ;;  %v11319_v42 = vld [vmem:[%s18882_s5 + $0x668] sm:$0xff]  ;;  %v14609_v54 = vpack.c.bf16 %v11367_v5, %v11366_v25 }
 0x6f0   : > { %14592 = vmatpush3.bf16.msra.mxu1 %v14591_v7  ;;  %14562 = vmatprep.subr.bf16.mxu0 %v14561_v50  ;;  %v11334_v7 = vld [vmem:[%s18882_s5 + $0x6e0] sm:$0xff]  ;;  %v11335_v50 = vld [vmem:[%s18882_s5 + $0x6e8] sm:$0xff]  ;;  %v14607_v52 = vpack.c.bf16 %v11349_v31, %v11348_v22  ;;  %v14579_v11 = vpack.c.bf16 %v11319_v42, %v11318_v15 }
 0x6f1   : > { %11865 = vmatmul.mubr.f32.gmra.mrb[164].mxu0 %v19404_v57  ;;  %14594 = vmatprep.subr.bf16.mxu1 %v14593_v39  ;;  %v19415_v39 = vld [vmem:[#allocation125_spill] sm:$0xff]  ;;  %v14577_v38 = vpack.c.bf16 %v11335_v50, %v11334_v7  ;;  %v19427_v53 = vld [vmem:[#allocation139_spill] sm:$0xff]  ;;  %v19431_v40 = vld [vmem:[#allocation142_spill] sm:$0xff] }
 0x6f2   : > { %11970 = vmatmul.mubr.f32.gmra.mrb[164].mxu1 %v19405_v10  ;;  %11869 = vmatprep.mubr.f32.mxu0 %v19406_v27  ;;  %v11369_v57 = vld [vmem:[%s18882_s5 + $0x7f8] sm:$0xff]  ;;  %v11320_v10 = vld [vmem:[%s18882_s5 + $0x670] sm:$0xff]  ;;  %v19438_v24 = vld [vmem:[#allocation147_spill] sm:$0xff] }
 0x6f3   : > { %11974 = vmatprep.mubr.f32.mxu1 %v19407_v14  ;;  %14564 = vmatpush3.bf16.msra.mxu0 %v14563_v33  ;;  %v11351_v33 = vld [vmem:[%s18882_s5 + $0x768] sm:$0xff]  ;;  %v11321_v27 = vld [vmem:[%s18882_s5 + $0x678] sm:$0xff]  ;;  %v14613_v12 = vpack.c.bf16 %v11369_v57, %v11368_v35  ;;  %v11352_v14 = vld [vmem:[%s18882_s5 + $0x770] sm:$0xff] }
 0x6f4   : > { %14596 = vmatpush3.bf16.msra.mxu1 %v14595_v1  ;;  %14566 = vmatprep.subr.bf16.mxu0 %v14565_v20  ;;  %v11336_v1 = vld [vmem:[%s18882_s5 + $0x6f0] sm:$0xff]  ;;  %v11337_v20 = vld [vmem:[%s18882_s5 + $0x6f8] sm:$0xff]  ;;  %v14611_v6 = vpack.c.bf16 %v11351_v33, %v11350_v60  ;;  %v14583_v18 = vpack.c.bf16 %v11321_v27, %v11320_v10  ;;  %v19442_v31 = vld [vmem:[#allocation155_spill] sm:$0xff] }
 0x6f5   : > { %11870 = vmatmul.mubr.f32.gmra.mrb[166].mxu0 %v19408_v13  ;;  %14598 = vmatprep.subr.bf16.mxu1 %v14597_v32  ;;  %v19419_v32 = vld [vmem:[#allocation131_spill] sm:$0xff]  ;;  %v14581_v56 = vpack.c.bf16 %v11337_v20, %v11336_v1  ;;  %v19424_v13 = vld [vmem:[#allocation128_spill] sm:$0xff]  ;;  %v19444_v50 = vld [vmem:[#allocation153_spill] sm:$0xff] }
 0x6f6   : > { %11975 = vmatmul.mubr.f32.gmra.mrb[166].mxu1 %v19409_v3  ;;  %11874 = vmatprep.mubr.f32.mxu0 %v19410_v43  ;;  %v19429_v3 = vld [vmem:[#allocation138_spill] sm:$0xff]  ;;  %v19430_v43 = vld [vmem:[#allocation137_spill] sm:$0xff]  ;;  %v19437_v45 = vld [vmem:[#allocation148_spill] sm:$0xff] }
 0x6f7   : > { %11979 = vmatprep.mubr.f32.mxu1 %v19411_v9  ;;  %14568 = vmatpush3.bf16.msra.mxu0 %v14567_v2  ;;  %v11353_v2 = vld [vmem:[%s18882_s5 + $0x778] sm:$0xff]  ;;  %v19433_v9 = vld [vmem:[#allocation140_spill] sm:$0xff]  ;;  %v19443_v7 = vld [vmem:[#allocation159_spill] sm:$0xff] }
 0x6f8   : > { %14600 = vmatpush3.bf16.msra.mxu1 %v14599_v26  ;;  %14570 = vmatprep.subr.bf16.mxu0 %v14569_v51  ;;  %v19421_v26 = vld [vmem:[#allocation130_spill] sm:$0xff]  ;;  %v19422_v51 = vld [vmem:[#allocation129_spill] sm:$0xff]  ;;  %v14615_v61 = vpack.c.bf16 %v11353_v2, %v11352_v14  ;;  %v19439_v22 = vld [vmem:[#allocation152_spill] sm:$0xff] }
 0x6f9   : > { %11875 = vmatmul.mubr.f32.gmra.mrb[168].mxu0 %v19412_v36  ;;  %14602 = vmatprep.subr.bf16.mxu1 %v14601_v47  ;;  %v19425_v47 = vld [vmem:[#allocation132_spill] sm:$0xff]  ;;  %v19440_v36 = vld [vmem:[#allocation146_spill] sm:$0xff]  ;;  %v19454_v42 = vld [vmem:[#allocation167_spill] sm:$0xff] }
 0x6fa   : > { %11980 = vmatmul.mubr.f32.gmra.mrb[168].mxu1 %v19413_v16  ;;  %11879 = vmatprep.mubr.f32.mxu0 %v19414_v29  ;;  %v19445_v16 = vld [vmem:[#allocation158_spill] sm:$0xff]  ;;  %v19446_v29 = vld [vmem:[#allocation157_spill] sm:$0xff]  ;;  %v19448_v5 = vld [vmem:[#allocation156_spill] sm:$0xff] }
 0x6fb   : > { %11984 = vmatprep.mubr.f32.mxu1 %v19415_v39  ;;  %14572 = vmatpush3.bf16.msra.mxu0 %v14571_v0  ;;  %v19434_v0 = vld [vmem:[#allocation145_spill] sm:$0xff]  ;;  %v19447_v25 = vld [vmem:[#allocation162_spill] sm:$0xff]  ;;  %v19449_v39 = vld [vmem:[#allocation160_spill] sm:$0xff] }
 0x6fc   : > { %14604 = vmatpush3.bf16.msra.mxu1 %v14603_v48  ;;  %14574 = vmatprep.subr.bf16.mxu0 %v14573_v8  ;;  %v19435_v48 = vld [vmem:[#allocation149_spill] sm:$0xff]  ;;  %v19436_v8 = vld [vmem:[#allocation143_spill] sm:$0xff]  ;;  %v19453_v15 = vld [vmem:[#allocation168_spill] sm:$0xff] }
 0x6fd   : > { %11880 = vmatmul.mubr.f32.gmra.mrb[170].mxu0 %v19416_v30  ;;  %14606 = vmatprep.subr.bf16.mxu1 %v14605_v44  ;;  %v19441_v44 = vld [vmem:[#allocation150_spill] sm:$0xff]  ;;  %v19455_v60 = vld [vmem:[#allocation172_spill] sm:$0xff] }
 0x6fe   : > { %11985 = vmatmul.mubr.f32.gmra.mrb[170].mxu1 %v19417_v55  ;;  %11884 = vmatprep.mubr.f32.mxu0 %v19418_v28  ;;  %v19456_v30 = vld [vmem:[#allocation166_spill] sm:$0xff] }
 0x6ff   : > { %11989 = vmatprep.mubr.f32.mxu1 %v19419_v32  ;;  %14576 = vmatpush3.bf16.msra.mxu0 %v14575_v23  ;;  %v19450_v23 = vld [vmem:[#allocation165_spill] sm:$0xff] }
 0x700   : > { %14608 = vmatpush3.bf16.msra.mxu1 %v14607_v52  ;;  %14578 = vmatprep.subr.bf16.mxu0 %v14577_v38  ;;  %v19451_v52 = vld [vmem:[#allocation169_spill] sm:$0xff]  ;;  %v19452_v38 = vld [vmem:[#allocation163_spill] sm:$0xff] }
 0x701   : > { %11885 = vmatmul.mubr.f32.gmra.mrb[172].mxu0 %v19420_v21  ;;  %14610 = vmatprep.subr.bf16.mxu1 %v14609_v54  ;;  %v19457_v54 = vld [vmem:[#allocation170_spill] sm:$0xff] }
 0x702   : > { %11990 = vmatmul.mubr.f32.gmra.mrb[172].mxu1 %v19421_v26  ;;  %11889 = vmatprep.mubr.f32.mxu0 %v19422_v51 }
 0x703   : > { %11994 = vmatprep.mubr.f32.mxu1 %v19423_v49  ;;  %14580 = vmatpush3.bf16.msra.mxu0 %v14579_v11 }
 0x704   : > { %14612 = vmatpush3.bf16.msra.mxu1 %v14611_v6  ;;  %14582 = vmatprep.subr.bf16.mxu0 %v14581_v56 }
 0x705   : > { %11890 = vmatmul.mubr.f32.gmra.mrb[174].mxu0 %v19424_v13  ;;  %14614 = vmatprep.subr.bf16.mxu1 %v14613_v12 }
 0x706   : > { %11995 = vmatmul.mubr.f32.gmra.mrb[174].mxu1 %v19425_v47  ;;  %12064 = vmatprep.mubr.f32.mxu0 %v19426_v59 }
 0x707   : > { %14584 = vmatpush3.bf16.msra.mxu0 %v14583_v18  ;;  %12169 = vmatprep.mubr.f32.mxu1 %v19427_v53 }
 0x708   : > { %14616 = vmatpush3.bf16.msra.mxu1 %v14615_v61 }
 0x70a   : > { %12065 = vmatmul.mubr.f32.vlgmr.msra.gmra.mrb[176].mxu0 %v19428_v58 }
 0x70b   : > { %12170 = vmatmul.mubr.f32.vlgmr.msra.gmra.mrb[176].mxu1 %v19429_v3  ;;  %12069 = vmatprep.mubr.f32.mxu0 %v19430_v43 }
 0x70c   : > { %12174 = vmatprep.mubr.f32.mxu1 %v19431_v40 }
 0x70e   : > { %12070 = vmatmul.mubr.f32.gmra.mrb[178].mxu0 %v19432_v41 }
 0x70f   : > { %12175 = vmatmul.mubr.f32.gmra.mrb[178].mxu1 %v19433_v9  ;;  %12074 = vmatprep.mubr.f32.mxu0 %v19434_v0 }
 0x710   : > { %12179 = vmatprep.mubr.f32.mxu1 %v19435_v48 }
 0x712   : > { %12075 = vmatmul.mubr.f32.gmra.mrb[180].mxu0 %v19436_v8 }
 0x713   : > { %12180 = vmatmul.mubr.f32.gmra.mrb[180].mxu1 %v19437_v45  ;;  %12079 = vmatprep.mubr.f32.mxu0 %v19438_v24 }
 0x714   : > { %12184 = vmatprep.mubr.f32.mxu1 %v19439_v22 }
 0x716   : > { %12080 = vmatmul.mubr.f32.gmra.mrb[182].mxu0 %v19440_v36 }
 0x717   : > { %12185 = vmatmul.mubr.f32.gmra.mrb[182].mxu1 %v19441_v44  ;;  %12084 = vmatprep.mubr.f32.mxu0 %v19442_v31 }
 0x718   : > { %12189 = vmatprep.mubr.f32.mxu1 %v19443_v7 }
 0x71a   : > { %12085 = vmatmul.mubr.f32.gmra.mrb[184].mxu0 %v19444_v50 }
 0x71b   : > { %12190 = vmatmul.mubr.f32.gmra.mrb[184].mxu1 %v19445_v16  ;;  %12089 = vmatprep.mubr.f32.mxu0 %v19446_v29 }
 0x71c   : > { %12194 = vmatprep.mubr.f32.mxu1 %v19447_v25 }
 0x71e   : > { %12090 = vmatmul.mubr.f32.gmra.mrb[186].mxu0 %v19448_v5 }
 0x71f   : > { %12195 = vmatmul.mubr.f32.gmra.mrb[186].mxu1 %v19449_v39  ;;  %12094 = vmatprep.mubr.f32.mxu0 %v19450_v23 }
 0x720   : > { %12199 = vmatprep.mubr.f32.mxu1 %v19451_v52 }
 0x722   : > { %12095 = vmatmul.mubr.f32.gmra.mrb[188].mxu0 %v19452_v38 }
 0x723   : > { %12200 = vmatmul.mubr.f32.gmra.mrb[188].mxu1 %v19453_v15  ;;  %12099 = vmatprep.mubr.f32.mxu0 %v19454_v42 }
 0x724   : > { %12204 = vmatprep.mubr.f32.mxu1 %v19455_v60 }
 0x726   : > { %12100 = vmatmul.mubr.f32.gmra.mrb[190].mxu0 %v19456_v30 }
 0x727   : > { %12205 = vmatmul.mubr.f32.gmra.mrb[190].mxu1 %v19457_v54 }
 0x741   : > { %v13705_v33 = vpop.f32.mrb[112].mxu0 }
 0x742   : > { %v13761_v1 = vpop.f32.mrb[112].mxu1  ;;  %v13706_v20 = vpop.f32.mrb[113].mxu0 }
 0x743   : > { %v13707_v55 = vadd.f32 %v13706_v20, %v13705_v33  ;;  %v13762_v28 = vpop.f32.mrb[113].mxu1 }
 0x744   : > { %v13763_v35 = vadd.f32 %v13762_v28, %v13761_v1 }
 0x745   : > { %v10694_v57 = vadd.f32 %v13707_v55, %v17736_v63  ;;  %v13708_v32 = vpop.f32.mrb[114].mxu0 }
 0x746   : > { %v13764_v11 = vpop.f32.mrb[114].mxu1  ;;  %v13709_v6 = vpop.f32.mrb[115].mxu0 }
 0x747   : > { %v13710_v56 = vadd.f32 %v13709_v6, %v13708_v32  ;;  %v13765_v10 = vpop.f32.mrb[115].mxu1  ;;  %v18644_v27 = vadd.f32 %v13763_v35, %v10694_v57 }
 0x748   : > { %v13766_v21 = vadd.f32 %v13765_v10, %v13764_v11 }
 0x749   : > { %v10699_v12 = vadd.f32 %v13710_v56, %v17800_v4  ;;  %v13711_v14 = vpop.f32.mrb[116].mxu0  ;;  %v10838_v2 = vsel %vm10837_vm1, %v18644_v27, -inf }
 0x74a   : > { %v13767_v26 = vpop.f32.mrb[116].mxu1  ;;  %v13712_v51 = vpop.f32.mrb[117].mxu0  ;;  %10839 = vmax.xlane.f32.xlu0 %v10838_v2 }
 0x74b   : > { %v13713_v49 = vadd.f32 %v13712_v51, %v13711_v14  ;;  %v13768_v63 = vpop.f32.mrb[117].mxu1  ;;  %v18649_v18 = vadd.f32 %v13766_v21, %v10699_v12 }
 0x74c   : > { %v13769_v61 = vadd.f32 %v13768_v63, %v13767_v26 }
 0x74d   : > { %v10704_v13 = vadd.f32 %v13713_v49, %v17852_v34  ;;  %v10841_v47 = vsel %vm10837_vm1, %v18649_v18, -inf }
 0x74e   : > { %10842 = vmax.xlane.f32.xlu0 %v10841_v47 }
 0x74f   : > { %v18654_v59 = vadd.f32 %v13769_v61, %v10704_v13 }
 0x751   : > { %v10844_v4 = vsel %vm10837_vm1, %v18654_v59, -inf }
 0x752   : > { %10845 = vmax.xlane.f32.xlu1 %v10844_v4 }
 0x75a   : > { %v13714_v53 = vpop.f32.mrb[118].mxu0 }
 0x75b   : > { %v13770_v58 = vpop.f32.mrb[118].mxu1  ;;  %v13715_v3 = vpop.f32.mrb[119].mxu0 }
 0x75c   : > { %v13716_v43 = vadd.f32 %v13715_v3, %v13714_v53  ;;  %v13771_v40 = vpop.f32.mrb[119].mxu1 }
 0x75d   : > { %v13772_v41 = vadd.f32 %v13771_v40, %v13770_v58 }
 0x75e   : > { %v10709_v9 = vadd.f32 %v13716_v43, %v17875_v19  ;;  %v13717_v0 = vpop.f32.mrb[120].mxu0 }
 0x75f   : > { %v13773_v34 = vpop.f32.mrb[120].mxu1  ;;  %v13718_v48 = vpop.f32.mrb[121].mxu0 }
 0x760   : > { %v13719_v8 = vadd.f32 %v13718_v48, %v13717_v0  ;;  %v13774_v45 = vpop.f32.mrb[121].mxu1  ;;  %v18659_v24 = vadd.f32 %v13772_v41, %v10709_v9 }
 0x761   : > { %v13775_v22 = vadd.f32 %v13774_v45, %v13773_v34 }
 0x762   : > { %v10714_v36 = vadd.f32 %v13719_v8, %v17911_v17  ;;  %v13720_v44 = vpop.f32.mrb[122].mxu0  ;;  %v10847_v31 = vsel %vm10837_vm1, %v18659_v24, -inf }
 0x763   : > { %v13776_v7 = vpop.f32.mrb[122].mxu1  ;;  %v13721_v50 = vpop.f32.mrb[123].mxu0  ;;  %10848 = vmax.xlane.f32.xlu1 %v10847_v31 }
 0x764   : > { %v13722_v16 = vadd.f32 %v13721_v50, %v13720_v44  ;;  %v13777_v29 = vpop.f32.mrb[123].mxu1  ;;  %v18664_v19 = vadd.f32 %v13775_v22, %v10714_v36 }
 0x765   : > { %v13778_v25 = vadd.f32 %v13777_v29, %v13776_v7 }
 0x766   : > { %v10719_v5 = vadd.f32 %v13722_v16, %v17940_v46  ;;  %v10850_v39 = vsel %vm10837_vm1, %v18664_v19, -inf }
 0x767   : > { %10851 = vmax.xlane.f32.xlu0 %v10850_v39 }
 0x768   : > { %v18669_v23 = vadd.f32 %v13778_v25, %v10719_v5 }
 0x76a   : > { %v10853_v17 = vsel %vm10837_vm1, %v18669_v23, -inf }
 0x76b   : > { %10854 = vmax.xlane.f32.xlu1 %v10853_v17 }
 0x772   : > { %v13723_v52 = vpop.f32.mrb[124].mxu0 }
 0x773   : > { %v13779_v38 = vpop.f32.mrb[124].mxu1  ;;  %v13724_v15 = vpop.f32.mrb[125].mxu0 }
 0x774   : > { %v13725_v42 = vadd.f32 %v13724_v15, %v13723_v52  ;;  %v13780_v60 = vpop.f32.mrb[125].mxu1 }
 0x775   : > { %v13781_v30 = vadd.f32 %v13780_v60, %v13779_v38 }
 0x776   : > { %v10724_v54 = vadd.f32 %v13725_v42, %v17945_v62  ;;  %v13726_v33 = vpop.f32.mrb[126].mxu0 }
 0x777   : > { %v13782_v46 = vpop.f32.mrb[126].mxu1  ;;  %v13727_v1 = vpop.f32.mrb[127].mxu0 }
 0x778   : > { %v13783_v20 = vpop.f32.mrb[127].mxu1  ;;  %v13728_v55 = vadd.f32 %v13727_v1, %v13726_v33  ;;  %v18674_v28 = vadd.f32 %v13781_v30, %v10724_v54 }
 0x779   : > { %v13784_v35 = vadd.f32 %v13783_v20, %v13782_v46 }
 0x77a   : > { %v10729_v57 = vadd.f32 %v13728_v55, %v17948_v37  ;;  %v13817_v32 = vpop.f32.mrb[128].mxu0  ;;  %v10856_v11 = vsel %vm10837_vm1, %v18674_v28, -inf }
 0x77b   : > { %v13873_v6 = vpop.f32.mrb[128].mxu1  ;;  %10857 = vmax.xlane.f32.xlu0 %v10856_v11  ;;  %v13818_v56 = vpop.f32.mrb[129].mxu0 }
 0x77c   : > { %v13874_v10 = vpop.f32.mrb[129].mxu1  ;;  %v13819_v21 = vadd.f32 %v13818_v56, %v13817_v32  ;;  %v18679_v62 = vadd.f32 %v13784_v35, %v10729_v57 }
 0x77d   : > { %v13875_v12 = vadd.f32 %v13874_v10, %v13873_v6 }
 0x77e   : > { %v13820_v14 = vpop.f32.mrb[130].mxu0  ;;  %v10859_v2 = vsel %vm10837_vm1, %v18679_v62, -inf }
 0x77f   : > { %v11542_v26 = vadd.f32 %v13875_v12, %v13819_v21  ;;  %v13876_v51 = vpop.f32.mrb[130].mxu1  ;;  %v13821_v49 = vpop.f32.mrb[131].mxu0  ;;  %10860 = vmax.xlane.f32.xlu1 %v10859_v2 }
 0x780   : > { %v13822_v37 = vadd.f32 %v13821_v49, %v13820_v14  ;;  %v13877_v63 = vpop.f32.mrb[131].mxu1 }
 0x781   : > { %v13878_v61 = vadd.f32 %v13877_v63, %v13876_v51 }
 0x782   : > { %v13823_v13 = vpop.f32.mrb[132].mxu0 }
 0x783   : > { %v11547_v47 = vadd.f32 %v13878_v61, %v13822_v37  ;;  %v13879_v4 = vpop.f32.mrb[132].mxu1  ;;  %v13824_v53 = vpop.f32.mrb[133].mxu0 }
 0x784   : > { %v13825_v58 = vadd.f32 %v13824_v53, %v13823_v13  ;;  %v13880_v3 = vpop.f32.mrb[133].mxu1 }
 0x785   : > { %v13881_v43 = vadd.f32 %v13880_v3, %v13879_v4 }
 0x786   : > { %v13826_v40 = vpop.f32.mrb[134].mxu0 }
 0x787   : > { %v11552_v41 = vadd.f32 %v13881_v43, %v13825_v58  ;;  %v13882_v9 = vpop.f32.mrb[134].mxu1  ;;  %v13827_v0 = vpop.f32.mrb[135].mxu0 }
 0x788   : > { %v13828_v34 = vadd.f32 %v13827_v0, %v13826_v40  ;;  %v13883_v48 = vpop.f32.mrb[135].mxu1 }
 0x789   : > { %v13884_v8 = vadd.f32 %v13883_v48, %v13882_v9 }
 0x78a   : > { %v13829_v45 = vpop.f32.mrb[136].mxu0 }
 0x78b   : > { %v11557_v22 = vadd.f32 %v13884_v8, %v13828_v34  ;;  %v13885_v36 = vpop.f32.mrb[136].mxu1  ;;  %v13830_v44 = vpop.f32.mrb[137].mxu0 }
 0x78c   : > { %v13831_v31 = vadd.f32 %v13830_v44, %v13829_v45  ;;  %v13886_v7 = vpop.f32.mrb[137].mxu1 }
 0x78d   : > { %v13887_v50 = vadd.f32 %v13886_v7, %v13885_v36 }
 0x78e   : > { %v13832_v16 = vpop.f32.mrb[138].mxu0 }
 0x78f   : > { %v11562_v29 = vadd.f32 %v13887_v50, %v13831_v31  ;;  %v13888_v25 = vpop.f32.mrb[138].mxu1  ;;  %v13833_v5 = vpop.f32.mrb[139].mxu0 }
 0x790   : > { %v13834_v39 = vadd.f32 %v13833_v5, %v13832_v16  ;;  %v13889_v17 = vpop.f32.mrb[139].mxu1 }
 0x791   : > { %v13890_v52 = vadd.f32 %v13889_v17, %v13888_v25 }
 0x792   : > { %v13835_v38 = vpop.f32.mrb[140].mxu0 }
 0x793   : > { %v11567_v15 = vadd.f32 %v13890_v52, %v13834_v39  ;;  %v13891_v42 = vpop.f32.mrb[140].mxu1  ;;  %v13836_v60 = vpop.f32.mrb[141].mxu0 }
 0x794   : > { %v13837_v30 = vadd.f32 %v13836_v60, %v13835_v38  ;;  %v13892_v54 = vpop.f32.mrb[141].mxu1 }
 0x795   : > { %v13893_v33 = vadd.f32 %v13892_v54, %v13891_v42 }
 0x796   : > { %v13838_v46 = vpop.f32.mrb[142].mxu0 }
 0x797   : > { %v11572_v1 = vadd.f32 %v13893_v33, %v13837_v30  ;;  %v13894_v20 = vpop.f32.mrb[142].mxu1  ;;  %v13839_v55 = vpop.f32.mrb[143].mxu0 }
 0x798   : > { %v13840_v35 = vadd.f32 %v13839_v55, %v13838_v46  ;;  %v13895_v57 = vpop.f32.mrb[143].mxu1 }
 0x799   : > { %v13896_v32 = vadd.f32 %v13895_v57, %v13894_v20 }
 0x79b   : > { %v18683_v11 = vadd.f32 %v13896_v32, %v13840_v35  ;;  %v13929_v6 = vpop.f32.mrb[144].mxu0 }
 0x79c   : > { %v13985_v56 = vpop.f32.mrb[144].mxu1  ;;  %v13930_v10 = vpop.f32.mrb[145].mxu0 }
 0x79d   : > { %v13931_v21 = vadd.f32 %v13930_v10, %v13929_v6  ;;  %v13986_v12 = vpop.f32.mrb[145].mxu1 }
 0x79e   : > { %v13987_v14 = vadd.f32 %v13986_v12, %v13985_v56 }
 0x79f   : > { %v11647_v2 = vadd.f32 %v13931_v21, %v11542_v26  ;;  %v13932_v51 = vpop.f32.mrb[146].mxu0 }
 0x7a0   : > { %v13988_v49 = vpop.f32.mrb[146].mxu1  ;;  %v13933_v37 = vpop.f32.mrb[147].mxu0 }
 0x7a1   : > { %v11752_v63 = vadd.f32 %v13987_v14, %v11647_v2  ;;  %v13934_v61 = vadd.f32 %v13933_v37, %v13932_v51  ;;  %v13989_v13 = vpop.f32.mrb[147].mxu1 }
 0x7a2   : > { %v13990_v4 = vadd.f32 %v13989_v13, %v13988_v49 }
 0x7a3   : > { %v11652_v53 = vadd.f32 %v13934_v61, %v11547_v47  ;;  %v13935_v58 = vpop.f32.mrb[148].mxu0 }
 0x7a4   : > { %v13991_v3 = vpop.f32.mrb[148].mxu1  ;;  %v13936_v43 = vpop.f32.mrb[149].mxu0 }
 0x7a5   : > { %v11757_v40 = vadd.f32 %v13990_v4, %v11652_v53  ;;  %v13937_v9 = vadd.f32 %v13936_v43, %v13935_v58  ;;  %v13992_v0 = vpop.f32.mrb[149].mxu1 }
 0x7a6   : > { %v13993_v34 = vadd.f32 %v13992_v0, %v13991_v3 }
 0x7a7   : > { %v11657_v48 = vadd.f32 %v13937_v9, %v11552_v41  ;;  %v13938_v8 = vpop.f32.mrb[150].mxu0 }
 0x7a8   : > { %v13994_v45 = vpop.f32.mrb[150].mxu1  ;;  %v13939_v36 = vpop.f32.mrb[151].mxu0 }
 0x7a9   : > { %v11762_v26 = vadd.f32 %v13993_v34, %v11657_v48  ;;  %v13940_v44 = vadd.f32 %v13939_v36, %v13938_v8  ;;  %v13995_v31 = vpop.f32.mrb[151].mxu1 }
 0x7aa   : > { %v13996_v7 = vadd.f32 %v13995_v31, %v13994_v45 }
 0x7ab   : > { %v11662_v50 = vadd.f32 %v13940_v44, %v11557_v22  ;;  %v13941_v16 = vpop.f32.mrb[152].mxu0 }
 0x7ac   : > { %v13997_v25 = vpop.f32.mrb[152].mxu1  ;;  %v13942_v5 = vpop.f32.mrb[153].mxu0 }
 0x7ad   : > { %v11767_v47 = vadd.f32 %v13996_v7, %v11662_v50  ;;  %v13943_v39 = vadd.f32 %v13942_v5, %v13941_v16  ;;  %v13998_v17 = vpop.f32.mrb[153].mxu1 }
 0x7ae   : > { %v13999_v52 = vadd.f32 %v13998_v17, %v13997_v25 }
 0x7af   : > { %v11667_v38 = vadd.f32 %v13943_v39, %v11562_v29  ;;  %v13944_v42 = vpop.f32.mrb[154].mxu0 }
 0x7b0   : > { %v14000_v60 = vpop.f32.mrb[154].mxu1  ;;  %v13945_v30 = vpop.f32.mrb[155].mxu0 }
 0x7b1   : > { %v11772_v41 = vadd.f32 %v13999_v52, %v11667_v38  ;;  %v13946_v54 = vadd.f32 %v13945_v30, %v13944_v42  ;;  %v14001_v33 = vpop.f32.mrb[155].mxu1 }
 0x7b2   : > { %v14002_v46 = vadd.f32 %v14001_v33, %v14000_v60 }
 0x7b3   : > { %v11672_v20 = vadd.f32 %v13946_v54, %v11567_v15  ;;  %v13947_v55 = vpop.f32.mrb[156].mxu0 }
 0x7b4   : > { %v14003_v35 = vpop.f32.mrb[156].mxu1  ;;  %v13948_v57 = vpop.f32.mrb[157].mxu0 }
 0x7b5   : > { %v11777_v22 = vadd.f32 %v14002_v46, %v11672_v20  ;;  %v13949_v32 = vadd.f32 %v13948_v57, %v13947_v55  ;;  %v14004_v6 = vpop.f32.mrb[157].mxu1 }
 0x7b6   : > { %v14005_v56 = vadd.f32 %v14004_v6, %v14003_v35 }
 0x7b7   : > { %v11677_v10 = vadd.f32 %v13949_v32, %v11572_v1  ;;  %v13950_v21 = vpop.f32.mrb[158].mxu0 }
 0x7b8   : > { %v14006_v12 = vpop.f32.mrb[158].mxu1  ;;  %v13951_v14 = vpop.f32.mrb[159].mxu0 }
 0x7b9   : > { %v11782_v29 = vadd.f32 %v14005_v56, %v11677_v10  ;;  %v13952_v2 = vadd.f32 %v13951_v14, %v13950_v21  ;;  %v14007_v51 = vpop.f32.mrb[159].mxu1 }
 0x7ba   : > { %v14008_v49 = vadd.f32 %v14007_v51, %v14006_v12 }
 0x7bb   : > { %v11682_v37 = vadd.f32 %v13952_v2, %v18683_v11 }
 0x7bc   : > { %v14041_v61 = vpop.f32.mrb[160].mxu0 }
 0x7bd   : > { %v18686_v13 = vadd.f32 %v14008_v49, %v11682_v37  ;;  %v14097_v15 = vpop.f32.mrb[160].mxu1  ;;  %v14042_v4 = vpop.f32.mrb[161].mxu0 }
 0x7be   : > { %v14043_v53 = vadd.f32 %v14042_v4, %v14041_v61  ;;  %v14098_v58 = vpop.f32.mrb[161].mxu1 }
 0x7bf   : > { %v14099_v3 = vadd.f32 %v14098_v58, %v14097_v15 }
 0x7c0   : > { %v11857_v43 = vadd.f32 %v14043_v53, %v11752_v63  ;;  %v14044_v9 = vpop.f32.mrb[162].mxu0 }
 0x7c1   : > { %v14100_v1 = vpop.f32.mrb[162].mxu1  ;;  %v14045_v0 = vpop.f32.mrb[163].mxu0 }
 0x7c2   : > { %v18688_v34 = vadd.f32 %v14099_v3, %v11857_v43  ;;  %v14046_v48 = vadd.f32 %v14045_v0, %v14044_v9  ;;  %v14101_v8 = vpop.f32.mrb[163].mxu1 }
 0x7c3   : > { %v14102_v45 = vadd.f32 %v14101_v8, %v14100_v1 }
 0x7c4   : > { %v11862_v36 = vadd.f32 %v14046_v48, %v11757_v40  ;;  %v14047_v44 = vpop.f32.mrb[164].mxu0 }
 0x7c5   : > { %v14103_v11 = vpop.f32.mrb[164].mxu1  ;;  %v14048_v31 = vpop.f32.mrb[165].mxu0 }
 0x7c6   : > { %v18690_v7 = vadd.f32 %v14102_v45, %v11862_v36  ;;  %v14049_v50 = vadd.f32 %v14048_v31, %v14047_v44  ;;  %v14104_v16 = vpop.f32.mrb[165].mxu1 }
 0x7c7   : > { %v14105_v25 = vadd.f32 %v14104_v16, %v14103_v11 }
 0x7c8   : > { %v11867_v5 = vadd.f32 %v14049_v50, %v11762_v26  ;;  %v14050_v39 = vpop.f32.mrb[166].mxu0 }
 0x7c9   : > { %v14106_v63 = vpop.f32.mrb[166].mxu1  ;;  %v14051_v17 = vpop.f32.mrb[167].mxu0 }
 0x7ca   : > { %v18692_v52 = vadd.f32 %v14105_v25, %v11867_v5  ;;  %v14052_v38 = vadd.f32 %v14051_v17, %v14050_v39  ;;  %v14107_v42 = vpop.f32.mrb[167].mxu1 }
 0x7cb   : > { %v14108_v60 = vadd.f32 %v14107_v42, %v14106_v63 }
 0x7cc   : > { %v11872_v30 = vadd.f32 %v14052_v38, %v11767_v47  ;;  %v14053_v54 = vpop.f32.mrb[168].mxu0 }
 0x7cd   : > { %v14109_v40 = vpop.f32.mrb[168].mxu1  ;;  %v14054_v33 = vpop.f32.mrb[169].mxu0 }
 0x7ce   : > { %v18694_v46 = vadd.f32 %v14108_v60, %v11872_v30  ;;  %v14055_v20 = vadd.f32 %v14054_v33, %v14053_v54  ;;  %v14110_v55 = vpop.f32.mrb[169].mxu1 }
 0x7cf   : > { %v14111_v35 = vadd.f32 %v14110_v55, %v14109_v40 }
 0x7d0   : > { %v11877_v57 = vadd.f32 %v14055_v20, %v11772_v41  ;;  %v14056_v32 = vpop.f32.mrb[170].mxu0 }
 0x7d1   : > { %v14112_v26 = vpop.f32.mrb[170].mxu1  ;;  %v14057_v6 = vpop.f32.mrb[171].mxu0 }
 0x7d2   : > { %v18696_v56 = vadd.f32 %v14111_v35, %v11877_v57  ;;  %v14058_v10 = vadd.f32 %v14057_v6, %v14056_v32  ;;  %v14113_v21 = vpop.f32.mrb[171].mxu1 }
 0x7d3   : > { %v14114_v12 = vadd.f32 %v14113_v21, %v14112_v26 }
 0x7d4   : > { %v11882_v14 = vadd.f32 %v14058_v10, %v11777_v22  ;;  %v14059_v2 = vpop.f32.mrb[172].mxu0 }
 0x7d5   : > { %v14115_v47 = vpop.f32.mrb[172].mxu1  ;;  %v14060_v51 = vpop.f32.mrb[173].mxu0 }
 0x7d6   : > { %v18698_v49 = vadd.f32 %v14114_v12, %v11882_v14  ;;  %v14061_v37 = vadd.f32 %v14060_v51, %v14059_v2  ;;  %v14116_v61 = vpop.f32.mrb[173].mxu1 }
 0x7d7   : > { %v10840_v15 = vpop.xlane.xlu0 %10839  ;;  %v14117_v4 = vadd.f32 %v14116_v61, %v14115_v47 }
 0x7d8   : > { %v10862_v41 = vsub.f32 %v18644_v27, %v10840_v15  ;;  %v11887_v53 = vadd.f32 %v14061_v37, %v11782_v29  ;;  %v14062_v58 = vpop.f32.mrb[174].mxu0 }
 0x7d9   : > { %v14118_v3 = vpop.f32.mrb[174].mxu1  ;;  %v14063_v43 = vpop.f32.mrb[175].mxu0 }
 0x7da   : > { %v10870_v9 = vmul.f32 1.442695, %v10862_v41  ;;  %v18701_v1 = vadd.f32 %v14117_v4, %v11887_v53  ;;  %v14064_v0 = vadd.f32 %v14063_v43, %v14062_v58  ;;  %v14119_v22 = vpop.f32.mrb[175].mxu1 }
 0x7db   : > { %v10843_v48 = vpop.xlane.xlu0 %10842  ;;  %v14120_v8 = vadd.f32 %v14119_v22, %v14118_v3 }
 0x7dc   : > { %15413 = vpow2.f32 %v10870_v9  ;;  %v10863_v45 = vsub.f32 %v18649_v18, %v10843_v48  ;;  %v11892_v36 = vadd.f32 %v14064_v0, %v18686_v13 }
 0x7dd   : > { %v14153_v44 = vpop.f32.mrb[176].mxu0 }
 0x7de   : > { %v10872_v11 = vmul.f32 1.442695, %v10863_v45  ;;  %v18705_v31 = vadd.f32 %v14120_v8, %v11892_v36  ;;  %v14209_v27 = vpop.f32.mrb[176].mxu1  ;;  %v14154_v29 = vpop.f32.mrb[177].mxu0 }
 0x7df   : > { %v14155_v50 = vadd.f32 %v14154_v29, %v14153_v44  ;;  %v14210_v16 = vpop.f32.mrb[177].mxu1  ;;  %v10846_v25 = vpop.xlane.xlu1 %10845 }
 0x7e0   : > { %15415 = vpow2.f32 %v10872_v11  ;;  %v14211_v5 = vadd.f32 %v14210_v16, %v14209_v27  ;;  %v10864_v39 = vsub.f32 %v18654_v59, %v10846_v25 }
 0x7e1   : > { %v12067_v63 = vadd.f32 %v14155_v50, %v18688_v34  ;;  %v14156_v17 = vpop.f32.mrb[178].mxu0 }
 0x7e2   : > { %v14212_v38 = vpop.f32.mrb[178].mxu1  ;;  %v14157_v18 = vpop.f32.mrb[179].mxu0  ;;  %v10874_v42 = vmul.f32 1.442695, %v10864_v39 }
 0x7e3   : > { %v18709_v13 = vadd.f32 %v14211_v5, %v12067_v63  ;;  %v14158_v60 = vadd.f32 %v14157_v18, %v14156_v17  ;;  %v14213_v30 = vpop.f32.mrb[179].mxu1 }
 0x7e4   : > { %v14214_v54 = vadd.f32 %v14213_v30, %v14212_v38  ;;  %15417 = vpow2.f32 %v10874_v42 }
 0x7e5   : > { %v12072_v33 = vadd.f32 %v14158_v60, %v18690_v7  ;;  %v14159_v20 = vpop.f32.mrb[180].mxu0 }
 0x7e6   : > { %v18711_v40 = vpop.eup %15413  ;;  %v14215_v55 = vpop.f32.mrb[180].mxu1 }
 0x7e7   : > { %v14160_v35 = vpop.f32.mrb[181].mxu0  ;;  %v10886_v59 = vsel %vm10837_vm1, %v18711_v40, 0.0  ;;  %v18716_v34 = vadd.f32 %v14214_v54, %v12072_v33  ;;  %v14216_v32 = vpop.f32.mrb[181].mxu1 }
 0x7e8   : > { %v14161_v57 = vadd.f32 %v14160_v35, %v14159_v20  ;;  %10887 = vadd.xlane.f32.xlu0 %v10886_v59  ;;  %v14217_v26 = vadd.f32 %v14216_v32, %v14215_v55 }
 0x7e9   : > { %v14162_v21 = vpop.f32.mrb[182].mxu0 }
 0x7ea   : > { %v18718_v6 = vpop.eup %15415  ;;  %v12077_v10 = vadd.f32 %v14161_v57, %v18692_v52  ;;  %v14218_v12 = vpop.f32.mrb[182].mxu1 }
 0x7eb   : > { %v14163_v14 = vpop.f32.mrb[183].mxu0  ;;  %v10889_v7 = vsel %vm10837_vm1, %v18718_v6, 0.0  ;;  %v14219_v51 = vpop.f32.mrb[183].mxu1 }
 0x7ec   : > { %v18723_v2 = vadd.f32 %v14217_v26, %v12077_v10  ;;  %v14164_v47 = vadd.f32 %v14163_v14, %v14162_v21  ;;  %10890 = vadd.xlane.f32.xlu1 %v10889_v7  ;;  %v14220_v37 = vadd.f32 %v14219_v51, %v14218_v12 }
 0x7ed   : > { %v14165_v15 = vpop.f32.mrb[184].mxu0 }
 0x7ee   : > { %v12082_v61 = vadd.f32 %v14164_v47, %v18694_v46  ;;  %v18726_v4 = vpop.eup %15417  ;;  %v14221_v41 = vpop.f32.mrb[184].mxu1 }
 0x7ef   : > { %v14166_v53 = vpop.f32.mrb[185].mxu0  ;;  %v14222_v3 = vpop.f32.mrb[185].mxu1  ;;  %v10892_v9 = vsel %vm10837_vm1, %v18726_v4, 0.0 }
 0x7f0   : > { %v18728_v52 = vadd.f32 %v14220_v37, %v12082_v61  ;;  %v14167_v58 = vadd.f32 %v14166_v53, %v14165_v15  ;;  %v10849_v43 = vpop.xlane.xlu1 %10848  ;;  %v14223_v0 = vadd.f32 %v14222_v3, %v14221_v41  ;;  %10893 = vadd.xlane.f32.xlu0 %v10892_v9 }
 0x7f1   : > { %v10865_v22 = vsub.f32 %v18659_v24, %v10849_v43  ;;  %v14168_v46 = vpop.f32.mrb[186].mxu0 }
 0x7f2   : > { %v12087_v48 = vadd.f32 %v14167_v58, %v18696_v56  ;;  %v14224_v8 = vpop.f32.mrb[186].mxu1  ;;  %v14169_v45 = vpop.f32.mrb[187].mxu0 }
 0x7f3   : > { %v10876_v36 = vmul.f32 1.442695, %v10865_v22  ;;  %v14170_v11 = vadd.f32 %v14169_v45, %v14168_v46  ;;  %v14225_v27 = vpop.f32.mrb[187].mxu1 }
 0x7f4   : > { %v18734_v44 = vadd.f32 %v14223_v0, %v12087_v48  ;;  %v10852_v29 = vpop.xlane.xlu0 %10851  ;;  %v14226_v50 = vadd.f32 %v14225_v27, %v14224_v8 }
 0x7f5   : > { %15419 = vpow2.f32 %v10876_v36  ;;  %v10866_v16 = vsub.f32 %v18664_v19, %v10852_v29  ;;  %v12092_v25 = vadd.f32 %v14170_v11, %v18698_v49  ;;  %v14171_v5 = vpop.f32.mrb[188].mxu0 }
 0x7f6   : > { %v14227_v24 = vpop.f32.mrb[188].mxu1  ;;  %v14172_v39 = vpop.f32.mrb[189].mxu0 }
 0x7f7   : > { %v10878_v63 = vmul.f32 1.442695, %v10866_v16  ;;  %v18738_v56 = vadd.f32 %v14226_v50, %v12092_v25  ;;  %v14173_v17 = vadd.f32 %v14172_v39, %v14171_v5  ;;  %v14228_v38 = vpop.f32.mrb[189].mxu1 }
 0x7f8   : > { %v10855_v18 = vpop.xlane.xlu1 %10854  ;;  %v14229_v42 = vadd.f32 %v14228_v38, %v14227_v24 }
 0x7f9   : > { %15421 = vpow2.f32 %v10878_v63  ;;  %v10867_v60 = vsub.f32 %v18669_v23, %v10855_v18  ;;  %v12097_v30 = vadd.f32 %v14173_v17, %v18701_v1  ;;  %v14174_v54 = vpop.f32.mrb[190].mxu0 }
 0x7fa   : > { %v14230_v33 = vpop.f32.mrb[190].mxu1  ;;  %v14175_v19 = vpop.f32.mrb[191].mxu0 }
 0x7fb   : > { %v10880_v20 = vmul.f32 1.442695, %v10867_v60  ;;  %v18742_v49 = vadd.f32 %v14229_v42, %v12097_v30  ;;  %v14176_v55 = vadd.f32 %v14175_v19, %v14174_v54  ;;  %v14231_v35 = vpop.f32.mrb[191].mxu1 }
 0x7fc   : > { %v14232_v59 = vadd.f32 %v14231_v35, %v14230_v33 }
 0x7fd   : > { %15423 = vpow2.f32 %v10880_v20  ;;  %v12102_v57 = vadd.f32 %v14176_v55, %v18705_v31 }
 0x7ff   : > { %v15420_v32 = vpop.eup %15419  ;;  %v18745_v26 = vadd.f32 %v14232_v59, %v12102_v57 }
 0x800   : > { %v10895_v10 = vsel %vm10837_vm1, %v15420_v32, 0.0 }
 0x801   : > { %10896 = vadd.xlane.f32.xlu1 %v10895_v10 }
 0x803   : > { %v15422_v23 = vpop.eup %15421 }
 0x804   : > { %v10898_v1 = vsel %vm10837_vm1, %v15422_v23, 0.0 }
 0x805   : > { %10899 = vadd.xlane.f32.xlu0 %v10898_v1 }
 0x807   : > { %v15424_v21 = vpop.eup %15423 }
 0x808   : > { %v10901_v12 = vsel %vm10837_vm1, %v15424_v21, 0.0  ;;  %v10858_v14 = vpop.xlane.xlu0 %10857 }
 0x809   : > { %10902 = vadd.xlane.f32.xlu1 %v10901_v12  ;;  %v10868_v7 = vsub.f32 %v18674_v28, %v10858_v14 }
 0x80b   : > { %v10882_v47 = vmul.f32 1.442695, %v10868_v7 }
 0x80c   : > { %v10861_v51 = vpop.xlane.xlu1 %10860 }
 0x80d   : > { %15425 = vpow2.f32 %v10882_v47  ;;  %v10869_v31 = vsub.f32 %v18679_v62, %v10861_v51 }
 0x80f   : > { %v10884_v37 = vmul.f32 1.442695, %v10869_v31 }
 0x811   : > { %15427 = vpow2.f32 %v10884_v37 }
 0x817   : > { %v15426_v61 = vpop.eup %15425 }
 0x818   : > { %v10904_v15 = vsel %vm10837_vm1, %v15426_v61, 0.0 }
 0x819   : > { %10905 = vadd.xlane.f32.xlu0 %v10904_v15 }
 0x81b   : > { %v15428_v41 = vpop.eup %15427 }
 0x81c   : > { %v10907_v53 = vsel %vm10837_vm1, %v15428_v41, 0.0 }
 0x81d   : > { %10908 = vadd.xlane.f32.xlu1 %v10907_v53 }
 0x875   : > { %v10888_v58 = vpop.xlane.xlu0 %10887 }
 0x876   : > { %15429 = vrcp.f32 %v10888_v58 }
 0x879   : > { %v10891_v3 = vpop.xlane.xlu1 %10890 }
 0x87a   : > { %15431 = vrcp.f32 %v10891_v3 }
 0x87d   : > { %v10894_v28 = vpop.xlane.xlu0 %10893 }
 0x87e   : > { %15433 = vrcp.f32 %v10894_v28 }
 0x880   : > { %v15430_v43 = vpop.eup %15429 }
 0x881   : > { %v10918_v9 = vmul.f32 %v15430_v43, %v18711_v40 }
 0x883   : > { %v10926_v62 = vsel %vm10837_vm1, %v10918_v9, -inf }
 0x884   : > { %v15432_v0 = vpop.eup %15431  ;;  %10927 = vmax.xlane.f32.xlu0 %v10926_v62 }
 0x885   : > { %v10919_v22 = vmul.f32 %v15432_v0, %v18718_v6 }
 0x887   : > { %v10929_v48 = vsel %vm10837_vm1, %v10919_v22, -inf }
 0x888   : > { %10930 = vmax.xlane.f32.xlu1 %v10929_v48  ;;  %v15434_v46 = vpop.eup %15433 }
 0x889   : > { %v10920_v8 = vmul.f32 %v15434_v46, %v18726_v4 }
 0x88b   : > { %v10932_v45 = vsel %vm10837_vm1, %v10920_v8, -inf }
 0x88c   : > { %10933 = vmax.xlane.f32.xlu0 %v10932_v45 }
 0x88e   : > { %v10897_v36 = vpop.xlane.xlu1 %10896 }
 0x88f   : > { %15435 = vrcp.f32 %v10897_v36 }
 0x892   : > { %v10900_v11 = vpop.xlane.xlu0 %10899 }
 0x893   : > { %15437 = vrcp.f32 %v10900_v11 }
 0x896   : > { %v10903_v40 = vpop.xlane.xlu1 %10902 }
 0x897   : > { %15439 = vrcp.f32 %v10903_v40 }
 0x899   : > { %v15436_v27 = vpop.eup %15435 }
 0x89a   : > { %v10921_v29 = vmul.f32 %v15436_v27, %v15420_v32 }
 0x89c   : > { %v10935_v50 = vsel %vm10837_vm1, %v10921_v29, -inf }
 0x89d   : > { %v15438_v6 = vpop.eup %15437  ;;  %10936 = vmax.xlane.f32.xlu1 %v10935_v50 }
 0x89e   : > { %v10922_v16 = vmul.f32 %v15438_v6, %v15422_v23 }
 0x8a0   : > { %v10938_v25 = vsel %vm10837_vm1, %v10922_v16, -inf }
 0x8a1   : > { %v15440_v5 = vpop.eup %15439  ;;  %10939 = vmax.xlane.f32.xlu0 %v10938_v25 }
 0x8a2   : > { %v10923_v4 = vmul.f32 %v15440_v5, %v15424_v21 }
 0x8a4   : > { %v10941_v24 = vsel %vm10837_vm1, %v10923_v4, -inf }
 0x8a5   : > { %10942 = vmax.xlane.f32.xlu1 %v10941_v24 }
 0x8a6   : > { %v10906_v39 = vpop.xlane.xlu0 %10905 }
 0x8a7   : > { %15441 = vrcp.f32 %v10906_v39 }
 0x8aa   : > { %v10909_v63 = vpop.xlane.xlu1 %10908 }
 0x8ab   : > { %15443 = vrcp.f32 %v10909_v63 }
 0x8b1   : > { %v15442_v17 = vpop.eup %15441 }
 0x8b2   : > { %v10924_v38 = vmul.f32 %v15442_v17, %v15426_v61 }
 0x8b4   : > { %v10944_v18 = vsel %vm10837_vm1, %v10924_v38, -inf }
 0x8b5   : > { %v15444_v42 = vpop.eup %15443  ;;  %10945 = vmax.xlane.f32.xlu0 %v10944_v18 }
 0x8b6   : > { %v10925_v60 = vmul.f32 %v15444_v42, %v15428_v41 }
 0x8b8   : > { %v10947_v30 = vsel %vm10837_vm1, %v10925_v60, -inf }
 0x8b9   : > { %10948 = vmax.xlane.f32.xlu1 %v10947_v30  ;;  %v11022_v30 = vld [vmem:[#allocation8] sm:$0x1] }
 0x911   : > { %v10928_v54 = vpop.xlane.xlu0 %10927 }
 0x912   : > { %v10950_v33 = vsub.f32 %v10918_v9, %v10928_v54 }
 0x914   : > { %v10958_v19 = vmul.f32 1.442695, %v10950_v33  ;;  %v11023_v33 = vmul.f32 1.442695, %v11022_v30 }
 0x915   : > { %v10931_v20 = vpop.xlane.xlu1 %10930 }
 0x916   : > { %15445 = vpow2.f32 %v10958_v19  ;;  %v10951_v55 = vsub.f32 %v10919_v22, %v10931_v20 }
 0x918   : > { %v10960_v35 = vmul.f32 1.442695, %v10951_v55  ;;  %v11026_v55 = vlaneseq }
 0x919   : > { %v10934_v59 = vpop.xlane.xlu0 %10933 }
 0x91a   : > { %15447 = vpow2.f32 %v10960_v35  ;;  %v10952_v57 = vsub.f32 %v10920_v8, %v10934_v59  ;;  %v11027_v59 = vshrl.u32 %v11026_v55, 7 }
 0x91c   : > { %v10962_v32 = vmul.f32 1.442695, %v10952_v57 }
 0x91e   : > { %15449 = vpow2.f32 %v10962_v32  ;;  %v11028_v32 = vsub.s32 0, %v11027_v59 }
 0x920   : > { %v15446_v10 = vpop.eup %15445 }
 0x921   : > { %v10974_v23 = vsel %vm10837_vm1, %v15446_v10, 0.0 }
 0x922   : > { %10975 = vadd.xlane.f32.xlu0 %v10974_v23 }
 0x924   : > { %v15448_v1 = vpop.eup %15447 }
 0x925   : > { %v10977_v21 = vsel %vm10837_vm1, %v15448_v1, 0.0 }
 0x926   : > { %10978 = vadd.xlane.f32.xlu1 %v10977_v21 }
 0x928   : > { %v15450_v12 = vpop.eup %15449 }
 0x929   : > { %v10980_v7 = vsel %vm10837_vm1, %v15450_v12, 0.0 }
 0x92a   : > { %v10937_v14 = vpop.xlane.xlu1 %10936  ;;  %10981 = vadd.xlane.f32.xlu0 %v10980_v7 }
 0x92b   : > { %v10953_v47 = vsub.f32 %v10921_v29, %v10937_v14 }
 0x92d   : > { %v10964_v51 = vmul.f32 1.442695, %v10953_v47 }
 0x92e   : > { %v10940_v31 = vpop.xlane.xlu0 %10939 }
 0x92f   : > { %15451 = vpow2.f32 %v10964_v51  ;;  %v10954_v37 = vsub.f32 %v10922_v16, %v10940_v31 }
 0x931   : > { %v10966_v61 = vmul.f32 1.442695, %v10954_v37 }
 0x932   : > { %v10943_v15 = vpop.xlane.xlu1 %10942 }
 0x933   : > { %15453 = vpow2.f32 %v10966_v61  ;;  %v10955_v41 = vsub.f32 %v10923_v4, %v10943_v15 }
 0x935   : > { %v10968_v53 = vmul.f32 1.442695, %v10955_v41 }
 0x937   : > { %15455 = vpow2.f32 %v10968_v53 }
 0x939   : > { %v15452_v58 = vpop.eup %15451 }
 0x93a   : > { %v10983_v3 = vsel %vm10837_vm1, %v15452_v58, 0.0 }
 0x93b   : > { %10984 = vadd.xlane.f32.xlu1 %v10983_v3 }
 0x93d   : > { %v15454_v28 = vpop.eup %15453 }
 0x93e   : > { %v10986_v43 = vsel %vm10837_vm1, %v15454_v28, 0.0 }
 0x93f   : > { %10987 = vadd.xlane.f32.xlu0 %v10986_v43 }
 0x941   : > { %v15456_v9 = vpop.eup %15455 }
 0x942   : > { %v10989_v62 = vsel %vm10837_vm1, %v15456_v9, 0.0  ;;  %v10946_v0 = vpop.xlane.xlu0 %10945 }
 0x943   : > { %10990 = vadd.xlane.f32.xlu1 %v10989_v62  ;;  %v10956_v22 = vsub.f32 %v10924_v38, %v10946_v0 }
 0x945   : > { %v10970_v48 = vmul.f32 1.442695, %v10956_v22 }
 0x946   : > { %v10949_v46 = vpop.xlane.xlu1 %10948 }
 0x947   : > { %15457 = vpow2.f32 %v10970_v48  ;;  %v10957_v8 = vsub.f32 %v10925_v60, %v10949_v46 }
 0x949   : > { %v10972_v45 = vmul.f32 1.442695, %v10957_v8 }
 0x94b   : > { %15459 = vpow2.f32 %v10972_v45 }
 0x951   : > { %v15458_v36 = vpop.eup %15457 }
 0x952   : > { %v10992_v11 = vsel %vm10837_vm1, %v15458_v36, 0.0 }
 0x953   : > { %10993 = vadd.xlane.f32.xlu0 %v10992_v11 }
 0x955   : > { %v15460_v40 = vpop.eup %15459 }
 0x956   : > { %v10995_v27 = vsel %vm10837_vm1, %v15460_v40, 0.0 }
 0x957   : > { %10996 = vadd.xlane.f32.xlu1 %v10995_v27 }
 0x9af   : > { %v10976_v29 = vpop.xlane.xlu0 %10975 }
 0x9b0   : > { %15461 = vrcp.f32 %v10976_v29 }
 0x9b3   : > { %v10979_v50 = vpop.xlane.xlu1 %10978 }
 0x9b4   : > { %15463 = vrcp.f32 %v10979_v50 }
 0x9b7   : > { %v10982_v6 = vpop.xlane.xlu0 %10981 }
 0x9b8   : > { %15465 = vrcp.f32 %v10982_v6 }
 0x9ba   : > { %v15462_v16 = vpop.eup %15461 }
 0x9bb   : > { %v11006_v25 = vmul.f32 %v15462_v16, %v15446_v10 }
 0x9bd   : > { %11014 = vst.msk [vmem:[%s18778_s13] sm:$0xff] %vm10837_vm1, %v11006_v25 }
 0x9be   : > { %v15464_v5 = vpop.eup %15463 }
 0x9bf   : > { %v11007_v4 = vmul.f32 %v15464_v5, %v15448_v1 }
 0x9c1   : > { %11015 = vst.msk [vmem:[%s18778_s13 + $0x8] sm:$0xff] %vm10837_vm1, %v11007_v4 }
 0x9c2   : > { %v15466_v24 = vpop.eup %15465 }
 0x9c3   : > { %v11008_v39 = vmul.f32 %v15466_v24, %v15450_v12 }
 0x9c5   : > { %11016 = vst.msk [vmem:[%s18778_s13 + $0x10] sm:$0xff] %vm10837_vm1, %v11008_v39 }
 0x9c8   : > { %v10985_v63 = vpop.xlane.xlu1 %10984 }
 0x9c9   : > { %15467 = vrcp.f32 %v10985_v63 }
 0x9cc   : > { %v10988_v17 = vpop.xlane.xlu0 %10987 }
 0x9cd   : > { %15469 = vrcp.f32 %v10988_v17 }
 0x9d0   : > { %v10991_v38 = vpop.xlane.xlu1 %10990 }
 0x9d1   : > { %15471 = vrcp.f32 %v10991_v38 }
 0x9d2   : > { %15473 = vpow2.f32 %v11023_v33 }
 0x9d3   : > { %v15468_v18 = vpop.eup %15467 }
 0x9d4   : > { %v11009_v42 = vmul.f32 %v15468_v18, %v15452_v58 }
 0x9d6   : > { %11017 = vst.msk [vmem:[%s18778_s13 + $0x18] sm:$0xff] %vm10837_vm1, %v11009_v42 }
 0x9d7   : > { %v15470_v60 = vpop.eup %15469 }
 0x9d8   : > { %v11010_v54 = vmul.f32 %v15470_v60, %v15454_v28 }
 0x9da   : > { %11018 = vst.msk [vmem:[%s18778_s13 + $0x20] sm:$0xff] %vm10837_vm1, %v11010_v54 }
 0x9db   : > { %v15472_v19 = vpop.eup %15471 }
 0x9dc   : > { %v11011_v20 = vmul.f32 %v15472_v19, %v15456_v9  ;;  %v15474_v10 = vpop.eup %15473 }
 0x9dd   : > { %v11029_v23 = vrot.slane %v15474_v10, %v11028_v32 }
 0x9de   : > { %11019 = vst.msk [vmem:[%s18778_s13 + $0x28] sm:$0xff] %vm10837_vm1, %v11011_v20 }
 0x9df   : > { %v11036_v21 = vmul.f32 %v11029_v23, %v11011_v20  ;;  %v11032_v14 = vmul.f32 %v11029_v23, %v11007_v4  ;;  %v11035_v7 = vmul.f32 %v11029_v23, %v11010_v54  ;;  %v11031_v31 = vmul.f32 %v11029_v23, %v11006_v25 }
 0x9e0   : > { %v10994_v35 = vpop.xlane.xlu0 %10993  ;;  %v11033_v37 = vmul.f32 %v11029_v23, %v11008_v39  ;;  %v11034_v61 = vmul.f32 %v11029_v23, %v11009_v42 }
 0x9e1   : > { %15475 = vrcp.f32 %v10994_v35  ;;  %v11045_v15 = vsel %vm10837_vm1, %v11036_v21, -inf  ;;  %v11040_v53 = vsel %vm10837_vm1, %v11032_v14, -inf  ;;  %v11043_v58 = vsel %vm10837_vm1, %v11035_v7, -inf }
 0x9e2   : > { %v11046_v43 = vmax.f32 %v11040_v53, %v11045_v15  ;;  %v11039_v9 = vsel %vm10837_vm1, %v11031_v31, -inf  ;;  %v11041_v62 = vsel %vm10837_vm1, %v11033_v37, -inf  ;;  %v11042_v0 = vsel %vm10837_vm1, %v11034_v61, -inf }
 0x9e3   : > { %v11044_v48 = vmax.f32 %v11039_v9, %v11043_v58 }
 0x9e4   : > { %v10997_v57 = vpop.xlane.xlu1 %10996 }
 0x9e5   : > { %15477 = vrcp.f32 %v10997_v57  ;;  %v11051_v45 = vmax.f32 %v11044_v48, %v11046_v43 }
 0x9eb   : > { %v15476_v1 = vpop.eup %15475 }
 0x9ec   : > { %v11012_v12 = vmul.f32 %v15476_v1, %v15458_v36 }
 0x9ee   : > { %11020 = vst.msk [vmem:[%s18778_s13 + $0x30] sm:$0xff] %vm10837_vm1, %v11012_v12  ;;  %v11037_v47 = vmul.f32 %v11029_v23, %v11012_v12 }
 0x9ef   : > { %v15478_v51 = vpop.eup %15477 }
 0x9f0   : > { %v11013_v41 = vmul.f32 %v15478_v51, %v15460_v40  ;;  %v11047_v3 = vsel %vm10837_vm1, %v11037_v47, -inf }
 0x9f1   : > { %v11048_v46 = vmax.f32 %v11041_v62, %v11047_v3 }
 0x9f2   : > { %11021 = vst.msk [vmem:[%s18778_s13 + $0x38] sm:$0xff] %vm10837_vm1, %v11013_v41  ;;  %v11038_v28 = vmul.f32 %v11029_v23, %v11013_v41 }
 0x9f4   : > { %v11049_v22 = vsel %vm10837_vm1, %v11038_v28, -inf }
 0x9f5   : > { %v11050_v8 = vmax.f32 %v11042_v0, %v11049_v22 }
 0x9f7   : > { %v11052_v36 = vmax.f32 %v11048_v46, %v11050_v8 }
 0x9f9   : > { %v11053_v11 = vmax.f32 %v11051_v45, %v11052_v36 }
 0x9fb   : > { %v11054_v40 = vrot.slane %v11053_v11, 4 }
 0x9fd   : > { %v11055_v27 = vmax.f32 %v11053_v11, %v11054_v40 }
 0x9ff   : > { %v11056_v29 = vrot.slane %v11055_v27, 2 }
 0xa01   : > { %v11057_v50 = vmax.f32 %v11055_v27, %v11056_v29 }
 0xa03   : > { %v11058_v6 = vrot.slane %v11057_v50, 1 }
 0xa05   : > { %v11059_v16 = vmax.f32 %v11057_v50, %v11058_v6 }
 0xa07   : > { %v11060_v25 = vsub.f32 %v11031_v31, %v11059_v16  ;;  %v11061_v5 = vsub.f32 %v11032_v14, %v11059_v16  ;;  %v11062_v4 = vsub.f32 %v11033_v37, %v11059_v16  ;;  %v11063_v24 = vsub.f32 %v11034_v61, %v11059_v16 }
 0xa08   : > { %v11064_v39 = vsub.f32 %v11035_v7, %v11059_v16  ;;  %v11065_v18 = vsub.f32 %v11036_v21, %v11059_v16  ;;  %v11066_v60 = vsub.f32 %v11037_v47, %v11059_v16  ;;  %v11067_v54 = vsub.f32 %v11038_v28, %v11059_v16 }
 0xa09   : > { %v11068_v63 = vmul.f32 1.442695, %v11060_v25  ;;  %v11070_v17 = vmul.f32 1.442695, %v11061_v5  ;;  %v11072_v38 = vmul.f32 1.442695, %v11062_v4 }
 0xa0a   : > { %v11074_v42 = vmul.f32 1.442695, %v11063_v24  ;;  %v11076_v30 = vmul.f32 1.442695, %v11064_v39  ;;  %v11078_v33 = vmul.f32 1.442695, %v11065_v18 }
 0xa0b   : > { %15479 = vpow2.f32 %v11068_v63  ;;  %v11080_v19 = vmul.f32 1.442695, %v11066_v60  ;;  %v11082_v20 = vmul.f32 1.442695, %v11067_v54 }
 0xa0c   : > { %15481 = vpow2.f32 %v11070_v17 }
 0xa0d   : > { %15483 = vpow2.f32 %v11072_v38 }
 0xa0e   : > { %15485 = vpow2.f32 %v11074_v42 }
 0xa0f   : > { %15487 = vpow2.f32 %v11076_v30 }
 0xa10   : > { %15489 = vpow2.f32 %v11078_v33 }
 0xa11   : > { %15491 = vpow2.f32 %v11080_v19 }
 0xa12   : > { %15493 = vpow2.f32 %v11082_v20 }
 0xa15   : > { %v15480_v55 = vpop.eup %15479 }
 0xa16   : > { %v15482_v35 = vpop.eup %15481  ;;  %v11084_v59 = vsel %vm10837_vm1, %v15480_v55, 0.0 }
 0xa17   : > { %v15484_v57 = vpop.eup %15483  ;;  %v11085_v32 = vsel %vm10837_vm1, %v15482_v35, 0.0 }
 0xa18   : > { %v15486_v10 = vpop.eup %15485  ;;  %v11086_v23 = vadd.f32 %v11085_v32, %v11084_v59  ;;  %v11087_v1 = vsel %vm10837_vm1, %v15484_v57, 0.0 }
 0xa19   : > { %v15488_v21 = vpop.eup %15487  ;;  %v11089_v14 = vsel %vm10837_vm1, %v15486_v10, 0.0 }
 0xa1a   : > { %v11088_v12 = vadd.f32 %v11087_v1, %v11086_v23  ;;  %v15490_v7 = vpop.eup %15489  ;;  %v11091_v51 = vsel %vm10837_vm1, %v15488_v21, 0.0 }
 0xa1b   : > { %v15492_v31 = vpop.eup %15491  ;;  %v11093_v61 = vsel %vm10837_vm1, %v15490_v7, 0.0 }
 0xa1c   : > { %v11090_v47 = vadd.f32 %v11089_v14, %v11088_v12  ;;  %v15494_v15 = vpop.eup %15493  ;;  %v11095_v53 = vsel %vm10837_vm1, %v15492_v31, 0.0 }
 0xa1d   : > { %v11097_v3 = vsel %vm10837_vm1, %v15494_v15, 0.0 }
 0xa1e   : > { %v11092_v37 = vadd.f32 %v11091_v51, %v11090_v47 }
 0xa20   : > { %v11094_v41 = vadd.f32 %v11093_v61, %v11092_v37 }
 0xa22   : > { %v11096_v58 = vadd.f32 %v11095_v53, %v11094_v41 }
 0xa24   : > { %v11098_v28 = vadd.f32 %v11097_v3, %v11096_v58 }
 0xa26   : > { %v11099_v43 = vrot.slane %v11098_v28, 4 }
 0xa28   : > { %v11100_v9 = vadd.f32 %v11099_v43, %v11098_v28 }
 0xa2a   : > { %v11101_v62 = vrot.slane %v11100_v9, 2 }
 0xa2c   : > { %v11102_v0 = vadd.f32 %v11101_v62, %v11100_v9 }
 0xa2e   : > { %v11103_v22 = vrot.slane %v11102_v0, 1 }
 0xa30   : > { %v11104_v48 = vadd.f32 %v11103_v22, %v11102_v0 }
 0xa32   : > { %15495 = vrcp.f32 %v11104_v48 }
 0xa3c   : > { %v15496_v46 = vpop.eup %15495 }
 0xa3d   : > { %v11106_v8 = vmul.f32 %v15496_v46, %v15480_v55  ;;  %v11107_v45 = vmul.f32 %v15496_v46, %v15482_v35  ;;  %v11108_v36 = vmul.f32 %v15496_v46, %v15484_v57  ;;  %v11109_v11 = vmul.f32 %v15496_v46, %v15486_v10  ;;  %v12239_v57 = vld [vmem:[#allocation10] sm:$0x1] }
 0xa3e   : > { %v11110_v40 = vmul.f32 %v15496_v46, %v15488_v21  ;;  %v11111_v6 = vmul.f32 %v15496_v46, %v15490_v7  ;;  %v11112_v24 = vmul.f32 %v15496_v46, %v15492_v31  ;;  %v11113_v38 = vmul.f32 %v15496_v46, %v15494_v15 }
 0xa3f   : > { %v12210_v27 = vmul.f32 %v18709_v13, %v11106_v8  ;;  %v12211_v29 = vmul.f32 %v18716_v34, %v11107_v45  ;;  %v12212_v50 = vmul.f32 %v18723_v2, %v11108_v36  ;;  %v12213_v16 = vmul.f32 %v18728_v52, %v11109_v11 }
 0xa40   : > { %v12214_v39 = vmul.f32 %v18734_v44, %v11110_v40  ;;  %v12215_v13 = vmul.f32 %v18738_v56, %v11111_v6  ;;  %v12216_v18 = vmul.f32 %v18742_v49, %v11112_v24  ;;  %v12217_v60 = vmul.f32 %v18745_v26, %v11113_v38 }
 0xa41   : > { %v12218_v25 = vsel %vm10837_vm1, %v12210_v27, 0.0  ;;  %v12219_v5 = vsel %vm10837_vm1, %v12211_v29, 0.0  ;;  %v12221_v63 = vsel %vm10837_vm1, %v12212_v50, 0.0  ;;  %v12223_v34 = vsel %vm10837_vm1, %v12213_v16, 0.0 }
 0xa42   : > { %v12220_v4 = vadd.f32 %v12219_v5, %v12218_v25  ;;  %v12225_v52 = vsel %vm10837_vm1, %v12214_v39, 0.0  ;;  %v12227_v30 = vsel %vm10837_vm1, %v12215_v13, 0.0  ;;  %v12229_v44 = vsel %vm10837_vm1, %v12216_v18, 0.0 }
 0xa43   : > { %v12231_v19 = vsel %vm10837_vm1, %v12217_v60, 0.0 }
 0xa44   : > { %v12222_v17 = vadd.f32 %v12221_v63, %v12220_v4 }
 0xa46   : > { %v12224_v2 = vadd.f32 %v12223_v34, %v12222_v17 }
 0xa48   : > { %v12226_v42 = vadd.f32 %v12225_v52, %v12224_v2 }
 0xa4a   : > { %v12228_v54 = vadd.f32 %v12227_v30, %v12226_v42 }
 0xa4c   : > { %v12230_v33 = vadd.f32 %v12229_v44, %v12228_v54 }
 0xa4e   : > { %v12232_v56 = vadd.f32 %v12231_v19, %v12230_v33 }
 0xa50   : > { %v12233_v20 = vrot.slane %v12232_v56, 4 }
 0xa52   : > { %v12234_v55 = vadd.f32 %v12233_v20, %v12232_v56 }
 0xa54   : > { %v12235_v35 = vrot.slane %v12234_v55, 2 }
 0xa56   : > { %v12236_v49 = vadd.f32 %v12235_v35, %v12234_v55 }
 0xa58   : > { %v12237_v59 = vrot.slane %v12236_v49, 1 }
 0xa5a   : > { %v12238_v32 = vadd.f32 %v12237_v59, %v12236_v49 }
 0xa5c   : > { %v12240_v26 = vadd.f32 %v12239_v57, %v12238_v32 }
 0xa5e   : > { %v12241_v10 = vsub.f32 0.0, %v12240_v26 }
 0xa60   : > { %v12242_v23 = vmul.f32 1.442695, %v12241_v10 }
 0xa62   : > { %15497 = vpow2.f32 %v12242_v23 }
 0xa6c   : > { %v15498_v1 = vpop.eup %15497 }
 0xa6d   : > { %v12244_v21 = vadd.f32 1.0, %v15498_v1 }
 0xa6f   : > { %15499 = vrcp.f32 %v12244_v21 }
 0xa79   : > { %v15500_v12 = vpop.eup %15499 }
 0xa7a   : > { %12247 = vst.msk [vmem:[%s402_s11] sm:$0x1] %vm12246_vm2, %v15500_v12 }
 0xa7b   : > { %15658 = shalt.err (!%p15655_p9)
}
 0xa7c   : > { %s15659_s14 = scalar_lea.hbm %s18833_s17, 16  ;;  %s15663_s16 = scalar_lea.hbm %s18884_s7, 32 }
 0xa7d   : > { %p15660_p13 = scmp.ne.s32.totalorder %s18833_s17, %s15659_s14  ;;  %p15664_p12 = scmp.lt.u32.totalorder %s18833_s17, %s18884_s7 }
 0xa7e   : > { %p15665_p2 = scmp.lt.u32.totalorder %s15663_s16, %s15659_s14  ;;  %p15667_p4 = scmp.lt.u32.totalorder %s15659_s14, %s18833_s17 }
 0xa7f   : > { %p15661_p11 = pnand %p15660_p13, %p15928_p5 }
 0xa80   : > { %p15666_p1 = por %p15665_p2, %p15664_p12 }
 0xa81   : > { %p15662_p7 = pneg %p15661_p11 }
 0xa82   : > { %p15668_p0 = por %p15667_p4, %p15666_p1 }
 0xa84   : > { %p15669_p8 = pnand %p15668_p0, %p15662_p7 }
 0xa86   : > { %15672 = shalt.err (!%p15669_p8)
}
 0xa87   : > { %15081 = dma.vmem_to_hbm [thread:$0]  (%p15928_p5), %s18835_s20, 16, %s18833_s17, %s12249_s15  }
 0xa88 PF: > { %s19458_s2 = sld [smem:[#allocation17_spill]]  ;;  %s19459_s4 = sld [smem:[#allocation18_spill]] }
 0xa89   : > { %p19461_p10 = scmp.ge.s32.totalorder %s15723_s30, 2 }
 0xa8e   : > { %s12281_s13 = sand.u32 1, %s19458_s2   ;;  %p19460_p6 = scmp.ne.s32.totalorder %s19459_s4, 0 }
 0xa8f   : > { %s12282_s18 = scalar_lea.sflag [#allocation4], %s12281_s13 }
 0xa90   : > { %p15101_p3 = pnand %p19461_p10, %p19460_p6 }
 0xa92   : > { %15706 = dma.done.wait (!%p15101_p3), %s12282_s18, 16  }
 0xa93   : > { %15708 = vsyncadd (!%p15101_p3), %s12282_s18, 4294967280  ;;  %p26_p9 = scmp.ge.s32.totalorder %s15914_s26, 4   ;;  %s19462_s27 = smov %s15715_s28 }
 0xa94   : > { %s19463_s28 = smov %s15719_s29  ;;  %s19464_s29 = smov %s15924_s19 }
 0xa95   : > { %s19465_s30 = smov %s15914_s26  ;;  %28 = sbr.rel (!%p26_p9) target bundleno = 13 (0xd), region = 130 }
 0xa9c   :  { %12294 = vsyncpa [#allocation3], 1 }
 0xa9d   :  { %12296 = vsyncpa [#allocation3 + $0x1], 1 }
 0xa9e   :  { %12297 = vsyncpa [#allocation6], 1 }
 0xa9f   :  { %12299 = vsyncpa [#allocation6 + $0x1], 1 }
 0xaa0   :  { %12300 = vsyncpa [#allocation9], 1 }
 0xaa1   :  { %12301 = vsyncpa [#allocation4], 1 }
 0xaa2   :  { %12303 = vsyncpa [#allocation4 + $0x1], 1 }

</bundles_post_ra>
